<compile_context>
chip_gen: v7x
topology: tpu7x:2x2x1
jax: 0.10.0
libtpu: 0.0.40
codegen_flags: <defaults>
</compile_context>

<pallas_src>
import functools

import jax
import jax.numpy as jnp
from jax.experimental import pallas as pl
from jax.experimental.pallas import tpu as pltpu


# ----------------------------------------------------------------------------
# Pallas kernel 1: conv1 (1->1, k=(1,3,3), pad (0,1,1)) + bias + ReLU — pure VPU.
# Input is pre-padded on H,W and flattened to (B*D, H+2, W+2); each grid step
# handles one batch's worth of depth planes. 9 shifted multiply-adds, no MXU.
# ----------------------------------------------------------------------------
def _conv1_relu_kernel(w_ref, b_ref, xp_ref, o_ref, *, H, W):
    acc = jnp.zeros(o_ref.shape, jnp.float32)
    k = 0
    for dh in range(3):
        for dw in range(3):
            acc = acc + w_ref[k] * xp_ref[:, dh:dh + H, dw:dw + W]
            k += 1
    o_ref[...] = jnp.maximum(acc + b_ref[0], 0.0)


def conv1_relu(x, w1, b1):
    """x: (B, D, H, W) f32; w1: (1,1,1,3,3); b1: (1,) -> (B, 1, D, H, W)."""
    B, D, H, W = x.shape
    xp = jnp.pad(x, ((0, 0), (0, 0), (1, 1), (1, 1)))
    xp = xp.reshape(B * D, H + 2, W + 2)
    out = pl.pallas_call(
        functools.partial(_conv1_relu_kernel, H=H, W=W),
        out_shape=jax.ShapeDtypeStruct((B * D, H, W), jnp.float32),
        grid=(B,),
        in_specs=[
            pl.BlockSpec(memory_space=pltpu.MemorySpace.SMEM),   # 9 taps
            pl.BlockSpec(memory_space=pltpu.MemorySpace.SMEM),   # bias
            pl.BlockSpec((D, H + 2, W + 2), lambda i: (i, 0, 0)),
        ],
        out_specs=pl.BlockSpec((D, H, W), lambda i: (i, 0, 0)),
        compiler_params=pltpu.CompilerParams(dimension_semantics=("parallel",)),
    )(w1.reshape(9), b1, xp)
    return out.reshape(B, 1, D, H, W)


# ----------------------------------------------------------------------------
# Pallas kernel 2: conv-as-matmul with the big spatial dim on the lane axis.
#   out[b] = relu( W (Cout,K) @ A^T[b] (K,M) + bias )   -> (B, Cout, M)
# Lane-dense output stores; grid over batch ("parallel" -> both v7x cores).
# ----------------------------------------------------------------------------
def _convT_matmul_kernel(w_ref, b_ref, a_ref, o_ref):
    acc = jnp.dot(w_ref[...], a_ref[0], preferred_element_type=jnp.float32)
    o_ref[0] = jnp.maximum(acc + b_ref[...], 0.0)


def convT_matmul_relu(a_t, w_m, bias):
    """a_t: (B, K, M), w_m: (Cout, K), bias: (Cout,) -> (B, Cout, M)."""
    B, K, M = a_t.shape
    Cout = w_m.shape[0]
    return pl.pallas_call(
        _convT_matmul_kernel,
        out_shape=jax.ShapeDtypeStruct((B, Cout, M), jnp.float32),
        grid=(B,),
        in_specs=[
            pl.BlockSpec((Cout, K), lambda b: (0, 0)),
            pl.BlockSpec((Cout, 1), lambda b: (0, 0)),
            pl.BlockSpec((1, K, M), lambda b: (b, 0, 0)),
        ],
        out_specs=pl.BlockSpec((1, Cout, M), lambda b: (b, 0, 0)),
        compiler_params=pltpu.CompilerParams(dimension_semantics=("parallel",)),
    )(w_m, bias.reshape(Cout, 1), a_t)


# ----------------------------------------------------------------------------
# Pallas kernel 3: final Linear(63, 512): (B*S, 63) @ (63, 512) + bias,
# tiled over N so lanes are dense (256) and both TensorCores get a block.
# ----------------------------------------------------------------------------
def _linear_kernel(a_ref, w_ref, b_ref, o_ref):
    acc = jnp.dot(a_ref[...], w_ref[...], preferred_element_type=jnp.float32)
    o_ref[...] = acc + b_ref[...]


def linear(a, w, b, *, n_blocks=2):
    M, K = a.shape
    K2, N = w.shape
    assert K == K2 and N % (128 * n_blocks) == 0
    tn = N // n_blocks
    return pl.pallas_call(
        _linear_kernel,
        out_shape=jax.ShapeDtypeStruct((M, N), jnp.float32),
        grid=(n_blocks,),
        in_specs=[
            pl.BlockSpec((M, K), lambda j: (0, 0)),
            pl.BlockSpec((K, tn), lambda j: (0, j)),
            pl.BlockSpec((1, tn), lambda j: (0, j)),
        ],
        out_specs=pl.BlockSpec((M, tn), lambda j: (0, j)),
        compiler_params=pltpu.CompilerParams(dimension_semantics=("parallel",)),
    )(a, w, b.reshape(1, N))


# ----------------------------------------------------------------------------
# XLA glue: layout plumbing only (window extraction / pooling reduce).
# ----------------------------------------------------------------------------
def im2col_T(x, ksize, pads):
    """x: (B, C, D, H, W) -> (B, C*kd*kh*kw, D*H*W) stride-1 patches, transposed.

    K ordering is (ci, kd, kh, kw), matching torch weight.reshape(Cout, -1)."""
    B, C, D, H, W = x.shape
    kd, kh, kw = ksize
    xp = jnp.pad(x, ((0, 0), (0, 0), pads[0], pads[1], pads[2]))
    taps = []
    for dd in range(kd):
        for hh in range(kh):
            for ww in range(kw):
                taps.append(
                    xp[:, :, dd:dd + D, hh:hh + H, ww:ww + W].reshape(B, C, -1))
    a = jnp.stack(taps, axis=2)                       # (B, C, kd*kh*kw, M)
    return a.reshape(B, C * kd * kh * kw, D * H * W)  # (B, K, M)


def maxpool3d(x, ksize, stride):
    """nn.MaxPool3d (no padding, floor mode). Fused elementwise max over strided
    slices — no P-fold HBM stack, no extra kernel launch."""
    B, C, D, H, W = x.shape
    kd, kh, kw = ksize
    sd, sh, sw = stride
    Do = (D - kd) // sd + 1
    Ho = (H - kh) // sh + 1
    Wo = (W - kw) // sw + 1
    out = None
    for od in range(kd):
        for oh in range(kh):
            for ow in range(kw):
                s = x[:, :, od:od + sd * Do:sd,
                      oh:oh + sh * Ho:sh,
                      ow:ow + sw * Wo:sw]
                out = s if out is None else jnp.maximum(out, s)
    return out


# ----------------------------------------------------------------------------
# deCNN.forward
# ----------------------------------------------------------------------------
def decnn_forward(x, params):
    """x: (B, D, H, W) f32 (torch input before .unsqueeze(1))."""
    B = x.shape[0]

    # conv1: Conv3d(1->1, k=(1,3,3), pad=(0,1,1)) + ReLU ; MaxPool3d((1,2,2),(1,2,2))
    y = conv1_relu(x, params["w1"], params["b1"])                 # (B,1,27,24,24)
    y = maxpool3d(y, (1, 2, 2), (1, 2, 2))                        # (B,1,27,12,12)

    # conv2: Conv3d(1->16, k=3, 'same') + ReLU ; MaxPool3d((3,2,2), stride 2)
    c2 = params["w2"].shape[0]
    _, _, D1, H1, W1 = y.shape
    a2 = im2col_T(y, (3, 3, 3), ((1, 1), (1, 1), (1, 1)))         # (B,27,3888)
    y = convT_matmul_relu(a2, params["w2"].reshape(c2, -1), params["b2"])
    y = y.reshape(B, c2, D1, H1, W1)                              # (B,16,27,12,12)
    y = maxpool3d(y, (3, 2, 2), (2, 2, 2))                        # (B,16,13,6,6)

    # conv3: Conv3d(16->seq_len, k=3, 'same') + ReLU ; MaxPool3d((1,2,2), stride 2)
    c3 = params["w3"].shape[0]
    _, _, D2, H2, W2 = y.shape
    a3 = im2col_T(y, (3, 3, 3), ((1, 1), (1, 1), (1, 1)))         # (B,432,468)
    y = convT_matmul_relu(a3, params["w3"].reshape(c3, -1), params["b3"])
    y = y.reshape(B, c3, D2, H2, W2)                              # (B,8,13,6,6)
    y = maxpool3d(y, (1, 2, 2), (2, 2, 2))                        # (B,8,7,3,3)

    # flatten (D,H,W) -> 63, Linear(63, 512)
    flat = y.reshape(B * c3, -1)                                  # (B*seq_len, 63)
    out = linear(flat, params["w_out"].T, params["b_out"])        # (B*seq_len, 512)
    return out.reshape(B, c3, -1)                                 # (B, seq_len, 512)


if __name__ == "__main__":
    seq_len, d_model = 8, 32          # d_model is unused by the torch forward
    B, D, H, W = 2, 27, 24, 24        # forced by nn.Linear(63, 512): 7*3*3 = 63

    key = jax.random.PRNGKey(0)
    ks = jax.random.split(key, 9)
    params = {
        "w1": 0.1 * jax.random.normal(ks[0], (1, 1, 1, 3, 3), jnp.float32),
        "b1": 0.1 * jax.random.normal(ks[1], (1,), jnp.float32),
        "w2": 0.1 * jax.random.normal(ks[2], (16, 1, 3, 3, 3), jnp.float32),
        "b2": 0.1 * jax.random.normal(ks[3], (16,), jnp.float32),
        "w3": 0.1 * jax.random.normal(ks[4], (seq_len, 16, 3, 3, 3), jnp.float32),
        "b3": 0.1 * jax.random.normal(ks[5], (seq_len,), jnp.float32),
        "w_out": 0.1 * jax.random.normal(ks[6], (512, 63), jnp.float32),
        "b_out": 0.1 * jax.random.normal(ks[7], (512,), jnp.float32),
    }
    x = jax.random.normal(ks[8], (B, D, H, W), jnp.float32)

    out = jax.jit(decnn_forward)(x, params)
    out = jax.block_until_ready(out)
    assert out.shape == (B, seq_len, 512), out.shape
    print("KERNEL_OK")
</pallas_src>

<mosaic_0001>
module attributes {stable_mosaic.version = 11 : i64} {
  func.func @_conv1_relu_kernel(%arg0: i32, %arg1: memref<9xf32, #tpu.memory_space<smem>>, %arg2: memref<1xf32, #tpu.memory_space<smem>>, %arg3: memref<27x26x26xf32, #tpu.memory_space<vmem>>, %arg4: memref<27x24x24xf32, #tpu.memory_space<vmem>>) attributes {dimension_semantics = [#tpu.dimension_semantics<parallel>], iteration_bounds = array<i64: 2>, scalar_prefetch = 0 : i64, scratch_operands = 0 : i64, tpu.core_type = #tpu.core_type<tc>, window_params = [{transform_indices = @transform_0, window_bounds = array<i64: 9>}, {transform_indices = @transform_1, window_bounds = array<i64: 1>}, {transform_indices = @transform_2, window_bounds = array<i64: 27, 26, 26>}, {transform_indices = @transform_3, window_bounds = array<i64: 27, 24, 24>}]} {
    %cst = arith.constant 0.000000e+00 : f32
    %0 = vector.broadcast %cst : f32 to vector<27x24x24xf32>
    %c0 = arith.constant 0 : index
    %1 = memref.load %arg1[%c0] : memref<9xf32, #tpu.memory_space<smem>>
    %c0_0 = arith.constant 0 : index
    %c0_1 = arith.constant 0 : index
    %c0_2 = arith.constant 0 : index
    %2 = vector.load %arg3[%c0_0, %c0_1, %c0_2] : memref<27x26x26xf32, #tpu.memory_space<vmem>>, vector<27x24x24xf32>
    %3 = vector.broadcast %1 : f32 to vector<27x24x24xf32>
    %4 = arith.mulf %3, %2 : vector<27x24x24xf32>
    %5 = arith.addf %0, %4 : vector<27x24x24xf32>
    %c1 = arith.constant 1 : index
    %6 = memref.load %arg1[%c1] : memref<9xf32, #tpu.memory_space<smem>>
    %c0_3 = arith.constant 0 : index
    %c0_4 = arith.constant 0 : index
    %c1_5 = arith.constant 1 : index
    %7 = vector.load %arg3[%c0_3, %c0_4, %c1_5] : memref<27x26x26xf32, #tpu.memory_space<vmem>>, vector<27x24x24xf32>
    %8 = vector.broadcast %6 : f32 to vector<27x24x24xf32>
    %9 = arith.mulf %8, %7 : vector<27x24x24xf32>
    %10 = arith.addf %5, %9 : vector<27x24x24xf32>
    %c2 = arith.constant 2 : index
    %11 = memref.load %arg1[%c2] : memref<9xf32, #tpu.memory_space<smem>>
    %c0_6 = arith.constant 0 : index
    %c0_7 = arith.constant 0 : index
    %c2_8 = arith.constant 2 : index
    %12 = vector.load %arg3[%c0_6, %c0_7, %c2_8] : memref<27x26x26xf32, #tpu.memory_space<vmem>>, vector<27x24x24xf32>
    %13 = vector.broadcast %11 : f32 to vector<27x24x24xf32>
    %14 = arith.mulf %13, %12 : vector<27x24x24xf32>
    %15 = arith.addf %10, %14 : vector<27x24x24xf32>
    %c3 = arith.constant 3 : index
    %16 = memref.load %arg1[%c3] : memref<9xf32, #tpu.memory_space<smem>>
    %c0_9 = arith.constant 0 : index
    %c1_10 = arith.constant 1 : index
    %c0_11 = arith.constant 0 : index
    %17 = vector.load %arg3[%c0_9, %c1_10, %c0_11] : memref<27x26x26xf32, #tpu.memory_space<vmem>>, vector<27x24x24xf32>
    %18 = vector.broadcast %16 : f32 to vector<27x24x24xf32>
    %19 = arith.mulf %18, %17 : vector<27x24x24xf32>
    %20 = arith.addf %15, %19 : vector<27x24x24xf32>
    %c4 = arith.constant 4 : index
    %21 = memref.load %arg1[%c4] : memref<9xf32, #tpu.memory_space<smem>>
    %c0_12 = arith.constant 0 : index
    %c1_13 = arith.constant 1 : index
    %c1_14 = arith.constant 1 : index
    %22 = vector.load %arg3[%c0_12, %c1_13, %c1_14] : memref<27x26x26xf32, #tpu.memory_space<vmem>>, vector<27x24x24xf32>
    %23 = vector.broadcast %21 : f32 to vector<27x24x24xf32>
    %24 = arith.mulf %23, %22 : vector<27x24x24xf32>
    %25 = arith.addf %20, %24 : vector<27x24x24xf32>
    %c5 = arith.constant 5 : index
    %26 = memref.load %arg1[%c5] : memref<9xf32, #tpu.memory_space<smem>>
    %c0_15 = arith.constant 0 : index
    %c1_16 = arith.constant 1 : index
    %c2_17 = arith.constant 2 : index
    %27 = vector.load %arg3[%c0_15, %c1_16, %c2_17] : memref<27x26x26xf32, #tpu.memory_space<vmem>>, vector<27x24x24xf32>
    %28 = vector.broadcast %26 : f32 to vector<27x24x24xf32>
    %29 = arith.mulf %28, %27 : vector<27x24x24xf32>
    %30 = arith.addf %25, %29 : vector<27x24x24xf32>
    %c6 = arith.constant 6 : index
    %31 = memref.load %arg1[%c6] : memref<9xf32, #tpu.memory_space<smem>>
    %c0_18 = arith.constant 0 : index
    %c2_19 = arith.constant 2 : index
    %c0_20 = arith.constant 0 : index
    %32 = vector.load %arg3[%c0_18, %c2_19, %c0_20] : memref<27x26x26xf32, #tpu.memory_space<vmem>>, vector<27x24x24xf32>
    %33 = vector.broadcast %31 : f32 to vector<27x24x24xf32>
    %34 = arith.mulf %33, %32 : vector<27x24x24xf32>
    %35 = arith.addf %30, %34 : vector<27x24x24xf32>
    %c7 = arith.constant 7 : index
    %36 = memref.load %arg1[%c7] : memref<9xf32, #tpu.memory_space<smem>>
    %c0_21 = arith.constant 0 : index
    %c2_22 = arith.constant 2 : index
    %c1_23 = arith.constant 1 : index
    %37 = vector.load %arg3[%c0_21, %c2_22, %c1_23] : memref<27x26x26xf32, #tpu.memory_space<vmem>>, vector<27x24x24xf32>
    %38 = vector.broadcast %36 : f32 to vector<27x24x24xf32>
    %39 = arith.mulf %38, %37 : vector<27x24x24xf32>
    %40 = arith.addf %35, %39 : vector<27x24x24xf32>
    %c8 = arith.constant 8 : index
    %41 = memref.load %arg1[%c8] : memref<9xf32, #tpu.memory_space<smem>>
    %c0_24 = arith.constant 0 : index
    %c2_25 = arith.constant 2 : index
    %c2_26 = arith.constant 2 : index
    %42 = vector.load %arg3[%c0_24, %c2_25, %c2_26] : memref<27x26x26xf32, #tpu.memory_space<vmem>>, vector<27x24x24xf32>
    %43 = vector.broadcast %41 : f32 to vector<27x24x24xf32>
    %44 = arith.mulf %43, %42 : vector<27x24x24xf32>
    %45 = arith.addf %40, %44 : vector<27x24x24xf32>
    %c0_27 = arith.constant 0 : index
    %46 = memref.load %arg2[%c0_27] : memref<1xf32, #tpu.memory_space<smem>>
    %47 = vector.broadcast %46 : f32 to vector<27x24x24xf32>
    %48 = arith.addf %45, %47 : vector<27x24x24xf32>
    %cst_28 = arith.constant 0.000000e+00 : f32
    %49 = vector.broadcast %cst_28 : f32 to vector<27x24x24xf32>
    %50 = arith.maximumf %48, %49 : vector<27x24x24xf32>
    %c0_29 = arith.constant 0 : index
    %c0_30 = arith.constant 0 : index
    %c0_31 = arith.constant 0 : index
    %51 = vector.load %arg4[%c0_29, %c0_30, %c0_31] : memref<27x24x24xf32, #tpu.memory_space<vmem>>, vector<27x24x24xf32>
    tpu.vector_store %arg4[%c0_29, %c0_30, %c0_31], %50 {strides = array<i32>} : memref<27x24x24xf32, #tpu.memory_space<vmem>>, vector<27x24x24xf32>,
    return
  }
  func.func @transform_0(%arg0: i32) -> i32 {
    %c0_i32 = arith.constant 0 : i32
    %c0_i32_0 = arith.constant 0 : i32
    return %c0_i32 : i32
  }
  func.func @transform_1(%arg0: i32) -> i32 {
    %c0_i32 = arith.constant 0 : i32
    %c0_i32_0 = arith.constant 0 : i32
    return %c0_i32 : i32
  }
  func.func @transform_2(%arg0: i32) -> (i32, i32, i32) {
    %c0_i32 = arith.constant 0 : i32
    %c0_i32_0 = arith.constant 0 : i32
    %c0_i32_1 = arith.constant 0 : i32
    return %arg0, %c0_i32, %c0_i32_0 : i32, i32, i32
  }
  func.func @transform_3(%arg0: i32) -> (i32, i32, i32) {
    %c0_i32 = arith.constant 0 : i32
    %c0_i32_0 = arith.constant 0 : i32
    %c0_i32_1 = arith.constant 0 : i32
    return %arg0, %c0_i32, %c0_i32_0 : i32, i32, i32
  }
}

module attributes {stable_mosaic.version = 11 : i64} {
  func.func @_convT_matmul_kernel(%arg0: i32, %arg1: memref<16x27xf32, #tpu.memory_space<vmem>>, %arg2: memref<16x1xf32, #tpu.memory_space<vmem>>, %arg3: memref<1x27x3888xf32, #tpu.memory_space<vmem>>, %arg4: memref<1x16x3888xf32, #tpu.memory_space<vmem>>) attributes {dimension_semantics = [#tpu.dimension_semantics<parallel>], iteration_bounds = array<i64: 2>, scalar_prefetch = 0 : i64, scratch_operands = 0 : i64, tpu.core_type = #tpu.core_type<tc>, window_params = [{pipeline_mode = #tpu.pipeline_mode<synchronous>, transform_indices = @transform_0, window_bounds = array<i64: 16, 27>}, {pipeline_mode = #tpu.pipeline_mode<synchronous>, transform_indices = @transform_1, window_bounds = array<i64: 16, 1>}, {transform_indices = @transform_2, window_bounds = array<i64: 1, 27, 3888>}, {transform_indices = @transform_3, window_bounds = array<i64: 1, 16, 3888>}]} {
    %c0 = arith.constant 0 : index
    %c0_0 = arith.constant 0 : index
    %0 = vector.load %arg1[%c0, %c0_0] : memref<16x27xf32, #tpu.memory_space<vmem>>, vector<16x27xf32>
    %c0_1 = arith.constant 0 : index
    %c0_2 = arith.constant 0 : index
    %c0_3 = arith.constant 0 : index
    %1 = vector.load %arg3[%c0_1, %c0_2, %c0_3] : memref<1x27x3888xf32, #tpu.memory_space<vmem>>, vector<1x27x3888xf32>
    %2 = vector.shape_cast %1 : vector<1x27x3888xf32> to vector<27x3888xf32>
    %cst = arith.constant dense<0.000000e+00> : vector<16x3888xf32>
    %3 = tpu.matmul %0, %2, %cst {dimension_numbers = #tpu.dot_dimension_numbers<[1], [0], [0], [1], [0, 0, 1, 1], [], []>} : vector<16x27xf32>, vector<27x3888xf32>, vector<16x3888xf32> -> vector<16x3888xf32>
    %c0_4 = arith.constant 0 : index
    %c0_5 = arith.constant 0 : index
    %4 = vector.load %arg2[%c0_4, %c0_5] : memref<16x1xf32, #tpu.memory_space<vmem>>, vector<16x1xf32>
    %5 = vector.broadcast %4 : vector<16x1xf32> to vector<16x3888xf32>
    %6 = arith.addf %3, %5 : vector<16x3888xf32>
    %cst_6 = arith.constant 0.000000e+00 : f32
    %7 = vector.broadcast %cst_6 : f32 to vector<16x3888xf32>
    %8 = arith.maximumf %6, %7 : vector<16x3888xf32>
    %c0_7 = arith.constant 0 : index
    %c0_8 = arith.constant 0 : index
    %c0_9 = arith.constant 0 : index
    %9 = vector.load %arg4[%c0_7, %c0_8, %c0_9] : memref<1x16x3888xf32, #tpu.memory_space<vmem>>, vector<1x16x3888xf32>
    %10 = vector.shape_cast %9 : vector<1x16x3888xf32> to vector<16x3888xf32>
    %11 = vector.shape_cast %8 : vector<16x3888xf32> to vector<1x16x3888xf32>
    tpu.vector_store %arg4[%c0_7, %c0_8, %c0_9], %11 {strides = array<i32>} : memref<1x16x3888xf32, #tpu.memory_space<vmem>>, vector<1x16x3888xf32>,
    return
  }
  func.func @transform_0(%arg0: i32) -> (i32, i32) {
    %c0_i32 = arith.constant 0 : i32
    %c0_i32_0 = arith.constant 0 : i32
    %c0_i32_1 = arith.constant 0 : i32
    return %c0_i32, %c0_i32_0 : i32, i32
  }
  func.func @transform_1(%arg0: i32) -> (i32, i32) {
    %c0_i32 = arith.constant 0 : i32
    %c0_i32_0 = arith.constant 0 : i32
    %c0_i32_1 = arith.constant 0 : i32
    return %c0_i32, %c0_i32_0 : i32, i32
  }
  func.func @transform_2(%arg0: i32) -> (i32, i32, i32) {
    %c0_i32 = arith.constant 0 : i32
    %c0_i32_0 = arith.constant 0 : i32
    %c0_i32_1 = arith.constant 0 : i32
    return %arg0, %c0_i32, %c0_i32_0 : i32, i32, i32
  }
  func.func @transform_3(%arg0: i32) -> (i32, i32, i32) {
    %c0_i32 = arith.constant 0 : i32
    %c0_i32_0 = arith.constant 0 : i32
    %c0_i32_1 = arith.constant 0 : i32
    return %arg0, %c0_i32, %c0_i32_0 : i32, i32, i32
  }
}

module attributes {stable_mosaic.version = 11 : i64} {
  func.func @_convT_matmul_kernel(%arg0: i32, %arg1: memref<8x432xf32, #tpu.memory_space<vmem>>, %arg2: memref<8x1xf32, #tpu.memory_space<vmem>>, %arg3: memref<1x432x468xf32, #tpu.memory_space<vmem>>, %arg4: memref<1x8x468xf32, #tpu.memory_space<vmem>>) attributes {dimension_semantics = [#tpu.dimension_semantics<parallel>], iteration_bounds = array<i64: 2>, scalar_prefetch = 0 : i64, scratch_operands = 0 : i64, tpu.core_type = #tpu.core_type<tc>, window_params = [{pipeline_mode = #tpu.pipeline_mode<synchronous>, transform_indices = @transform_0, window_bounds = array<i64: 8, 432>}, {pipeline_mode = #tpu.pipeline_mode<synchronous>, transform_indices = @transform_1, window_bounds = array<i64: 8, 1>}, {transform_indices = @transform_2, window_bounds = array<i64: 1, 432, 468>}, {transform_indices = @transform_3, window_bounds = array<i64: 1, 8, 468>}]} {
    %c0 = arith.constant 0 : index
    %c0_0 = arith.constant 0 : index
    %0 = vector.load %arg1[%c0, %c0_0] : memref<8x432xf32, #tpu.memory_space<vmem>>, vector<8x432xf32>
    %c0_1 = arith.constant 0 : index
    %c0_2 = arith.constant 0 : index
    %c0_3 = arith.constant 0 : index
    %1 = vector.load %arg3[%c0_1, %c0_2, %c0_3] : memref<1x432x468xf32, #tpu.memory_space<vmem>>, vector<1x432x468xf32>
    %2 = vector.shape_cast %1 : vector<1x432x468xf32> to vector<432x468xf32>
    %cst = arith.constant dense<0.000000e+00> : vector<8x468xf32>
    %3 = tpu.matmul %0, %2, %cst {dimension_numbers = #tpu.dot_dimension_numbers<[1], [0], [0], [1], [0, 0, 1, 1], [], []>} : vector<8x432xf32>, vector<432x468xf32>, vector<8x468xf32> -> vector<8x468xf32>
    %c0_4 = arith.constant 0 : index
    %c0_5 = arith.constant 0 : index
    %4 = vector.load %arg2[%c0_4, %c0_5] : memref<8x1xf32, #tpu.memory_space<vmem>>, vector<8x1xf32>
    %5 = vector.broadcast %4 : vector<8x1xf32> to vector<8x468xf32>
    %6 = arith.addf %3, %5 : vector<8x468xf32>
    %cst_6 = arith.constant 0.000000e+00 : f32
    %7 = vector.broadcast %cst_6 : f32 to vector<8x468xf32>
    %8 = arith.maximumf %6, %7 : vector<8x468xf32>
    %c0_7 = arith.constant 0 : index
    %c0_8 = arith.constant 0 : index
    %c0_9 = arith.constant 0 : index
    %9 = vector.load %arg4[%c0_7, %c0_8, %c0_9] : memref<1x8x468xf32, #tpu.memory_space<vmem>>, vector<1x8x468xf32>
    %10 = vector.shape_cast %9 : vector<1x8x468xf32> to vector<8x468xf32>
    %11 = vector.shape_cast %8 : vector<8x468xf32> to vector<1x8x468xf32>
    tpu.vector_store %arg4[%c0_7, %c0_8, %c0_9], %11 {strides = array<i32>} : memref<1x8x468xf32, #tpu.memory_space<vmem>>, vector<1x8x468xf32>,
    return
  }
  func.func @transform_0(%arg0: i32) -> (i32, i32) {
    %c0_i32 = arith.constant 0 : i32
    %c0_i32_0 = arith.constant 0 : i32
    %c0_i32_1 = arith.constant 0 : i32
    return %c0_i32, %c0_i32_0 : i32, i32
  }
  func.func @transform_1(%arg0: i32) -> (i32, i32) {
    %c0_i32 = arith.constant 0 : i32
    %c0_i32_0 = arith.constant 0 : i32
    %c0_i32_1 = arith.constant 0 : i32
    return %c0_i32, %c0_i32_0 : i32, i32
  }
  func.func @transform_2(%arg0: i32) -> (i32, i32, i32) {
    %c0_i32 = arith.constant 0 : i32
    %c0_i32_0 = arith.constant 0 : i32
    %c0_i32_1 = arith.constant 0 : i32
    return %arg0, %c0_i32, %c0_i32_0 : i32, i32, i32
  }
  func.func @transform_3(%arg0: i32) -> (i32, i32, i32) {
    %c0_i32 = arith.constant 0 : i32
    %c0_i32_0 = arith.constant 0 : i32
    %c0_i32_1 = arith.constant 0 : i32
    return %arg0, %c0_i32, %c0_i32_0 : i32, i32, i32
  }
}

module attributes {stable_mosaic.version = 11 : i64} {
  func.func @_linear_kernel(%arg0: i32, %arg1: memref<16x63xf32, #tpu.memory_space<vmem>>, %arg2: memref<63x256xf32, #tpu.memory_space<vmem>>, %arg3: memref<1x256xf32, #tpu.memory_space<vmem>>, %arg4: memref<16x256xf32, #tpu.memory_space<vmem>>) attributes {dimension_semantics = [#tpu.dimension_semantics<parallel>], iteration_bounds = array<i64: 2>, scalar_prefetch = 0 : i64, scratch_operands = 0 : i64, tpu.core_type = #tpu.core_type<tc>, window_params = [{pipeline_mode = #tpu.pipeline_mode<synchronous>, transform_indices = @transform_0, window_bounds = array<i64: 16, 63>}, {transform_indices = @transform_1, window_bounds = array<i64: 63, 256>}, {transform_indices = @transform_2, window_bounds = array<i64: 1, 256>}, {transform_indices = @transform_3, window_bounds = array<i64: 16, 256>}]} {
    %c0 = arith.constant 0 : index
    %c0_0 = arith.constant 0 : index
    %0 = vector.load %arg1[%c0, %c0_0] : memref<16x63xf32, #tpu.memory_space<vmem>>, vector<16x63xf32>
    %c0_1 = arith.constant 0 : index
    %c0_2 = arith.constant 0 : index
    %1 = vector.load %arg2[%c0_1, %c0_2] : memref<63x256xf32, #tpu.memory_space<vmem>>, vector<63x256xf32>
    %cst = arith.constant dense<0.000000e+00> : vector<16x256xf32>
    %2 = tpu.matmul %0, %1, %cst {dimension_numbers = #tpu.dot_dimension_numbers<[1], [0], [0], [1], [0, 0, 1, 1], [], []>} : vector<16x63xf32>, vector<63x256xf32>, vector<16x256xf32> -> vector<16x256xf32>
    %c0_3 = arith.constant 0 : index
    %c0_4 = arith.constant 0 : index
    %3 = vector.load %arg3[%c0_3, %c0_4] : memref<1x256xf32, #tpu.memory_space<vmem>>, vector<1x256xf32>
    %4 = vector.broadcast %3 : vector<1x256xf32> to vector<16x256xf32>
    %5 = arith.addf %2, %4 : vector<16x256xf32>
    %c0_5 = arith.constant 0 : index
    %c0_6 = arith.constant 0 : index
    %6 = vector.load %arg4[%c0_5, %c0_6] : memref<16x256xf32, #tpu.memory_space<vmem>>, vector<16x256xf32>
    tpu.vector_store %arg4[%c0_5, %c0_6], %5 {strides = array<i32>} : memref<16x256xf32, #tpu.memory_space<vmem>>, vector<16x256xf32>,
    return
  }
  func.func @transform_0(%arg0: i32) -> (i32, i32) {
    %c0_i32 = arith.constant 0 : i32
    %c0_i32_0 = arith.constant 0 : i32
    %c0_i32_1 = arith.constant 0 : i32
    return %c0_i32, %c0_i32_0 : i32, i32
  }
  func.func @transform_1(%arg0: i32) -> (i32, i32) {
    %c0_i32 = arith.constant 0 : i32
    %c0_i32_0 = arith.constant 0 : i32
    return %c0_i32, %arg0 : i32, i32
  }
  func.func @transform_2(%arg0: i32) -> (i32, i32) {
    %c0_i32 = arith.constant 0 : i32
    %c0_i32_0 = arith.constant 0 : i32
    return %c0_i32, %arg0 : i32, i32
  }
  func.func @transform_3(%arg0: i32) -> (i32, i32) {
    %c0_i32 = arith.constant 0 : i32
    %c0_i32_0 = arith.constant 0 : i32
    return %c0_i32, %arg0 : i32, i32
  }
}

</mosaic_0001>

<bundles_post_ra>
// kernel: decnn_forward.4
= control target key start
LH: loop header
LB: loop body
LE: loop exit
PB: predicated region body
PF: predicated region fallthrough
CT: control target
= control target key end

     0   :  { %s9730_s0 = inlined_call_operand.vmem [shape: f32[9], index: 0, kind: input, shape index: {}]   ;;  %s9731_s1 = inlined_call_operand.<no memory space> [shape: f32[1], index: 1, kind: input, shape index: {}]   ;;  %s9732_s2 = inlined_call_operand.vmem [shape: f32[54,26,26], index: 2, kind: input, shape index: {}]   ;;  %s9733_s3 = inlined_call_operand.vmem [shape: f32[54,24,24], index: 3, kind: output, shape index: {}]  }
   0x1   :  { %8 = sst [smem:[#allocation2]] %s9731_s1 }
   0x2   :  { %9 = vsyncpa [#allocation4], 0  ;;  %s4567_s14 = smov 0  }
   0x3 LB: > { %s4173_s15 = sadd.s32 4294967295, %s4539_s14   ;;  %p4175_p0 = scmp.ge.s32.totalorder %s4539_s14, 1  ;;  %s4539_s14 = sphi %s4567_s14, %s15_s14  }
   0x4   : > { %p114_p1 = scmp.lt.s32.totalorder %s4539_s14, 3  ;;  %s127_s18 = sshll.u32 %s9730_s0, 4  ;;  %s128_s18 = int_to_ptr.vmem [resolvable:$true] %s127_s18 }
   0x5   : > { %p4582_p3 = scmp.eq.s32.totalorder %s4173_s15, 0  ;;  %s4514_s20 = scalar_lea.vmem %s128_s18, 16 }
   0x6   : > { %p4578_p2 = pnand %p4175_p0, %p114_p1  ;;  %p4515_p6 = scmp.ne.s32.totalorder %s128_s18, %s4514_s20 }
   0x7   : > { %p4522_p10 = scmp.lt.s32.totalorder %s128_s18, %s128_s18  ;;  %p4523_p11 = scmp.lt.s32.totalorder %s4514_s20, %s4514_s20 }
   0x8   : > { %p4199_p4 = pneg %p4578_p2 }
   0x9   : > { %p4524_p12 = por %p4523_p11, %p4522_p10 }
   0xa   : > { %p4200_p5 = pnand %p4582_p3, %p4199_p4 }
   0xc   : > { %p4516_p7 = pneg %p4200_p5 }
   0xe   : > { %p4517_p8 = pnand %p4516_p7, %p4515_p6 }
  0x10   : > { %p4518_p9 = pneg %p4517_p8 }
  0x12   : > { %p4525_p13 = pnand %p4524_p12, %p4518_p9 }
  0x14   : > { %4528 = shalt.err (!%p4525_p13)
}
  0x15   : > { %s4541_s21 = smov [#allocation3]   ;;  %153 = sbr.rel (%p4578_p2) target bundleno = 1223 (0x4c7), region = 32 }
  0x16   : > { %4202 = dma.vmem_to_smem (!%p4200_p5), %s128_s18, 16, %s4541_s21, [#allocation4]  }
  0x1c   : > { %4534 = dma.done.wait (%p4582_p3), [#allocation4], 16  }
  0x1d   : > { %4536 = vsyncadd (%p4582_p3), [#allocation4], 4294967280 }
  0x1e   : > { %159 = sfence }
  0x1f   : > { %s180_s22 = smul.u32 27, %s4173_s15  ;;  %s4183_s23 = sld [smem:[#allocation3 + $0x1]]  ;;  %vm4021_vm0 = vcmask 195584  }
  0x20   : > { %s4542_s28 = smov 127   ;;  %s4184_s29 = sld [smem:[#allocation3 + $0x2]] }
  0x21   : > { %p181_p0 = scmp.lt.s32.totalorder %s180_s22, 53  ;;  %s4543_s30 = smov 126  }
  0x22   : > { %s4186_s4 = sld [smem:[#allocation3 + $0x4]]  ;;  %s4187_s5 = sld [smem:[#allocation3 + $0x5]] }
  0x23   : > { %s11158_s22 = smov (!%p181_p0, %s180_s22), 53  ;;  %s4189_s6 = sld [smem:[#allocation3 + $0x7]] }
  0x24   : > { %s4193_s24 = sshll.u32 %s11158_s22, 5  ;;  %s194_s7 = sld [smem:[#allocation3]] }
  0x25   : > { %v4599_v0 = vstv %s4183_s23  ;;  %s4604_s27 = scalar_lea.vmem %s9732_s2, %s4193_s24  ;;  %s7192_s8 = sld [smem:[#allocation3 + $0x8]] }
  0x26   : > { %v4607_v1 = vld [vmem:[%s4604_s27 + $0x10] sm:$0xff]  ;;  %v4610_v2 = vld [vmem:[%s4604_s27] sm:$0xff]  ;;  %v4620_v6 = vld [vmem:[%s4604_s27 + $0x8] sm:$0xff]  ;;  %s7333_s9 = sld [smem:[#allocation3 + $0x3]]  ;;  %s8674_s10 = sld [smem:[#allocation3 + $0x6]] }
  0x27   : > { %v4613_v3 = vld [vmem:[%s4604_s27 + $0x20] sm:$0xff]  ;;  %v443_v4 = vmul.f32 %v4599_v0, %v4607_v1  ;;  %v441_v5 = vmul.f32 %v4599_v0, %v4610_v2  ;;  %v442_v8 = vmul.f32 %v4599_v0, %v4620_v6  ;;  %v4629_v9 = vld [vmem:[%s4604_s27 + $0x30] sm:$0xff]  ;;  %v4632_v10 = vld [vmem:[%s4604_s27 + $0x28] sm:$0xff]  ;;  %s8842_s11 = sld [smem:[#allocation2]]  ;;  %s4194_s12 = smul.u32 24, %s11158_s22 }
  0x28   : > { %v444_v7 = vmul.f32 %v4599_v0, %v4613_v3  ;;  %v446_v11 = vmul.f32 %v4599_v0, %v4629_v9  ;;  %v445_v12 = vmul.f32 %v4599_v0, %v4632_v10  ;;  %v4641_v13 = vld [vmem:[%s4604_s27 + $0x48] sm:$0xff]  ;;  %v4644_v14 = vld [vmem:[%s4604_s27 + $0x40] sm:$0xff]  ;;  %v4656_v18 = vld [vmem:[%s4604_s27 + $0x50] sm:$0xff] }
  0x29   : > { %607 = vrot.lane.b32.xlu1 %v443_v4, %s4542_s28  ;;  %603 = vrot.lane.b32.xlu0 %v441_v5, %s4542_s28  ;;  %v448_v15 = vmul.f32 %v4599_v0, %v4641_v13  ;;  %v447_v16 = vmul.f32 %v4599_v0, %v4644_v14  ;;  %v4653_v17 = vld [vmem:[%s4604_s27 + $0x60] sm:$0xff]  ;;  %v449_v20 = vmul.f32 %v4599_v0, %v4656_v18  ;;  %v4665_v21 = vld [vmem:[%s4604_s27 + $0x70] sm:$0xff]  ;;  %s8977_s16 = scalar_lea.vmem %s9733_s3, %s4194_s12 }
  0x2a   : > { %v450_v19 = vmul.f32 %v4599_v0, %v4653_v17  ;;  %v4668_v22 = vld [vmem:[%s4604_s27 + $0x68] sm:$0xff]  ;;  %v452_v23 = vmul.f32 %v4599_v0, %v4665_v21  ;;  %v4680_v26 = vld [vmem:[%s4604_s27 + $0x80] sm:$0xff]  ;;  %v4692_v30 = vld [vmem:[%s4604_s27 + $0x90] sm:$0xff] }
  0x2b   : > { %v451_v24 = vmul.f32 %v4599_v0, %v4668_v22  ;;  %v4677_v25 = vld [vmem:[%s4604_s27 + $0x88] sm:$0xff]  ;;  %v453_v28 = vmul.f32 %v4599_v0, %v4680_v26  ;;  %v4689_v29 = vld [vmem:[%s4604_s27 + $0xa0] sm:$0xff]  ;;  %v455_v32 = vmul.f32 %v4599_v0, %v4692_v30  ;;  %v4701_v33 = vld [vmem:[%s4604_s27 + $0xb0] sm:$0xff] }
  0x2c   : > { %v454_v27 = vmul.f32 %v4599_v0, %v4677_v25  ;;  %v456_v31 = vmul.f32 %v4599_v0, %v4689_v29  ;;  %v4704_v34 = vld [vmem:[%s4604_s27 + $0xa8] sm:$0xff]  ;;  %v458_v35 = vmul.f32 %v4599_v0, %v4701_v33  ;;  %v4716_v38 = vld [vmem:[%s4604_s27 + $0xc0] sm:$0xff]  ;;  %v4728_v42 = vld [vmem:[%s4604_s27 + $0xd0] sm:$0xff] }
  0x2d   : > { %609 = vrot.lane.b32.xlu1 %v444_v7, %s4542_s28  ;;  %605 = vrot.lane.b32.xlu0 %v442_v8, %s4542_s28  ;;  %v457_v36 = vmul.f32 %v4599_v0, %v4704_v34  ;;  %v4713_v37 = vld [vmem:[%s4604_s27 + $0xc8] sm:$0xff]  ;;  %v459_v40 = vmul.f32 %v4599_v0, %v4716_v38  ;;  %v4725_v41 = vld [vmem:[%s4604_s27 + $0xe0] sm:$0xff]  ;;  %v461_v44 = vmul.f32 %v4599_v0, %v4728_v42 }
  0x2e   : > { %v460_v39 = vmul.f32 %v4599_v0, %v4713_v37  ;;  %v462_v43 = vmul.f32 %v4599_v0, %v4725_v41  ;;  %v4737_v45 = vld [vmem:[%s4604_s27 + $0xf0] sm:$0xff]  ;;  %v4740_v46 = vld [vmem:[%s4604_s27 + $0xe8] sm:$0xff]  ;;  %v4752_v50 = vld [vmem:[%s4604_s27 + $0x100] sm:$0xff] }
  0x2f   : > { %v464_v47 = vmul.f32 %v4599_v0, %v4737_v45  ;;  %v463_v48 = vmul.f32 %v4599_v0, %v4740_v46  ;;  %v4749_v49 = vld [vmem:[%s4604_s27 + $0x108] sm:$0xff]  ;;  %v465_v52 = vmul.f32 %v4599_v0, %v4752_v50  ;;  %v4761_v53 = vld [vmem:[%s4604_s27 + $0x120] sm:$0xff]  ;;  %v4764_v54 = vld [vmem:[%s4604_s27 + $0x110] sm:$0xff] }
  0x30   : > { %v466_v51 = vmul.f32 %v4599_v0, %v4749_v49  ;;  %v468_v55 = vmul.f32 %v4599_v0, %v4761_v53  ;;  %v467_v56 = vmul.f32 %v4599_v0, %v4764_v54  ;;  %v4773_v57 = vld [vmem:[%s4604_s27 + $0x130] sm:$0xff]  ;;  %v4776_v58 = vld [vmem:[%s4604_s27 + $0x128] sm:$0xff]  ;;  %v4788_v62 = vld [vmem:[%s4604_s27 + $0x140] sm:$0xff] }
  0x31   : > { %613 = vrot.lane.b32.xlu1 %v446_v11, %s4542_s28  ;;  %611 = vrot.lane.b32.xlu0 %v445_v12, %s4542_s28  ;;  %v470_v59 = vmul.f32 %v4599_v0, %v4773_v57  ;;  %v469_v60 = vmul.f32 %v4599_v0, %v4776_v58  ;;  %v4785_v61 = vld [vmem:[%s4604_s27 + $0x148] sm:$0xff]  ;;  %v471_v4 = vmul.f32 %v4599_v0, %v4788_v62  ;;  %v4797_v5 = vld [vmem:[%s4604_s27 + $0x160] sm:$0xff] }
  0x32   : > { %v472_v63 = vmul.f32 %v4599_v0, %v4785_v61  ;;  %v4800_v7 = vld [vmem:[%s4604_s27 + $0x150] sm:$0xff]  ;;  %v474_v8 = vmul.f32 %v4599_v0, %v4797_v5 }
  0x33   : > { %v473_v11 = vmul.f32 %v4599_v0, %v4800_v7  ;;  %v4809_v12 = vld [vmem:[%s4604_s27 + $0x170] sm:$0xff] }
  0x35   : > { %617 = vrot.lane.b32.xlu1 %v448_v15, %s4542_s28  ;;  %615 = vrot.lane.b32.xlu0 %v447_v16, %s4542_s28  ;;  %v4812_v15 = vld [vmem:[%s4604_s27 + $0x168] sm:$0xff]  ;;  %v476_v16 = vmul.f32 %v4599_v0, %v4809_v12 }
  0x39   : > { %621 = vrot.lane.b32.xlu1 %v450_v19, %s4542_s28  ;;  %619 = vrot.lane.b32.xlu0 %v449_v20, %s4542_s28  ;;  %v475_v19 = vmul.f32 %v4599_v0, %v4812_v15  ;;  %v4821_v20 = vld [vmem:[%s4604_s27 + $0x188] sm:$0xff] }
  0x3d   : > { %625 = vrot.lane.b32.xlu1 %v452_v23, %s4542_s28  ;;  %623 = vrot.lane.b32.xlu0 %v451_v24, %s4542_s28  ;;  %v4824_v23 = vld [vmem:[%s4604_s27 + $0x180] sm:$0xff]  ;;  %v478_v24 = vmul.f32 %v4599_v0, %v4821_v20 }
  0x41   : > { %629 = vrot.lane.b32.xlu1 %v454_v27, %s4542_s28  ;;  %627 = vrot.lane.b32.xlu0 %v453_v28, %s4542_s28  ;;  %v477_v27 = vmul.f32 %v4599_v0, %v4824_v23  ;;  %v4833_v28 = vld [vmem:[%s4604_s27 + $0x1a0] sm:$0xff] }
  0x45   : > { %633 = vrot.lane.b32.xlu1 %v456_v31, %s4542_s28  ;;  %631 = vrot.lane.b32.xlu0 %v455_v32, %s4542_s28  ;;  %v4836_v31 = vld [vmem:[%s4604_s27 + $0x190] sm:$0xff]  ;;  %v480_v32 = vmul.f32 %v4599_v0, %v4833_v28 }
  0x49   : > { %637 = vrot.lane.b32.xlu1 %v458_v35, %s4542_s28  ;;  %635 = vrot.lane.b32.xlu0 %v457_v36, %s4542_s28  ;;  %v479_v35 = vmul.f32 %v4599_v0, %v4836_v31  ;;  %v4845_v36 = vld [vmem:[%s4604_s27 + $0x1b0] sm:$0xff] }
  0x4d   : > { %641 = vrot.lane.b32.xlu1 %v460_v39, %s4542_s28  ;;  %639 = vrot.lane.b32.xlu0 %v459_v40, %s4542_s28  ;;  %v4848_v39 = vld [vmem:[%s4604_s27 + $0x1a8] sm:$0xff]  ;;  %v482_v40 = vmul.f32 %v4599_v0, %v4845_v36 }
  0x51   : > { %645 = vrot.lane.b32.xlu1 %v462_v43, %s4542_s28  ;;  %643 = vrot.lane.b32.xlu0 %v461_v44, %s4542_s28  ;;  %v481_v43 = vmul.f32 %v4599_v0, %v4848_v39  ;;  %v4857_v44 = vld [vmem:[%s4604_s27 + $0x1c8] sm:$0xff] }
  0x55   : > { %649 = vrot.lane.b32.xlu1 %v464_v47, %s4542_s28  ;;  %647 = vrot.lane.b32.xlu0 %v463_v48, %s4542_s28  ;;  %v4860_v47 = vld [vmem:[%s4604_s27 + $0x1c0] sm:$0xff]  ;;  %v484_v48 = vmul.f32 %v4599_v0, %v4857_v44 }
  0x59   : > { %653 = vrot.lane.b32.xlu1 %v466_v51, %s4542_s28  ;;  %651 = vrot.lane.b32.xlu0 %v465_v52, %s4542_s28  ;;  %v483_v51 = vmul.f32 %v4599_v0, %v4860_v47  ;;  %v4869_v52 = vld [vmem:[%s4604_s27 + $0x1e0] sm:$0xff] }
  0x5d   : > { %657 = vrot.lane.b32.xlu1 %v468_v55, %s4542_s28  ;;  %655 = vrot.lane.b32.xlu0 %v467_v56, %s4542_s28  ;;  %v4872_v55 = vld [vmem:[%s4604_s27 + $0x1d0] sm:$0xff]  ;;  %v486_v56 = vmul.f32 %v4599_v0, %v4869_v52 }
  0x61   : > { %661 = vrot.lane.b32.xlu1 %v470_v59, %s4542_s28  ;;  %659 = vrot.lane.b32.xlu0 %v469_v60, %s4542_s28  ;;  %v485_v59 = vmul.f32 %v4599_v0, %v4872_v55  ;;  %v4881_v60 = vld [vmem:[%s4604_s27 + $0x1f0] sm:$0xff] }
  0x65   : > { %665 = vrot.lane.b32.xlu1 %v472_v63, %s4542_s28  ;;  %663 = vrot.lane.b32.xlu0 %v471_v4, %s4542_s28  ;;  %v4884_v63 = vld [vmem:[%s4604_s27 + $0x1e8] sm:$0xff]  ;;  %v488_v4 = vmul.f32 %v4599_v0, %v4881_v60 }
  0x69   : > { %669 = vrot.lane.b32.xlu1 %v474_v8, %s4542_s28  ;;  %667 = vrot.lane.b32.xlu0 %v473_v11, %s4542_s28  ;;  %v487_v8 = vmul.f32 %v4599_v0, %v4884_v63  ;;  %v4893_v11 = vld [vmem:[%s4604_s27 + $0x208] sm:$0xff] }
  0x6d   : > { %673 = vrot.lane.b32.xlu1 %v476_v16, %s4542_s28  ;;  %671 = vrot.lane.b32.xlu0 %v475_v19, %s4542_s28  ;;  %v4896_v16 = vld [vmem:[%s4604_s27 + $0x200] sm:$0xff]  ;;  %v490_v19 = vmul.f32 %v4599_v0, %v4893_v11 }
  0x71   : > { %677 = vrot.lane.b32.xlu1 %v478_v24, %s4542_s28  ;;  %675 = vrot.lane.b32.xlu0 %v477_v27, %s4542_s28  ;;  %v489_v24 = vmul.f32 %v4599_v0, %v4896_v16  ;;  %v4905_v27 = vld [vmem:[%s4604_s27 + $0x220] sm:$0xff] }
  0x72   : > { %9805 = vst [vmem:[#allocation6_spill] sm:$0xff] %v4905_v27 }
  0x75   : > { %681 = vrot.lane.b32.xlu1 %v480_v32, %s4542_s28  ;;  %679 = vrot.lane.b32.xlu0 %v479_v35, %s4542_s28  ;;  %v4908_v32 = vld [vmem:[%s4604_s27 + $0x210] sm:$0xff]  ;;  %v492_v35 = vmul.f32 %v4599_v0, %v4905_v27 }
  0x79   : > { %685 = vrot.lane.b32.xlu1 %v482_v40, %s4542_s28  ;;  %683 = vrot.lane.b32.xlu0 %v481_v43, %s4542_s28  ;;  %v491_v40 = vmul.f32 %v4599_v0, %v4908_v32  ;;  %v4917_v43 = vld [vmem:[%s4604_s27 + $0x230] sm:$0xff] }
  0x7a   : > { %9806 = vst [vmem:[#allocation7_spill] sm:$0xff] %v4917_v43 }
  0x7d   : > { %689 = vrot.lane.b32.xlu1 %v484_v48, %s4542_s28  ;;  %687 = vrot.lane.b32.xlu0 %v483_v51, %s4542_s28  ;;  %v4920_v48 = vld [vmem:[%s4604_s27 + $0x228] sm:$0xff]  ;;  %v494_v51 = vmul.f32 %v4599_v0, %v4917_v43  ;;  %v4968_v43 = vld [vmem:[%s4604_s27 + $0x280] sm:$0xff] }
  0x7e   : > { %9807 = vst [vmem:[#allocation8_spill] sm:$0xff] %v4920_v48  ;;  %9815 = vst [vmem:[#allocation16_spill] sm:$0xff] %v4968_v43 }
  0x81   : > { %693 = vrot.lane.b32.xlu1 %v486_v56, %s4542_s28  ;;  %691 = vrot.lane.b32.xlu0 %v485_v59, %s4542_s28  ;;  %v493_v56 = vmul.f32 %v4599_v0, %v4920_v48  ;;  %v4929_v59 = vld [vmem:[%s4604_s27 + $0x248] sm:$0xff] }
  0x82   : > { %9808 = vst [vmem:[#allocation9_spill] sm:$0xff] %v4929_v59 }
  0x85   : > { %697 = vrot.lane.b32.xlu1 %v488_v4, %s4542_s28  ;;  %695 = vrot.lane.b32.xlu0 %v487_v8, %s4542_s28  ;;  %v4932_v4 = vld [vmem:[%s4604_s27 + $0x240] sm:$0xff]  ;;  %v496_v8 = vmul.f32 %v4599_v0, %v4929_v59  ;;  %v4956_v59 = vld [vmem:[%s4604_s27 + $0x268] sm:$0xff] }
  0x86   : > { %9809 = vst [vmem:[#allocation10_spill] sm:$0xff] %v4932_v4  ;;  %9813 = vst [vmem:[#allocation14_spill] sm:$0xff] %v4956_v59 }
  0x89   : > { %701 = vrot.lane.b32.xlu1 %v490_v19, %s4542_s28  ;;  %699 = vrot.lane.b32.xlu0 %v489_v24, %s4542_s28  ;;  %v495_v19 = vmul.f32 %v4599_v0, %v4932_v4  ;;  %v4941_v24 = vld [vmem:[%s4604_s27 + $0x260] sm:$0xff] }
  0x8a   : > { %9810 = vst [vmem:[#allocation11_spill] sm:$0xff] %v4941_v24 }
  0x8d   : > { %705 = vrot.lane.b32.xlu1 %v492_v35, %s4542_s28  ;;  %703 = vrot.lane.b32.xlu0 %v491_v40, %s4542_s28  ;;  %v4944_v35 = vld [vmem:[%s4604_s27 + $0x250] sm:$0xff]  ;;  %v498_v40 = vmul.f32 %v4599_v0, %v4941_v24  ;;  %v4965_v24 = vld [vmem:[%s4604_s27 + $0x288] sm:$0xff] }
  0x8e   : > { %9811 = vst [vmem:[#allocation12_spill] sm:$0xff] %v4944_v35  ;;  %9814 = vst [vmem:[#allocation15_spill] sm:$0xff] %v4965_v24 }
  0x91   : > { %709 = vrot.lane.b32.xlu1 %v494_v51, %s4542_s28  ;;  %707 = vrot.lane.b32.xlu0 %v493_v56, %s4542_s28  ;;  %v497_v51 = vmul.f32 %v4599_v0, %v4944_v35  ;;  %v4953_v56 = vld [vmem:[%s4604_s27 + $0x270] sm:$0xff] }
  0x92   : > { %9812 = vst [vmem:[#allocation13_spill] sm:$0xff] %v4953_v56 }
  0x95   : > { %713 = vrot.lane.b32.xlu1 %v496_v8, %s4542_s28  ;;  %711 = vrot.lane.b32.xlu0 %v495_v19, %s4542_s28  ;;  %v500_v8 = vmul.f32 %v4599_v0, %v4953_v56  ;;  %v499_v19 = vmul.f32 %v4599_v0, %v4956_v59  ;;  %v4981_v56 = vld [vmem:[%s4604_s27 + $0x2a0] sm:$0xff]  ;;  %v4984_v59 = vld [vmem:[%s4604_s27 + $0x290] sm:$0xff] }
  0x96   : > { %9818 = vst [vmem:[#allocation19_spill] sm:$0xff] %v4981_v56  ;;  %9819 = vst [vmem:[#allocation20_spill] sm:$0xff] %v4984_v59 }
  0x99   : > { %717 = vrot.lane.b32.xlu1 %v498_v40, %s4542_s28  ;;  %715 = vrot.lane.b32.xlu0 %v497_v51, %s4542_s28  ;;  %v502_v40 = vmul.f32 %v4599_v0, %v4965_v24  ;;  %v501_v51 = vmul.f32 %v4599_v0, %v4968_v43  ;;  %v5000_v24 = vld [vmem:[%s4604_s27 + $0x2a8] sm:$0xff] }
  0x9a   : > { %9823 = vst [vmem:[#allocation24_spill] sm:$0xff] %v5000_v24 }
  0x9b   : > { %v4970_v35 = vpop.permute.xlu1 %607  ;;  %v4972_v4 = vpop.permute.xlu0 %603 }
  0x9c   : > { %9816 = vst [vmem:[#allocation17_spill] sm:$0xff] %v4970_v35  ;;  %9817 = vst [vmem:[#allocation18_spill] sm:$0xff] %v4972_v4  ;;  %v4997_v4 = vld [vmem:[%s4604_s27 + $0x2b0] sm:$0xff] }
  0x9d   : > { %721 = vrot.lane.b32.xlu1 %v500_v8, %s4542_s28  ;;  %719 = vrot.lane.b32.xlu0 %v499_v19, %s4542_s28  ;;  %v504_v8 = vmul.f32 %v4599_v0, %v4981_v56  ;;  %v503_v19 = vmul.f32 %v4599_v0, %v4984_v59  ;;  %9822 = vst [vmem:[#allocation23_spill] sm:$0xff] %v4997_v4  ;;  %v5016_v56 = vld [vmem:[%s4604_s27 + $0x2c0] sm:$0xff] }
  0x9e   : > { %9827 = vst [vmem:[#allocation28_spill] sm:$0xff] %v5016_v56 }
  0x9f   : > { %v4986_v27 = vpop.permute.xlu1 %609  ;;  %v4988_v35 = vpop.permute.xlu0 %605 }
  0xa0   : > { %9820 = vst [vmem:[#allocation21_spill] sm:$0xff] %v4986_v27  ;;  %9821 = vst [vmem:[#allocation22_spill] sm:$0xff] %v4988_v35  ;;  %v5013_v35 = vld [vmem:[%s4604_s27 + $0x2c8] sm:$0xff] }
  0xa1   : > { %725 = vrot.lane.b32.xlu1 %v502_v40, %s4542_s28  ;;  %723 = vrot.lane.b32.xlu0 %v501_v51, %s4542_s28  ;;  %v506_v40 = vmul.f32 %v4599_v0, %v4997_v4  ;;  %v505_v51 = vmul.f32 %v4599_v0, %v5000_v24  ;;  %9826 = vst [vmem:[#allocation27_spill] sm:$0xff] %v5013_v35  ;;  %v5032_v4 = vld [vmem:[%s4604_s27 + $0x2d0] sm:$0xff] }
  0xa2   : > { %9831 = vst [vmem:[#allocation32_spill] sm:$0xff] %v5032_v4 }
  0xa3   : > { %v5002_v43 = vpop.permute.xlu1 %613  ;;  %v5004_v27 = vpop.permute.xlu0 %611 }
  0xa4   : > { %9824 = vst [vmem:[#allocation25_spill] sm:$0xff] %v5002_v43  ;;  %9825 = vst [vmem:[#allocation26_spill] sm:$0xff] %v5004_v27  ;;  %v5029_v27 = vld [vmem:[%s4604_s27 + $0x2e0] sm:$0xff] }
  0xa5   : > { %729 = vrot.lane.b32.xlu1 %v504_v8, %s4542_s28  ;;  %727 = vrot.lane.b32.xlu0 %v503_v19, %s4542_s28  ;;  %v508_v8 = vmul.f32 %v4599_v0, %v5013_v35  ;;  %v507_v19 = vmul.f32 %v4599_v0, %v5016_v56  ;;  %9830 = vst [vmem:[#allocation31_spill] sm:$0xff] %v5029_v27  ;;  %v5048_v35 = vld [vmem:[%s4604_s27 + $0x2e8] sm:$0xff] }
  0xa6   : > { %9835 = vst [vmem:[#allocation36_spill] sm:$0xff] %v5048_v35 }
  0xa7   : > { %v5018_v59 = vpop.permute.xlu1 %617  ;;  %v5020_v43 = vpop.permute.xlu0 %615 }
  0xa8   : > { %9828 = vst [vmem:[#allocation29_spill] sm:$0xff] %v5018_v59  ;;  %9829 = vst [vmem:[#allocation30_spill] sm:$0xff] %v5020_v43  ;;  %v5045_v43 = vld [vmem:[%s4604_s27 + $0x2f0] sm:$0xff] }
  0xa9   : > { %733 = vrot.lane.b32.xlu1 %v506_v40, %s4542_s28  ;;  %731 = vrot.lane.b32.xlu0 %v505_v51, %s4542_s28  ;;  %v510_v40 = vmul.f32 %v4599_v0, %v5029_v27  ;;  %v509_v51 = vmul.f32 %v4599_v0, %v5032_v4  ;;  %9834 = vst [vmem:[#allocation35_spill] sm:$0xff] %v5045_v43  ;;  %v5064_v27 = vld [vmem:[%s4604_s27 + $0x300] sm:$0xff] }
  0xaa   : > { %9839 = vst [vmem:[#allocation40_spill] sm:$0xff] %v5064_v27 }
  0xab   : > { %v5034_v24 = vpop.permute.xlu1 %621  ;;  %v5036_v59 = vpop.permute.xlu0 %619 }
  0xac   : > { %9832 = vst [vmem:[#allocation33_spill] sm:$0xff] %v5034_v24  ;;  %9833 = vst [vmem:[#allocation34_spill] sm:$0xff] %v5036_v59  ;;  %v5061_v59 = vld [vmem:[%s4604_s27 + $0x308] sm:$0xff] }
  0xad   : > { %737 = vrot.lane.b32.xlu1 %v508_v8, %s4542_s28  ;;  %735 = vrot.lane.b32.xlu0 %v507_v19, %s4542_s28  ;;  %v512_v8 = vmul.f32 %v4599_v0, %v5045_v43  ;;  %v511_v19 = vmul.f32 %v4599_v0, %v5048_v35  ;;  %9838 = vst [vmem:[#allocation39_spill] sm:$0xff] %v5061_v59  ;;  %v5080_v43 = vld [vmem:[%s4604_s27 + $0x310] sm:$0xff] }
  0xae   : > { %9843 = vst [vmem:[#allocation44_spill] sm:$0xff] %v5080_v43 }
  0xaf   : > { %v5050_v56 = vpop.permute.xlu1 %625  ;;  %v5052_v24 = vpop.permute.xlu0 %623 }
  0xb0   : > { %9836 = vst [vmem:[#allocation37_spill] sm:$0xff] %v5050_v56  ;;  %9837 = vst [vmem:[#allocation38_spill] sm:$0xff] %v5052_v24  ;;  %v5077_v24 = vld [vmem:[%s4604_s27 + $0x320] sm:$0xff] }
  0xb1   : > { %741 = vrot.lane.b32.xlu1 %v510_v40, %s4542_s28  ;;  %739 = vrot.lane.b32.xlu0 %v509_v51, %s4542_s28  ;;  %v514_v40 = vmul.f32 %v4599_v0, %v5061_v59  ;;  %v513_v51 = vmul.f32 %v4599_v0, %v5064_v27  ;;  %9842 = vst [vmem:[#allocation43_spill] sm:$0xff] %v5077_v24  ;;  %v5096_v59 = vld [vmem:[%s4604_s27 + $0x328] sm:$0xff] }
  0xb2   : > { %9847 = vst [vmem:[#allocation48_spill] sm:$0xff] %v5096_v59 }
  0xb3   : > { %v5066_v4 = vpop.permute.xlu1 %629  ;;  %v5068_v56 = vpop.permute.xlu0 %627 }
  0xb4   : > { %9840 = vst [vmem:[#allocation41_spill] sm:$0xff] %v5066_v4  ;;  %9841 = vst [vmem:[#allocation42_spill] sm:$0xff] %v5068_v56  ;;  %v5093_v56 = vld [vmem:[%s4604_s27 + $0x330] sm:$0xff] }
  0xb5   : > { %745 = vrot.lane.b32.xlu1 %v512_v8, %s4542_s28  ;;  %743 = vrot.lane.b32.xlu0 %v511_v19, %s4542_s28  ;;  %v516_v8 = vmul.f32 %v4599_v0, %v5077_v24  ;;  %v515_v19 = vmul.f32 %v4599_v0, %v5080_v43  ;;  %9846 = vst [vmem:[#allocation47_spill] sm:$0xff] %v5093_v56  ;;  %v5112_v24 = vld [vmem:[%s4604_s27 + $0x340] sm:$0xff] }
  0xb7   : > { %v5082_v35 = vpop.permute.xlu1 %633  ;;  %v5084_v4 = vpop.permute.xlu0 %631 }
  0xb8   : > { %9844 = vst [vmem:[#allocation45_spill] sm:$0xff] %v5082_v35  ;;  %9845 = vst [vmem:[#allocation46_spill] sm:$0xff] %v5084_v4  ;;  %v5109_v4 = vld [vmem:[%s4604_s27 + $0x348] sm:$0xff] }
  0xb9   : > { %749 = vrot.lane.b32.xlu1 %v514_v40, %s4542_s28  ;;  %747 = vrot.lane.b32.xlu0 %v513_v51, %s4542_s28  ;;  %v518_v40 = vmul.f32 %v4599_v0, %v5093_v56  ;;  %v517_v51 = vmul.f32 %v4599_v0, %v5096_v59 }
  0xbb   : > { %v5098_v35 = vpop.permute.xlu1 %637  ;;  %v5100_v27 = vpop.permute.xlu0 %635 }
  0xbc   : > { %9848 = vst [vmem:[#allocation49_spill] sm:$0xff] %v5098_v35  ;;  %9849 = vst [vmem:[#allocation50_spill] sm:$0xff] %v5100_v27  ;;  %v5124_v27 = vstv %s4184_s29  ;;  %v5127_v35 = vld [vmem:[%s4604_s27 + $0x350] sm:$0xff] }
  0xbd   : > { %753 = vrot.lane.b32.xlu1 %v516_v8, %s4542_s28  ;;  %751 = vrot.lane.b32.xlu0 %v515_v19, %s4542_s28  ;;  %v520_v8 = vmul.f32 %v4599_v0, %v5109_v4  ;;  %v519_v19 = vmul.f32 %v4599_v0, %v5112_v24 }
  0xbf   : > { %v5114_v43 = vpop.permute.xlu1 %641  ;;  %v5116_v48 = vpop.permute.xlu0 %639 }
  0xc0   : > { %9850 = vst [vmem:[#allocation51_spill] sm:$0xff] %v5114_v43  ;;  %9851 = vst [vmem:[#allocation52_spill] sm:$0xff] %v5116_v48 }
  0xc1   : > { %757 = vrot.lane.b32.xlu1 %v518_v40, %s4542_s28  ;;  %755 = vrot.lane.b32.xlu0 %v517_v51, %s4542_s28  ;;  %v929_v40 = vmul.f32 %v5124_v27, %v4610_v2  ;;  %v521_v51 = vmul.f32 %v4599_v0, %v5127_v35  ;;  %v933_v0 = vmul.f32 %v5124_v27, %v4632_v10 }
  0xc3   : > { %v5129_v56 = vpop.permute.xlu1 %645  ;;  %v5131_v59 = vpop.permute.xlu0 %643 }
  0xc4   : > { %9852 = vst [vmem:[#allocation53_spill] sm:$0xff] %v5129_v56  ;;  %9853 = vst [vmem:[#allocation54_spill] sm:$0xff] %v5131_v59 }
  0xc5   : > { %761 = vrot.lane.b32.xlu1 %v520_v8, %s4542_s28  ;;  %759 = vrot.lane.b32.xlu0 %v519_v19, %s4542_s28  ;;  %v931_v8 = vmul.f32 %v5124_v27, %v4607_v1  ;;  %v930_v19 = vmul.f32 %v5124_v27, %v4620_v6  ;;  %v935_v6 = vmul.f32 %v5124_v27, %v4644_v14 }
  0xc7   : > { %v5139_v48 = vpop.permute.xlu1 %649  ;;  %v5141_v43 = vpop.permute.xlu0 %647 }
  0xc8   : > { %9854 = vst [vmem:[#allocation55_spill] sm:$0xff] %v5139_v48  ;;  %9855 = vst [vmem:[#allocation56_spill] sm:$0xff] %v5141_v43  ;;  %v5981_v48 = vld [vmem:[%s4604_s27 + $0x241] sm:$0xff] }
  0xc9   : > { %1091 = vrot.lane.b32.xlu1 %v929_v40, %s4543_s30  ;;  %763 = vrot.lane.b32.xlu0 %v521_v51, %s4542_s28  ;;  %v932_v40 = vmul.f32 %v5124_v27, %v4613_v3  ;;  %v937_v3 = vmul.f32 %v5124_v27, %v4656_v18  ;;  %10019 = vst [vmem:[#allocation166_spill] sm:$0xff] %v5981_v48 }
  0xcb   : > { %v5149_v59 = vpop.permute.xlu1 %653  ;;  %v5151_v2 = vpop.permute.xlu0 %651 }
  0xcc   : > { %9856 = vst [vmem:[#allocation57_spill] sm:$0xff] %v5149_v59  ;;  %9857 = vst [vmem:[#allocation58_spill] sm:$0xff] %v5151_v2  ;;  %v5965_v59 = vld [vmem:[%s4604_s27 + $0x229] sm:$0xff] }
  0xcd   : > { %1095 = vrot.lane.b32.xlu1 %v931_v8, %s4543_s30  ;;  %1093 = vrot.lane.b32.xlu0 %v930_v19, %s4543_s30  ;;  %v934_v8 = vmul.f32 %v5124_v27, %v4629_v9  ;;  %v939_v9 = vmul.f32 %v5124_v27, %v4668_v22 }
  0xcf   : > { %v5159_v51 = vpop.permute.xlu1 %657  ;;  %v5161_v1 = vpop.permute.xlu0 %655 }
  0xd0   : > { %9858 = vst [vmem:[#allocation59_spill] sm:$0xff] %v5159_v51  ;;  %9859 = vst [vmem:[#allocation60_spill] sm:$0xff] %v5161_v1  ;;  %v5949_v51 = vld [vmem:[%s4604_s27 + $0x211] sm:$0xff] }
  0xd1   : > { %1099 = vrot.lane.b32.xlu1 %v933_v0, %s4543_s30  ;;  %1097 = vrot.lane.b32.xlu0 %v932_v40, %s4543_s30  ;;  %v936_v0 = vmul.f32 %v5124_v27, %v4641_v13  ;;  %v941_v13 = vmul.f32 %v5124_v27, %v4680_v26 }
  0xd3   : > { %v5169_v19 = vpop.permute.xlu1 %661  ;;  %v5171_v10 = vpop.permute.xlu0 %659 }
  0xd4   : > { %9860 = vst [vmem:[#allocation61_spill] sm:$0xff] %v5169_v19  ;;  %9861 = vst [vmem:[#allocation62_spill] sm:$0xff] %v5171_v10  ;;  %v5933_v19 = vld [vmem:[%s4604_s27 + $0x201] sm:$0xff] }
  0xd5   : > { %1103 = vrot.lane.b32.xlu1 %v935_v6, %s4543_s30  ;;  %1101 = vrot.lane.b32.xlu0 %v934_v8, %s4543_s30  ;;  %v938_v6 = vmul.f32 %v5124_v27, %v4653_v17  ;;  %v943_v17 = vmul.f32 %v5124_v27, %v4692_v30 }
  0xd7   : > { %v5179_v40 = vpop.permute.xlu1 %665  ;;  %v5181_v14 = vpop.permute.xlu0 %663 }
  0xd8   : > { %9862 = vst [vmem:[#allocation63_spill] sm:$0xff] %v5179_v40  ;;  %9863 = vst [vmem:[#allocation64_spill] sm:$0xff] %v5181_v14  ;;  %v5917_v40 = vld [vmem:[%s4604_s27 + $0x1e9] sm:$0xff] }
  0xd9   : > { %1107 = vrot.lane.b32.xlu1 %v937_v3, %s4543_s30  ;;  %1105 = vrot.lane.b32.xlu0 %v936_v0, %s4543_s30  ;;  %v940_v3 = vmul.f32 %v5124_v27, %v4665_v21  ;;  %v945_v21 = vmul.f32 %v5124_v27, %v4704_v34 }
  0xdb   : > { %v5189_v8 = vpop.permute.xlu1 %669  ;;  %v5191_v18 = vpop.permute.xlu0 %667 }
  0xdc   : > { %9864 = vst [vmem:[#allocation65_spill] sm:$0xff] %v5189_v8  ;;  %9865 = vst [vmem:[#allocation66_spill] sm:$0xff] %v5191_v18  ;;  %v5901_v8 = vld [vmem:[%s4604_s27 + $0x1d1] sm:$0xff] }
  0xdd   : > { %1111 = vrot.lane.b32.xlu1 %v939_v9, %s4543_s30  ;;  %1109 = vrot.lane.b32.xlu0 %v938_v6, %s4543_s30  ;;  %v942_v9 = vmul.f32 %v5124_v27, %v4677_v25  ;;  %v947_v25 = vmul.f32 %v5124_v27, %v4716_v38 }
  0xdf   : > { %v5199_v0 = vpop.permute.xlu1 %673  ;;  %v5201_v22 = vpop.permute.xlu0 %671 }
  0xe0   : > { %9866 = vst [vmem:[#allocation67_spill] sm:$0xff] %v5199_v0  ;;  %9867 = vst [vmem:[#allocation68_spill] sm:$0xff] %v5201_v22  ;;  %v5885_v0 = vld [vmem:[%s4604_s27 + $0x1c1] sm:$0xff] }
  0xe1   : > { %1115 = vrot.lane.b32.xlu1 %v941_v13, %s4543_s30  ;;  %1113 = vrot.lane.b32.xlu0 %v940_v3, %s4543_s30  ;;  %v944_v13 = vmul.f32 %v5124_v27, %v4689_v29  ;;  %v949_v29 = vmul.f32 %v5124_v27, %v4728_v42 }
  0xe3   : > { %v5209_v6 = vpop.permute.xlu1 %677  ;;  %v5211_v26 = vpop.permute.xlu0 %675 }
  0xe4   : > { %9868 = vst [vmem:[#allocation69_spill] sm:$0xff] %v5209_v6  ;;  %9869 = vst [vmem:[#allocation70_spill] sm:$0xff] %v5211_v26  ;;  %v5869_v6 = vld [vmem:[%s4604_s27 + $0x1a9] sm:$0xff] }
  0xe5   : > { %1119 = vrot.lane.b32.xlu1 %v943_v17, %s4543_s30  ;;  %1117 = vrot.lane.b32.xlu0 %v942_v9, %s4543_s30  ;;  %v946_v17 = vmul.f32 %v5124_v27, %v4701_v33  ;;  %v951_v33 = vmul.f32 %v5124_v27, %v4740_v46 }
  0xe7   : > { %v5219_v3 = vpop.permute.xlu1 %681  ;;  %v5221_v30 = vpop.permute.xlu0 %679 }
  0xe8   : > { %9870 = vst [vmem:[#allocation71_spill] sm:$0xff] %v5219_v3  ;;  %9871 = vst [vmem:[#allocation72_spill] sm:$0xff] %v5221_v30  ;;  %v5853_v3 = vld [vmem:[%s4604_s27 + $0x191] sm:$0xff] }
  0xe9   : > { %1123 = vrot.lane.b32.xlu1 %v945_v21, %s4543_s30  ;;  %1121 = vrot.lane.b32.xlu0 %v944_v13, %s4543_s30  ;;  %v948_v21 = vmul.f32 %v5124_v27, %v4713_v37  ;;  %v953_v37 = vmul.f32 %v5124_v27, %v4752_v50 }
  0xeb   : > { %v5229_v9 = vpop.permute.xlu1 %685  ;;  %v5231_v34 = vpop.permute.xlu0 %683 }
  0xec   : > { %9872 = vst [vmem:[#allocation73_spill] sm:$0xff] %v5229_v9  ;;  %9873 = vst [vmem:[#allocation74_spill] sm:$0xff] %v5231_v34  ;;  %v5837_v9 = vld [vmem:[%s4604_s27 + $0x181] sm:$0xff] }
  0xed   : > { %1127 = vrot.lane.b32.xlu1 %v947_v25, %s4543_s30  ;;  %1125 = vrot.lane.b32.xlu0 %v946_v17, %s4543_s30  ;;  %v950_v25 = vmul.f32 %v5124_v27, %v4725_v41  ;;  %v955_v41 = vmul.f32 %v5124_v27, %v4764_v54 }
  0xef   : > { %v5239_v13 = vpop.permute.xlu1 %689  ;;  %v5241_v38 = vpop.permute.xlu0 %687 }
  0xf0   : > { %9874 = vst [vmem:[#allocation75_spill] sm:$0xff] %v5239_v13  ;;  %9875 = vst [vmem:[#allocation76_spill] sm:$0xff] %v5241_v38  ;;  %v5821_v13 = vld [vmem:[%s4604_s27 + $0x169] sm:$0xff] }
  0xf1   : > { %1131 = vrot.lane.b32.xlu1 %v949_v29, %s4543_s30  ;;  %1129 = vrot.lane.b32.xlu0 %v948_v21, %s4543_s30  ;;  %v952_v29 = vmul.f32 %v5124_v27, %v4737_v45  ;;  %v957_v45 = vmul.f32 %v5124_v27, %v4776_v58 }
  0xf3   : > { %v5249_v17 = vpop.permute.xlu1 %693  ;;  %v5251_v42 = vpop.permute.xlu0 %691 }
  0xf4   : > { %9876 = vst [vmem:[#allocation77_spill] sm:$0xff] %v5249_v17  ;;  %9877 = vst [vmem:[#allocation78_spill] sm:$0xff] %v5251_v42  ;;  %v5805_v17 = vld [vmem:[%s4604_s27 + $0x151] sm:$0xff] }
  0xf5   : > { %1135 = vrot.lane.b32.xlu1 %v951_v33, %s4543_s30  ;;  %1133 = vrot.lane.b32.xlu0 %v950_v25, %s4543_s30  ;;  %v954_v33 = vmul.f32 %v5124_v27, %v4749_v49  ;;  %v959_v49 = vmul.f32 %v5124_v27, %v4788_v62 }
  0xf7   : > { %v5259_v21 = vpop.permute.xlu1 %697  ;;  %v5261_v46 = vpop.permute.xlu0 %695 }
  0xf8   : > { %9878 = vst [vmem:[#allocation79_spill] sm:$0xff] %v5259_v21  ;;  %9879 = vst [vmem:[#allocation80_spill] sm:$0xff] %v5261_v46  ;;  %v5789_v21 = vld [vmem:[%s4604_s27 + $0x141] sm:$0xff] }
  0xf9   : > { %1139 = vrot.lane.b32.xlu1 %v953_v37, %s4543_s30  ;;  %1137 = vrot.lane.b32.xlu0 %v952_v29, %s4543_s30  ;;  %v956_v37 = vmul.f32 %v5124_v27, %v4761_v53  ;;  %v961_v53 = vmul.f32 %v5124_v27, %v4800_v7 }
  0xfb   : > { %v5269_v25 = vpop.permute.xlu1 %701  ;;  %v5271_v50 = vpop.permute.xlu0 %699 }
  0xfc   : > { %9880 = vst [vmem:[#allocation81_spill] sm:$0xff] %v5269_v25  ;;  %9881 = vst [vmem:[#allocation82_spill] sm:$0xff] %v5271_v50  ;;  %v5773_v25 = vld [vmem:[%s4604_s27 + $0x129] sm:$0xff] }
  0xfd   : > { %1143 = vrot.lane.b32.xlu1 %v955_v41, %s4543_s30  ;;  %1141 = vrot.lane.b32.xlu0 %v954_v33, %s4543_s30  ;;  %v958_v41 = vmul.f32 %v5124_v27, %v4773_v57  ;;  %v963_v57 = vmul.f32 %v5124_v27, %v4812_v15 }
  0xff   : > { %v5279_v29 = vpop.permute.xlu1 %705  ;;  %v5281_v54 = vpop.permute.xlu0 %703 }
 0x100   : > { %9882 = vst [vmem:[#allocation83_spill] sm:$0xff] %v5279_v29  ;;  %9883 = vst [vmem:[#allocation84_spill] sm:$0xff] %v5281_v54  ;;  %v5757_v29 = vld [vmem:[%s4604_s27 + $0x111] sm:$0xff] }
 0x101   : > { %1147 = vrot.lane.b32.xlu1 %v957_v45, %s4543_s30  ;;  %1145 = vrot.lane.b32.xlu0 %v956_v37, %s4543_s30  ;;  %v960_v45 = vmul.f32 %v5124_v27, %v4785_v61  ;;  %v965_v61 = vmul.f32 %v5124_v27, %v4824_v23 }
 0x103   : > { %v5289_v33 = vpop.permute.xlu1 %709  ;;  %v5291_v58 = vpop.permute.xlu0 %707 }
 0x104   : > { %9884 = vst [vmem:[#allocation85_spill] sm:$0xff] %v5289_v33  ;;  %9885 = vst [vmem:[#allocation86_spill] sm:$0xff] %v5291_v58  ;;  %v5741_v33 = vld [vmem:[%s4604_s27 + $0x101] sm:$0xff] }
 0x105   : > { %1151 = vrot.lane.b32.xlu1 %v959_v49, %s4543_s30  ;;  %1149 = vrot.lane.b32.xlu0 %v958_v41, %s4543_s30  ;;  %v962_v49 = vmul.f32 %v5124_v27, %v4797_v5  ;;  %v967_v5 = vmul.f32 %v5124_v27, %v4836_v31 }
 0x107   : > { %v5299_v37 = vpop.permute.xlu1 %713  ;;  %v5301_v62 = vpop.permute.xlu0 %711 }
 0x108   : > { %9886 = vst [vmem:[#allocation87_spill] sm:$0xff] %v5299_v37  ;;  %9887 = vst [vmem:[#allocation88_spill] sm:$0xff] %v5301_v62  ;;  %v5725_v37 = vld [vmem:[%s4604_s27 + $0xe9] sm:$0xff] }
 0x109   : > { %1155 = vrot.lane.b32.xlu1 %v961_v53, %s4543_s30  ;;  %1153 = vrot.lane.b32.xlu0 %v960_v45, %s4543_s30  ;;  %v964_v53 = vmul.f32 %v5124_v27, %v4809_v12  ;;  %v969_v12 = vmul.f32 %v5124_v27, %v4848_v39 }
 0x10b   : > { %v5309_v41 = vpop.permute.xlu1 %717  ;;  %v5311_v7 = vpop.permute.xlu0 %715 }
 0x10c   : > { %9888 = vst [vmem:[#allocation89_spill] sm:$0xff] %v5309_v41  ;;  %9889 = vst [vmem:[#allocation90_spill] sm:$0xff] %v5311_v7  ;;  %v5709_v41 = vld [vmem:[%s4604_s27 + $0xd1] sm:$0xff] }
 0x10d   : > { %1159 = vrot.lane.b32.xlu1 %v963_v57, %s4543_s30  ;;  %1157 = vrot.lane.b32.xlu0 %v962_v49, %s4543_s30  ;;  %v966_v57 = vmul.f32 %v5124_v27, %v4821_v20  ;;  %v971_v20 = vmul.f32 %v5124_v27, %v4860_v47 }
 0x10f   : > { %v5319_v45 = vpop.permute.xlu1 %721  ;;  %v5321_v15 = vpop.permute.xlu0 %719 }
 0x110   : > { %9890 = vst [vmem:[#allocation91_spill] sm:$0xff] %v5319_v45  ;;  %9891 = vst [vmem:[#allocation92_spill] sm:$0xff] %v5321_v15  ;;  %v5693_v45 = vld [vmem:[%s4604_s27 + $0xc1] sm:$0xff] }
 0x111   : > { %1163 = vrot.lane.b32.xlu1 %v965_v61, %s4543_s30  ;;  %1161 = vrot.lane.b32.xlu0 %v964_v53, %s4543_s30  ;;  %v968_v61 = vmul.f32 %v5124_v27, %v4833_v28  ;;  %v973_v28 = vmul.f32 %v5124_v27, %v4872_v55 }
 0x113   : > { %v5329_v49 = vpop.permute.xlu1 %725  ;;  %v5331_v23 = vpop.permute.xlu0 %723 }
 0x114   : > { %9892 = vst [vmem:[#allocation93_spill] sm:$0xff] %v5329_v49  ;;  %9893 = vst [vmem:[#allocation94_spill] sm:$0xff] %v5331_v23  ;;  %v5677_v49 = vld [vmem:[%s4604_s27 + $0xa9] sm:$0xff] }
 0x115   : > { %1167 = vrot.lane.b32.xlu1 %v967_v5, %s4543_s30  ;;  %1165 = vrot.lane.b32.xlu0 %v966_v57, %s4543_s30  ;;  %v970_v5 = vmul.f32 %v5124_v27, %v4845_v36  ;;  %v975_v36 = vmul.f32 %v5124_v27, %v4884_v63 }
 0x117   : > { %v5339_v53 = vpop.permute.xlu1 %729  ;;  %v5341_v31 = vpop.permute.xlu0 %727 }
 0x118   : > { %9894 = vst [vmem:[#allocation95_spill] sm:$0xff] %v5339_v53  ;;  %9895 = vst [vmem:[#allocation96_spill] sm:$0xff] %v5341_v31  ;;  %v5661_v53 = vld [vmem:[%s4604_s27 + $0x91] sm:$0xff] }
 0x119   : > { %1171 = vrot.lane.b32.xlu1 %v969_v12, %s4543_s30  ;;  %1169 = vrot.lane.b32.xlu0 %v968_v61, %s4543_s30  ;;  %v972_v12 = vmul.f32 %v5124_v27, %v4857_v44  ;;  %v977_v44 = vmul.f32 %v5124_v27, %v4896_v16 }
 0x11b   : > { %v5349_v57 = vpop.permute.xlu1 %733  ;;  %v5351_v39 = vpop.permute.xlu0 %731 }
 0x11c   : > { %9896 = vst [vmem:[#allocation97_spill] sm:$0xff] %v5349_v57  ;;  %9897 = vst [vmem:[#allocation98_spill] sm:$0xff] %v5351_v39  ;;  %v5645_v57 = vld [vmem:[%s4604_s27 + $0x81] sm:$0xff] }
 0x11d   : > { %1175 = vrot.lane.b32.xlu1 %v971_v20, %s4543_s30  ;;  %1173 = vrot.lane.b32.xlu0 %v970_v5, %s4543_s30  ;;  %v974_v20 = vmul.f32 %v5124_v27, %v4869_v52  ;;  %v979_v52 = vmul.f32 %v5124_v27, %v4908_v32 }
 0x11f   : > { %v5359_v61 = vpop.permute.xlu1 %737  ;;  %v5361_v47 = vpop.permute.xlu0 %735 }
 0x120   : > { %9898 = vst [vmem:[#allocation99_spill] sm:$0xff] %v5359_v61  ;;  %9899 = vst [vmem:[#allocation100_spill] sm:$0xff] %v5361_v47  ;;  %v5629_v61 = vld [vmem:[%s4604_s27 + $0x69] sm:$0xff] }
 0x121   : > { %1179 = vrot.lane.b32.xlu1 %v973_v28, %s4543_s30  ;;  %1177 = vrot.lane.b32.xlu0 %v972_v12, %s4543_s30  ;;  %v976_v28 = vmul.f32 %v5124_v27, %v4881_v60  ;;  %v9906_v60 = vld [vmem:[#allocation8_spill] sm:$0xff] }
 0x123   : > { %v5369_v5 = vpop.permute.xlu1 %741  ;;  %v5371_v55 = vpop.permute.xlu0 %739 }
 0x124   : > { %9900 = vst [vmem:[#allocation101_spill] sm:$0xff] %v5369_v5  ;;  %9901 = vst [vmem:[#allocation102_spill] sm:$0xff] %v5371_v55  ;;  %v5613_v5 = vld [vmem:[%s4604_s27 + $0x51] sm:$0xff] }
 0x125   : > { %1183 = vrot.lane.b32.xlu1 %v975_v36, %s4543_s30  ;;  %1181 = vrot.lane.b32.xlu0 %v974_v20, %s4543_s30  ;;  %v978_v36 = vmul.f32 %v5124_v27, %v4893_v11  ;;  %v9910_v11 = vld [vmem:[#allocation10_spill] sm:$0xff] }
 0x127   : > { %v5379_v12 = vpop.permute.xlu1 %745  ;;  %v5381_v63 = vpop.permute.xlu0 %743 }
 0x128   : > { %9902 = vst [vmem:[#allocation103_spill] sm:$0xff] %v5379_v12  ;;  %9903 = vst [vmem:[#allocation104_spill] sm:$0xff] %v5381_v63  ;;  %v981_v63 = vmul.f32 %v5124_v27, %v9906_v60 }
 0x129   : > { %1187 = vrot.lane.b32.xlu1 %v977_v44, %s4543_s30  ;;  %1185 = vrot.lane.b32.xlu0 %v976_v28, %s4543_s30  ;;  %v9907_v44 = vld [vmem:[#allocation6_spill] sm:$0xff] }
 0x12a   : > { %v980_v28 = vmul.f32 %v5124_v27, %v9907_v44  ;;  %v9914_v44 = vld [vmem:[#allocation12_spill] sm:$0xff] }
 0x12b   : > { %v5389_v20 = vpop.permute.xlu1 %749  ;;  %v5391_v16 = vpop.permute.xlu0 %747 }
 0x12c   : > { %9904 = vst [vmem:[#allocation105_spill] sm:$0xff] %v5389_v20  ;;  %9905 = vst [vmem:[#allocation106_spill] sm:$0xff] %v5391_v16  ;;  %v983_v16 = vmul.f32 %v5124_v27, %v9910_v11 }
 0x12d   : > { %1191 = vrot.lane.b32.xlu1 %v979_v52, %s4543_s30  ;;  %1189 = vrot.lane.b32.xlu0 %v978_v36, %s4543_s30  ;;  %v9911_v52 = vld [vmem:[#allocation7_spill] sm:$0xff] }
 0x12e   : > { %v982_v36 = vmul.f32 %v5124_v27, %v9911_v52  ;;  %v9918_v52 = vld [vmem:[#allocation14_spill] sm:$0xff] }
 0x12f   : > { %v5399_v12 = vpop.permute.xlu1 %753  ;;  %v5401_v32 = vpop.permute.xlu0 %751 }
 0x130   : > { %9908 = vst [vmem:[#allocation8_spill] sm:$0xff] %v5399_v12  ;;  %9909 = vst [vmem:[#allocation6_spill] sm:$0xff] %v5401_v32  ;;  %v985_v32 = vmul.f32 %v5124_v27, %v9914_v44 }
 0x131   : > { %1195 = vrot.lane.b32.xlu1 %v981_v63, %s4543_s30  ;;  %1193 = vrot.lane.b32.xlu0 %v980_v28, %s4543_s30  ;;  %v9915_v63 = vld [vmem:[#allocation9_spill] sm:$0xff] }
 0x132   : > { %v984_v28 = vmul.f32 %v5124_v27, %v9915_v63  ;;  %v9922_v63 = vld [vmem:[#allocation16_spill] sm:$0xff] }
 0x133   : > { %v5409_v20 = vpop.permute.xlu1 %757  ;;  %v5411_v60 = vpop.permute.xlu0 %755 }
 0x134   : > { %9912 = vst [vmem:[#allocation10_spill] sm:$0xff] %v5409_v20  ;;  %9913 = vst [vmem:[#allocation7_spill] sm:$0xff] %v5411_v60  ;;  %v987_v60 = vmul.f32 %v5124_v27, %v9918_v52 }
 0x135   : > { %1199 = vrot.lane.b32.xlu1 %v983_v16, %s4543_s30  ;;  %1197 = vrot.lane.b32.xlu0 %v982_v36, %s4543_s30  ;;  %v9919_v16 = vld [vmem:[#allocation11_spill] sm:$0xff] }
 0x136   : > { %v986_v36 = vmul.f32 %v5124_v27, %v9919_v16  ;;  %v9926_v16 = vld [vmem:[#allocation20_spill] sm:$0xff] }
 0x137   : > { %v5419_v12 = vpop.permute.xlu1 %761  ;;  %v5421_v11 = vpop.permute.xlu0 %759 }
 0x138   : > { %9916 = vst [vmem:[#allocation12_spill] sm:$0xff] %v5419_v12  ;;  %9917 = vst [vmem:[#allocation9_spill] sm:$0xff] %v5421_v11  ;;  %v989_v11 = vmul.f32 %v5124_v27, %v9922_v63 }
 0x139   : > { %1203 = vrot.lane.b32.xlu1 %v985_v32, %s4543_s30  ;;  %1201 = vrot.lane.b32.xlu0 %v984_v28, %s4543_s30  ;;  %v9923_v32 = vld [vmem:[#allocation13_spill] sm:$0xff] }
 0x13a   : > { %v988_v28 = vmul.f32 %v5124_v27, %v9923_v32  ;;  %v9930_v32 = vld [vmem:[#allocation24_spill] sm:$0xff] }
 0x13b   : > { %v5429_v20 = vpop.permute.xlu1 %1091  ;;  %v5431_v44 = vpop.permute.xlu0 %763 }
 0x13c   : > { %9920 = vst [vmem:[#allocation14_spill] sm:$0xff] %v5429_v20  ;;  %9921 = vst [vmem:[#allocation11_spill] sm:$0xff] %v5431_v44  ;;  %v991_v44 = vmul.f32 %v5124_v27, %v9926_v16 }
 0x13d   : > { %1207 = vrot.lane.b32.xlu1 %v987_v60, %s4543_s30  ;;  %1205 = vrot.lane.b32.xlu0 %v986_v36, %s4543_s30  ;;  %v9927_v60 = vld [vmem:[#allocation15_spill] sm:$0xff] }
 0x13e   : > { %v990_v36 = vmul.f32 %v5124_v27, %v9927_v60  ;;  %v9934_v60 = vld [vmem:[#allocation28_spill] sm:$0xff] }
 0x13f   : > { %v5439_v12 = vpop.permute.xlu1 %1095  ;;  %v5441_v52 = vpop.permute.xlu0 %1093 }
 0x140   : > { %9924 = vst [vmem:[#allocation16_spill] sm:$0xff] %v5439_v12  ;;  %9925 = vst [vmem:[#allocation13_spill] sm:$0xff] %v5441_v52  ;;  %v993_v52 = vmul.f32 %v5124_v27, %v9930_v32 }
 0x141   : > { %1211 = vrot.lane.b32.xlu1 %v989_v11, %s4543_s30  ;;  %1209 = vrot.lane.b32.xlu0 %v988_v28, %s4543_s30  ;;  %v9931_v11 = vld [vmem:[#allocation19_spill] sm:$0xff] }
 0x142   : > { %v992_v28 = vmul.f32 %v5124_v27, %v9931_v11  ;;  %v9938_v11 = vld [vmem:[#allocation32_spill] sm:$0xff] }
 0x143   : > { %v5449_v20 = vpop.permute.xlu1 %1099  ;;  %v5451_v63 = vpop.permute.xlu0 %1097 }
 0x144   : > { %9928 = vst [vmem:[#allocation20_spill] sm:$0xff] %v5449_v20  ;;  %9929 = vst [vmem:[#allocation15_spill] sm:$0xff] %v5451_v63  ;;  %v995_v20 = vmul.f32 %v5124_v27, %v9934_v60 }
 0x145   : > { %1215 = vrot.lane.b32.xlu1 %v991_v44, %s4543_s30  ;;  %1213 = vrot.lane.b32.xlu0 %v990_v36, %s4543_s30  ;;  %v9935_v44 = vld [vmem:[#allocation23_spill] sm:$0xff] }
 0x146   : > { %v994_v36 = vmul.f32 %v5124_v27, %v9935_v44  ;;  %v9942_v44 = vld [vmem:[#allocation36_spill] sm:$0xff] }
 0x147   : > { %v5459_v12 = vpop.permute.xlu1 %1103  ;;  %v5461_v16 = vpop.permute.xlu0 %1101 }
 0x148   : > { %9932 = vst [vmem:[#allocation24_spill] sm:$0xff] %v5459_v12  ;;  %9933 = vst [vmem:[#allocation19_spill] sm:$0xff] %v5461_v16  ;;  %v997_v12 = vmul.f32 %v5124_v27, %v9938_v11 }
 0x149   : > { %1219 = vrot.lane.b32.xlu1 %v993_v52, %s4543_s30  ;;  %1217 = vrot.lane.b32.xlu0 %v992_v28, %s4543_s30  ;;  %v9939_v52 = vld [vmem:[#allocation27_spill] sm:$0xff] }
 0x14a   : > { %v996_v28 = vmul.f32 %v5124_v27, %v9939_v52  ;;  %v9946_v52 = vld [vmem:[#allocation40_spill] sm:$0xff] }
 0x14b   : > { %v5469_v63 = vpop.permute.xlu1 %1107  ;;  %v5471_v32 = vpop.permute.xlu0 %1105 }
 0x14c   : > { %9936 = vst [vmem:[#allocation28_spill] sm:$0xff] %v5469_v63  ;;  %9937 = vst [vmem:[#allocation23_spill] sm:$0xff] %v5471_v32  ;;  %v999_v32 = vmul.f32 %v5124_v27, %v9942_v44 }
 0x14d   : > { %1223 = vrot.lane.b32.xlu1 %v995_v20, %s4543_s30  ;;  %1221 = vrot.lane.b32.xlu0 %v994_v36, %s4543_s30  ;;  %v9943_v20 = vld [vmem:[#allocation31_spill] sm:$0xff] }
 0x14e   : > { %v998_v36 = vmul.f32 %v5124_v27, %v9943_v20  ;;  %v9950_v20 = vld [vmem:[#allocation44_spill] sm:$0xff] }
 0x14f   : > { %v5479_v16 = vpop.permute.xlu1 %1111  ;;  %v5481_v60 = vpop.permute.xlu0 %1109 }
 0x150   : > { %9940 = vst [vmem:[#allocation32_spill] sm:$0xff] %v5479_v16  ;;  %9941 = vst [vmem:[#allocation27_spill] sm:$0xff] %v5481_v60  ;;  %v1001_v60 = vmul.f32 %v5124_v27, %v9946_v52 }
 0x151   : > { %1227 = vrot.lane.b32.xlu1 %v997_v12, %s4543_s30  ;;  %1225 = vrot.lane.b32.xlu0 %v996_v28, %s4543_s30  ;;  %v9947_v12 = vld [vmem:[#allocation35_spill] sm:$0xff] }
 0x152   : > { %v1000_v28 = vmul.f32 %v5124_v27, %v9947_v12  ;;  %v9954_v12 = vld [vmem:[#allocation48_spill] sm:$0xff] }
 0x153   : > { %v5489_v63 = vpop.permute.xlu1 %1115  ;;  %v5491_v11 = vpop.permute.xlu0 %1113 }
 0x154   : > { %9944 = vst [vmem:[#allocation36_spill] sm:$0xff] %v5489_v63  ;;  %9945 = vst [vmem:[#allocation31_spill] sm:$0xff] %v5491_v11  ;;  %v1003_v11 = vmul.f32 %v5124_v27, %v9950_v20 }
 0x155   : > { %1231 = vrot.lane.b32.xlu1 %v999_v32, %s4543_s30  ;;  %1229 = vrot.lane.b32.xlu0 %v998_v36, %s4543_s30  ;;  %v9951_v32 = vld [vmem:[#allocation39_spill] sm:$0xff] }
 0x156   : > { %v1002_v36 = vmul.f32 %v5124_v27, %v9951_v32 }
 0x157   : > { %v5499_v16 = vpop.permute.xlu1 %1119  ;;  %v5501_v44 = vpop.permute.xlu0 %1117 }
 0x158   : > { %9948 = vst [vmem:[#allocation40_spill] sm:$0xff] %v5499_v16  ;;  %9949 = vst [vmem:[#allocation35_spill] sm:$0xff] %v5501_v44  ;;  %v1005_v44 = vmul.f32 %v5124_v27, %v9954_v12  ;;  %v5597_v16 = vld [vmem:[%s4604_s27 + $0x41] sm:$0xff] }
 0x159   : > { %1235 = vrot.lane.b32.xlu1 %v1001_v60, %s4543_s30  ;;  %1233 = vrot.lane.b32.xlu0 %v1000_v28, %s4543_s30  ;;  %v9955_v60 = vld [vmem:[#allocation43_spill] sm:$0xff] }
 0x15a   : > { %v1004_v28 = vmul.f32 %v5124_v27, %v9955_v60 }
 0x15b   : > { %v5509_v63 = vpop.permute.xlu1 %1123  ;;  %v5511_v52 = vpop.permute.xlu0 %1121 }
 0x15c   : > { %9952 = vst [vmem:[#allocation44_spill] sm:$0xff] %v5509_v63  ;;  %9953 = vst [vmem:[#allocation39_spill] sm:$0xff] %v5511_v52 }
 0x15d   : > { %1239 = vrot.lane.b32.xlu1 %v1003_v11, %s4543_s30  ;;  %1237 = vrot.lane.b32.xlu0 %v1002_v36, %s4543_s30  ;;  %v1007_v11 = vmul.f32 %v5124_v27, %v5112_v24  ;;  %v9958_v36 = vld [vmem:[#allocation47_spill] sm:$0xff]  ;;  %v5539_v24 = vstv %s4186_s4 }
 0x15e   : > { %v1006_v12 = vmul.f32 %v5124_v27, %v9958_v36 }
 0x15f   : > { %v5519_v20 = vpop.permute.xlu1 %1127  ;;  %v5521_v32 = vpop.permute.xlu0 %1125 }
 0x160   : > { %9956 = vst [vmem:[#allocation48_spill] sm:$0xff] %v5519_v20  ;;  %9957 = vst [vmem:[#allocation43_spill] sm:$0xff] %v5521_v32  ;;  %v5581_v20 = vld [vmem:[%s4604_s27 + $0x29] sm:$0xff] }
 0x161   : > { %1243 = vrot.lane.b32.xlu1 %v1005_v44, %s4543_s30  ;;  %1241 = vrot.lane.b32.xlu0 %v1004_v28, %s4543_s30  ;;  %v1009_v44 = vmul.f32 %v5124_v27, %v5127_v35  ;;  %v1008_v28 = vmul.f32 %v5124_v27, %v5109_v4 }
 0x163   : > { %v5529_v63 = vpop.permute.xlu1 %1131  ;;  %v5531_v60 = vpop.permute.xlu0 %1129 }
 0x164   : > { %9959 = vst [vmem:[#allocation47_spill] sm:$0xff] %v5529_v63  ;;  %9960 = vst [vmem:[#allocation107_spill] sm:$0xff] %v5531_v60  ;;  %v5546_v63 = vld [vmem:[%s4604_s27 + $0x9] sm:$0xff]  ;;  %v5549_v60 = vld [vmem:[%s4604_s27 + $0x1] sm:$0xff] }
 0x165   : > { %1247 = vrot.lane.b32.xlu1 %v1007_v11, %s4543_s30  ;;  %1245 = vrot.lane.b32.xlu0 %v1006_v12, %s4543_s30  ;;  %v1663_v35 = vmul.f32 %v5539_v24, %v5546_v63  ;;  %v1662_v27 = vmul.f32 %v5539_v24, %v5549_v60  ;;  %v5562_v12 = vld [vmem:[%s4604_s27 + $0x21] sm:$0xff] }
 0x167   : > { %v5541_v32 = vpop.permute.xlu1 %1135  ;;  %v5543_v36 = vpop.permute.xlu0 %1133 }
 0x168   : > { %9961 = vst [vmem:[#allocation108_spill] sm:$0xff] %v5541_v32  ;;  %9962 = vst [vmem:[#allocation109_spill] sm:$0xff] %v5543_v36  ;;  %v5565_v36 = vld [vmem:[%s4604_s27 + $0x11] sm:$0xff] }
 0x169   : > { %1251 = vrot.lane.b32.xlu1 %v1009_v44, %s4543_s30  ;;  %1249 = vrot.lane.b32.xlu0 %v1008_v28, %s4543_s30  ;;  %v1665_v44 = vmul.f32 %v5539_v24, %v5562_v12  ;;  %v1664_v28 = vmul.f32 %v5539_v24, %v5565_v36 }
 0x16b   : > { %v5557_v4 = vpop.permute.xlu1 %1139  ;;  %v5559_v11 = vpop.permute.xlu0 %1137 }
 0x16c   : > { %9963 = vst [vmem:[#allocation110_spill] sm:$0xff] %v5557_v4  ;;  %9964 = vst [vmem:[#allocation111_spill] sm:$0xff] %v5559_v11  ;;  %v5578_v11 = vld [vmem:[%s4604_s27 + $0x31] sm:$0xff] }
 0x16d   : > { %1826 = vrot.lane.b32.xlu1 %v1663_v35, %s4542_s28  ;;  %1824 = vrot.lane.b32.xlu0 %v1662_v27, %s4542_s28  ;;  %v1667_v35 = vmul.f32 %v5539_v24, %v5578_v11  ;;  %v1666_v27 = vmul.f32 %v5539_v24, %v5581_v20 }
 0x16f   : > { %v5573_v32 = vpop.permute.xlu1 %1143  ;;  %v5575_v4 = vpop.permute.xlu0 %1141 }
 0x170   : > { %9965 = vst [vmem:[#allocation112_spill] sm:$0xff] %v5573_v32  ;;  %9966 = vst [vmem:[#allocation113_spill] sm:$0xff] %v5575_v4  ;;  %v5594_v4 = vld [vmem:[%s4604_s27 + $0x49] sm:$0xff] }
 0x171   : > { %1830 = vrot.lane.b32.xlu1 %v1665_v44, %s4542_s28  ;;  %1828 = vrot.lane.b32.xlu0 %v1664_v28, %s4542_s28  ;;  %v1669_v44 = vmul.f32 %v5539_v24, %v5594_v4  ;;  %v1668_v28 = vmul.f32 %v5539_v24, %v5597_v16 }
 0x173   : > { %v5589_v52 = vpop.permute.xlu1 %1147  ;;  %v5591_v32 = vpop.permute.xlu0 %1145 }
 0x174   : > { %9967 = vst [vmem:[#allocation114_spill] sm:$0xff] %v5589_v52  ;;  %9968 = vst [vmem:[#allocation115_spill] sm:$0xff] %v5591_v32  ;;  %v5610_v32 = vld [vmem:[%s4604_s27 + $0x61] sm:$0xff] }
 0x175   : > { %1834 = vrot.lane.b32.xlu1 %v1667_v35, %s4542_s28  ;;  %1832 = vrot.lane.b32.xlu0 %v1666_v27, %s4542_s28  ;;  %v1671_v35 = vmul.f32 %v5539_v24, %v5610_v32  ;;  %v1670_v27 = vmul.f32 %v5539_v24, %v5613_v5 }
 0x177   : > { %v5605_v55 = vpop.permute.xlu1 %1151  ;;  %v5607_v52 = vpop.permute.xlu0 %1149 }
 0x178   : > { %9969 = vst [vmem:[#allocation116_spill] sm:$0xff] %v5605_v55  ;;  %9970 = vst [vmem:[#allocation117_spill] sm:$0xff] %v5607_v52  ;;  %v5626_v52 = vld [vmem:[%s4604_s27 + $0x71] sm:$0xff] }
 0x179   : > { %1838 = vrot.lane.b32.xlu1 %v1669_v44, %s4542_s28  ;;  %1836 = vrot.lane.b32.xlu0 %v1668_v28, %s4542_s28  ;;  %v1673_v44 = vmul.f32 %v5539_v24, %v5626_v52  ;;  %v1672_v28 = vmul.f32 %v5539_v24, %v5629_v61 }
 0x17b   : > { %v5621_v47 = vpop.permute.xlu1 %1155  ;;  %v5623_v55 = vpop.permute.xlu0 %1153 }
 0x17c   : > { %9971 = vst [vmem:[#allocation118_spill] sm:$0xff] %v5621_v47  ;;  %9972 = vst [vmem:[#allocation119_spill] sm:$0xff] %v5623_v55  ;;  %v5642_v55 = vld [vmem:[%s4604_s27 + $0x89] sm:$0xff] }
 0x17d   : > { %1842 = vrot.lane.b32.xlu1 %v1671_v35, %s4542_s28  ;;  %1840 = vrot.lane.b32.xlu0 %v1670_v27, %s4542_s28  ;;  %v1675_v35 = vmul.f32 %v5539_v24, %v5642_v55  ;;  %v1674_v27 = vmul.f32 %v5539_v24, %v5645_v57 }
 0x17f   : > { %v5637_v39 = vpop.permute.xlu1 %1159  ;;  %v5639_v47 = vpop.permute.xlu0 %1157 }
 0x180   : > { %9973 = vst [vmem:[#allocation120_spill] sm:$0xff] %v5637_v39  ;;  %9974 = vst [vmem:[#allocation121_spill] sm:$0xff] %v5639_v47  ;;  %v5658_v47 = vld [vmem:[%s4604_s27 + $0xa1] sm:$0xff] }
 0x181   : > { %1846 = vrot.lane.b32.xlu1 %v1673_v44, %s4542_s28  ;;  %1844 = vrot.lane.b32.xlu0 %v1672_v28, %s4542_s28  ;;  %v1677_v44 = vmul.f32 %v5539_v24, %v5658_v47  ;;  %v1676_v28 = vmul.f32 %v5539_v24, %v5661_v53 }
 0x183   : > { %v5653_v31 = vpop.permute.xlu1 %1163  ;;  %v5655_v39 = vpop.permute.xlu0 %1161 }
 0x184   : > { %9975 = vst [vmem:[#allocation122_spill] sm:$0xff] %v5653_v31  ;;  %9976 = vst [vmem:[#allocation123_spill] sm:$0xff] %v5655_v39  ;;  %v5674_v39 = vld [vmem:[%s4604_s27 + $0xb1] sm:$0xff] }
 0x185   : > { %1850 = vrot.lane.b32.xlu1 %v1675_v35, %s4542_s28  ;;  %1848 = vrot.lane.b32.xlu0 %v1674_v27, %s4542_s28  ;;  %v1679_v35 = vmul.f32 %v5539_v24, %v5674_v39  ;;  %v1678_v27 = vmul.f32 %v5539_v24, %v5677_v49 }
 0x187   : > { %v5669_v23 = vpop.permute.xlu1 %1167  ;;  %v5671_v31 = vpop.permute.xlu0 %1165 }
 0x188   : > { %9977 = vst [vmem:[#allocation124_spill] sm:$0xff] %v5669_v23  ;;  %9978 = vst [vmem:[#allocation125_spill] sm:$0xff] %v5671_v31  ;;  %v5690_v31 = vld [vmem:[%s4604_s27 + $0xc9] sm:$0xff] }
 0x189   : > { %1854 = vrot.lane.b32.xlu1 %v1677_v44, %s4542_s28  ;;  %1852 = vrot.lane.b32.xlu0 %v1676_v28, %s4542_s28  ;;  %v1681_v44 = vmul.f32 %v5539_v24, %v5690_v31  ;;  %v1680_v28 = vmul.f32 %v5539_v24, %v5693_v45 }
 0x18b   : > { %v5685_v15 = vpop.permute.xlu1 %1171  ;;  %v5687_v23 = vpop.permute.xlu0 %1169 }
 0x18c   : > { %9979 = vst [vmem:[#allocation126_spill] sm:$0xff] %v5685_v15  ;;  %9980 = vst [vmem:[#allocation127_spill] sm:$0xff] %v5687_v23  ;;  %v5706_v23 = vld [vmem:[%s4604_s27 + $0xe1] sm:$0xff] }
 0x18d   : > { %1858 = vrot.lane.b32.xlu1 %v1679_v35, %s4542_s28  ;;  %1856 = vrot.lane.b32.xlu0 %v1678_v27, %s4542_s28  ;;  %v1683_v35 = vmul.f32 %v5539_v24, %v5706_v23  ;;  %v1682_v27 = vmul.f32 %v5539_v24, %v5709_v41 }
 0x18f   : > { %v5701_v7 = vpop.permute.xlu1 %1175  ;;  %v5703_v15 = vpop.permute.xlu0 %1173 }
 0x190   : > { %9981 = vst [vmem:[#allocation128_spill] sm:$0xff] %v5701_v7  ;;  %9982 = vst [vmem:[#allocation129_spill] sm:$0xff] %v5703_v15  ;;  %v5722_v15 = vld [vmem:[%s4604_s27 + $0xf1] sm:$0xff] }
 0x191   : > { %1862 = vrot.lane.b32.xlu1 %v1681_v44, %s4542_s28  ;;  %1860 = vrot.lane.b32.xlu0 %v1680_v28, %s4542_s28  ;;  %v1685_v44 = vmul.f32 %v5539_v24, %v5722_v15  ;;  %v1684_v28 = vmul.f32 %v5539_v24, %v5725_v37 }
 0x193   : > { %v5717_v62 = vpop.permute.xlu1 %1179  ;;  %v5719_v7 = vpop.permute.xlu0 %1177 }
 0x194   : > { %9983 = vst [vmem:[#allocation130_spill] sm:$0xff] %v5717_v62  ;;  %9984 = vst [vmem:[#allocation131_spill] sm:$0xff] %v5719_v7  ;;  %v5738_v7 = vld [vmem:[%s4604_s27 + $0x109] sm:$0xff] }
 0x195   : > { %1866 = vrot.lane.b32.xlu1 %v1683_v35, %s4542_s28  ;;  %1864 = vrot.lane.b32.xlu0 %v1682_v27, %s4542_s28  ;;  %v1687_v35 = vmul.f32 %v5539_v24, %v5738_v7  ;;  %v1686_v27 = vmul.f32 %v5539_v24, %v5741_v33 }
 0x197   : > { %v5733_v58 = vpop.permute.xlu1 %1183  ;;  %v5735_v62 = vpop.permute.xlu0 %1181 }
 0x198   : > { %9985 = vst [vmem:[#allocation132_spill] sm:$0xff] %v5733_v58  ;;  %9986 = vst [vmem:[#allocation133_spill] sm:$0xff] %v5735_v62  ;;  %v5754_v62 = vld [vmem:[%s4604_s27 + $0x121] sm:$0xff] }
 0x199   : > { %1870 = vrot.lane.b32.xlu1 %v1685_v44, %s4542_s28  ;;  %1868 = vrot.lane.b32.xlu0 %v1684_v28, %s4542_s28  ;;  %v1689_v44 = vmul.f32 %v5539_v24, %v5754_v62  ;;  %v1688_v28 = vmul.f32 %v5539_v24, %v5757_v29 }
 0x19b   : > { %v5749_v54 = vpop.permute.xlu1 %1187  ;;  %v5751_v58 = vpop.permute.xlu0 %1185 }
 0x19c   : > { %9987 = vst [vmem:[#allocation134_spill] sm:$0xff] %v5749_v54  ;;  %9988 = vst [vmem:[#allocation135_spill] sm:$0xff] %v5751_v58  ;;  %v5770_v58 = vld [vmem:[%s4604_s27 + $0x131] sm:$0xff] }
 0x19d   : > { %1874 = vrot.lane.b32.xlu1 %v1687_v35, %s4542_s28  ;;  %1872 = vrot.lane.b32.xlu0 %v1686_v27, %s4542_s28  ;;  %v1691_v35 = vmul.f32 %v5539_v24, %v5770_v58  ;;  %v1690_v27 = vmul.f32 %v5539_v24, %v5773_v25 }
 0x19f   : > { %v5765_v50 = vpop.permute.xlu1 %1191  ;;  %v5767_v54 = vpop.permute.xlu0 %1189 }
 0x1a0   : > { %9989 = vst [vmem:[#allocation136_spill] sm:$0xff] %v5765_v50  ;;  %9990 = vst [vmem:[#allocation137_spill] sm:$0xff] %v5767_v54  ;;  %v5786_v54 = vld [vmem:[%s4604_s27 + $0x149] sm:$0xff] }
 0x1a1   : > { %1878 = vrot.lane.b32.xlu1 %v1689_v44, %s4542_s28  ;;  %1876 = vrot.lane.b32.xlu0 %v1688_v28, %s4542_s28  ;;  %v1693_v44 = vmul.f32 %v5539_v24, %v5786_v54  ;;  %v1692_v28 = vmul.f32 %v5539_v24, %v5789_v21 }
 0x1a3   : > { %v5781_v46 = vpop.permute.xlu1 %1195  ;;  %v5783_v50 = vpop.permute.xlu0 %1193 }
 0x1a4   : > { %9991 = vst [vmem:[#allocation138_spill] sm:$0xff] %v5781_v46  ;;  %9992 = vst [vmem:[#allocation139_spill] sm:$0xff] %v5783_v50  ;;  %v5802_v50 = vld [vmem:[%s4604_s27 + $0x161] sm:$0xff] }
 0x1a5   : > { %1882 = vrot.lane.b32.xlu1 %v1691_v35, %s4542_s28  ;;  %1880 = vrot.lane.b32.xlu0 %v1690_v27, %s4542_s28  ;;  %v1695_v35 = vmul.f32 %v5539_v24, %v5802_v50  ;;  %v1694_v27 = vmul.f32 %v5539_v24, %v5805_v17 }
 0x1a7   : > { %v5797_v42 = vpop.permute.xlu1 %1199  ;;  %v5799_v46 = vpop.permute.xlu0 %1197 }
 0x1a8   : > { %9993 = vst [vmem:[#allocation140_spill] sm:$0xff] %v5797_v42  ;;  %9994 = vst [vmem:[#allocation141_spill] sm:$0xff] %v5799_v46  ;;  %v5818_v46 = vld [vmem:[%s4604_s27 + $0x171] sm:$0xff] }
 0x1a9   : > { %1886 = vrot.lane.b32.xlu1 %v1693_v44, %s4542_s28  ;;  %1884 = vrot.lane.b32.xlu0 %v1692_v28, %s4542_s28  ;;  %v1697_v44 = vmul.f32 %v5539_v24, %v5818_v46  ;;  %v1696_v28 = vmul.f32 %v5539_v24, %v5821_v13 }
 0x1ab   : > { %v5813_v38 = vpop.permute.xlu1 %1203  ;;  %v5815_v42 = vpop.permute.xlu0 %1201 }
 0x1ac   : > { %9995 = vst [vmem:[#allocation142_spill] sm:$0xff] %v5813_v38  ;;  %9996 = vst [vmem:[#allocation143_spill] sm:$0xff] %v5815_v42  ;;  %v5834_v42 = vld [vmem:[%s4604_s27 + $0x189] sm:$0xff] }
 0x1ad   : > { %1890 = vrot.lane.b32.xlu1 %v1695_v35, %s4542_s28  ;;  %1888 = vrot.lane.b32.xlu0 %v1694_v27, %s4542_s28  ;;  %v1699_v35 = vmul.f32 %v5539_v24, %v5834_v42  ;;  %v1698_v27 = vmul.f32 %v5539_v24, %v5837_v9 }
 0x1af   : > { %v5829_v34 = vpop.permute.xlu1 %1207  ;;  %v5831_v38 = vpop.permute.xlu0 %1205 }
 0x1b0   : > { %9997 = vst [vmem:[#allocation144_spill] sm:$0xff] %v5829_v34  ;;  %9998 = vst [vmem:[#allocation145_spill] sm:$0xff] %v5831_v38  ;;  %v5850_v38 = vld [vmem:[%s4604_s27 + $0x1a1] sm:$0xff] }
 0x1b1   : > { %1894 = vrot.lane.b32.xlu1 %v1697_v44, %s4542_s28  ;;  %1892 = vrot.lane.b32.xlu0 %v1696_v28, %s4542_s28  ;;  %v1701_v44 = vmul.f32 %v5539_v24, %v5850_v38  ;;  %v1700_v28 = vmul.f32 %v5539_v24, %v5853_v3 }
 0x1b3   : > { %v5845_v30 = vpop.permute.xlu1 %1211  ;;  %v5847_v34 = vpop.permute.xlu0 %1209 }
 0x1b4   : > { %9999 = vst [vmem:[#allocation146_spill] sm:$0xff] %v5845_v30  ;;  %10000 = vst [vmem:[#allocation147_spill] sm:$0xff] %v5847_v34  ;;  %v5866_v34 = vld [vmem:[%s4604_s27 + $0x1b1] sm:$0xff] }
 0x1b5   : > { %1898 = vrot.lane.b32.xlu1 %v1699_v35, %s4542_s28  ;;  %1896 = vrot.lane.b32.xlu0 %v1698_v27, %s4542_s28  ;;  %v1703_v35 = vmul.f32 %v5539_v24, %v5866_v34  ;;  %v1702_v27 = vmul.f32 %v5539_v24, %v5869_v6 }
 0x1b7   : > { %v5861_v26 = vpop.permute.xlu1 %1215  ;;  %v5863_v30 = vpop.permute.xlu0 %1213 }
 0x1b8   : > { %10001 = vst [vmem:[#allocation148_spill] sm:$0xff] %v5861_v26  ;;  %10002 = vst [vmem:[#allocation149_spill] sm:$0xff] %v5863_v30  ;;  %v5882_v30 = vld [vmem:[%s4604_s27 + $0x1c9] sm:$0xff] }
 0x1b9   : > { %1902 = vrot.lane.b32.xlu1 %v1701_v44, %s4542_s28  ;;  %1900 = vrot.lane.b32.xlu0 %v1700_v28, %s4542_s28  ;;  %v1705_v44 = vmul.f32 %v5539_v24, %v5882_v30  ;;  %v1704_v28 = vmul.f32 %v5539_v24, %v5885_v0 }
 0x1bb   : > { %v5877_v22 = vpop.permute.xlu1 %1219  ;;  %v5879_v26 = vpop.permute.xlu0 %1217 }
 0x1bc   : > { %10003 = vst [vmem:[#allocation150_spill] sm:$0xff] %v5877_v22  ;;  %10004 = vst [vmem:[#allocation151_spill] sm:$0xff] %v5879_v26  ;;  %v5898_v26 = vld [vmem:[%s4604_s27 + $0x1e1] sm:$0xff] }
 0x1bd   : > { %1906 = vrot.lane.b32.xlu1 %v1703_v35, %s4542_s28  ;;  %1904 = vrot.lane.b32.xlu0 %v1702_v27, %s4542_s28  ;;  %v1707_v35 = vmul.f32 %v5539_v24, %v5898_v26  ;;  %v1706_v27 = vmul.f32 %v5539_v24, %v5901_v8 }
 0x1bf   : > { %v5893_v18 = vpop.permute.xlu1 %1223  ;;  %v5895_v22 = vpop.permute.xlu0 %1221 }
 0x1c0   : > { %10005 = vst [vmem:[#allocation152_spill] sm:$0xff] %v5893_v18  ;;  %10006 = vst [vmem:[#allocation153_spill] sm:$0xff] %v5895_v22  ;;  %v5914_v22 = vld [vmem:[%s4604_s27 + $0x1f1] sm:$0xff] }
 0x1c1   : > { %1910 = vrot.lane.b32.xlu1 %v1705_v44, %s4542_s28  ;;  %1908 = vrot.lane.b32.xlu0 %v1704_v28, %s4542_s28  ;;  %v1709_v44 = vmul.f32 %v5539_v24, %v5914_v22  ;;  %v1708_v28 = vmul.f32 %v5539_v24, %v5917_v40 }
 0x1c3   : > { %v5909_v14 = vpop.permute.xlu1 %1227  ;;  %v5911_v18 = vpop.permute.xlu0 %1225 }
 0x1c4   : > { %10007 = vst [vmem:[#allocation154_spill] sm:$0xff] %v5909_v14  ;;  %10008 = vst [vmem:[#allocation155_spill] sm:$0xff] %v5911_v18  ;;  %v5930_v18 = vld [vmem:[%s4604_s27 + $0x209] sm:$0xff] }
 0x1c5   : > { %1914 = vrot.lane.b32.xlu1 %v1707_v35, %s4542_s28  ;;  %1912 = vrot.lane.b32.xlu0 %v1706_v27, %s4542_s28  ;;  %v1711_v35 = vmul.f32 %v5539_v24, %v5930_v18  ;;  %v1710_v27 = vmul.f32 %v5539_v24, %v5933_v19 }
 0x1c7   : > { %v5925_v10 = vpop.permute.xlu1 %1231  ;;  %v5927_v14 = vpop.permute.xlu0 %1229 }
 0x1c8   : > { %10009 = vst [vmem:[#allocation156_spill] sm:$0xff] %v5925_v10  ;;  %10010 = vst [vmem:[#allocation157_spill] sm:$0xff] %v5927_v14  ;;  %v5946_v14 = vld [vmem:[%s4604_s27 + $0x221] sm:$0xff] }
 0x1c9   : > { %1918 = vrot.lane.b32.xlu1 %v1709_v44, %s4542_s28  ;;  %1916 = vrot.lane.b32.xlu0 %v1708_v28, %s4542_s28  ;;  %v1713_v44 = vmul.f32 %v5539_v24, %v5946_v14  ;;  %v1712_v28 = vmul.f32 %v5539_v24, %v5949_v51 }
 0x1cb   : > { %v5941_v1 = vpop.permute.xlu1 %1235  ;;  %v5943_v10 = vpop.permute.xlu0 %1233 }
 0x1cc   : > { %10011 = vst [vmem:[#allocation158_spill] sm:$0xff] %v5941_v1  ;;  %10012 = vst [vmem:[#allocation159_spill] sm:$0xff] %v5943_v10  ;;  %v5962_v10 = vld [vmem:[%s4604_s27 + $0x231] sm:$0xff] }
 0x1cd   : > { %1922 = vrot.lane.b32.xlu1 %v1711_v35, %s4542_s28  ;;  %1920 = vrot.lane.b32.xlu0 %v1710_v27, %s4542_s28  ;;  %10015 = vst [vmem:[#allocation162_spill] sm:$0xff] %v5962_v10  ;;  %v1715_v35 = vmul.f32 %v5539_v24, %v5962_v10  ;;  %v1714_v27 = vmul.f32 %v5539_v24, %v5965_v59  ;;  %v5997_v10 = vld [vmem:[%s4604_s27 + $0x251] sm:$0xff] }
 0x1ce   : > { %10023 = vst [vmem:[#allocation170_spill] sm:$0xff] %v5997_v10 }
 0x1cf   : > { %v5957_v2 = vpop.permute.xlu1 %1239  ;;  %v5959_v1 = vpop.permute.xlu0 %1237 }
 0x1d0   : > { %10013 = vst [vmem:[#allocation160_spill] sm:$0xff] %v5957_v2  ;;  %10014 = vst [vmem:[#allocation161_spill] sm:$0xff] %v5959_v1  ;;  %v5978_v1 = vld [vmem:[%s4604_s27 + $0x249] sm:$0xff] }
 0x1d1   : > { %1926 = vrot.lane.b32.xlu1 %v1713_v44, %s4542_s28  ;;  %1924 = vrot.lane.b32.xlu0 %v1712_v28, %s4542_s28  ;;  %10018 = vst [vmem:[#allocation165_spill] sm:$0xff] %v5978_v1  ;;  %v1717_v44 = vmul.f32 %v5539_v24, %v5978_v1  ;;  %v1716_v28 = vmul.f32 %v5539_v24, %v5981_v48  ;;  %v6013_v48 = vld [vmem:[%s4604_s27 + $0x269] sm:$0xff] }
 0x1d2   : > { %10027 = vst [vmem:[#allocation174_spill] sm:$0xff] %v6013_v48 }
 0x1d3   : > { %v5973_v43 = vpop.permute.xlu1 %1243  ;;  %v5975_v2 = vpop.permute.xlu0 %1241 }
 0x1d4   : > { %10016 = vst [vmem:[#allocation163_spill] sm:$0xff] %v5973_v43  ;;  %10017 = vst [vmem:[#allocation164_spill] sm:$0xff] %v5975_v2  ;;  %v5994_v2 = vld [vmem:[%s4604_s27 + $0x261] sm:$0xff] }
 0x1d5   : > { %1930 = vrot.lane.b32.xlu1 %v1715_v35, %s4542_s28  ;;  %1928 = vrot.lane.b32.xlu0 %v1714_v27, %s4542_s28  ;;  %10022 = vst [vmem:[#allocation169_spill] sm:$0xff] %v5994_v2  ;;  %v1719_v35 = vmul.f32 %v5539_v24, %v5994_v2  ;;  %v1718_v27 = vmul.f32 %v5539_v24, %v5997_v10  ;;  %v6029_v10 = vld [vmem:[%s4604_s27 + $0x281] sm:$0xff] }
 0x1d6   : > { %10031 = vst [vmem:[#allocation178_spill] sm:$0xff] %v6029_v10 }
 0x1d7   : > { %v5989_v56 = vpop.permute.xlu1 %1247  ;;  %v5991_v43 = vpop.permute.xlu0 %1245 }
 0x1d8   : > { %10020 = vst [vmem:[#allocation167_spill] sm:$0xff] %v5989_v56  ;;  %10021 = vst [vmem:[#allocation168_spill] sm:$0xff] %v5991_v43  ;;  %v6010_v43 = vld [vmem:[%s4604_s27 + $0x271] sm:$0xff] }
 0x1d9   : > { %1934 = vrot.lane.b32.xlu1 %v1717_v44, %s4542_s28  ;;  %1932 = vrot.lane.b32.xlu0 %v1716_v28, %s4542_s28  ;;  %10026 = vst [vmem:[#allocation173_spill] sm:$0xff] %v6010_v43  ;;  %v1721_v44 = vmul.f32 %v5539_v24, %v6010_v43  ;;  %v1720_v28 = vmul.f32 %v5539_v24, %v6013_v48  ;;  %v6045_v48 = vld [vmem:[%s4604_s27 + $0x291] sm:$0xff] }
 0x1da   : > { %10035 = vst [vmem:[#allocation182_spill] sm:$0xff] %v6045_v48 }
 0x1db   : > { %v6005_v1 = vpop.permute.xlu1 %1251  ;;  %v6007_v56 = vpop.permute.xlu0 %1249 }
 0x1dc   : > { %10024 = vst [vmem:[#allocation171_spill] sm:$0xff] %v6005_v1  ;;  %10025 = vst [vmem:[#allocation172_spill] sm:$0xff] %v6007_v56  ;;  %v6026_v56 = vld [vmem:[%s4604_s27 + $0x289] sm:$0xff] }
 0x1dd   : > { %1938 = vrot.lane.b32.xlu1 %v1719_v35, %s4542_s28  ;;  %1936 = vrot.lane.b32.xlu0 %v1718_v27, %s4542_s28  ;;  %10030 = vst [vmem:[#allocation177_spill] sm:$0xff] %v6026_v56  ;;  %v1723_v35 = vmul.f32 %v5539_v24, %v6026_v56  ;;  %v1722_v27 = vmul.f32 %v5539_v24, %v6029_v10  ;;  %v6061_v10 = vld [vmem:[%s4604_s27 + $0x2a9] sm:$0xff] }
 0x1de   : > { %10039 = vst [vmem:[#allocation186_spill] sm:$0xff] %v6061_v10 }
 0x1df   : > { %v6021_v2 = vpop.permute.xlu1 %1826  ;;  %v6023_v1 = vpop.permute.xlu0 %1824 }
 0x1e0   : > { %10028 = vst [vmem:[#allocation175_spill] sm:$0xff] %v6021_v2  ;;  %10029 = vst [vmem:[#allocation176_spill] sm:$0xff] %v6023_v1  ;;  %v6042_v1 = vld [vmem:[%s4604_s27 + $0x2a1] sm:$0xff] }
 0x1e1   : > { %1942 = vrot.lane.b32.xlu1 %v1721_v44, %s4542_s28  ;;  %1940 = vrot.lane.b32.xlu0 %v1720_v28, %s4542_s28  ;;  %10034 = vst [vmem:[#allocation181_spill] sm:$0xff] %v6042_v1  ;;  %v1725_v44 = vmul.f32 %v5539_v24, %v6042_v1  ;;  %v1724_v28 = vmul.f32 %v5539_v24, %v6045_v48  ;;  %v6077_v48 = vld [vmem:[%s4604_s27 + $0x2c1] sm:$0xff] }
 0x1e2   : > { %10043 = vst [vmem:[#allocation190_spill] sm:$0xff] %v6077_v48 }
 0x1e3   : > { %v6037_v43 = vpop.permute.xlu1 %1830  ;;  %v6039_v2 = vpop.permute.xlu0 %1828 }
 0x1e4   : > { %10032 = vst [vmem:[#allocation179_spill] sm:$0xff] %v6037_v43  ;;  %10033 = vst [vmem:[#allocation180_spill] sm:$0xff] %v6039_v2  ;;  %v6058_v2 = vld [vmem:[%s4604_s27 + $0x2b1] sm:$0xff] }
 0x1e5   : > { %1946 = vrot.lane.b32.xlu1 %v1723_v35, %s4542_s28  ;;  %1944 = vrot.lane.b32.xlu0 %v1722_v27, %s4542_s28  ;;  %10038 = vst [vmem:[#allocation185_spill] sm:$0xff] %v6058_v2  ;;  %v1727_v35 = vmul.f32 %v5539_v24, %v6058_v2  ;;  %v1726_v27 = vmul.f32 %v5539_v24, %v6061_v10  ;;  %v6093_v10 = vld [vmem:[%s4604_s27 + $0x2d1] sm:$0xff] }
 0x1e6   : > { %10047 = vst [vmem:[#allocation194_spill] sm:$0xff] %v6093_v10 }
 0x1e7   : > { %v6053_v56 = vpop.permute.xlu1 %1834  ;;  %v6055_v43 = vpop.permute.xlu0 %1832 }
 0x1e8   : > { %10036 = vst [vmem:[#allocation183_spill] sm:$0xff] %v6053_v56  ;;  %10037 = vst [vmem:[#allocation184_spill] sm:$0xff] %v6055_v43  ;;  %v6074_v43 = vld [vmem:[%s4604_s27 + $0x2c9] sm:$0xff] }
 0x1e9   : > { %1950 = vrot.lane.b32.xlu1 %v1725_v44, %s4542_s28  ;;  %1948 = vrot.lane.b32.xlu0 %v1724_v28, %s4542_s28  ;;  %10042 = vst [vmem:[#allocation189_spill] sm:$0xff] %v6074_v43  ;;  %v1729_v44 = vmul.f32 %v5539_v24, %v6074_v43  ;;  %v1728_v28 = vmul.f32 %v5539_v24, %v6077_v48  ;;  %v6109_v48 = vld [vmem:[%s4604_s27 + $0x2e9] sm:$0xff] }
 0x1ea   : > { %10051 = vst [vmem:[#allocation198_spill] sm:$0xff] %v6109_v48 }
 0x1eb   : > { %v6069_v1 = vpop.permute.xlu1 %1838  ;;  %v6071_v56 = vpop.permute.xlu0 %1836 }
 0x1ec   : > { %10040 = vst [vmem:[#allocation187_spill] sm:$0xff] %v6069_v1  ;;  %10041 = vst [vmem:[#allocation188_spill] sm:$0xff] %v6071_v56  ;;  %v6090_v56 = vld [vmem:[%s4604_s27 + $0x2e1] sm:$0xff] }
 0x1ed   : > { %1954 = vrot.lane.b32.xlu1 %v1727_v35, %s4542_s28  ;;  %1952 = vrot.lane.b32.xlu0 %v1726_v27, %s4542_s28  ;;  %10046 = vst [vmem:[#allocation193_spill] sm:$0xff] %v6090_v56  ;;  %v1731_v35 = vmul.f32 %v5539_v24, %v6090_v56  ;;  %v1730_v27 = vmul.f32 %v5539_v24, %v6093_v10  ;;  %v6125_v10 = vld [vmem:[%s4604_s27 + $0x301] sm:$0xff] }
 0x1ee   : > { %10055 = vst [vmem:[#allocation202_spill] sm:$0xff] %v6125_v10 }
 0x1ef   : > { %v6085_v2 = vpop.permute.xlu1 %1842  ;;  %v6087_v1 = vpop.permute.xlu0 %1840 }
 0x1f0   : > { %10044 = vst [vmem:[#allocation191_spill] sm:$0xff] %v6085_v2  ;;  %10045 = vst [vmem:[#allocation192_spill] sm:$0xff] %v6087_v1  ;;  %v6106_v1 = vld [vmem:[%s4604_s27 + $0x2f1] sm:$0xff] }
 0x1f1   : > { %1958 = vrot.lane.b32.xlu1 %v1729_v44, %s4542_s28  ;;  %1956 = vrot.lane.b32.xlu0 %v1728_v28, %s4542_s28  ;;  %10050 = vst [vmem:[#allocation197_spill] sm:$0xff] %v6106_v1  ;;  %v1733_v44 = vmul.f32 %v5539_v24, %v6106_v1  ;;  %v1732_v28 = vmul.f32 %v5539_v24, %v6109_v48  ;;  %v6141_v48 = vld [vmem:[%s4604_s27 + $0x311] sm:$0xff] }
 0x1f2   : > { %10059 = vst [vmem:[#allocation206_spill] sm:$0xff] %v6141_v48 }
 0x1f3   : > { %v6101_v43 = vpop.permute.xlu1 %1846  ;;  %v6103_v2 = vpop.permute.xlu0 %1844 }
 0x1f4   : > { %10048 = vst [vmem:[#allocation195_spill] sm:$0xff] %v6101_v43  ;;  %10049 = vst [vmem:[#allocation196_spill] sm:$0xff] %v6103_v2  ;;  %v6122_v2 = vld [vmem:[%s4604_s27 + $0x309] sm:$0xff] }
 0x1f5   : > { %1962 = vrot.lane.b32.xlu1 %v1731_v35, %s4542_s28  ;;  %1960 = vrot.lane.b32.xlu0 %v1730_v27, %s4542_s28  ;;  %10054 = vst [vmem:[#allocation201_spill] sm:$0xff] %v6122_v2  ;;  %v1735_v35 = vmul.f32 %v5539_v24, %v6122_v2  ;;  %v1734_v27 = vmul.f32 %v5539_v24, %v6125_v10  ;;  %v6154_v2 = vld [vmem:[%s4604_s27 + $0x331] sm:$0xff]  ;;  %v6157_v10 = vld [vmem:[%s4604_s27 + $0x329] sm:$0xff] }
 0x1f6   : > { %10062 = vst [vmem:[#allocation209_spill] sm:$0xff] %v6154_v2  ;;  %10063 = vst [vmem:[#allocation210_spill] sm:$0xff] %v6157_v10 }
 0x1f7   : > { %v6117_v56 = vpop.permute.xlu1 %1850  ;;  %v6119_v43 = vpop.permute.xlu0 %1848 }
 0x1f8   : > { %10052 = vst [vmem:[#allocation199_spill] sm:$0xff] %v6117_v56  ;;  %10053 = vst [vmem:[#allocation200_spill] sm:$0xff] %v6119_v43  ;;  %v6138_v43 = vld [vmem:[%s4604_s27 + $0x321] sm:$0xff] }
 0x1f9   : > { %1966 = vrot.lane.b32.xlu1 %v1733_v44, %s4542_s28  ;;  %1964 = vrot.lane.b32.xlu0 %v1732_v28, %s4542_s28  ;;  %10058 = vst [vmem:[#allocation205_spill] sm:$0xff] %v6138_v43  ;;  %v1737_v44 = vmul.f32 %v5539_v24, %v6138_v43  ;;  %v1736_v28 = vmul.f32 %v5539_v24, %v6141_v48  ;;  %v6173_v48 = vld [vmem:[%s4604_s27 + $0x341] sm:$0xff] }
 0x1fa   : > { %10067 = vst [vmem:[#allocation214_spill] sm:$0xff] %v6173_v48 }
 0x1fb   : > { %v6133_v1 = vpop.permute.xlu1 %1854  ;;  %v6135_v56 = vpop.permute.xlu0 %1852 }
 0x1fc   : > { %10056 = vst [vmem:[#allocation203_spill] sm:$0xff] %v6133_v1  ;;  %10057 = vst [vmem:[#allocation204_spill] sm:$0xff] %v6135_v56 }
 0x1fd   : > { %1970 = vrot.lane.b32.xlu1 %v1735_v35, %s4542_s28  ;;  %1968 = vrot.lane.b32.xlu0 %v1734_v27, %s4542_s28  ;;  %v1739_v35 = vmul.f32 %v5539_v24, %v6154_v2  ;;  %v1738_v27 = vmul.f32 %v5539_v24, %v6157_v10  ;;  %v6181_v2 = vstv %s4187_s5 }
 0x1ff   : > { %v6149_v1 = vpop.permute.xlu1 %1858  ;;  %v6151_v56 = vpop.permute.xlu0 %1856 }
 0x200   : > { %10060 = vst [vmem:[#allocation207_spill] sm:$0xff] %v6149_v1  ;;  %10061 = vst [vmem:[#allocation208_spill] sm:$0xff] %v6151_v56  ;;  %v6170_v56 = vld [vmem:[%s4604_s27 + $0x349] sm:$0xff] }
 0x201   : > { %1974 = vrot.lane.b32.xlu1 %v1737_v44, %s4542_s28  ;;  %1972 = vrot.lane.b32.xlu0 %v1736_v28, %s4542_s28  ;;  %10066 = vst [vmem:[#allocation213_spill] sm:$0xff] %v6170_v56  ;;  %v1741_v44 = vmul.f32 %v5539_v24, %v6170_v56  ;;  %v1740_v28 = vmul.f32 %v5539_v24, %v6173_v48 }
 0x203   : > { %v6165_v43 = vpop.permute.xlu1 %1862  ;;  %v6167_v1 = vpop.permute.xlu0 %1860 }
 0x204   : > { %10064 = vst [vmem:[#allocation211_spill] sm:$0xff] %v6165_v43  ;;  %10065 = vst [vmem:[#allocation212_spill] sm:$0xff] %v6167_v1  ;;  %v6188_v1 = vld [vmem:[%s4604_s27 + $0x351] sm:$0xff] }
 0x205   : > { %1978 = vrot.lane.b32.xlu1 %v1739_v35, %s4542_s28  ;;  %1976 = vrot.lane.b32.xlu0 %v1738_v27, %s4542_s28  ;;  %v2150_v35 = vmul.f32 %v6181_v2, %v5549_v60  ;;  %v1742_v27 = vmul.f32 %v5539_v24, %v6188_v1  ;;  %v2154_v24 = vmul.f32 %v6181_v2, %v5581_v20 }
 0x207   : > { %v6183_v10 = vpop.permute.xlu1 %1866  ;;  %v6185_v43 = vpop.permute.xlu0 %1864 }
 0x208   : > { %10068 = vst [vmem:[#allocation215_spill] sm:$0xff] %v6183_v10  ;;  %10069 = vst [vmem:[#allocation216_spill] sm:$0xff] %v6185_v43  ;;  %v2152_v43 = vmul.f32 %v6181_v2, %v5565_v36 }
 0x209   : > { %1982 = vrot.lane.b32.xlu1 %v1741_v44, %s4542_s28  ;;  %1980 = vrot.lane.b32.xlu0 %v1740_v28, %s4542_s28  ;;  %v2151_v44 = vmul.f32 %v6181_v2, %v5546_v63  ;;  %v2156_v63 = vmul.f32 %v6181_v2, %v5597_v16 }
 0x20b   : > { %v6196_v56 = vpop.permute.xlu1 %1870  ;;  %v6198_v48 = vpop.permute.xlu0 %1868 }
 0x20c   : > { %10070 = vst [vmem:[#allocation217_spill] sm:$0xff] %v6196_v56  ;;  %10071 = vst [vmem:[#allocation218_spill] sm:$0xff] %v6198_v48 }
 0x20d   : > { %2312 = vrot.lane.b32.xlu1 %v2150_v35, %s4543_s30  ;;  %1984 = vrot.lane.b32.xlu0 %v1742_v27, %s4542_s28  ;;  %v2153_v35 = vmul.f32 %v6181_v2, %v5562_v12  ;;  %v2158_v12 = vmul.f32 %v6181_v2, %v5613_v5 }
 0x20f   : > { %v6206_v28 = vpop.permute.xlu1 %1874  ;;  %v6208_v60 = vpop.permute.xlu0 %1872 }
 0x210   : > { %10072 = vst [vmem:[#allocation219_spill] sm:$0xff] %v6206_v28  ;;  %10073 = vst [vmem:[#allocation220_spill] sm:$0xff] %v6208_v60 }
 0x211   : > { %2316 = vrot.lane.b32.xlu1 %v2152_v43, %s4543_s30  ;;  %2314 = vrot.lane.b32.xlu0 %v2151_v44, %s4543_s30  ;;  %v2155_v43 = vmul.f32 %v6181_v2, %v5578_v11  ;;  %v2160_v11 = vmul.f32 %v6181_v2, %v5629_v61 }
 0x213   : > { %v6216_v27 = vpop.permute.xlu1 %1878  ;;  %v6218_v36 = vpop.permute.xlu0 %1876 }
 0x214   : > { %10074 = vst [vmem:[#allocation221_spill] sm:$0xff] %v6216_v27  ;;  %10075 = vst [vmem:[#allocation222_spill] sm:$0xff] %v6218_v36  ;;  %v4244_v36 = vld [vmem:[%s4604_s27 + $0x130] sm:$0xff] }
 0x215   : > { %2320 = vrot.lane.b32.xlu1 %v2154_v24, %s4543_s30  ;;  %2318 = vrot.lane.b32.xlu0 %v2153_v35, %s4543_s30  ;;  %v2157_v24 = vmul.f32 %v6181_v2, %v5594_v4  ;;  %v2162_v4 = vmul.f32 %v6181_v2, %v5645_v57 }
 0x217   : > { %v6226_v44 = vpop.permute.xlu1 %1882  ;;  %v6228_v20 = vpop.permute.xlu0 %1880 }
 0x218   : > { %10076 = vst [vmem:[#allocation223_spill] sm:$0xff] %v6226_v44  ;;  %10077 = vst [vmem:[#allocation224_spill] sm:$0xff] %v6228_v20  ;;  %v6748_v44 = vld [vmem:[%s4604_s27 + $0xc2] sm:$0xff] }
 0x219   : > { %2324 = vrot.lane.b32.xlu1 %v2156_v63, %s4543_s30  ;;  %2322 = vrot.lane.b32.xlu0 %v2155_v43, %s4543_s30  ;;  %v2159_v63 = vmul.f32 %v6181_v2, %v5610_v32  ;;  %v2164_v32 = vmul.f32 %v6181_v2, %v5661_v53  ;;  %10204 = vst [vmem:[#allocation297_spill] sm:$0xff] %v6748_v44 }
 0x21b   : > { %v6236_v35 = vpop.permute.xlu1 %1886  ;;  %v6238_v16 = vpop.permute.xlu0 %1884 }
 0x21c   : > { %10078 = vst [vmem:[#allocation225_spill] sm:$0xff] %v6236_v35  ;;  %10079 = vst [vmem:[#allocation226_spill] sm:$0xff] %v6238_v16  ;;  %v6718_v35 = vld [vmem:[%s4604_s27 + $0x92] sm:$0xff] }
 0x21d   : > { %2328 = vrot.lane.b32.xlu1 %v2158_v12, %s4543_s30  ;;  %2326 = vrot.lane.b32.xlu0 %v2157_v24, %s4543_s30  ;;  %v2161_v12 = vmul.f32 %v6181_v2, %v5626_v52  ;;  %v2166_v52 = vmul.f32 %v6181_v2, %v5677_v49  ;;  %10197 = vst [vmem:[#allocation290_spill] sm:$0xff] %v6718_v35 }
 0x21f   : > { %v6246_v43 = vpop.permute.xlu1 %1890  ;;  %v6248_v5 = vpop.permute.xlu0 %1888 }
 0x220   : > { %10080 = vst [vmem:[#allocation227_spill] sm:$0xff] %v6246_v43  ;;  %10081 = vst [vmem:[#allocation228_spill] sm:$0xff] %v6248_v5 }
 0x221   : > { %2332 = vrot.lane.b32.xlu1 %v2160_v11, %s4543_s30  ;;  %2330 = vrot.lane.b32.xlu0 %v2159_v63, %s4543_s30  ;;  %v2163_v11 = vmul.f32 %v6181_v2, %v5642_v55  ;;  %v2168_v55 = vmul.f32 %v6181_v2, %v5693_v45 }
 0x223   : > { %v6256_v24 = vpop.permute.xlu1 %1894  ;;  %v6258_v61 = vpop.permute.xlu0 %1892 }
 0x224   : > { %10082 = vst [vmem:[#allocation229_spill] sm:$0xff] %v6256_v24  ;;  %10083 = vst [vmem:[#allocation230_spill] sm:$0xff] %v6258_v61  ;;  %v6686_v24 = vld [vmem:[%s4604_s27 + $0x6a] sm:$0xff] }
 0x225   : > { %2336 = vrot.lane.b32.xlu1 %v2162_v4, %s4543_s30  ;;  %2334 = vrot.lane.b32.xlu0 %v2161_v12, %s4543_s30  ;;  %v2165_v4 = vmul.f32 %v6181_v2, %v5658_v47  ;;  %v2170_v47 = vmul.f32 %v6181_v2, %v5709_v41 }
 0x227   : > { %v6266_v63 = vpop.permute.xlu1 %1898  ;;  %v6268_v57 = vpop.permute.xlu0 %1896 }
 0x228   : > { %10084 = vst [vmem:[#allocation231_spill] sm:$0xff] %v6266_v63  ;;  %10085 = vst [vmem:[#allocation232_spill] sm:$0xff] %v6268_v57  ;;  %v6683_v57 = vld [vmem:[%s4604_s27 + $0x72] sm:$0xff] }
 0x229   : > { %2340 = vrot.lane.b32.xlu1 %v2164_v32, %s4543_s30  ;;  %2338 = vrot.lane.b32.xlu0 %v2163_v11, %s4543_s30  ;;  %v2167_v32 = vmul.f32 %v6181_v2, %v5674_v39  ;;  %v2172_v39 = vmul.f32 %v6181_v2, %v5725_v37  ;;  %10189 = vst [vmem:[#allocation282_spill] sm:$0xff] %v6683_v57 }
 0x22b   : > { %v6276_v12 = vpop.permute.xlu1 %1902  ;;  %v6278_v53 = vpop.permute.xlu0 %1900 }
 0x22c   : > { %10086 = vst [vmem:[#allocation233_spill] sm:$0xff] %v6276_v12  ;;  %10087 = vst [vmem:[#allocation234_spill] sm:$0xff] %v6278_v53  ;;  %v6670_v12 = vld [vmem:[%s4604_s27 + $0x52] sm:$0xff] }
 0x22d   : > { %2344 = vrot.lane.b32.xlu1 %v2166_v52, %s4543_s30  ;;  %2342 = vrot.lane.b32.xlu0 %v2165_v4, %s4543_s30  ;;  %v2169_v52 = vmul.f32 %v6181_v2, %v5690_v31  ;;  %v2174_v31 = vmul.f32 %v6181_v2, %v5741_v33 }
 0x22f   : > { %v6286_v11 = vpop.permute.xlu1 %1906  ;;  %v6288_v49 = vpop.permute.xlu0 %1904 }
 0x230   : > { %10088 = vst [vmem:[#allocation235_spill] sm:$0xff] %v6286_v11  ;;  %10089 = vst [vmem:[#allocation236_spill] sm:$0xff] %v6288_v49  ;;  %v6667_v49 = vld [vmem:[%s4604_s27 + $0x62] sm:$0xff] }
 0x231   : > { %2348 = vrot.lane.b32.xlu1 %v2168_v55, %s4543_s30  ;;  %2346 = vrot.lane.b32.xlu0 %v2167_v32, %s4543_s30  ;;  %v2171_v55 = vmul.f32 %v6181_v2, %v5706_v23  ;;  %v2176_v23 = vmul.f32 %v6181_v2, %v5757_v29 }
 0x233   : > { %v6296_v4 = vpop.permute.xlu1 %1910  ;;  %v6298_v45 = vpop.permute.xlu0 %1908 }
 0x234   : > { %10090 = vst [vmem:[#allocation237_spill] sm:$0xff] %v6296_v4  ;;  %10091 = vst [vmem:[#allocation238_spill] sm:$0xff] %v6298_v45  ;;  %v6654_v4 = vld [vmem:[%s4604_s27 + $0x42] sm:$0xff] }
 0x235   : > { %2352 = vrot.lane.b32.xlu1 %v2170_v47, %s4543_s30  ;;  %2350 = vrot.lane.b32.xlu0 %v2169_v52, %s4543_s30  ;;  %v2173_v47 = vmul.f32 %v6181_v2, %v5722_v15  ;;  %v2178_v15 = vmul.f32 %v6181_v2, %v5773_v25 }
 0x237   : > { %v6306_v32 = vpop.permute.xlu1 %1914  ;;  %v6308_v41 = vpop.permute.xlu0 %1912 }
 0x238   : > { %10092 = vst [vmem:[#allocation239_spill] sm:$0xff] %v6306_v32  ;;  %10093 = vst [vmem:[#allocation240_spill] sm:$0xff] %v6308_v41  ;;  %v6651_v41 = vld [vmem:[%s4604_s27 + $0x4a] sm:$0xff] }
 0x239   : > { %2356 = vrot.lane.b32.xlu1 %v2172_v39, %s4543_s30  ;;  %2354 = vrot.lane.b32.xlu0 %v2171_v55, %s4543_s30  ;;  %v2175_v39 = vmul.f32 %v6181_v2, %v5738_v7  ;;  %v2180_v7 = vmul.f32 %v6181_v2, %v5789_v21 }
 0x23b   : > { %v6316_v52 = vpop.permute.xlu1 %1918  ;;  %v6318_v37 = vpop.permute.xlu0 %1916 }
 0x23c   : > { %10094 = vst [vmem:[#allocation241_spill] sm:$0xff] %v6316_v52  ;;  %10095 = vst [vmem:[#allocation242_spill] sm:$0xff] %v6318_v37  ;;  %v6638_v52 = vld [vmem:[%s4604_s27 + $0x2a] sm:$0xff] }
 0x23d   : > { %2360 = vrot.lane.b32.xlu1 %v2174_v31, %s4543_s30  ;;  %2358 = vrot.lane.b32.xlu0 %v2173_v47, %s4543_s30  ;;  %v2177_v31 = vmul.f32 %v6181_v2, %v5754_v62  ;;  %v2182_v62 = vmul.f32 %v6181_v2, %v5805_v17 }
 0x23f   : > { %v6326_v55 = vpop.permute.xlu1 %1922  ;;  %v6328_v33 = vpop.permute.xlu0 %1920 }
 0x240   : > { %10096 = vst [vmem:[#allocation243_spill] sm:$0xff] %v6326_v55  ;;  %10097 = vst [vmem:[#allocation244_spill] sm:$0xff] %v6328_v33  ;;  %v6635_v33 = vld [vmem:[%s4604_s27 + $0x32] sm:$0xff] }
 0x241   : > { %2364 = vrot.lane.b32.xlu1 %v2176_v23, %s4543_s30  ;;  %2362 = vrot.lane.b32.xlu0 %v2175_v39, %s4543_s30  ;;  %v2179_v23 = vmul.f32 %v6181_v2, %v5770_v58  ;;  %v2184_v58 = vmul.f32 %v6181_v2, %v5821_v13 }
 0x243   : > { %v6336_v47 = vpop.permute.xlu1 %1926  ;;  %v6338_v29 = vpop.permute.xlu0 %1924 }
 0x244   : > { %10098 = vst [vmem:[#allocation245_spill] sm:$0xff] %v6336_v47  ;;  %10099 = vst [vmem:[#allocation246_spill] sm:$0xff] %v6338_v29  ;;  %v6622_v47 = vld [vmem:[%s4604_s27 + $0x12] sm:$0xff] }
 0x245   : > { %2368 = vrot.lane.b32.xlu1 %v2178_v15, %s4543_s30  ;;  %2366 = vrot.lane.b32.xlu0 %v2177_v31, %s4543_s30  ;;  %v2181_v15 = vmul.f32 %v6181_v2, %v5786_v54  ;;  %v2186_v54 = vmul.f32 %v6181_v2, %v5837_v9 }
 0x247   : > { %v6346_v39 = vpop.permute.xlu1 %1930  ;;  %v6348_v25 = vpop.permute.xlu0 %1928 }
 0x248   : > { %10100 = vst [vmem:[#allocation247_spill] sm:$0xff] %v6346_v39  ;;  %10101 = vst [vmem:[#allocation248_spill] sm:$0xff] %v6348_v25  ;;  %v6603_v39 = vld [vmem:[%s4604_s27 + $0xa] sm:$0xff]  ;;  %v6606_v25 = vld [vmem:[%s4604_s27 + $0x2] sm:$0xff] }
 0x249   : > { %2372 = vrot.lane.b32.xlu1 %v2180_v7, %s4543_s30  ;;  %2370 = vrot.lane.b32.xlu0 %v2179_v23, %s4543_s30  ;;  %v2183_v7 = vmul.f32 %v6181_v2, %v5802_v50  ;;  %v2188_v50 = vmul.f32 %v6181_v2, %v5853_v3 }
 0x24b   : > { %v6356_v31 = vpop.permute.xlu1 %1934  ;;  %v6358_v21 = vpop.permute.xlu0 %1932 }
 0x24c   : > { %10102 = vst [vmem:[#allocation249_spill] sm:$0xff] %v6356_v31  ;;  %10103 = vst [vmem:[#allocation250_spill] sm:$0xff] %v6358_v21 }
 0x24d   : > { %2376 = vrot.lane.b32.xlu1 %v2182_v62, %s4543_s30  ;;  %2374 = vrot.lane.b32.xlu0 %v2181_v15, %s4543_s30  ;;  %v2185_v62 = vmul.f32 %v6181_v2, %v5818_v46  ;;  %v2190_v46 = vmul.f32 %v6181_v2, %v5869_v6 }
 0x24f   : > { %v6366_v23 = vpop.permute.xlu1 %1938  ;;  %v6368_v17 = vpop.permute.xlu0 %1936 }
 0x250   : > { %10104 = vst [vmem:[#allocation251_spill] sm:$0xff] %v6366_v23  ;;  %10105 = vst [vmem:[#allocation252_spill] sm:$0xff] %v6368_v17  ;;  %v10173_v23 = vld [vmem:[#allocation209_spill] sm:$0xff] }
 0x251   : > { %2380 = vrot.lane.b32.xlu1 %v2184_v58, %s4543_s30  ;;  %2378 = vrot.lane.b32.xlu0 %v2183_v7, %s4543_s30  ;;  %v2187_v58 = vmul.f32 %v6181_v2, %v5834_v42  ;;  %v2192_v42 = vmul.f32 %v6181_v2, %v5885_v0 }
 0x253   : > { %v6376_v15 = vpop.permute.xlu1 %1942  ;;  %v6378_v13 = vpop.permute.xlu0 %1940 }
 0x254   : > { %10106 = vst [vmem:[#allocation253_spill] sm:$0xff] %v6376_v15  ;;  %10107 = vst [vmem:[#allocation254_spill] sm:$0xff] %v6378_v13 }
 0x255   : > { %2384 = vrot.lane.b32.xlu1 %v2186_v54, %s4543_s30  ;;  %2382 = vrot.lane.b32.xlu0 %v2185_v62, %s4543_s30  ;;  %v2189_v54 = vmul.f32 %v6181_v2, %v5850_v38  ;;  %v2194_v38 = vmul.f32 %v6181_v2, %v5901_v8 }
 0x257   : > { %v6386_v7 = vpop.permute.xlu1 %1946  ;;  %v6388_v9 = vpop.permute.xlu0 %1944 }
 0x258   : > { %10108 = vst [vmem:[#allocation255_spill] sm:$0xff] %v6386_v7  ;;  %10109 = vst [vmem:[#allocation256_spill] sm:$0xff] %v6388_v9 }
 0x259   : > { %2388 = vrot.lane.b32.xlu1 %v2188_v50, %s4543_s30  ;;  %2386 = vrot.lane.b32.xlu0 %v2187_v58, %s4543_s30  ;;  %v2191_v50 = vmul.f32 %v6181_v2, %v5866_v34  ;;  %v2196_v34 = vmul.f32 %v6181_v2, %v5917_v40 }
 0x25b   : > { %v6396_v62 = vpop.permute.xlu1 %1950  ;;  %v6398_v3 = vpop.permute.xlu0 %1948 }
 0x25c   : > { %10110 = vst [vmem:[#allocation257_spill] sm:$0xff] %v6396_v62  ;;  %10111 = vst [vmem:[#allocation258_spill] sm:$0xff] %v6398_v3 }
 0x25d   : > { %2392 = vrot.lane.b32.xlu1 %v2190_v46, %s4543_s30  ;;  %2390 = vrot.lane.b32.xlu0 %v2189_v54, %s4543_s30  ;;  %v2193_v46 = vmul.f32 %v6181_v2, %v5882_v30  ;;  %v2198_v30 = vmul.f32 %v6181_v2, %v5933_v19 }
 0x25f   : > { %v6406_v58 = vpop.permute.xlu1 %1954  ;;  %v6408_v6 = vpop.permute.xlu0 %1952 }
 0x260   : > { %10112 = vst [vmem:[#allocation259_spill] sm:$0xff] %v6406_v58  ;;  %10113 = vst [vmem:[#allocation260_spill] sm:$0xff] %v6408_v6 }
 0x261   : > { %2396 = vrot.lane.b32.xlu1 %v2192_v42, %s4543_s30  ;;  %2394 = vrot.lane.b32.xlu0 %v2191_v50, %s4543_s30  ;;  %v2195_v42 = vmul.f32 %v6181_v2, %v5898_v26  ;;  %v2200_v26 = vmul.f32 %v6181_v2, %v5949_v51 }
 0x263   : > { %v6416_v54 = vpop.permute.xlu1 %1958  ;;  %v6418_v0 = vpop.permute.xlu0 %1956 }
 0x264   : > { %10114 = vst [vmem:[#allocation261_spill] sm:$0xff] %v6416_v54  ;;  %10115 = vst [vmem:[#allocation262_spill] sm:$0xff] %v6418_v0 }
 0x265   : > { %2400 = vrot.lane.b32.xlu1 %v2194_v38, %s4543_s30  ;;  %2398 = vrot.lane.b32.xlu0 %v2193_v46, %s4543_s30  ;;  %v2197_v38 = vmul.f32 %v6181_v2, %v5914_v22  ;;  %v2202_v22 = vmul.f32 %v6181_v2, %v5965_v59 }
 0x267   : > { %v6426_v50 = vpop.permute.xlu1 %1962  ;;  %v6428_v8 = vpop.permute.xlu0 %1960 }
 0x268   : > { %10116 = vst [vmem:[#allocation263_spill] sm:$0xff] %v6426_v50  ;;  %10117 = vst [vmem:[#allocation264_spill] sm:$0xff] %v6428_v8 }
 0x269   : > { %2404 = vrot.lane.b32.xlu1 %v2196_v34, %s4543_s30  ;;  %2402 = vrot.lane.b32.xlu0 %v2195_v42, %s4543_s30  ;;  %v2199_v34 = vmul.f32 %v6181_v2, %v5930_v18  ;;  %v10124_v18 = vld [vmem:[#allocation166_spill] sm:$0xff] }
 0x26b   : > { %v6436_v46 = vpop.permute.xlu1 %1966  ;;  %v6438_v40 = vpop.permute.xlu0 %1964 }
 0x26c   : > { %10118 = vst [vmem:[#allocation265_spill] sm:$0xff] %v6436_v46  ;;  %10119 = vst [vmem:[#allocation266_spill] sm:$0xff] %v6438_v40 }
 0x26d   : > { %2408 = vrot.lane.b32.xlu1 %v2198_v30, %s4543_s30  ;;  %2406 = vrot.lane.b32.xlu0 %v2197_v38, %s4543_s30  ;;  %v2201_v30 = vmul.f32 %v6181_v2, %v5946_v14  ;;  %v10128_v14 = vld [vmem:[#allocation170_spill] sm:$0xff] }
 0x26f   : > { %v6446_v42 = vpop.permute.xlu1 %1970  ;;  %v6448_v19 = vpop.permute.xlu0 %1968 }
 0x270   : > { %10120 = vst [vmem:[#allocation267_spill] sm:$0xff] %v6446_v42  ;;  %10121 = vst [vmem:[#allocation268_spill] sm:$0xff] %v6448_v19  ;;  %v2204_v42 = vmul.f32 %v6181_v2, %v10124_v18 }
 0x271   : > { %2412 = vrot.lane.b32.xlu1 %v2200_v26, %s4543_s30  ;;  %2410 = vrot.lane.b32.xlu0 %v2199_v34, %s4543_s30  ;;  %v10125_v26 = vld [vmem:[#allocation162_spill] sm:$0xff] }
 0x272   : > { %v2203_v34 = vmul.f32 %v6181_v2, %v10125_v26  ;;  %v10132_v26 = vld [vmem:[#allocation174_spill] sm:$0xff] }
 0x273   : > { %v6456_v38 = vpop.permute.xlu1 %1974  ;;  %v6458_v51 = vpop.permute.xlu0 %1972 }
 0x274   : > { %10122 = vst [vmem:[#allocation269_spill] sm:$0xff] %v6456_v38  ;;  %10123 = vst [vmem:[#allocation270_spill] sm:$0xff] %v6458_v51  ;;  %v2206_v38 = vmul.f32 %v6181_v2, %v10128_v14 }
 0x275   : > { %2416 = vrot.lane.b32.xlu1 %v2202_v22, %s4543_s30  ;;  %2414 = vrot.lane.b32.xlu0 %v2201_v30, %s4543_s30  ;;  %v10129_v22 = vld [vmem:[#allocation165_spill] sm:$0xff] }
 0x276   : > { %v2205_v30 = vmul.f32 %v6181_v2, %v10129_v22  ;;  %v10136_v22 = vld [vmem:[#allocation178_spill] sm:$0xff] }
 0x277   : > { %v6466_v19 = vpop.permute.xlu1 %1978  ;;  %v6468_v59 = vpop.permute.xlu0 %1976 }
 0x278   : > { %10126 = vst [vmem:[#allocation166_spill] sm:$0xff] %v6466_v19  ;;  %10127 = vst [vmem:[#allocation162_spill] sm:$0xff] %v6468_v59  ;;  %v2208_v19 = vmul.f32 %v6181_v2, %v10132_v26 }
 0x279   : > { %2420 = vrot.lane.b32.xlu1 %v2204_v42, %s4543_s30  ;;  %2418 = vrot.lane.b32.xlu0 %v2203_v34, %s4543_s30  ;;  %v10133_v42 = vld [vmem:[#allocation169_spill] sm:$0xff] }
 0x27a   : > { %v2207_v34 = vmul.f32 %v6181_v2, %v10133_v42  ;;  %v10140_v42 = vld [vmem:[#allocation182_spill] sm:$0xff] }
 0x27b   : > { %v6476_v51 = vpop.permute.xlu1 %1982  ;;  %v6478_v18 = vpop.permute.xlu0 %1980 }
 0x27c   : > { %10130 = vst [vmem:[#allocation170_spill] sm:$0xff] %v6476_v51  ;;  %10131 = vst [vmem:[#allocation165_spill] sm:$0xff] %v6478_v18  ;;  %v2210_v51 = vmul.f32 %v6181_v2, %v10136_v22 }
 0x27d   : > { %2424 = vrot.lane.b32.xlu1 %v2206_v38, %s4543_s30  ;;  %2422 = vrot.lane.b32.xlu0 %v2205_v30, %s4543_s30  ;;  %v10137_v38 = vld [vmem:[#allocation173_spill] sm:$0xff] }
 0x27e   : > { %v2209_v30 = vmul.f32 %v6181_v2, %v10137_v38  ;;  %v10144_v38 = vld [vmem:[#allocation186_spill] sm:$0xff] }
 0x27f   : > { %v6486_v59 = vpop.permute.xlu1 %2312  ;;  %v6488_v14 = vpop.permute.xlu0 %1984  ;;  %v2214_v40 = vmul.f32 %v6181_v2, %v10144_v38 }
 0x280   : > { %10134 = vst [vmem:[#allocation174_spill] sm:$0xff] %v6486_v59  ;;  %10135 = vst [vmem:[#allocation169_spill] sm:$0xff] %v6488_v14  ;;  %v2212_v14 = vmul.f32 %v6181_v2, %v10140_v42  ;;  %v2711_v59 = vld [vmem:[%s4604_s27 + $0x312] sm:$0xff] }
 0x281   : > { %2428 = vrot.lane.b32.xlu1 %v2208_v19, %s4543_s30  ;;  %2426 = vrot.lane.b32.xlu0 %v2207_v34, %s4543_s30  ;;  %v10141_v19 = vld [vmem:[#allocation177_spill] sm:$0xff] }
 0x282   : > { %v2211_v34 = vmul.f32 %v6181_v2, %v10141_v19  ;;  %v10148_v19 = vld [vmem:[#allocation190_spill] sm:$0xff] }
 0x283   : > { %v6496_v18 = vpop.permute.xlu1 %2316  ;;  %v6498_v26 = vpop.permute.xlu0 %2314  ;;  %v2216_v8 = vmul.f32 %v6181_v2, %v10148_v19 }
 0x284   : > { %10138 = vst [vmem:[#allocation178_spill] sm:$0xff] %v6496_v18  ;;  %10139 = vst [vmem:[#allocation173_spill] sm:$0xff] %v6498_v26  ;;  %v4242_v26 = vld [vmem:[%s4604_s27 + $0x120] sm:$0xff]  ;;  %v4243_v18 = vld [vmem:[%s4604_s27 + $0x110] sm:$0xff] }
 0x285   : > { %2432 = vrot.lane.b32.xlu1 %v2210_v51, %s4543_s30  ;;  %2430 = vrot.lane.b32.xlu0 %v2209_v30, %s4543_s30  ;;  %v10145_v51 = vld [vmem:[#allocation181_spill] sm:$0xff] }
 0x286   : > { %v2213_v30 = vmul.f32 %v6181_v2, %v10145_v51  ;;  %v10152_v51 = vld [vmem:[#allocation194_spill] sm:$0xff] }
 0x287   : > { %v6506_v46 = vpop.permute.xlu1 %2320  ;;  %v6508_v22 = vpop.permute.xlu0 %2318  ;;  %v2218_v0 = vmul.f32 %v6181_v2, %v10152_v51 }
 0x288   : > { %10142 = vst [vmem:[#allocation182_spill] sm:$0xff] %v6506_v46  ;;  %10143 = vst [vmem:[#allocation177_spill] sm:$0xff] %v6508_v22  ;;  %v4238_v22 = vld [vmem:[%s4604_s27 + $0xf0] sm:$0xff] }
 0x289   : > { %2436 = vrot.lane.b32.xlu1 %v2212_v14, %s4543_s30  ;;  %2434 = vrot.lane.b32.xlu0 %v2211_v34, %s4543_s30  ;;  %v10149_v14 = vld [vmem:[#allocation185_spill] sm:$0xff] }
 0x28a   : > { %v2215_v34 = vmul.f32 %v6181_v2, %v10149_v14  ;;  %v10156_v14 = vld [vmem:[#allocation198_spill] sm:$0xff] }
 0x28b   : > { %v6516_v50 = vpop.permute.xlu1 %2324  ;;  %v6518_v42 = vpop.permute.xlu0 %2322  ;;  %v2220_v6 = vmul.f32 %v6181_v2, %v10156_v14 }
 0x28c   : > { %10146 = vst [vmem:[#allocation186_spill] sm:$0xff] %v6516_v50  ;;  %10147 = vst [vmem:[#allocation181_spill] sm:$0xff] %v6518_v42 }
 0x28d   : > { %2440 = vrot.lane.b32.xlu1 %v2214_v40, %s4543_s30  ;;  %2438 = vrot.lane.b32.xlu0 %v2213_v30, %s4543_s30  ;;  %v10153_v40 = vld [vmem:[#allocation189_spill] sm:$0xff] }
 0x28e   : > { %v2217_v30 = vmul.f32 %v6181_v2, %v10153_v40  ;;  %v10160_v40 = vld [vmem:[#allocation202_spill] sm:$0xff] }
 0x28f   : > { %v6526_v54 = vpop.permute.xlu1 %2328  ;;  %v6528_v38 = vpop.permute.xlu0 %2326  ;;  %v2222_v3 = vmul.f32 %v6181_v2, %v10160_v40 }
 0x290   : > { %10150 = vst [vmem:[#allocation190_spill] sm:$0xff] %v6526_v54  ;;  %10151 = vst [vmem:[#allocation185_spill] sm:$0xff] %v6528_v38  ;;  %v4231_v38 = vld [vmem:[%s4604_s27 + $0x90] sm:$0xff] }
 0x291   : > { %2444 = vrot.lane.b32.xlu1 %v2216_v8, %s4543_s30  ;;  %2442 = vrot.lane.b32.xlu0 %v2215_v34, %s4543_s30  ;;  %v10157_v8 = vld [vmem:[#allocation193_spill] sm:$0xff] }
 0x292   : > { %v2219_v34 = vmul.f32 %v6181_v2, %v10157_v8  ;;  %v10164_v8 = vld [vmem:[#allocation206_spill] sm:$0xff] }
 0x293   : > { %v6536_v58 = vpop.permute.xlu1 %2332  ;;  %v6538_v19 = vpop.permute.xlu0 %2330  ;;  %v2224_v9 = vmul.f32 %v6181_v2, %v10164_v8 }
 0x294   : > { %10154 = vst [vmem:[#allocation194_spill] sm:$0xff] %v6536_v58  ;;  %10155 = vst [vmem:[#allocation189_spill] sm:$0xff] %v6538_v19  ;;  %v4225_v19 = vld [vmem:[%s4604_s27 + $0x50] sm:$0xff] }
 0x295   : > { %2448 = vrot.lane.b32.xlu1 %v2218_v0, %s4543_s30  ;;  %2446 = vrot.lane.b32.xlu0 %v2217_v30, %s4543_s30  ;;  %v10161_v0 = vld [vmem:[#allocation197_spill] sm:$0xff] }
 0x296   : > { %v2221_v30 = vmul.f32 %v6181_v2, %v10161_v0  ;;  %v10168_v0 = vld [vmem:[#allocation210_spill] sm:$0xff] }
 0x297   : > { %v6546_v62 = vpop.permute.xlu1 %2336  ;;  %v6548_v51 = vpop.permute.xlu0 %2334  ;;  %v2226_v13 = vmul.f32 %v6181_v2, %v10168_v0  ;;  %v2227_v0 = vmul.f32 %v6181_v2, %v10173_v23 }
 0x298   : > { %10158 = vst [vmem:[#allocation198_spill] sm:$0xff] %v6546_v62  ;;  %10159 = vst [vmem:[#allocation193_spill] sm:$0xff] %v6548_v51  ;;  %v2707_v62 = vld [vmem:[%s4604_s27 + $0x2ea] sm:$0xff] }
 0x299   : > { %2452 = vrot.lane.b32.xlu1 %v2220_v6, %s4543_s30  ;;  %2450 = vrot.lane.b32.xlu0 %v2219_v34, %s4543_s30  ;;  %v10165_v6 = vld [vmem:[#allocation201_spill] sm:$0xff] }
 0x29a   : > { %v2223_v34 = vmul.f32 %v6181_v2, %v10165_v6 }
 0x29b   : > { %v6556_v7 = vpop.permute.xlu1 %2340  ;;  %v6558_v14 = vpop.permute.xlu0 %2338 }
 0x29c   : > { %10162 = vst [vmem:[#allocation202_spill] sm:$0xff] %v6556_v7  ;;  %10163 = vst [vmem:[#allocation197_spill] sm:$0xff] %v6558_v14 }
 0x29d   : > { %2456 = vrot.lane.b32.xlu1 %v2222_v3, %s4543_s30  ;;  %2454 = vrot.lane.b32.xlu0 %v2221_v30, %s4543_s30  ;;  %v10169_v3 = vld [vmem:[#allocation205_spill] sm:$0xff] }
 0x29e   : > { %v2225_v30 = vmul.f32 %v6181_v2, %v10169_v3 }
 0x29f   : > { %v6566_v15 = vpop.permute.xlu1 %2344  ;;  %v6568_v40 = vpop.permute.xlu0 %2342 }
 0x2a0   : > { %10166 = vst [vmem:[#allocation206_spill] sm:$0xff] %v6566_v15  ;;  %10167 = vst [vmem:[#allocation201_spill] sm:$0xff] %v6568_v40  ;;  %v4217_v40 = vld [vmem:[%s4604_s27] sm:$0xff] }
 0x2a1   : > { %2460 = vrot.lane.b32.xlu1 %v2224_v9, %s4543_s30  ;;  %2458 = vrot.lane.b32.xlu0 %v2223_v34, %s4543_s30  ;;  %v10172_v9 = vld [vmem:[#allocation214_spill] sm:$0xff] }
 0x2a2   : > { %v2228_v34 = vmul.f32 %v6181_v2, %v10172_v9  ;;  %v6596_v9 = vstv %s4189_s6 }
 0x2a3   : > { %v6576_v8 = vpop.permute.xlu1 %2348  ;;  %v6578_v6 = vpop.permute.xlu0 %2346 }
 0x2a4   : > { %10170 = vst [vmem:[#allocation210_spill] sm:$0xff] %v6576_v8  ;;  %10171 = vst [vmem:[#allocation205_spill] sm:$0xff] %v6578_v6  ;;  %v2706_v6 = vld [vmem:[%s4604_s27 + $0x2e2] sm:$0xff]  ;;  %v2705_v8 = vld [vmem:[%s4604_s27 + $0x2d2] sm:$0xff] }
 0x2a5   : > { %2464 = vrot.lane.b32.xlu1 %v2226_v13, %s4543_s30  ;;  %2462 = vrot.lane.b32.xlu0 %v2225_v30, %s4543_s30  ;;  %v2230_v13 = vmul.f32 %v6181_v2, %v6188_v1  ;;  %v10176_v30 = vld [vmem:[#allocation213_spill] sm:$0xff]  ;;  %v2884_v1 = vmul.f32 %v6596_v9, %v6603_v39 }
 0x2a6   : > { %v2229_v31 = vmul.f32 %v6181_v2, %v10176_v30  ;;  %v2883_v2 = vmul.f32 %v6596_v9, %v6606_v25  ;;  %v6619_v30 = vld [vmem:[%s4604_s27 + $0x22] sm:$0xff] }
 0x2a7   : > { %v6586_v17 = vpop.permute.xlu1 %2352  ;;  %v6588_v3 = vpop.permute.xlu0 %2350 }
 0x2a8   : > { %10174 = vst [vmem:[#allocation214_spill] sm:$0xff] %v6586_v17  ;;  %10175 = vst [vmem:[#allocation209_spill] sm:$0xff] %v6588_v3  ;;  %v2703_v3 = vld [vmem:[%s4604_s27 + $0x2c2] sm:$0xff]  ;;  %v7002_v17 = vstv %s194_s7 }
 0x2a9   : > { %2468 = vrot.lane.b32.xlu1 %v2228_v34, %s4543_s30  ;;  %2466 = vrot.lane.b32.xlu0 %v2227_v0, %s4543_s30  ;;  %v7016_v15 = vmul.f32 %v4217_v40, %v7002_v17  ;;  %v4221_v40 = vld [vmem:[%s4604_s27 + $0x28] sm:$0xff]  ;;  %v7058_v58 = vmul.f32 %v4225_v19, %v7002_v17 }
 0x2aa   : > { %v7036_v51 = vmul.f32 %v4221_v40, %v7002_v17  ;;  %v2953_v40 = vmul.f32 %v6596_v9, %v2707_v62  ;;  %v4228_v62 = vld [vmem:[%s4604_s27 + $0x88] sm:$0xff] }
 0x2ab   : > { %v6598_v21 = vpop.permute.xlu1 %2356  ;;  %v6600_v23 = vpop.permute.xlu0 %2354 }
 0x2ac   : > { %10177 = vst [vmem:[#allocation213_spill] sm:$0xff] %v6598_v21  ;;  %10178 = vst [vmem:[#allocation271_spill] sm:$0xff] %v6600_v23  ;;  %v2701_v23 = vld [vmem:[%s4604_s27 + $0x2aa] sm:$0xff] }
 0x2ad   : > { %2472 = vrot.lane.b32.xlu1 %v2230_v13, %s4543_s30  ;;  %2470 = vrot.lane.b32.xlu0 %v2229_v31, %s4543_s30  ;;  %v2886_v31 = vmul.f32 %v6596_v9, %v6619_v30  ;;  %v2885_v13 = vmul.f32 %v6596_v9, %v6622_v47  ;;  %v2704_v21 = vld [vmem:[%s4604_s27 + $0x2ca] sm:$0xff] }
 0x2af   : > { %v6614_v34 = vpop.permute.xlu1 %2360  ;;  %v6616_v0 = vpop.permute.xlu0 %2358 }
 0x2b0   : > { %10179 = vst [vmem:[#allocation272_spill] sm:$0xff] %v6614_v34  ;;  %10180 = vst [vmem:[#allocation273_spill] sm:$0xff] %v6616_v0  ;;  %v2699_v0 = vld [vmem:[%s4604_s27 + $0x292] sm:$0xff] }
 0x2b1   : > { %3047 = vrot.lane.b32.xlu1 %v2884_v1, %s4542_s28  ;;  %3045 = vrot.lane.b32.xlu0 %v2883_v2, %s4542_s28  ;;  %v2888_v1 = vmul.f32 %v6596_v9, %v6635_v33  ;;  %v2887_v2 = vmul.f32 %v6596_v9, %v6638_v52 }
 0x2b3   : > { %v6630_v29 = vpop.permute.xlu1 %2364  ;;  %v6632_v55 = vpop.permute.xlu0 %2362 }
 0x2b4   : > { %10181 = vst [vmem:[#allocation274_spill] sm:$0xff] %v6630_v29  ;;  %10182 = vst [vmem:[#allocation275_spill] sm:$0xff] %v6632_v55  ;;  %v2662_v29 = vld [vmem:[%s4604_s27 + $0x10a] sm:$0xff] }
 0x2b5   : > { %3051 = vrot.lane.b32.xlu1 %v2886_v31, %s4542_s28  ;;  %3049 = vrot.lane.b32.xlu0 %v2885_v13, %s4542_s28  ;;  %v2890_v31 = vmul.f32 %v6596_v9, %v6651_v41  ;;  %v2889_v13 = vmul.f32 %v6596_v9, %v6654_v4 }
 0x2b7   : > { %v6646_v37 = vpop.permute.xlu1 %2368  ;;  %v6648_v32 = vpop.permute.xlu0 %2366 }
 0x2b8   : > { %10183 = vst [vmem:[#allocation276_spill] sm:$0xff] %v6646_v37  ;;  %10184 = vst [vmem:[#allocation277_spill] sm:$0xff] %v6648_v32 }
 0x2b9   : > { %3055 = vrot.lane.b32.xlu1 %v2888_v1, %s4542_s28  ;;  %3053 = vrot.lane.b32.xlu0 %v2887_v2, %s4542_s28  ;;  %v2892_v1 = vmul.f32 %v6596_v9, %v6667_v49  ;;  %v2891_v2 = vmul.f32 %v6596_v9, %v6670_v12 }
 0x2bb   : > { %v6662_v45 = vpop.permute.xlu1 %2372  ;;  %v6664_v11 = vpop.permute.xlu0 %2370 }
 0x2bc   : > { %10185 = vst [vmem:[#allocation278_spill] sm:$0xff] %v6662_v45  ;;  %10186 = vst [vmem:[#allocation279_spill] sm:$0xff] %v6664_v11  ;;  %v6734_v45 = vld [vmem:[%s4604_s27 + $0xaa] sm:$0xff] }
 0x2bd   : > { %3059 = vrot.lane.b32.xlu1 %v2890_v31, %s4542_s28  ;;  %3057 = vrot.lane.b32.xlu0 %v2889_v13, %s4542_s28  ;;  %v2894_v31 = vmul.f32 %v6596_v9, %v6683_v57  ;;  %v2893_v13 = vmul.f32 %v6596_v9, %v6686_v24  ;;  %10201 = vst [vmem:[#allocation294_spill] sm:$0xff] %v6734_v45 }
 0x2bf   : > { %v6678_v53 = vpop.permute.xlu1 %2376  ;;  %v6680_v63 = vpop.permute.xlu0 %2374 }
 0x2c0   : > { %10187 = vst [vmem:[#allocation280_spill] sm:$0xff] %v6678_v53  ;;  %10188 = vst [vmem:[#allocation281_spill] sm:$0xff] %v6680_v63  ;;  %v6699_v63 = vld [vmem:[%s4604_s27 + $0x8a] sm:$0xff]  ;;  %v6702_v53 = vld [vmem:[%s4604_s27 + $0x82] sm:$0xff] }
 0x2c1   : > { %3063 = vrot.lane.b32.xlu1 %v2892_v1, %s4542_s28  ;;  %3061 = vrot.lane.b32.xlu0 %v2891_v2, %s4542_s28  ;;  %10192 = vst [vmem:[#allocation285_spill] sm:$0xff] %v6699_v63  ;;  %10193 = vst [vmem:[#allocation286_spill] sm:$0xff] %v6702_v53  ;;  %v2896_v1 = vmul.f32 %v6596_v9, %v6699_v63  ;;  %v2895_v2 = vmul.f32 %v6596_v9, %v6702_v53 }
 0x2c3   : > { %v6694_v61 = vpop.permute.xlu1 %2380  ;;  %v6696_v43 = vpop.permute.xlu0 %2378 }
 0x2c4   : > { %10190 = vst [vmem:[#allocation283_spill] sm:$0xff] %v6694_v61  ;;  %10191 = vst [vmem:[#allocation284_spill] sm:$0xff] %v6696_v43  ;;  %v6715_v43 = vld [vmem:[%s4604_s27 + $0xa2] sm:$0xff] }
 0x2c5   : > { %3067 = vrot.lane.b32.xlu1 %v2894_v31, %s4542_s28  ;;  %3065 = vrot.lane.b32.xlu0 %v2893_v13, %s4542_s28  ;;  %10196 = vst [vmem:[#allocation289_spill] sm:$0xff] %v6715_v43  ;;  %v2898_v31 = vmul.f32 %v6596_v9, %v6715_v43  ;;  %v2897_v13 = vmul.f32 %v6596_v9, %v6718_v35 }
 0x2c7   : > { %v6710_v5 = vpop.permute.xlu1 %2384  ;;  %v6712_v61 = vpop.permute.xlu0 %2382 }
 0x2c8   : > { %10194 = vst [vmem:[#allocation287_spill] sm:$0xff] %v6710_v5  ;;  %10195 = vst [vmem:[#allocation288_spill] sm:$0xff] %v6712_v61  ;;  %v6731_v61 = vld [vmem:[%s4604_s27 + $0xb2] sm:$0xff] }
 0x2c9   : > { %3071 = vrot.lane.b32.xlu1 %v2896_v1, %s4542_s28  ;;  %3069 = vrot.lane.b32.xlu0 %v2895_v2, %s4542_s28  ;;  %10200 = vst [vmem:[#allocation293_spill] sm:$0xff] %v6731_v61  ;;  %v2900_v1 = vmul.f32 %v6596_v9, %v6731_v61  ;;  %v2899_v2 = vmul.f32 %v6596_v9, %v6734_v45  ;;  %v4251_v61 = vld [vmem:[%s4604_s27 + $0x168] sm:$0xff] }
 0x2cb   : > { %v6726_v11 = vpop.permute.xlu1 %2388  ;;  %v6728_v5 = vpop.permute.xlu0 %2386 }
 0x2cc   : > { %10198 = vst [vmem:[#allocation291_spill] sm:$0xff] %v6726_v11  ;;  %10199 = vst [vmem:[#allocation292_spill] sm:$0xff] %v6728_v5  ;;  %v2656_v5 = vld [vmem:[%s4604_s27 + $0xca] sm:$0xff] }
 0x2cd   : > { %3075 = vrot.lane.b32.xlu1 %v2898_v31, %s4542_s28  ;;  %3073 = vrot.lane.b32.xlu0 %v2897_v13, %s4542_s28  ;;  %v2902_v31 = vmul.f32 %v6596_v9, %v2656_v5  ;;  %v2901_v13 = vmul.f32 %v6596_v9, %v6748_v44  ;;  %v7182_v44 = vmul.f32 %v4251_v61, %v7002_v17  ;;  %v4255_v61 = vld [vmem:[%s4604_s27 + $0x190] sm:$0xff] }
 0x2ce   : > { %v7200_v43 = vmul.f32 %v4255_v61, %v7002_v17  ;;  %v4259_v61 = vld [vmem:[%s4604_s27 + $0x1c0] sm:$0xff] }
 0x2cf   : > { %v6742_v16 = vpop.permute.xlu1 %2392  ;;  %v6744_v11 = vpop.permute.xlu0 %2390 }
 0x2d0   : > { %10202 = vst [vmem:[#allocation295_spill] sm:$0xff] %v6742_v16  ;;  %10203 = vst [vmem:[#allocation296_spill] sm:$0xff] %v6744_v11  ;;  %v2658_v16 = vld [vmem:[%s4604_s27 + $0xe2] sm:$0xff]  ;;  %v6761_v11 = vld [vmem:[%s4604_s27 + $0xd2] sm:$0xff] }
 0x2d1   : > { %3079 = vrot.lane.b32.xlu1 %v2900_v1, %s4542_s28  ;;  %3077 = vrot.lane.b32.xlu0 %v2899_v2, %s4542_s28  ;;  %10207 = vst [vmem:[#allocation300_spill] sm:$0xff] %v6761_v11  ;;  %v2904_v1 = vmul.f32 %v6596_v9, %v2658_v16  ;;  %v2903_v5 = vmul.f32 %v6596_v9, %v6761_v11  ;;  %10262 = vst [vmem:[#allocation355_spill] sm:$0xff] %v7200_v43 }
 0x2d2   : > { %v7220_v43 = vmul.f32 %v4259_v61, %v7002_v17 }
 0x2d3   : > { %v6755_v32 = vpop.permute.xlu1 %2396  ;;  %v6757_v37 = vpop.permute.xlu0 %2394 }
 0x2d4   : > { %10205 = vst [vmem:[#allocation298_spill] sm:$0xff] %v6755_v32  ;;  %10206 = vst [vmem:[#allocation299_spill] sm:$0xff] %v6757_v37  ;;  %v2660_v32 = vld [vmem:[%s4604_s27 + $0xf2] sm:$0xff]  ;;  %v2659_v37 = vld [vmem:[%s4604_s27 + $0xea] sm:$0xff] }
 0x2d5   : > { %3083 = vrot.lane.b32.xlu1 %v2902_v31, %s4542_s28  ;;  %3081 = vrot.lane.b32.xlu0 %v2901_v13, %s4542_s28  ;;  %v2906_v31 = vmul.f32 %v6596_v9, %v2660_v32  ;;  %v2905_v13 = vmul.f32 %v6596_v9, %v2659_v37  ;;  %v2664_v37 = vld [vmem:[%s4604_s27 + $0x122] sm:$0xff]  ;;  %10268 = vst [vmem:[#allocation361_spill] sm:$0xff] %v7220_v43 }
 0x2d7   : > { %v6768_v2 = vpop.permute.xlu1 %2400  ;;  %v6770_v20 = vpop.permute.xlu0 %2398 }
 0x2d8   : > { %10208 = vst [vmem:[#allocation301_spill] sm:$0xff] %v6768_v2  ;;  %10209 = vst [vmem:[#allocation302_spill] sm:$0xff] %v6770_v20  ;;  %v2661_v2 = vld [vmem:[%s4604_s27 + $0x102] sm:$0xff] }
 0x2d9   : > { %3087 = vrot.lane.b32.xlu1 %v2904_v1, %s4542_s28  ;;  %3085 = vrot.lane.b32.xlu0 %v2903_v5, %s4542_s28  ;;  %v2908_v1 = vmul.f32 %v6596_v9, %v2662_v29  ;;  %v2907_v5 = vmul.f32 %v6596_v9, %v2661_v2  ;;  %v2666_v2 = vld [vmem:[%s4604_s27 + $0x132] sm:$0xff] }
 0x2db   : > { %v6778_v16 = vpop.permute.xlu1 %2404  ;;  %v6780_v55 = vpop.permute.xlu0 %2402 }
 0x2dc   : > { %10210 = vst [vmem:[#allocation303_spill] sm:$0xff] %v6778_v16  ;;  %10211 = vst [vmem:[#allocation304_spill] sm:$0xff] %v6780_v55  ;;  %v2663_v16 = vld [vmem:[%s4604_s27 + $0x112] sm:$0xff] }
 0x2dd   : > { %3091 = vrot.lane.b32.xlu1 %v2906_v31, %s4542_s28  ;;  %3089 = vrot.lane.b32.xlu0 %v2905_v13, %s4542_s28  ;;  %v2910_v31 = vmul.f32 %v6596_v9, %v2664_v37  ;;  %v2909_v13 = vmul.f32 %v6596_v9, %v2663_v16  ;;  %v2668_v16 = vld [vmem:[%s4604_s27 + $0x14a] sm:$0xff] }
 0x2df   : > { %v6788_v20 = vpop.permute.xlu1 %2408  ;;  %v6790_v32 = vpop.permute.xlu0 %2406 }
 0x2e0   : > { %10212 = vst [vmem:[#allocation305_spill] sm:$0xff] %v6788_v20  ;;  %10213 = vst [vmem:[#allocation306_spill] sm:$0xff] %v6790_v32  ;;  %v2665_v20 = vld [vmem:[%s4604_s27 + $0x12a] sm:$0xff] }
 0x2e1   : > { %3095 = vrot.lane.b32.xlu1 %v2908_v1, %s4542_s28  ;;  %3093 = vrot.lane.b32.xlu0 %v2907_v5, %s4542_s28  ;;  %v2912_v1 = vmul.f32 %v6596_v9, %v2666_v2  ;;  %v2911_v5 = vmul.f32 %v6596_v9, %v2665_v20  ;;  %v2670_v20 = vld [vmem:[%s4604_s27 + $0x162] sm:$0xff] }
 0x2e3   : > { %v6798_v55 = vpop.permute.xlu1 %2412  ;;  %v6800_v29 = vpop.permute.xlu0 %2410 }
 0x2e4   : > { %10214 = vst [vmem:[#allocation307_spill] sm:$0xff] %v6798_v55  ;;  %10215 = vst [vmem:[#allocation308_spill] sm:$0xff] %v6800_v29  ;;  %v2667_v55 = vld [vmem:[%s4604_s27 + $0x142] sm:$0xff] }
 0x2e5   : > { %3099 = vrot.lane.b32.xlu1 %v2910_v31, %s4542_s28  ;;  %3097 = vrot.lane.b32.xlu0 %v2909_v13, %s4542_s28  ;;  %v2914_v31 = vmul.f32 %v6596_v9, %v2668_v16  ;;  %v2913_v13 = vmul.f32 %v6596_v9, %v2667_v55  ;;  %v2672_v55 = vld [vmem:[%s4604_s27 + $0x172] sm:$0xff] }
 0x2e7   : > { %v6808_v32 = vpop.permute.xlu1 %2416  ;;  %v6810_v37 = vpop.permute.xlu0 %2414 }
 0x2e8   : > { %10216 = vst [vmem:[#allocation309_spill] sm:$0xff] %v6808_v32  ;;  %10217 = vst [vmem:[#allocation310_spill] sm:$0xff] %v6810_v37  ;;  %v2669_v32 = vld [vmem:[%s4604_s27 + $0x152] sm:$0xff] }
 0x2e9   : > { %3103 = vrot.lane.b32.xlu1 %v2912_v1, %s4542_s28  ;;  %3101 = vrot.lane.b32.xlu0 %v2911_v5, %s4542_s28  ;;  %v2916_v1 = vmul.f32 %v6596_v9, %v2670_v20  ;;  %v2915_v5 = vmul.f32 %v6596_v9, %v2669_v32  ;;  %v2674_v32 = vld [vmem:[%s4604_s27 + $0x18a] sm:$0xff] }
 0x2eb   : > { %v6818_v29 = vpop.permute.xlu1 %2420  ;;  %v6820_v2 = vpop.permute.xlu0 %2418 }
 0x2ec   : > { %10218 = vst [vmem:[#allocation311_spill] sm:$0xff] %v6818_v29  ;;  %10219 = vst [vmem:[#allocation312_spill] sm:$0xff] %v6820_v2  ;;  %v2671_v29 = vld [vmem:[%s4604_s27 + $0x16a] sm:$0xff] }
 0x2ed   : > { %3107 = vrot.lane.b32.xlu1 %v2914_v31, %s4542_s28  ;;  %3105 = vrot.lane.b32.xlu0 %v2913_v13, %s4542_s28  ;;  %v2918_v31 = vmul.f32 %v6596_v9, %v2672_v55  ;;  %v2917_v13 = vmul.f32 %v6596_v9, %v2671_v29  ;;  %v2676_v29 = vld [vmem:[%s4604_s27 + $0x1a2] sm:$0xff] }
 0x2ef   : > { %v6828_v37 = vpop.permute.xlu1 %2424  ;;  %v6830_v16 = vpop.permute.xlu0 %2422 }
 0x2f0   : > { %10220 = vst [vmem:[#allocation313_spill] sm:$0xff] %v6828_v37  ;;  %10221 = vst [vmem:[#allocation314_spill] sm:$0xff] %v6830_v16  ;;  %v2673_v37 = vld [vmem:[%s4604_s27 + $0x182] sm:$0xff] }
 0x2f1   : > { %3111 = vrot.lane.b32.xlu1 %v2916_v1, %s4542_s28  ;;  %3109 = vrot.lane.b32.xlu0 %v2915_v5, %s4542_s28  ;;  %v2920_v1 = vmul.f32 %v6596_v9, %v2674_v32  ;;  %v2919_v5 = vmul.f32 %v6596_v9, %v2673_v37  ;;  %v2678_v37 = vld [vmem:[%s4604_s27 + $0x1b2] sm:$0xff] }
 0x2f3   : > { %v6838_v2 = vpop.permute.xlu1 %2428  ;;  %v6840_v20 = vpop.permute.xlu0 %2426 }
 0x2f4   : > { %10222 = vst [vmem:[#allocation315_spill] sm:$0xff] %v6838_v2  ;;  %10223 = vst [vmem:[#allocation316_spill] sm:$0xff] %v6840_v20  ;;  %v2675_v2 = vld [vmem:[%s4604_s27 + $0x192] sm:$0xff] }
 0x2f5   : > { %3115 = vrot.lane.b32.xlu1 %v2918_v31, %s4542_s28  ;;  %3113 = vrot.lane.b32.xlu0 %v2917_v13, %s4542_s28  ;;  %v2922_v31 = vmul.f32 %v6596_v9, %v2676_v29  ;;  %v2921_v13 = vmul.f32 %v6596_v9, %v2675_v2  ;;  %v2680_v2 = vld [vmem:[%s4604_s27 + $0x1ca] sm:$0xff] }
 0x2f7   : > { %v6848_v16 = vpop.permute.xlu1 %2432  ;;  %v6850_v55 = vpop.permute.xlu0 %2430 }
 0x2f8   : > { %10224 = vst [vmem:[#allocation317_spill] sm:$0xff] %v6848_v16  ;;  %10225 = vst [vmem:[#allocation318_spill] sm:$0xff] %v6850_v55  ;;  %v2677_v16 = vld [vmem:[%s4604_s27 + $0x1aa] sm:$0xff] }
 0x2f9   : > { %3119 = vrot.lane.b32.xlu1 %v2920_v1, %s4542_s28  ;;  %3117 = vrot.lane.b32.xlu0 %v2919_v5, %s4542_s28  ;;  %v2924_v1 = vmul.f32 %v6596_v9, %v2678_v37  ;;  %v2923_v5 = vmul.f32 %v6596_v9, %v2677_v16  ;;  %v2682_v16 = vld [vmem:[%s4604_s27 + $0x1e2] sm:$0xff] }
 0x2fb   : > { %v6858_v20 = vpop.permute.xlu1 %2436  ;;  %v6860_v32 = vpop.permute.xlu0 %2434 }
 0x2fc   : > { %10226 = vst [vmem:[#allocation319_spill] sm:$0xff] %v6858_v20  ;;  %10227 = vst [vmem:[#allocation320_spill] sm:$0xff] %v6860_v32  ;;  %v2679_v20 = vld [vmem:[%s4604_s27 + $0x1c2] sm:$0xff] }
 0x2fd   : > { %3123 = vrot.lane.b32.xlu1 %v2922_v31, %s4542_s28  ;;  %3121 = vrot.lane.b32.xlu0 %v2921_v13, %s4542_s28  ;;  %v2926_v31 = vmul.f32 %v6596_v9, %v2680_v2  ;;  %v2925_v13 = vmul.f32 %v6596_v9, %v2679_v20  ;;  %v2684_v20 = vld [vmem:[%s4604_s27 + $0x1f2] sm:$0xff] }
 0x2ff   : > { %v6868_v55 = vpop.permute.xlu1 %2440  ;;  %v6870_v29 = vpop.permute.xlu0 %2438 }
 0x300   : > { %10228 = vst [vmem:[#allocation321_spill] sm:$0xff] %v6868_v55  ;;  %10229 = vst [vmem:[#allocation322_spill] sm:$0xff] %v6870_v29  ;;  %v2681_v55 = vld [vmem:[%s4604_s27 + $0x1d2] sm:$0xff] }
 0x301   : > { %3127 = vrot.lane.b32.xlu1 %v2924_v1, %s4542_s28  ;;  %3125 = vrot.lane.b32.xlu0 %v2923_v5, %s4542_s28  ;;  %v2928_v1 = vmul.f32 %v6596_v9, %v2682_v16  ;;  %v2927_v5 = vmul.f32 %v6596_v9, %v2681_v55  ;;  %v2686_v55 = vld [vmem:[%s4604_s27 + $0x20a] sm:$0xff] }
 0x303   : > { %v6878_v32 = vpop.permute.xlu1 %2444  ;;  %v6880_v37 = vpop.permute.xlu0 %2442 }
 0x304   : > { %10230 = vst [vmem:[#allocation323_spill] sm:$0xff] %v6878_v32  ;;  %10231 = vst [vmem:[#allocation324_spill] sm:$0xff] %v6880_v37  ;;  %v2683_v32 = vld [vmem:[%s4604_s27 + $0x1ea] sm:$0xff] }
 0x305   : > { %3131 = vrot.lane.b32.xlu1 %v2926_v31, %s4542_s28  ;;  %3129 = vrot.lane.b32.xlu0 %v2925_v13, %s4542_s28  ;;  %v2930_v31 = vmul.f32 %v6596_v9, %v2684_v20  ;;  %v2929_v13 = vmul.f32 %v6596_v9, %v2683_v32  ;;  %v2688_v32 = vld [vmem:[%s4604_s27 + $0x222] sm:$0xff] }
 0x307   : > { %v6888_v29 = vpop.permute.xlu1 %2448  ;;  %v6890_v2 = vpop.permute.xlu0 %2446 }
 0x308   : > { %10232 = vst [vmem:[#allocation325_spill] sm:$0xff] %v6888_v29  ;;  %10233 = vst [vmem:[#allocation326_spill] sm:$0xff] %v6890_v2  ;;  %v2685_v29 = vld [vmem:[%s4604_s27 + $0x202] sm:$0xff] }
 0x309   : > { %3135 = vrot.lane.b32.xlu1 %v2928_v1, %s4542_s28  ;;  %3133 = vrot.lane.b32.xlu0 %v2927_v5, %s4542_s28  ;;  %v2932_v1 = vmul.f32 %v6596_v9, %v2686_v55  ;;  %v2931_v5 = vmul.f32 %v6596_v9, %v2685_v29  ;;  %v2690_v29 = vld [vmem:[%s4604_s27 + $0x232] sm:$0xff] }
 0x30b   : > { %v6898_v37 = vpop.permute.xlu1 %2452  ;;  %v6900_v16 = vpop.permute.xlu0 %2450 }
 0x30c   : > { %10234 = vst [vmem:[#allocation327_spill] sm:$0xff] %v6898_v37  ;;  %10235 = vst [vmem:[#allocation328_spill] sm:$0xff] %v6900_v16  ;;  %v2687_v37 = vld [vmem:[%s4604_s27 + $0x212] sm:$0xff] }
 0x30d   : > { %3139 = vrot.lane.b32.xlu1 %v2930_v31, %s4542_s28  ;;  %3137 = vrot.lane.b32.xlu0 %v2929_v13, %s4542_s28  ;;  %v2934_v31 = vmul.f32 %v6596_v9, %v2688_v32  ;;  %v2933_v13 = vmul.f32 %v6596_v9, %v2687_v37  ;;  %v2692_v37 = vld [vmem:[%s4604_s27 + $0x24a] sm:$0xff] }
 0x30f   : > { %v6908_v2 = vpop.permute.xlu1 %2456  ;;  %v6910_v20 = vpop.permute.xlu0 %2454 }
 0x310   : > { %10236 = vst [vmem:[#allocation329_spill] sm:$0xff] %v6908_v2  ;;  %10237 = vst [vmem:[#allocation330_spill] sm:$0xff] %v6910_v20  ;;  %v2689_v2 = vld [vmem:[%s4604_s27 + $0x22a] sm:$0xff] }
 0x311   : > { %3143 = vrot.lane.b32.xlu1 %v2932_v1, %s4542_s28  ;;  %3141 = vrot.lane.b32.xlu0 %v2931_v5, %s4542_s28  ;;  %v2936_v1 = vmul.f32 %v6596_v9, %v2690_v29  ;;  %v2935_v5 = vmul.f32 %v6596_v9, %v2689_v2  ;;  %v2694_v2 = vld [vmem:[%s4604_s27 + $0x262] sm:$0xff] }
 0x313   : > { %v6918_v16 = vpop.permute.xlu1 %2460  ;;  %v6920_v55 = vpop.permute.xlu0 %2458 }
 0x314   : > { %10238 = vst [vmem:[#allocation331_spill] sm:$0xff] %v6918_v16  ;;  %10239 = vst [vmem:[#allocation332_spill] sm:$0xff] %v6920_v55  ;;  %v2691_v16 = vld [vmem:[%s4604_s27 + $0x242] sm:$0xff] }
 0x315   : > { %3147 = vrot.lane.b32.xlu1 %v2934_v31, %s4542_s28  ;;  %3145 = vrot.lane.b32.xlu0 %v2933_v13, %s4542_s28  ;;  %v2938_v31 = vmul.f32 %v6596_v9, %v2692_v37  ;;  %v2937_v13 = vmul.f32 %v6596_v9, %v2691_v16  ;;  %v2696_v16 = vld [vmem:[%s4604_s27 + $0x272] sm:$0xff] }
 0x317   : > { %v6928_v20 = vpop.permute.xlu1 %2464  ;;  %v6930_v32 = vpop.permute.xlu0 %2462 }
 0x318   : > { %10240 = vst [vmem:[#allocation333_spill] sm:$0xff] %v6928_v20  ;;  %10241 = vst [vmem:[#allocation334_spill] sm:$0xff] %v6930_v32  ;;  %v2693_v20 = vld [vmem:[%s4604_s27 + $0x252] sm:$0xff] }
 0x319   : > { %3151 = vrot.lane.b32.xlu1 %v2936_v1, %s4542_s28  ;;  %3149 = vrot.lane.b32.xlu0 %v2935_v5, %s4542_s28  ;;  %v2940_v1 = vmul.f32 %v6596_v9, %v2694_v2  ;;  %v2939_v5 = vmul.f32 %v6596_v9, %v2693_v20  ;;  %v2698_v20 = vld [vmem:[%s4604_s27 + $0x28a] sm:$0xff] }
 0x31b   : > { %v6938_v55 = vpop.permute.xlu1 %2468  ;;  %v6940_v29 = vpop.permute.xlu0 %2466 }
 0x31c   : > { %10242 = vst [vmem:[#allocation335_spill] sm:$0xff] %v6938_v55  ;;  %10243 = vst [vmem:[#allocation336_spill] sm:$0xff] %v6940_v29  ;;  %v2695_v55 = vld [vmem:[%s4604_s27 + $0x26a] sm:$0xff] }
 0x31d   : > { %3155 = vrot.lane.b32.xlu1 %v2938_v31, %s4542_s28  ;;  %3153 = vrot.lane.b32.xlu0 %v2937_v13, %s4542_s28  ;;  %v2942_v31 = vmul.f32 %v6596_v9, %v2696_v16  ;;  %v2941_v13 = vmul.f32 %v6596_v9, %v2695_v55  ;;  %v2700_v55 = vld [vmem:[%s4604_s27 + $0x2a2] sm:$0xff] }
 0x31f   : > { %v6948_v32 = vpop.permute.xlu1 %2472  ;;  %v6950_v37 = vpop.permute.xlu0 %2470 }
 0x320   : > { %10244 = vst [vmem:[#allocation337_spill] sm:$0xff] %v6948_v32  ;;  %10245 = vst [vmem:[#allocation338_spill] sm:$0xff] %v6950_v37  ;;  %v2697_v32 = vld [vmem:[%s4604_s27 + $0x282] sm:$0xff] }
 0x321   : > { %3159 = vrot.lane.b32.xlu1 %v2940_v1, %s4542_s28  ;;  %3157 = vrot.lane.b32.xlu0 %v2939_v5, %s4542_s28  ;;  %v2944_v1 = vmul.f32 %v6596_v9, %v2698_v20  ;;  %v2943_v5 = vmul.f32 %v6596_v9, %v2697_v32  ;;  %v2702_v32 = vld [vmem:[%s4604_s27 + $0x2b2] sm:$0xff] }
 0x323   : > { %v6958_v29 = vpop.permute.xlu1 %3047  ;;  %v6960_v2 = vpop.permute.xlu0 %3045 }
 0x324   : > { %10246 = vst [vmem:[#allocation339_spill] sm:$0xff] %v6958_v29  ;;  %10247 = vst [vmem:[#allocation340_spill] sm:$0xff] %v6960_v2  ;;  %v7120_v2 = vmul.f32 %v4238_v22, %v7002_v17  ;;  %v7136_v22 = vmul.f32 %v4242_v26, %v7002_v17  ;;  %v4246_v26 = vld [vmem:[%s4604_s27 + $0x148] sm:$0xff] }
 0x325   : > { %3163 = vrot.lane.b32.xlu1 %v2942_v31, %s4542_s28  ;;  %3161 = vrot.lane.b32.xlu0 %v2941_v13, %s4542_s28  ;;  %v2946_v31 = vmul.f32 %v6596_v9, %v2700_v55  ;;  %v2945_v13 = vmul.f32 %v6596_v9, %v2699_v0  ;;  %v7156_v48 = vmul.f32 %v4246_v26, %v7002_v17 }
 0x327   : > { %v6968_v37 = vpop.permute.xlu1 %3051  ;;  %v6970_v16 = vpop.permute.xlu0 %3049 }
 0x328   : > { %10248 = vst [vmem:[#allocation341_spill] sm:$0xff] %v6968_v37  ;;  %10249 = vst [vmem:[#allocation342_spill] sm:$0xff] %v6970_v16  ;;  %v2709_v16 = vld [vmem:[%s4604_s27 + $0x302] sm:$0xff] }
 0x329   : > { %3167 = vrot.lane.b32.xlu1 %v2944_v1, %s4542_s28  ;;  %3165 = vrot.lane.b32.xlu0 %v2943_v5, %s4542_s28  ;;  %v2948_v1 = vmul.f32 %v6596_v9, %v2702_v32  ;;  %v2947_v5 = vmul.f32 %v6596_v9, %v2701_v23 }
 0x32b   : > { %v6978_v34 = vpop.permute.xlu1 %3055  ;;  %v6980_v20 = vpop.permute.xlu0 %3053 }
 0x32c   : > { %10250 = vst [vmem:[#allocation343_spill] sm:$0xff] %v6978_v34  ;;  %10251 = vst [vmem:[#allocation344_spill] sm:$0xff] %v6980_v20  ;;  %v4230_v34 = vld [vmem:[%s4604_s27 + $0xa0] sm:$0xff] }
 0x32d   : > { %3171 = vrot.lane.b32.xlu1 %v2946_v31, %s4542_s28  ;;  %3169 = vrot.lane.b32.xlu0 %v2945_v13, %s4542_s28  ;;  %v2950_v31 = vmul.f32 %v6596_v9, %v2704_v21  ;;  %v2949_v13 = vmul.f32 %v6596_v9, %v2703_v3  ;;  %v2951_v21 = vmul.f32 %v6596_v9, %v2705_v8  ;;  %v4216_v3 = vld [vmem:[%s4604_s27 + $0x10] sm:$0xff]  ;;  %v4219_v8 = vld [vmem:[%s4604_s27 + $0x8] sm:$0xff] }
 0x32e   : > { %v7028_v7 = vmul.f32 %v4219_v8, %v7002_v17  ;;  %v4223_v8 = vld [vmem:[%s4604_s27 + $0x40] sm:$0xff] }
 0x32f   : > { %v6988_v55 = vpop.permute.xlu1 %3059  ;;  %v6990_v0 = vpop.permute.xlu0 %3057 }
 0x330   : > { %10252 = vst [vmem:[#allocation345_spill] sm:$0xff] %v6988_v55  ;;  %10253 = vst [vmem:[#allocation346_spill] sm:$0xff] %v6990_v0  ;;  %v4229_v0 = vld [vmem:[%s4604_s27 + $0x80] sm:$0xff] }
 0x331   : > { %3175 = vrot.lane.b32.xlu1 %v2948_v1, %s4542_s28  ;;  %3173 = vrot.lane.b32.xlu0 %v2947_v5, %s4542_s28  ;;  %v2952_v1 = vmul.f32 %v6596_v9, %v2706_v6  ;;  %v7012_v5 = vmul.f32 %v4216_v3, %v7002_v17  ;;  %v4220_v3 = vld [vmem:[%s4604_s27 + $0x30] sm:$0xff]  ;;  %v7074_v19 = vmul.f32 %v4229_v0, %v7002_v17  ;;  %v4233_v0 = vld [vmem:[%s4604_s27 + $0xa8] sm:$0xff] }
 0x332   : > { %v7094_v42 = vmul.f32 %v4233_v0, %v7002_v17 }
 0x333   : > { %v6998_v32 = vpop.permute.xlu1 %3063  ;;  %v7000_v23 = vpop.permute.xlu0 %3061 }
 0x334   : > { %10254 = vst [vmem:[#allocation347_spill] sm:$0xff] %v6998_v32  ;;  %10255 = vst [vmem:[#allocation348_spill] sm:$0xff] %v7000_v23  ;;  %v7032_v32 = vmul.f32 %v4220_v3, %v7002_v17  ;;  %v7046_v23 = vmul.f32 %v4223_v8, %v7002_v17  ;;  %v4226_v8 = vld [vmem:[%s4604_s27 + $0x70] sm:$0xff] }
 0x335   : > { %3179 = vrot.lane.b32.xlu1 %v2950_v31, %s4542_s28  ;;  %3177 = vrot.lane.b32.xlu0 %v2949_v13, %s4542_s28  ;;  %v4218_v31 = vld [vmem:[%s4604_s27 + $0x20] sm:$0xff] }
 0x336   : > { %v7020_v14 = vmul.f32 %v4218_v31, %v7002_v17  ;;  %v4222_v31 = vld [vmem:[%s4604_s27 + $0x48] sm:$0xff] }
 0x337   : > { %v7022_v13 = vpop.permute.xlu1 %3067  ;;  %v7024_v6 = vpop.permute.xlu0 %3065 }
 0x338   : > { %10256 = vst [vmem:[#allocation349_spill] sm:$0xff] %v7022_v13  ;;  %10257 = vst [vmem:[#allocation350_spill] sm:$0xff] %v7024_v6  ;;  %v7040_v13 = vmul.f32 %v4222_v31, %v7002_v17  ;;  %v2708_v6 = vld [vmem:[%s4604_s27 + $0x2f2] sm:$0xff]  ;;  %v4224_v31 = vld [vmem:[%s4604_s27 + $0x60] sm:$0xff] }
 0x339   : > { %3183 = vrot.lane.b32.xlu1 %v2952_v1, %s4542_s28  ;;  %3181 = vrot.lane.b32.xlu0 %v2951_v21, %s4542_s28  ;;  %v2954_v3 = vmul.f32 %v6596_v9, %v2708_v6  ;;  %v7054_v55 = vmul.f32 %v4224_v31, %v7002_v17  ;;  %v7062_v1 = vmul.f32 %v4226_v8, %v7002_v17  ;;  %v4227_v21 = vld [vmem:[%s4604_s27 + $0x68] sm:$0xff] }
 0x33a   : > { %v7066_v6 = vmul.f32 %v4227_v21, %v7002_v17  ;;  %v7070_v31 = vmul.f32 %v4228_v62, %v7002_v17  ;;  %v7078_v8 = vmul.f32 %v4230_v34, %v7002_v17  ;;  %v7082_v21 = vmul.f32 %v4231_v38, %v7002_v17  ;;  %v4232_v62 = vld [vmem:[%s4604_s27 + $0xb0] sm:$0xff]  ;;  %v4234_v34 = vld [vmem:[%s4604_s27 + $0xc8] sm:$0xff]  ;;  %v4235_v38 = vld [vmem:[%s4604_s27 + $0xc0] sm:$0xff] }
 0x33b   : > { %v7084_v54 = vpop.permute.xlu1 %3071  ;;  %v7086_v20 = vpop.permute.xlu0 %3069  ;;  %v7090_v37 = vmul.f32 %v4232_v62, %v7002_v17  ;;  %v7098_v50 = vmul.f32 %v4234_v34, %v7002_v17  ;;  %v4236_v62 = vld [vmem:[%s4604_s27 + $0xe0] sm:$0xff]  ;;  %v2955_v34 = vmul.f32 %v6596_v9, %v2709_v16 }
 0x33c   : > { %10258 = vst [vmem:[#allocation351_spill] sm:$0xff] %v7084_v54  ;;  %10259 = vst [vmem:[#allocation352_spill] sm:$0xff] %v7086_v20  ;;  %v7102_v54 = vmul.f32 %v4235_v38, %v7002_v17  ;;  %v2710_v20 = vld [vmem:[%s4604_s27 + $0x30a] sm:$0xff]  ;;  %v7108_v29 = vmul.f32 %v4236_v62, %v7002_v17  ;;  %v4241_v16 = vld [vmem:[%s4604_s27 + $0x100] sm:$0xff] }
 0x33d   : > { %3187 = vrot.lane.b32.xlu1 %v2954_v3, %s4542_s28  ;;  %3185 = vrot.lane.b32.xlu0 %v2953_v40, %s4542_s28  ;;  %v2956_v0 = vmul.f32 %v6596_v9, %v2710_v20  ;;  %v4237_v38 = vld [vmem:[%s4604_s27 + $0xd0] sm:$0xff]  ;;  %v4239_v62 = vld [vmem:[%s4604_s27 + $0xe8] sm:$0xff] }
 0x33e   : > { %v7116_v46 = vmul.f32 %v4237_v38, %v7002_v17  ;;  %v7124_v3 = vmul.f32 %v4239_v62, %v7002_v17  ;;  %v4240_v40 = vld [vmem:[%s4604_s27 + $0x108] sm:$0xff]  ;;  %v7132_v38 = vmul.f32 %v4241_v16, %v7002_v17  ;;  %v7140_v62 = vmul.f32 %v4243_v18, %v7002_v17  ;;  %v4247_v18 = vld [vmem:[%s4604_s27 + $0x140] sm:$0xff] }
 0x33f   : > { %v7128_v20 = vmul.f32 %v4240_v40, %v7002_v17  ;;  %v7144_v40 = vmul.f32 %v4244_v36, %v7002_v17  ;;  %v7146_v27 = vpop.permute.xlu1 %3075  ;;  %v7148_v60 = vpop.permute.xlu0 %3073  ;;  %v4245_v16 = vld [vmem:[%s4604_s27 + $0x128] sm:$0xff]  ;;  %v7160_v56 = vmul.f32 %v4247_v18, %v7002_v17  ;;  %v4248_v36 = vld [vmem:[%s4604_s27 + $0x160] sm:$0xff]  ;;  %v2957_v18 = vmul.f32 %v6596_v9, %v2711_v59 }
 0x340   : > { %10260 = vst [vmem:[#allocation353_spill] sm:$0xff] %v7146_v27  ;;  %10261 = vst [vmem:[#allocation354_spill] sm:$0xff] %v7148_v60  ;;  %v7152_v28 = vmul.f32 %v4245_v16, %v7002_v17  ;;  %v7164_v27 = vmul.f32 %v4248_v36, %v7002_v17  ;;  %v2712_v60 = vld [vmem:[%s4604_s27 + $0x322] sm:$0xff]  ;;  %v4249_v16 = vld [vmem:[%s4604_s27 + $0x150] sm:$0xff] }
 0x341   : > { %v7170_v10 = vmul.f32 %v4249_v16, %v7002_v17  ;;  %3191 = vrot.lane.b32.xlu1 %v2956_v0, %s4542_s28  ;;  %3189 = vrot.lane.b32.xlu0 %v2955_v34, %s4542_s28  ;;  %v2958_v26 = vmul.f32 %v6596_v9, %v2712_v60  ;;  %v4250_v36 = vld [vmem:[%s4604_s27 + $0x170] sm:$0xff]  ;;  %v4252_v16 = vld [vmem:[%s4604_s27 + $0x188] sm:$0xff] }
 0x342   : > { %v7178_v11 = vmul.f32 %v4250_v36, %v7002_v17  ;;  %v7186_v0 = vmul.f32 %v4252_v16, %v7002_v17  ;;  %v4253_v34 = vld [vmem:[%s4604_s27 + $0x180] sm:$0xff]  ;;  %v4256_v16 = vld [vmem:[%s4604_s27 + $0x1b0] sm:$0xff] }
 0x343   : > { %v7190_v60 = vmul.f32 %v4253_v34, %v7002_v17  ;;  %v4254_v59 = vld [vmem:[%s4604_s27 + $0x1a0] sm:$0xff]  ;;  %v7204_v45 = vmul.f32 %v4256_v16, %v7002_v17  ;;  %v4257_v34 = vld [vmem:[%s4604_s27 + $0x1a8] sm:$0xff]  ;;  %v7210_v35 = vpop.permute.xlu1 %3079  ;;  %v7212_v57 = vpop.permute.xlu0 %3077 }
 0x344   : > { %v7196_v36 = vmul.f32 %v4254_v59, %v7002_v17  ;;  %v7208_v63 = vmul.f32 %v4257_v34, %v7002_v17  ;;  %10265 = vst [vmem:[#allocation358_spill] sm:$0xff] %v7210_v35  ;;  %10266 = vst [vmem:[#allocation359_spill] sm:$0xff] %v7212_v57  ;;  %v4258_v59 = vld [vmem:[%s4604_s27 + $0x1c8] sm:$0xff]  ;;  %v4260_v16 = vld [vmem:[%s4604_s27 + $0x1e0] sm:$0xff] }
 0x345   : > { %10263 = vst [vmem:[#allocation356_spill] sm:$0xff] %v7204_v45  ;;  %v7216_v53 = vmul.f32 %v4258_v59, %v7002_v17  ;;  %v7224_v45 = vmul.f32 %v4260_v16, %v7002_v17  ;;  %v4261_v34 = vld [vmem:[%s4604_s27 + $0x1d0] sm:$0xff]  ;;  %3195 = vrot.lane.b32.xlu1 %v2958_v26, %s4542_s28  ;;  %3193 = vrot.lane.b32.xlu0 %v2957_v18, %s4542_s28  ;;  %v4266_v18 = vld [vmem:[%s4604_s27 + $0x220] sm:$0xff] }
 0x346   : > { %10264 = vst [vmem:[#allocation357_spill] sm:$0xff] %v7208_v63  ;;  %v7228_v35 = vmul.f32 %v4261_v34, %v7002_v17  ;;  %v2714_v57 = vld [vmem:[%s4604_s27 + $0x332] sm:$0xff]  ;;  %v2713_v63 = vld [vmem:[%s4604_s27 + $0x32a] sm:$0xff] }
 0x347   : > { %10267 = vst [vmem:[#allocation360_spill] sm:$0xff] %v7216_v53  ;;  %10269 = vst [vmem:[#allocation362_spill] sm:$0xff] %v7224_v45  ;;  %v4262_v59 = vld [vmem:[%s4604_s27 + $0x1f0] sm:$0xff]  ;;  %v2960_v61 = vmul.f32 %v6596_v9, %v2714_v57  ;;  %v2959_v16 = vmul.f32 %v6596_v9, %v2713_v63  ;;  %v4263_v34 = vld [vmem:[%s4604_s27 + $0x1e8] sm:$0xff]  ;;  %v7254_v57 = vmul.f32 %v4266_v18, %v7002_v17 }
 0x348   : > { %10270 = vst [vmem:[#allocation363_spill] sm:$0xff] %v7228_v35  ;;  %v7234_v53 = vmul.f32 %v4262_v59, %v7002_v17  ;;  %v7242_v35 = vmul.f32 %v4263_v34, %v7002_v17  ;;  %v4264_v45 = vld [vmem:[%s4604_s27 + $0x208] sm:$0xff]  ;;  %v4265_v59 = vld [vmem:[%s4604_s27 + $0x200] sm:$0xff]  ;;  %v4267_v63 = vld [vmem:[%s4604_s27 + $0x210] sm:$0xff] }
 0x349   : > { %v7246_v43 = vmul.f32 %v4264_v45, %v7002_v17  ;;  %v7250_v26 = vmul.f32 %v4265_v59, %v7002_v17  ;;  %10275 = vst [vmem:[#allocation368_spill] sm:$0xff] %v7254_v57  ;;  %v7258_v34 = vmul.f32 %v4267_v63, %v7002_v17  ;;  %v7272_v57 = vpop.permute.xlu1 %3083  ;;  %v4271_v63 = vld [vmem:[%s4604_s27 + $0x240] sm:$0xff]  ;;  %3199 = vrot.lane.b32.xlu1 %v2960_v61, %s4542_s28  ;;  %v7315_v61 = vstv %s7192_s8 }
 0x34a   : > { %10271 = vst [vmem:[#allocation364_spill] sm:$0xff] %v7234_v53  ;;  %10272 = vst [vmem:[#allocation365_spill] sm:$0xff] %v7242_v35  ;;  %v4268_v35 = vld [vmem:[%s4604_s27 + $0x230] sm:$0xff]  ;;  %v7274_v53 = vpop.permute.xlu0 %3081  ;;  %3197 = vrot.lane.b32.xlu0 %v2959_v16, %s4542_s28 }
 0x34b   : > { %10273 = vst [vmem:[#allocation366_spill] sm:$0xff] %v7246_v43  ;;  %10274 = vst [vmem:[#allocation367_spill] sm:$0xff] %v7250_v26  ;;  %v7262_v45 = vmul.f32 %v4268_v35, %v7002_v17  ;;  %v4269_v43 = vld [vmem:[%s4604_s27 + $0x228] sm:$0xff]  ;;  %v4272_v35 = vld [vmem:[%s4604_s27 + $0x260] sm:$0xff] }
 0x34c   : > { %10276 = vst [vmem:[#allocation369_spill] sm:$0xff] %v7258_v34  ;;  %v7266_v59 = vmul.f32 %v4269_v43, %v7002_v17  ;;  %v4270_v26 = vld [vmem:[%s4604_s27 + $0x248] sm:$0xff]  ;;  %10280 = vst [vmem:[#allocation373_spill] sm:$0xff] %v7272_v57  ;;  %v7278_v34 = vmul.f32 %v4271_v63, %v7002_v17  ;;  %v4273_v43 = vld [vmem:[%s4604_s27 + $0x250] sm:$0xff] }
 0x34d   : > { %10277 = vst [vmem:[#allocation370_spill] sm:$0xff] %v7262_v45  ;;  %v7270_v18 = vmul.f32 %v4270_v26, %v7002_v17  ;;  %10281 = vst [vmem:[#allocation374_spill] sm:$0xff] %v7274_v53  ;;  %v7282_v45 = vmul.f32 %v4272_v35, %v7002_v17  ;;  %v4274_v26 = vld [vmem:[%s4604_s27 + $0x270] sm:$0xff]  ;;  %v4275_v63 = vld [vmem:[%s4604_s27 + $0x268] sm:$0xff] }
 0x34e   : > { %10278 = vst [vmem:[#allocation371_spill] sm:$0xff] %v7266_v59  ;;  %10282 = vst [vmem:[#allocation375_spill] sm:$0xff] %v7278_v34  ;;  %v7286_v59 = vmul.f32 %v4273_v43, %v7002_v17  ;;  %v7290_v57 = vmul.f32 %v4274_v26, %v7002_v17  ;;  %v2716_v53 = vld [vmem:[%s4604_s27 + $0x34a] sm:$0xff]  ;;  %v7296_v34 = vmul.f32 %v4275_v63, %v7002_v17  ;;  %v4278_v63 = vld [vmem:[%s4604_s27 + $0x2a0] sm:$0xff] }
 0x34f   : > { %10279 = vst [vmem:[#allocation372_spill] sm:$0xff] %v7270_v18  ;;  %10283 = vst [vmem:[#allocation376_spill] sm:$0xff] %v7282_v45  ;;  %v2715_v18 = vld [vmem:[%s4604_s27 + $0x342] sm:$0xff]  ;;  %v2962_v35 = vmul.f32 %v6596_v9, %v2716_v53  ;;  %v10290_v53 = vld [vmem:[#allocation17_spill] sm:$0xff] }
 0x350   : > { %10284 = vst [vmem:[#allocation377_spill] sm:$0xff] %v7286_v59  ;;  %10285 = vst [vmem:[#allocation378_spill] sm:$0xff] %v7290_v57  ;;  %v2961_v43 = vmul.f32 %v6596_v9, %v2715_v18  ;;  %v4276_v59 = vld [vmem:[%s4604_s27 + $0x288] sm:$0xff]  ;;  %v4277_v57 = vld [vmem:[%s4604_s27 + $0x280] sm:$0xff]  ;;  %v7319_v16 = vadd.f32 %v10290_v53, %v7012_v5  ;;  %v7337_v5 = vpop.permute.xlu0 %3085 }
 0x351   : > { %10286 = vst [vmem:[#allocation379_spill] sm:$0xff] %v7296_v34  ;;  %v7304_v26 = vmul.f32 %v4276_v59, %v7002_v17  ;;  %v7308_v45 = vmul.f32 %v4277_v57, %v7002_v17  ;;  %v7312_v34 = vmul.f32 %v4278_v63, %v7002_v17  ;;  %v4279_v18 = vld [vmem:[%s4604_s27 + $0x290] sm:$0xff]  ;;  %10296 = vst [vmem:[#allocation387_spill] sm:$0xff] %v7337_v5  ;;  %v10297_v53 = vld [vmem:[#allocation18_spill] sm:$0xff]  ;;  %3203 = vrot.lane.b32.xlu1 %v2962_v35, %s4542_s28 }
 0x352   : > { %10291 = vst [vmem:[#allocation17_spill] sm:$0xff] %v7319_v16  ;;  %v7323_v59 = vmul.f32 %v4279_v18, %v7002_v17  ;;  %v7341_v16 = vadd.f32 %v10297_v53, %v7016_v15  ;;  %v10298_v18 = vld [vmem:[#allocation21_spill] sm:$0xff]  ;;  %v10300_v5 = vld [vmem:[#allocation22_spill] sm:$0xff]  ;;  %3201 = vrot.lane.b32.xlu0 %v2961_v43, %s4542_s28 }
 0x353   : > { %10287 = vst [vmem:[#allocation380_spill] sm:$0xff] %v7304_v26  ;;  %10288 = vst [vmem:[#allocation381_spill] sm:$0xff] %v7308_v45  ;;  %v4280_v26 = vld [vmem:[%s4604_s27 + $0x2b0] sm:$0xff]  ;;  %v4281_v45 = vld [vmem:[%s4604_s27 + $0x2a8] sm:$0xff]  ;;  %v7358_v15 = vadd.f32 %v10300_v5, %v7028_v7 }
 0x354   : > { %10289 = vst [vmem:[#allocation382_spill] sm:$0xff] %v7312_v34  ;;  %10292 = vst [vmem:[#allocation383_spill] sm:$0xff] %v7323_v59  ;;  %v7327_v57 = vmul.f32 %v4280_v26, %v7002_v17  ;;  %v7331_v63 = vmul.f32 %v4281_v45, %v7002_v17  ;;  %v7335_v34 = vpop.permute.xlu1 %3087  ;;  %v7345_v26 = vadd.f32 %v10298_v18, %v7020_v14  ;;  %v2717_v59 = vld [vmem:[%s4604_s27 + $0x352] sm:$0xff]  ;;  %v4284_v7 = vld [vmem:[%s4604_s27 + $0x2e0] sm:$0xff] }
 0x355   : > { %10295 = vst [vmem:[#allocation386_spill] sm:$0xff] %v7335_v34  ;;  %v3371_v14 = vmul.f32 %v7315_v61, %v6606_v25  ;;  %v10301_v53 = vld [vmem:[#allocation25_spill] sm:$0xff]  ;;  %v7375_v35 = vmul.f32 %v4284_v7, %v7002_v17 }
 0x356   : > { %10293 = vst [vmem:[#allocation384_spill] sm:$0xff] %v7327_v57  ;;  %10294 = vst [vmem:[#allocation385_spill] sm:$0xff] %v7331_v63  ;;  %v4282_v57 = vld [vmem:[%s4604_s27 + $0x2c8] sm:$0xff]  ;;  %v4283_v63 = vld [vmem:[%s4604_s27 + $0x2c0] sm:$0xff]  ;;  %v7367_v18 = vadd.f32 %v10301_v53, %v7032_v32 }
 0x357   : > { %10299 = vst [vmem:[#allocation18_spill] sm:$0xff] %v7345_v26  ;;  %v7349_v45 = vmul.f32 %v4282_v57, %v7002_v17  ;;  %v7353_v34 = vmul.f32 %v4283_v63, %v7002_v17  ;;  %v2963_v57 = vmul.f32 %v6596_v9, %v2717_v59  ;;  %v10303_v63 = vld [vmem:[#allocation26_spill] sm:$0xff]  ;;  %v4285_v43 = vld [vmem:[%s4604_s27 + $0x2d0] sm:$0xff]  ;;  %3533 = vrot.lane.b32.xlu1 %v3371_v14, %s4543_s30 }
 0x358   : > { %10302 = vst [vmem:[#allocation21_spill] sm:$0xff] %v7367_v18  ;;  %v7371_v26 = vadd.f32 %v10303_v63, %v7036_v51  ;;  %v7379_v25 = vmul.f32 %v4285_v43, %v7002_v17  ;;  %v10304_v9 = vld [vmem:[#allocation29_spill] sm:$0xff]  ;;  %v10306_v32 = vld [vmem:[#allocation30_spill] sm:$0xff]  ;;  %v4287_v63 = vld [vmem:[%s4604_s27 + $0x2e8] sm:$0xff]  ;;  %v7397_v18 = vpop.permute.xlu1 %3091  ;;  %v7399_v43 = vpop.permute.xlu0 %3089 }
 0x359   : > { %v7383_v59 = vadd.f32 %v10304_v9, %v7040_v13  ;;  %v7387_v5 = vadd.f32 %v10306_v32, %v7046_v23  ;;  %v4286_v51 = vld [vmem:[%s4604_s27 + $0x2f0] sm:$0xff]  ;;  %v7395_v7 = vmul.f32 %v4287_v63, %v7002_v17  ;;  %10308 = vst [vmem:[#allocation26_spill] sm:$0xff] %v7397_v18  ;;  %10309 = vst [vmem:[#allocation29_spill] sm:$0xff] %v7399_v43  ;;  %v10312_v23 = vld [vmem:[#allocation34_spill] sm:$0xff]  ;;  %3205 = vrot.lane.b32.xlu0 %v2963_v57, %s4542_s28 }
 0x35a   : > { %v7391_v53 = vmul.f32 %v4286_v51, %v7002_v17  ;;  %v10310_v13 = vld [vmem:[#allocation33_spill] sm:$0xff]  ;;  %v7407_v32 = vadd.f32 %v10312_v23, %v7058_v58  ;;  %v4288_v51 = vld [vmem:[%s4604_s27 + $0x308] sm:$0xff]  ;;  %v4289_v63 = vld [vmem:[%s4604_s27 + $0x300] sm:$0xff]  ;;  %v3373_v58 = vmul.f32 %v7315_v61, %v6622_v47 }
 0x35b   : > { %10305 = vst [vmem:[#allocation22_spill] sm:$0xff] %v7383_v59  ;;  %10307 = vst [vmem:[#allocation25_spill] sm:$0xff] %v7387_v5  ;;  %v7403_v9 = vadd.f32 %v10310_v13, %v7054_v55  ;;  %v7411_v59 = vmul.f32 %v4288_v51, %v7002_v17  ;;  %v7415_v18 = vmul.f32 %v4289_v63, %v7002_v17  ;;  %v4290_v5 = vld [vmem:[%s4604_s27 + $0x320] sm:$0xff]  ;;  %v10314_v13 = vld [vmem:[#allocation37_spill] sm:$0xff] }
 0x35c   : > { %10313 = vst [vmem:[#allocation33_spill] sm:$0xff] %v7407_v32  ;;  %v7419_v43 = vmul.f32 %v4290_v5, %v7002_v17  ;;  %v3372_v55 = vmul.f32 %v7315_v61, %v6603_v39  ;;  %v7429_v23 = vadd.f32 %v10314_v13, %v7062_v1  ;;  %v10316_v51 = vld [vmem:[#allocation38_spill] sm:$0xff]  ;;  %v4291_v5 = vld [vmem:[%s4604_s27 + $0x310] sm:$0xff]  ;;  %3537 = vrot.lane.b32.xlu1 %v3373_v58, %s4543_s30 }
 0x35d   : > { %10311 = vst [vmem:[#allocation30_spill] sm:$0xff] %v7403_v9  ;;  %v7433_v63 = vadd.f32 %v10316_v51, %v7066_v6  ;;  %v7437_v14 = vmul.f32 %v4291_v5, %v7002_v17  ;;  %v4292_v57 = vld [vmem:[%s4604_s27 + $0x330] sm:$0xff]  ;;  %v10320_v1 = vld [vmem:[#allocation42_spill] sm:$0xff]  ;;  %v4293_v6 = vld [vmem:[%s4604_s27 + $0x328] sm:$0xff]  ;;  %v7458_v5 = vpop.permute.xlu1 %3095 }
 0x35e   : > { %10315 = vst [vmem:[#allocation34_spill] sm:$0xff] %v7429_v23  ;;  %v7441_v47 = vmul.f32 %v4292_v57, %v7002_v17  ;;  %v10318_v39 = vld [vmem:[#allocation41_spill] sm:$0xff]  ;;  %v7449_v13 = vadd.f32 %v10320_v1, %v7074_v19  ;;  %v7453_v51 = vmul.f32 %v4293_v6, %v7002_v17  ;;  %v7456_v23 = vstv %s7333_s9  ;;  %v4294_v19 = vld [vmem:[%s4604_s27 + $0x348] sm:$0xff]  ;;  %v4295_v6 = vld [vmem:[%s4604_s27 + $0x340] sm:$0xff]  ;;  %3535 = vrot.lane.b32.xlu0 %v3372_v55, %s4543_s30 }
 0x35f   : > { %10317 = vst [vmem:[#allocation37_spill] sm:$0xff] %v7433_v63  ;;  %v7445_v9 = vadd.f32 %v10318_v39, %v7070_v31  ;;  %10321 = vst [vmem:[#allocation41_spill] sm:$0xff] %v7458_v5  ;;  %v7460_v63 = vpop.permute.xlu0 %3093  ;;  %v10323_v57 = vld [vmem:[#allocation45_spill] sm:$0xff]  ;;  %v10324_v31 = vld [vmem:[#allocation46_spill] sm:$0xff]  ;;  %v7472_v1 = vmul.f32 %v4294_v19, %v7002_v17 }
 0x360   : > { %10322 = vst [vmem:[#allocation42_spill] sm:$0xff] %v7460_v63  ;;  %v7464_v32 = vadd.f32 %v10323_v57, %v7078_v8  ;;  %v7468_v39 = vadd.f32 %v10324_v31, %v7082_v21  ;;  %v4296_v5 = vld [vmem:[%s4604_s27 + $0x350] sm:$0xff]  ;;  %v3375_v8 = vmul.f32 %v7315_v61, %v6638_v52  ;;  %v3374_v21 = vmul.f32 %v7315_v61, %v6619_v30  ;;  %v10327_v19 = vld [vmem:[#allocation50_spill] sm:$0xff]  ;;  %v4297_v55 = vld [vmem:[%s4604_s27 + $0x1] sm:$0xff] }
 0x361   : > { %10319 = vst [vmem:[#allocation38_spill] sm:$0xff] %v7445_v9  ;;  %v7476_v9 = vmul.f32 %v4295_v6, %v7002_v17  ;;  %v7480_v63 = vmul.f32 %v4296_v5, %v7002_v17  ;;  %v10325_v57 = vld [vmem:[#allocation49_spill] sm:$0xff]  ;;  %v7494_v6 = vadd.f32 %v10327_v19, %v7094_v42  ;;  %v10328_v17 = vld [vmem:[#allocation51_spill] sm:$0xff]  ;;  %v7502_v52 = vmul.f32 %v4297_v55, %v7456_v23  ;;  %v10330_v30 = vld [vmem:[#allocation52_spill] sm:$0xff] }
 0x362   : > { %v7490_v31 = vadd.f32 %v10325_v57, %v7090_v37  ;;  %v7498_v58 = vadd.f32 %v10328_v17, %v7098_v50  ;;  %v7506_v5 = vadd.f32 %v10330_v30, %v7102_v54  ;;  %v10331_v37 = vld [vmem:[#allocation53_spill] sm:$0xff]  ;;  %v7520_v17 = vpop.permute.xlu1 %3099  ;;  %v10335_v54 = vld [vmem:[#allocation54_spill] sm:$0xff]  ;;  %3541 = vrot.lane.b32.xlu1 %v3375_v8, %s4543_s30  ;;  %3539 = vrot.lane.b32.xlu0 %v3374_v21, %s4543_s30  ;;  %v4303_v21 = vld [vmem:[%s4604_s27 + $0x41] sm:$0xff] }
 0x363   : > { %v7510_v57 = vadd.f32 %v10331_v37, %v7108_v29  ;;  %v4299_v19 = vld [vmem:[%s4604_s27 + $0x11] sm:$0xff]  ;;  %10333 = vst [vmem:[#allocation50_spill] sm:$0xff] %v7520_v17  ;;  %v7522_v55 = vpop.permute.xlu0 %3097  ;;  %v7526_v30 = vadd.f32 %v10335_v54, %v7116_v46  ;;  %v10336_v29 = vld [vmem:[#allocation55_spill] sm:$0xff]  ;;  %v10337_v17 = vld [vmem:[#allocation56_spill] sm:$0xff]  ;;  %v3377_v46 = vmul.f32 %v7315_v61, %v6654_v4  ;;  %v7564_v4 = vmul.f32 %v4303_v21, %v7456_v23 }
 0x364   : > { %10326 = vst [vmem:[#allocation45_spill] sm:$0xff] %v7490_v31  ;;  %10329 = vst [vmem:[#allocation46_spill] sm:$0xff] %v7498_v58  ;;  %v4298_v31 = vld [vmem:[%s4604_s27 + $0x9] sm:$0xff]  ;;  %v7518_v50 = vmul.f32 %v4299_v19, %v7456_v23  ;;  %v7530_v37 = vadd.f32 %v10336_v29, %v7120_v2  ;;  %v3376_v2 = vmul.f32 %v7315_v61, %v6635_v33  ;;  %v10342_v33 = vld [vmem:[#allocation59_spill] sm:$0xff] }
 0x365   : > { %10332 = vst [vmem:[#allocation49_spill] sm:$0xff] %v7510_v57  ;;  %v7514_v42 = vmul.f32 %v4298_v31, %v7456_v23  ;;  %10334 = vst [vmem:[#allocation51_spill] sm:$0xff] %v7522_v55  ;;  %v4300_v31 = vld [vmem:[%s4604_s27 + $0x21] sm:$0xff]  ;;  %v4301_v19 = vld [vmem:[%s4604_s27 + $0x29] sm:$0xff]  ;;  %v7542_v55 = vadd.f32 %v10337_v17, %v7124_v3  ;;  %v7568_v17 = vadd.f32 %v10342_v33, %v7136_v22 }
 0x366   : > { %v7534_v57 = vmul.f32 %v4300_v31, %v7456_v23  ;;  %v7538_v58 = vmul.f32 %v4301_v19, %v7456_v23  ;;  %v10338_v54 = vld [vmem:[#allocation57_spill] sm:$0xff]  ;;  %v10340_v31 = vld [vmem:[#allocation58_spill] sm:$0xff]  ;;  %3545 = vrot.lane.b32.xlu1 %v3377_v46, %s4543_s30  ;;  %3543 = vrot.lane.b32.xlu0 %v3376_v2, %s4543_s30  ;;  %v4310_v2 = vld [vmem:[%s4604_s27 + $0x81] sm:$0xff] }
 0x367   : > { %v7552_v29 = vadd.f32 %v10338_v54, %v7128_v20  ;;  %v7556_v19 = vadd.f32 %v10340_v31, %v7132_v38  ;;  %v4302_v3 = vld [vmem:[%s4604_s27 + $0x31] sm:$0xff]  ;;  %10343 = vst [vmem:[#allocation54_spill] sm:$0xff] %v7568_v17  ;;  %v10344_v20 = vld [vmem:[#allocation60_spill] sm:$0xff]  ;;  %v7584_v21 = vpop.permute.xlu0 %3101 }
 0x368   : > { %v7560_v8 = vmul.f32 %v4302_v3, %v7456_v23  ;;  %v7572_v54 = vadd.f32 %v10344_v20, %v7140_v62  ;;  %v4304_v38 = vld [vmem:[%s4604_s27 + $0x49] sm:$0xff]  ;;  %10347 = vst [vmem:[#allocation57_spill] sm:$0xff] %v7584_v21  ;;  %v10350_v62 = vld [vmem:[#allocation62_spill] sm:$0xff] }
 0x369   : > { %10339 = vst [vmem:[#allocation52_spill] sm:$0xff] %v7552_v29  ;;  %10341 = vst [vmem:[#allocation53_spill] sm:$0xff] %v7556_v19  ;;  %v7576_v31 = vmul.f32 %v4304_v38, %v7456_v23  ;;  %v4305_v29 = vld [vmem:[%s4604_s27 + $0x51] sm:$0xff]  ;;  %v7582_v19 = vpop.permute.xlu1 %3103  ;;  %v7592_v20 = vadd.f32 %v10350_v62, %v7152_v28  ;;  %v4306_v38 = vld [vmem:[%s4604_s27 + $0x61] sm:$0xff]  ;;  %v3379_v28 = vmul.f32 %v7315_v61, %v6670_v12 }
 0x36a   : > { %10345 = vst [vmem:[#allocation55_spill] sm:$0xff] %v7572_v54  ;;  %v7580_v3 = vmul.f32 %v4305_v29, %v7456_v23  ;;  %10346 = vst [vmem:[#allocation56_spill] sm:$0xff] %v7582_v19  ;;  %v10348_v22 = vld [vmem:[#allocation61_spill] sm:$0xff]  ;;  %v7596_v17 = vmul.f32 %v4306_v38, %v7456_v23  ;;  %v10353_v38 = vld [vmem:[#allocation64_spill] sm:$0xff]  ;;  %v7626_v12 = vmul.f32 %v4310_v2, %v7456_v23 }
 0x36b   : > { %v7588_v33 = vadd.f32 %v10348_v22, %v7144_v40  ;;  %v4307_v29 = vld [vmem:[%s4604_s27 + $0x69] sm:$0xff]  ;;  %v4308_v54 = vld [vmem:[%s4604_s27 + $0x71] sm:$0xff]  ;;  %v3378_v40 = vmul.f32 %v7315_v61, %v6651_v41  ;;  %v10351_v22 = vld [vmem:[#allocation63_spill] sm:$0xff]  ;;  %v7646_v2 = vpop.permute.xlu0 %3105  ;;  %3549 = vrot.lane.b32.xlu1 %v3379_v28, %s4543_s30 }
 0x36c   : > { %v7600_v19 = vmul.f32 %v4307_v29, %v7456_v23  ;;  %v7604_v21 = vmul.f32 %v4308_v54, %v7456_v23  ;;  %v7614_v62 = vadd.f32 %v10351_v22, %v7156_v48  ;;  %v7618_v29 = vadd.f32 %v10353_v38, %v7160_v56  ;;  %v4309_v54 = vld [vmem:[%s4604_s27 + $0x89] sm:$0xff]  ;;  %v10357_v48 = vld [vmem:[#allocation66_spill] sm:$0xff]  ;;  %v4311_v56 = vld [vmem:[%s4604_s27 + $0xa1] sm:$0xff]  ;;  %10360 = vst [vmem:[#allocation64_spill] sm:$0xff] %v7646_v2 }
 0x36d   : > { %10349 = vst [vmem:[#allocation58_spill] sm:$0xff] %v7588_v33  ;;  %v7622_v46 = vmul.f32 %v4309_v54, %v7456_v23  ;;  %v10355_v41 = vld [vmem:[#allocation65_spill] sm:$0xff]  ;;  %v7634_v22 = vadd.f32 %v10357_v48, %v7170_v10  ;;  %v7638_v38 = vmul.f32 %v4311_v56, %v7456_v23  ;;  %v10363_v10 = vld [vmem:[#allocation68_spill] sm:$0xff]  ;;  %3547 = vrot.lane.b32.xlu0 %v3378_v40, %s4543_s30 }
 0x36e   : > { %10352 = vst [vmem:[#allocation59_spill] sm:$0xff] %v7614_v62  ;;  %10354 = vst [vmem:[#allocation60_spill] sm:$0xff] %v7618_v29  ;;  %v7630_v33 = vadd.f32 %v10355_v41, %v7164_v27  ;;  %v4312_v62 = vld [vmem:[%s4604_s27 + $0x91] sm:$0xff]  ;;  %v7644_v29 = vpop.permute.xlu1 %3107  ;;  %v10361_v27 = vld [vmem:[#allocation67_spill] sm:$0xff]  ;;  %v7654_v48 = vadd.f32 %v10363_v10, %v7182_v44  ;;  %v3381_v44 = vmul.f32 %v7315_v61, %v6686_v24 }
 0x36f   : > { %10358 = vst [vmem:[#allocation62_spill] sm:$0xff] %v7634_v22  ;;  %v7642_v54 = vmul.f32 %v4312_v62, %v7456_v23  ;;  %10359 = vst [vmem:[#allocation63_spill] sm:$0xff] %v7644_v29  ;;  %v7650_v41 = vadd.f32 %v10361_v27, %v7178_v11  ;;  %v4313_v56 = vld [vmem:[%s4604_s27 + $0xb1] sm:$0xff]  ;;  %v4314_v62 = vld [vmem:[%s4604_s27 + $0xa9] sm:$0xff]  ;;  %v3380_v11 = vmul.f32 %v7315_v61, %v6667_v49 }
 0x370   : > { %10356 = vst [vmem:[#allocation61_spill] sm:$0xff] %v7630_v33  ;;  %10364 = vst [vmem:[#allocation66_spill] sm:$0xff] %v7654_v48  ;;  %v7658_v33 = vmul.f32 %v4313_v56, %v7456_v23  ;;  %v7662_v29 = vmul.f32 %v4314_v62, %v7456_v23  ;;  %v4315_v22 = vld [vmem:[%s4604_s27 + $0xc1] sm:$0xff]  ;;  %v10365_v27 = vld [vmem:[#allocation69_spill] sm:$0xff]  ;;  %3553 = vrot.lane.b32.xlu1 %v3381_v44, %s4543_s30 }
 0x371   : > { %10362 = vst [vmem:[#allocation65_spill] sm:$0xff] %v7650_v41  ;;  %v7666_v2 = vmul.f32 %v4315_v22, %v7456_v23  ;;  %v7676_v10 = vadd.f32 %v10365_v27, %v7186_v0  ;;  %v10367_v56 = vld [vmem:[#allocation70_spill] sm:$0xff]  ;;  %v4316_v22 = vld [vmem:[%s4604_s27 + $0xc9] sm:$0xff]  ;;  %v10371_v49 = vld [vmem:[#allocation71_spill] sm:$0xff]  ;;  %3551 = vrot.lane.b32.xlu0 %v3380_v11, %s4543_s30 }
 0x372   : > { %v7680_v62 = vadd.f32 %v10367_v56, %v7190_v60  ;;  %v7684_v28 = vmul.f32 %v4316_v22, %v7456_v23  ;;  %v4317_v40 = vld [vmem:[%s4604_s27 + $0xd1] sm:$0xff]  ;;  %v7692_v41 = vadd.f32 %v10371_v49, %v7196_v36  ;;  %v10373_v0 = vld [vmem:[#allocation355_spill] sm:$0xff]  ;;  %v10374_v27 = vld [vmem:[#allocation72_spill] sm:$0xff] }
 0x373   : > { %10366 = vst [vmem:[#allocation67_spill] sm:$0xff] %v7676_v10  ;;  %v7688_v24 = vmul.f32 %v4317_v40, %v7456_v23  ;;  %v7696_v10 = vadd.f32 %v10374_v27, %v10373_v0  ;;  %v4318_v48 = vld [vmem:[%s4604_s27 + $0xe1] sm:$0xff]  ;;  %v4319_v56 = vld [vmem:[%s4604_s27 + $0xe9] sm:$0xff]  ;;  %v7708_v40 = vpop.permute.xlu0 %3109  ;;  %v10384_v27 = vld [vmem:[#allocation74_spill] sm:$0xff] }
 0x374   : > { %10368 = vst [vmem:[#allocation68_spill] sm:$0xff] %v7680_v62  ;;  %10369 = vst [vmem:[#allocation69_spill] sm:$0xff] %v7684_v28  ;;  %v7700_v60 = vmul.f32 %v4318_v48, %v7456_v23  ;;  %v7704_v22 = vmul.f32 %v4319_v56, %v7456_v23  ;;  %v7706_v62 = vpop.permute.xlu1 %3111  ;;  %v10381_v36 = vld [vmem:[#allocation73_spill] sm:$0xff]  ;;  %v4321_v56 = vld [vmem:[%s4604_s27 + $0x101] sm:$0xff] }
 0x375   : > { %10370 = vst [vmem:[#allocation70_spill] sm:$0xff] %v7688_v24  ;;  %10372 = vst [vmem:[#allocation71_spill] sm:$0xff] %v7692_v41  ;;  %v10380_v24 = vld [vmem:[#allocation356_spill] sm:$0xff]  ;;  %v10383_v0 = vld [vmem:[#allocation357_spill] sm:$0xff] }
 0x376   : > { %10375 = vst [vmem:[#allocation355_spill] sm:$0xff] %v7696_v10  ;;  %10376 = vst [vmem:[#allocation72_spill] sm:$0xff] %v7700_v60  ;;  %v7712_v49 = vadd.f32 %v10381_v36, %v10380_v24  ;;  %v7716_v41 = vadd.f32 %v10384_v27, %v10383_v0  ;;  %v4320_v48 = vld [vmem:[%s4604_s27 + $0xf1] sm:$0xff]  ;;  %v4324_v28 = vld [vmem:[%s4604_s27 + $0x121] sm:$0xff] }
 0x377   : > { %10377 = vst [vmem:[#allocation388_spill] sm:$0xff] %v7704_v22  ;;  %10378 = vst [vmem:[#allocation389_spill] sm:$0xff] %v7706_v62  ;;  %v7720_v10 = vmul.f32 %v4320_v48, %v7456_v23  ;;  %v7724_v22 = vmul.f32 %v4321_v56, %v7456_v23  ;;  %v10388_v62 = vld [vmem:[#allocation360_spill] sm:$0xff]  ;;  %v10391_v24 = vld [vmem:[#allocation286_spill] sm:$0xff] }
 0x378   : > { %10379 = vst [vmem:[#allocation390_spill] sm:$0xff] %v7708_v40  ;;  %10382 = vst [vmem:[#allocation356_spill] sm:$0xff] %v7712_v49  ;;  %v10389_v40 = vld [vmem:[#allocation75_spill] sm:$0xff]  ;;  %v3383_v36 = vmul.f32 %v7315_v61, %v10391_v24  ;;  %v10392_v0 = vld [vmem:[#allocation282_spill] sm:$0xff] }
 0x379   : > { %10385 = vst [vmem:[#allocation73_spill] sm:$0xff] %v7716_v41  ;;  %10386 = vst [vmem:[#allocation357_spill] sm:$0xff] %v7720_v10  ;;  %v7728_v60 = vadd.f32 %v10389_v40, %v10388_v62  ;;  %v3382_v27 = vmul.f32 %v7315_v61, %v10392_v0  ;;  %v10393_v48 = vld [vmem:[#allocation361_spill] sm:$0xff]  ;;  %v10394_v49 = vld [vmem:[#allocation76_spill] sm:$0xff] }
 0x37a   : > { %10387 = vst [vmem:[#allocation74_spill] sm:$0xff] %v7724_v22  ;;  %v7738_v41 = vadd.f32 %v10394_v49, %v10393_v48  ;;  %v10396_v56 = vld [vmem:[#allocation362_spill] sm:$0xff]  ;;  %v10397_v22 = vld [vmem:[#allocation77_spill] sm:$0xff]  ;;  %v10401_v24 = vld [vmem:[#allocation363_spill] sm:$0xff]  ;;  %3557 = vrot.lane.b32.xlu1 %v3383_v36, %s4543_s30 }
 0x37b   : > { %10390 = vst [vmem:[#allocation360_spill] sm:$0xff] %v7728_v60  ;;  %v7742_v10 = vadd.f32 %v10397_v22, %v10396_v56  ;;  %v4322_v62 = vld [vmem:[%s4604_s27 + $0x109] sm:$0xff]  ;;  %v4323_v11 = vld [vmem:[%s4604_s27 + $0x111] sm:$0xff]  ;;  %v10405_v48 = vld [vmem:[#allocation79_spill] sm:$0xff]  ;;  %v7762_v22 = vmul.f32 %v4324_v28, %v7456_v23  ;;  %3555 = vrot.lane.b32.xlu0 %v3382_v27, %s4543_s30 }
 0x37c   : > { %10395 = vst [vmem:[#allocation75_spill] sm:$0xff] %v7738_v41  ;;  %v7746_v44 = vmul.f32 %v4322_v62, %v7456_v23  ;;  %v7750_v40 = vmul.f32 %v4323_v11, %v7456_v23  ;;  %v10402_v0 = vld [vmem:[#allocation78_spill] sm:$0xff]  ;;  %v10404_v49 = vld [vmem:[#allocation364_spill] sm:$0xff]  ;;  %v7770_v11 = vpop.permute.xlu0 %3113 }
 0x37d   : > { %10398 = vst [vmem:[#allocation286_spill] sm:$0xff] %v7742_v10  ;;  %v7754_v60 = vadd.f32 %v10402_v0, %v10401_v24  ;;  %v7758_v41 = vadd.f32 %v10405_v48, %v10404_v49  ;;  %10407 = vst [vmem:[#allocation77_spill] sm:$0xff] %v7762_v22  ;;  %v4325_v56 = vld [vmem:[%s4604_s27 + $0x129] sm:$0xff]  ;;  %v7768_v10 = vpop.permute.xlu1 %3115  ;;  %v10414_v49 = vld [vmem:[#allocation366_spill] sm:$0xff] }
 0x37e   : > { %10399 = vst [vmem:[#allocation282_spill] sm:$0xff] %v7746_v44  ;;  %10400 = vst [vmem:[#allocation361_spill] sm:$0xff] %v7750_v40  ;;  %v7766_v62 = vmul.f32 %v4325_v56, %v7456_v23  ;;  %v10411_v40 = vld [vmem:[#allocation365_spill] sm:$0xff]  ;;  %v10412_v24 = vld [vmem:[#allocation80_spill] sm:$0xff] }
 0x37f   : > { %10403 = vst [vmem:[#allocation76_spill] sm:$0xff] %v7754_v60  ;;  %10406 = vst [vmem:[#allocation362_spill] sm:$0xff] %v7758_v41  ;;  %v7774_v0 = vadd.f32 %v10412_v24, %v10411_v40  ;;  %v10415_v48 = vld [vmem:[#allocation81_spill] sm:$0xff]  ;;  %v4327_v56 = vld [vmem:[%s4604_s27 + $0x141] sm:$0xff] }
 0x380   : > { %10408 = vst [vmem:[#allocation363_spill] sm:$0xff] %v7766_v62  ;;  %10409 = vst [vmem:[#allocation78_spill] sm:$0xff] %v7768_v10  ;;  %v7778_v41 = vadd.f32 %v10415_v48, %v10414_v49  ;;  %v4326_v28 = vld [vmem:[%s4604_s27 + $0x131] sm:$0xff]  ;;  %v7786_v62 = vmul.f32 %v4327_v56, %v7456_v23  ;;  %v10419_v10 = vld [vmem:[#allocation367_spill] sm:$0xff] }
 0x381   : > { %10410 = vst [vmem:[#allocation364_spill] sm:$0xff] %v7770_v11  ;;  %10413 = vst [vmem:[#allocation79_spill] sm:$0xff] %v7774_v0  ;;  %v7782_v60 = vmul.f32 %v4326_v28, %v7456_v23  ;;  %v10420_v11 = vld [vmem:[#allocation82_spill] sm:$0xff]  ;;  %v10423_v49 = vld [vmem:[#allocation285_spill] sm:$0xff] }
 0x382   : > { %10416 = vst [vmem:[#allocation365_spill] sm:$0xff] %v7778_v41  ;;  %10418 = vst [vmem:[#allocation366_spill] sm:$0xff] %v7786_v62  ;;  %v7790_v22 = vadd.f32 %v10420_v11, %v10419_v10  ;;  %v10422_v40 = vld [vmem:[#allocation290_spill] sm:$0xff]  ;;  %v3384_v48 = vmul.f32 %v7315_v61, %v10423_v49  ;;  %v10424_v28 = vld [vmem:[#allocation368_spill] sm:$0xff] }
 0x383   : > { %10417 = vst [vmem:[#allocation80_spill] sm:$0xff] %v7782_v60  ;;  %v3385_v24 = vmul.f32 %v7315_v61, %v10422_v40  ;;  %v10425_v41 = vld [vmem:[#allocation83_spill] sm:$0xff]  ;;  %v10427_v56 = vld [vmem:[#allocation369_spill] sm:$0xff]  ;;  %v10428_v62 = vld [vmem:[#allocation84_spill] sm:$0xff] }
 0x384   : > { %10421 = vst [vmem:[#allocation81_spill] sm:$0xff] %v7790_v22  ;;  %v7800_v0 = vadd.f32 %v10425_v41, %v10424_v28  ;;  %v7804_v60 = vadd.f32 %v10428_v62, %v10427_v56  ;;  %v4328_v10 = vld [vmem:[%s4604_s27 + $0x149] sm:$0xff]  ;;  %v4329_v27 = vld [vmem:[%s4604_s27 + $0x151] sm:$0xff]  ;;  %v10435_v41 = vld [vmem:[#allocation371_spill] sm:$0xff]  ;;  %3559 = vrot.lane.b32.xlu0 %v3384_v48, %s4543_s30 }
 0x385   : > { %v7808_v36 = vmul.f32 %v4328_v10, %v7456_v23  ;;  %v7812_v11 = vmul.f32 %v4329_v27, %v7456_v23  ;;  %v10432_v40 = vld [vmem:[#allocation370_spill] sm:$0xff]  ;;  %v10433_v49 = vld [vmem:[#allocation85_spill] sm:$0xff]  ;;  %v4330_v62 = vld [vmem:[%s4604_s27 + $0x161] sm:$0xff]  ;;  %v7832_v27 = vpop.permute.xlu0 %3117  ;;  %3561 = vrot.lane.b32.xlu1 %v3385_v24, %s4543_s30 }
 0x386   : > { %10426 = vst [vmem:[#allocation367_spill] sm:$0xff] %v7800_v0  ;;  %10429 = vst [vmem:[#allocation82_spill] sm:$0xff] %v7804_v60  ;;  %v7816_v22 = vadd.f32 %v10433_v49, %v10432_v40  ;;  %v10436_v28 = vld [vmem:[#allocation86_spill] sm:$0xff]  ;;  %v7824_v56 = vmul.f32 %v4330_v62, %v7456_v23  ;;  %v4331_v60 = vld [vmem:[%s4604_s27 + $0x169] sm:$0xff] }
 0x387   : > { %10430 = vst [vmem:[#allocation290_spill] sm:$0xff] %v7808_v36  ;;  %10431 = vst [vmem:[#allocation285_spill] sm:$0xff] %v7812_v11  ;;  %v7820_v0 = vadd.f32 %v10436_v28, %v10435_v41  ;;  %v7828_v10 = vmul.f32 %v4331_v60, %v7456_v23  ;;  %v7830_v36 = vpop.permute.xlu1 %3119  ;;  %v10442_v11 = vld [vmem:[#allocation372_spill] sm:$0xff]  ;;  %v10443_v40 = vld [vmem:[#allocation87_spill] sm:$0xff] }
 0x388   : > { %10434 = vst [vmem:[#allocation368_spill] sm:$0xff] %v7816_v22  ;;  %10438 = vst [vmem:[#allocation369_spill] sm:$0xff] %v7824_v56  ;;  %v7836_v49 = vadd.f32 %v10443_v40, %v10442_v11  ;;  %v10445_v22 = vld [vmem:[#allocation375_spill] sm:$0xff]  ;;  %v10446_v41 = vld [vmem:[#allocation88_spill] sm:$0xff] }
 0x389   : > { %10437 = vst [vmem:[#allocation83_spill] sm:$0xff] %v7820_v0  ;;  %10439 = vst [vmem:[#allocation84_spill] sm:$0xff] %v7828_v10  ;;  %v7840_v28 = vadd.f32 %v10446_v41, %v10445_v22  ;;  %v4332_v62 = vld [vmem:[%s4604_s27 + $0x171] sm:$0xff]  ;;  %v4333_v60 = vld [vmem:[%s4604_s27 + $0x181] sm:$0xff] }
 0x38a   : > { %10440 = vst [vmem:[#allocation370_spill] sm:$0xff] %v7830_v36  ;;  %10441 = vst [vmem:[#allocation85_spill] sm:$0xff] %v7832_v27  ;;  %v7844_v0 = vmul.f32 %v4332_v62, %v7456_v23  ;;  %v7848_v36 = vmul.f32 %v4333_v60, %v7456_v23  ;;  %v4334_v10 = vld [vmem:[%s4604_s27 + $0x189] sm:$0xff]  ;;  %v10451_v22 = vld [vmem:[#allocation294_spill] sm:$0xff] }
 0x38b   : > { %10444 = vst [vmem:[#allocation371_spill] sm:$0xff] %v7836_v49  ;;  %10447 = vst [vmem:[#allocation86_spill] sm:$0xff] %v7840_v28  ;;  %v7852_v27 = vmul.f32 %v4334_v10, %v7456_v23  ;;  %v3387_v11 = vmul.f32 %v7315_v61, %v10451_v22  ;;  %v10452_v40 = vld [vmem:[#allocation289_spill] sm:$0xff]  ;;  %v10453_v62 = vld [vmem:[#allocation376_spill] sm:$0xff] }
 0x38c   : > { %10448 = vst [vmem:[#allocation372_spill] sm:$0xff] %v7844_v0  ;;  %10449 = vst [vmem:[#allocation87_spill] sm:$0xff] %v7848_v36  ;;  %v3386_v41 = vmul.f32 %v7315_v61, %v10452_v40  ;;  %v10454_v49 = vld [vmem:[#allocation89_spill] sm:$0xff]  ;;  %v10457_v36 = vld [vmem:[#allocation90_spill] sm:$0xff] }
 0x38d   : > { %10450 = vst [vmem:[#allocation375_spill] sm:$0xff] %v7852_v27  ;;  %v7862_v28 = vadd.f32 %v10454_v49, %v10453_v62  ;;  %v10456_v60 = vld [vmem:[#allocation377_spill] sm:$0xff]  ;;  %v4335_v10 = vld [vmem:[%s4604_s27 + $0x1a1] sm:$0xff]  ;;  %v10461_v40 = vld [vmem:[#allocation378_spill] sm:$0xff]  ;;  %3565 = vrot.lane.b32.xlu1 %v3387_v11, %s4543_s30 }
 0x38e   : > { %v7866_v0 = vadd.f32 %v10457_v36, %v10456_v60  ;;  %v7870_v24 = vmul.f32 %v4335_v10, %v7456_v23  ;;  %v4336_v48 = vld [vmem:[%s4604_s27 + $0x191] sm:$0xff]  ;;  %v10462_v27 = vld [vmem:[#allocation91_spill] sm:$0xff]  ;;  %v10465_v62 = vld [vmem:[#allocation92_spill] sm:$0xff]  ;;  %3563 = vrot.lane.b32.xlu0 %v3386_v41, %s4543_s30 }
 0x38f   : > { %10455 = vst [vmem:[#allocation88_spill] sm:$0xff] %v7862_v28  ;;  %v7874_v22 = vmul.f32 %v4336_v48, %v7456_v23  ;;  %v7878_v56 = vadd.f32 %v10462_v27, %v10461_v40  ;;  %v10464_v49 = vld [vmem:[#allocation379_spill] sm:$0xff]  ;;  %v4337_v36 = vld [vmem:[%s4604_s27 + $0x1b1] sm:$0xff]  ;;  %v7894_v48 = vpop.permute.xlu0 %3121  ;;  %v4343_v41 = vld [vmem:[%s4604_s27 + $0x1e9] sm:$0xff] }
 0x390   : > { %10458 = vst [vmem:[#allocation294_spill] sm:$0xff] %v7866_v0  ;;  %10459 = vst [vmem:[#allocation289_spill] sm:$0xff] %v7870_v24  ;;  %v7882_v28 = vadd.f32 %v10465_v62, %v10464_v49  ;;  %v7886_v60 = vmul.f32 %v4337_v36, %v7456_v23  ;;  %v4338_v0 = vld [vmem:[%s4604_s27 + $0x1a9] sm:$0xff]  ;;  %v7892_v24 = vpop.permute.xlu1 %3123  ;;  %v10475_v49 = vld [vmem:[#allocation94_spill] sm:$0xff] }
 0x391   : > { %10460 = vst [vmem:[#allocation376_spill] sm:$0xff] %v7874_v22  ;;  %10463 = vst [vmem:[#allocation89_spill] sm:$0xff] %v7878_v56  ;;  %v7890_v10 = vmul.f32 %v4338_v0, %v7456_v23  ;;  %v10471_v22 = vld [vmem:[#allocation380_spill] sm:$0xff]  ;;  %v10472_v27 = vld [vmem:[#allocation93_spill] sm:$0xff] }
 0x392   : > { %10466 = vst [vmem:[#allocation377_spill] sm:$0xff] %v7882_v28  ;;  %10467 = vst [vmem:[#allocation90_spill] sm:$0xff] %v7886_v60  ;;  %v7898_v40 = vadd.f32 %v10472_v27, %v10471_v22  ;;  %v10474_v56 = vld [vmem:[#allocation381_spill] sm:$0xff]  ;;  %v4340_v0 = vld [vmem:[%s4604_s27 + $0x1c1] sm:$0xff] }
 0x393   : > { %10468 = vst [vmem:[#allocation378_spill] sm:$0xff] %v7890_v10  ;;  %10469 = vst [vmem:[#allocation91_spill] sm:$0xff] %v7892_v24  ;;  %v7902_v62 = vadd.f32 %v10475_v49, %v10474_v56  ;;  %v4339_v36 = vld [vmem:[%s4604_s27 + $0x1c9] sm:$0xff]  ;;  %v7910_v24 = vmul.f32 %v4340_v0, %v7456_v23  ;;  %v4341_v60 = vld [vmem:[%s4604_s27 + $0x1d1] sm:$0xff] }
 0x394   : > { %10470 = vst [vmem:[#allocation379_spill] sm:$0xff] %v7894_v48  ;;  %10473 = vst [vmem:[#allocation92_spill] sm:$0xff] %v7898_v40  ;;  %v7906_v28 = vmul.f32 %v4339_v36, %v7456_v23  ;;  %v7914_v48 = vmul.f32 %v4341_v60, %v7456_v23  ;;  %v10480_v56 = vld [vmem:[#allocation297_spill] sm:$0xff]  ;;  %v10482_v36 = vld [vmem:[#allocation382_spill] sm:$0xff] }
 0x395   : > { %10476 = vst [vmem:[#allocation380_spill] sm:$0xff] %v7902_v62  ;;  %10478 = vst [vmem:[#allocation381_spill] sm:$0xff] %v7910_v24  ;;  %v3389_v22 = vmul.f32 %v7315_v61, %v10480_v56  ;;  %v10481_v27 = vld [vmem:[#allocation293_spill] sm:$0xff]  ;;  %v10483_v40 = vld [vmem:[#allocation95_spill] sm:$0xff]  ;;  %v7936_v56 = vmul.f32 %v4343_v41, %v7456_v23  ;;  %v7956_v41 = vpop.permute.xlu0 %3125 }
 0x396   : > { %10477 = vst [vmem:[#allocation93_spill] sm:$0xff] %v7906_v28  ;;  %10479 = vst [vmem:[#allocation94_spill] sm:$0xff] %v7914_v48  ;;  %v3388_v49 = vmul.f32 %v7315_v61, %v10481_v27  ;;  %v7924_v62 = vadd.f32 %v10483_v40, %v10482_v36  ;;  %v10485_v0 = vld [vmem:[#allocation383_spill] sm:$0xff]  ;;  %v10486_v24 = vld [vmem:[#allocation96_spill] sm:$0xff] }
 0x397   : > { %v7928_v28 = vadd.f32 %v10486_v24, %v10485_v0  ;;  %v4342_v60 = vld [vmem:[%s4604_s27 + $0x1e1] sm:$0xff]  ;;  %v10489_v27 = vld [vmem:[#allocation97_spill] sm:$0xff]  ;;  %v10492_v36 = vld [vmem:[#allocation98_spill] sm:$0xff]  ;;  %10495 = vst [vmem:[#allocation96_spill] sm:$0xff] %v7956_v41  ;;  %3569 = vrot.lane.b32.xlu1 %v3389_v22, %s4543_s30 }
 0x398   : > { %10484 = vst [vmem:[#allocation297_spill] sm:$0xff] %v7924_v62  ;;  %v7932_v11 = vmul.f32 %v4342_v60, %v7456_v23  ;;  %v10488_v48 = vld [vmem:[#allocation384_spill] sm:$0xff]  ;;  %v10491_v40 = vld [vmem:[#allocation385_spill] sm:$0xff]  ;;  %3567 = vrot.lane.b32.xlu0 %v3388_v49, %s4543_s30 }
 0x399   : > { %10487 = vst [vmem:[#allocation293_spill] sm:$0xff] %v7928_v28  ;;  %v7940_v10 = vadd.f32 %v10489_v27, %v10488_v48  ;;  %v7944_v62 = vadd.f32 %v10492_v36, %v10491_v40  ;;  %v4344_v44 = vld [vmem:[%s4604_s27 + $0x1f1] sm:$0xff]  ;;  %v4345_v0 = vld [vmem:[%s4604_s27 + $0x201] sm:$0xff]  ;;  %v7954_v28 = vpop.permute.xlu1 %3127 }
 0x39a   : > { %v7948_v24 = vmul.f32 %v4344_v44, %v7456_v23  ;;  %v7952_v60 = vmul.f32 %v4345_v0, %v7456_v23  ;;  %10494 = vst [vmem:[#allocation383_spill] sm:$0xff] %v7954_v28  ;;  %v10496_v48 = vld [vmem:[#allocation99_spill] sm:$0xff]  ;;  %v10498_v40 = vld [vmem:[#allocation100_spill] sm:$0xff]  ;;  %v4347_v0 = vld [vmem:[%s4604_s27 + $0x211] sm:$0xff] }
 0x39b   : > { %10490 = vst [vmem:[#allocation382_spill] sm:$0xff] %v7940_v10  ;;  %10493 = vst [vmem:[#allocation95_spill] sm:$0xff] %v7944_v62  ;;  %v7960_v27 = vadd.f32 %v10496_v48, %v7349_v45  ;;  %v7964_v36 = vadd.f32 %v10498_v40, %v7353_v34  ;;  %v4346_v44 = vld [vmem:[%s4604_s27 + $0x209] sm:$0xff]  ;;  %v7972_v28 = vmul.f32 %v4347_v0, %v7456_v23  ;;  %v4349_v22 = vld [vmem:[%s4604_s27 + $0x221] sm:$0xff] }
 0x39c   : > { %v7968_v10 = vmul.f32 %v4346_v44, %v7456_v23  ;;  %v10499_v41 = vld [vmem:[#allocation101_spill] sm:$0xff]  ;;  %v10501_v34 = vld [vmem:[#allocation300_spill] sm:$0xff]  ;;  %v10503_v44 = vld [vmem:[#allocation102_spill] sm:$0xff]  ;;  %v7997_v49 = vmul.f32 %v4349_v22, %v7456_v23 }
 0x39d   : > { %10497 = vst [vmem:[#allocation384_spill] sm:$0xff] %v7960_v27  ;;  %v7976_v62 = vadd.f32 %v10499_v41, %v7375_v35  ;;  %v3391_v45 = vmul.f32 %v7315_v61, %v10501_v34  ;;  %v7983_v48 = vld [vmem:[%s4604_s27 + $0xca] sm:$0xff]  ;;  %v7989_v0 = vadd.f32 %v10503_v44, %v7379_v25  ;;  %v10505_v35 = vld [vmem:[#allocation103_spill] sm:$0xff] }
 0x39e   : > { %10502 = vst [vmem:[#allocation385_spill] sm:$0xff] %v7983_v48  ;;  %v3390_v40 = vmul.f32 %v7983_v48, %v7315_v61  ;;  %v7993_v41 = vadd.f32 %v10505_v35, %v7391_v53  ;;  %v4350_v34 = vld [vmem:[%s4604_s27 + $0x229] sm:$0xff]  ;;  %v4351_v53 = vld [vmem:[%s4604_s27 + $0x231] sm:$0xff]  ;;  %v4352_v22 = vld [vmem:[%s4604_s27 + $0x241] sm:$0xff] }
 0x39f   : > { %10500 = vst [vmem:[#allocation97_spill] sm:$0xff] %v7976_v62  ;;  %10504 = vst [vmem:[#allocation98_spill] sm:$0xff] %v7989_v0  ;;  %v8001_v62 = vmul.f32 %v4350_v34, %v7456_v23  ;;  %v10507_v48 = vld [vmem:[#allocation104_spill] sm:$0xff]  ;;  %v10509_v25 = vld [vmem:[#allocation105_spill] sm:$0xff]  ;;  %v8013_v35 = vmul.f32 %v4351_v53, %v7456_v23  ;;  %v8019_v34 = vpop.permute.xlu1 %3131  ;;  %v8021_v0 = vpop.permute.xlu0 %3129  ;;  %3573 = vrot.lane.b32.xlu1 %v3391_v45, %s4543_s30 }
 0x3a0   : > { %10506 = vst [vmem:[#allocation99_spill] sm:$0xff] %v7993_v41  ;;  %v8005_v27 = vadd.f32 %v10507_v48, %v7395_v7  ;;  %v8009_v44 = vadd.f32 %v10509_v25, %v7411_v59  ;;  %v8017_v41 = vmul.f32 %v4352_v22, %v7456_v23  ;;  %10511 = vst [vmem:[#allocation300_spill] sm:$0xff] %v8019_v34  ;;  %v10513_v7 = vld [vmem:[#allocation106_spill] sm:$0xff]  ;;  %v10515_v59 = vld [vmem:[#allocation8_spill] sm:$0xff]  ;;  %3571 = vrot.lane.b32.xlu0 %v3390_v40, %s4543_s30 }
 0x3a1   : > { %10512 = vst [vmem:[#allocation102_spill] sm:$0xff] %v8021_v0  ;;  %v8025_v48 = vadd.f32 %v10513_v7, %v7415_v18  ;;  %v8029_v25 = vadd.f32 %v10515_v59, %v7419_v43  ;;  %v4353_v53 = vld [vmem:[%s4604_s27 + $0x249] sm:$0xff]  ;;  %v4354_v22 = vld [vmem:[%s4604_s27 + $0x251] sm:$0xff]  ;;  %v4357_v40 = vld [vmem:[%s4604_s27 + $0x261] sm:$0xff] }
 0x3a2   : > { %10508 = vst [vmem:[#allocation100_spill] sm:$0xff] %v8005_v27  ;;  %10510 = vst [vmem:[#allocation101_spill] sm:$0xff] %v8009_v44  ;;  %v8033_v44 = vmul.f32 %v4353_v53, %v7456_v23  ;;  %v8037_v27 = vmul.f32 %v4354_v22, %v7456_v23  ;;  %v10517_v34 = vld [vmem:[#allocation6_spill] sm:$0xff]  ;;  %v8046_v18 = vld [vmem:[%s4604_s27 + $0xea] sm:$0xff] }
 0x3a3   : > { %10514 = vst [vmem:[#allocation103_spill] sm:$0xff] %v8025_v48  ;;  %10516 = vst [vmem:[#allocation104_spill] sm:$0xff] %v8029_v25  ;;  %v8041_v0 = vadd.f32 %v10517_v34, %v7437_v14  ;;  %v3393_v43 = vmul.f32 %v8046_v18, %v7315_v61  ;;  %v8051_v7 = vld [vmem:[%s4604_s27 + $0xe2] sm:$0xff]  ;;  %v10521_v53 = vld [vmem:[#allocation10_spill] sm:$0xff]  ;;  %v8065_v34 = vmul.f32 %v4357_v40, %v7456_v23 }
 0x3a4   : > { %10519 = vst [vmem:[#allocation106_spill] sm:$0xff] %v8046_v18  ;;  %10520 = vst [vmem:[#allocation8_spill] sm:$0xff] %v8051_v7  ;;  %v3392_v59 = vmul.f32 %v8051_v7, %v7315_v61  ;;  %v8057_v22 = vadd.f32 %v10521_v53, %v7441_v47  ;;  %v10523_v14 = vld [vmem:[#allocation7_spill] sm:$0xff]  ;;  %v4358_v18 = vld [vmem:[%s4604_s27 + $0x269] sm:$0xff] }
 0x3a5   : > { %10518 = vst [vmem:[#allocation105_spill] sm:$0xff] %v8041_v0  ;;  %v8061_v45 = vadd.f32 %v10523_v14, %v7453_v51  ;;  %v8069_v25 = vmul.f32 %v4358_v18, %v7456_v23  ;;  %v10526_v7 = vld [vmem:[#allocation12_spill] sm:$0xff]  ;;  %v10528_v47 = vld [vmem:[#allocation14_spill] sm:$0xff]  ;;  %v8087_v18 = vpop.permute.xlu0 %3133  ;;  %3577 = vrot.lane.b32.xlu1 %v3393_v43, %s4543_s30 }
 0x3a6   : > { %10522 = vst [vmem:[#allocation6_spill] sm:$0xff] %v8057_v22  ;;  %v8073_v0 = vadd.f32 %v10526_v7, %v7472_v1  ;;  %v1334_v53 = vadd.f32 %v10528_v47, %v7341_v16  ;;  %v4359_v51 = vld [vmem:[%s4604_s27 + $0x271] sm:$0xff]  ;;  %v4360_v40 = vld [vmem:[%s4604_s27 + $0x281] sm:$0xff]  ;;  %10532 = vst [vmem:[#allocation393_spill] sm:$0xff] %v8087_v18  ;;  %3575 = vrot.lane.b32.xlu0 %v3392_v59, %s4543_s30 }
 0x3a7   : > { %10524 = vst [vmem:[#allocation10_spill] sm:$0xff] %v8061_v45  ;;  %10525 = vst [vmem:[#allocation7_spill] sm:$0xff] %v8069_v25  ;;  %v8079_v14 = vmul.f32 %v4359_v51, %v7456_v23  ;;  %v8083_v22 = vmul.f32 %v4360_v40, %v7456_v23  ;;  %v8085_v45 = vpop.permute.xlu1 %3135  ;;  %v10533_v1 = vld [vmem:[#allocation9_spill] sm:$0xff]  ;;  %v10536_v47 = vld [vmem:[#allocation16_spill] sm:$0xff] }
 0x3a8   : > { %10527 = vst [vmem:[#allocation12_spill] sm:$0xff] %v8073_v0  ;;  %10531 = vst [vmem:[#allocation392_spill] sm:$0xff] %v8085_v45  ;;  %v8091_v7 = vadd.f32 %v10533_v1, %v7476_v9  ;;  %v10535_v16 = vld [vmem:[#allocation17_spill] sm:$0xff]  ;;  %v8108_v9 = vld [vmem:[%s4604_s27 + $0x102] sm:$0xff] }
 0x3a9   : > { %10529 = vst [vmem:[#allocation14_spill] sm:$0xff] %v8079_v14  ;;  %10530 = vst [vmem:[#allocation391_spill] sm:$0xff] %v8083_v22  ;;  %v1336_v0 = vadd.f32 %v10536_v47, %v10535_v16  ;;  %v10537_v51 = vld [vmem:[#allocation13_spill] sm:$0xff]  ;;  %v3395_v1 = vmul.f32 %v8108_v9, %v7315_v61  ;;  %v4365_v18 = vld [vmem:[%s4604_s27 + $0x2a1] sm:$0xff] }
 0x3aa   : > { %10534 = vst [vmem:[#allocation9_spill] sm:$0xff] %v8091_v7  ;;  %v1335_v48 = vadd.f32 %v10537_v51, %v7358_v15  ;;  %v4361_v14 = vld [vmem:[%s4604_s27 + $0x289] sm:$0xff]  ;;  %v4362_v22 = vld [vmem:[%s4604_s27 + $0x291] sm:$0xff]  ;;  %10540 = vst [vmem:[#allocation13_spill] sm:$0xff] %v8108_v9  ;;  %v8125_v59 = vmul.f32 %v4365_v18, %v7456_v23 }
 0x3ab   : > { %v8099_v40 = vmul.f32 %v4361_v14, %v7456_v23  ;;  %v8103_v45 = vmul.f32 %v4362_v22, %v7456_v23  ;;  %v8113_v16 = vld [vmem:[%s4604_s27 + $0xf2] sm:$0xff]  ;;  %v10542_v14 = vld [vmem:[#allocation11_spill] sm:$0xff]  ;;  %v4366_v7 = vld [vmem:[%s4604_s27 + $0x2a9] sm:$0xff]  ;;  %v8142_v18 = vpop.permute.xlu1 %3139  ;;  %3581 = vrot.lane.b32.xlu1 %v3395_v1, %s4543_s30 }
 0x3ac   : > { %10541 = vst [vmem:[#allocation394_spill] sm:$0xff] %v8113_v16  ;;  %v3394_v15 = vmul.f32 %v8113_v16, %v7315_v61  ;;  %v8119_v47 = vadd.f32 %v10542_v14, %v7480_v63  ;;  %v10544_v22 = vld [vmem:[#allocation18_spill] sm:$0xff]  ;;  %v10545_v51 = vld [vmem:[#allocation15_spill] sm:$0xff]  ;;  %v8129_v9 = vmul.f32 %v4366_v7, %v7456_v23  ;;  %v8136_v14 = vadd.f32 %v7502_v52, %v1334_v53  ;;  %v10554_v7 = vld [vmem:[#allocation25_spill] sm:$0xff] }
 0x3ad   : > { %10538 = vst [vmem:[#allocation17_spill] sm:$0xff] %v8099_v40  ;;  %10539 = vst [vmem:[#allocation16_spill] sm:$0xff] %v8103_v45  ;;  %v1337_v43 = vadd.f32 %v10545_v51, %v10544_v22  ;;  %v10548_v45 = vld [vmem:[#allocation20_spill] sm:$0xff]  ;;  %v10549_v40 = vld [vmem:[#allocation21_spill] sm:$0xff] }
 0x3ae   : > { %10543 = vst [vmem:[#allocation11_spill] sm:$0xff] %v8119_v47  ;;  %10546 = vst [vmem:[#allocation18_spill] sm:$0xff] %v8125_v59  ;;  %v1338_v16 = vadd.f32 %v10548_v45, %v7371_v26  ;;  %v10550_v25 = vld [vmem:[#allocation19_spill] sm:$0xff]  ;;  %v4367_v22 = vld [vmem:[%s4604_s27 + $0x2b1] sm:$0xff]  ;;  %v8144_v47 = vpop.permute.xlu0 %3137  ;;  %v8149_v26 = vadd.f32 %v7514_v42, %v1335_v48  ;;  %3579 = vrot.lane.b32.xlu0 %v3394_v15, %s4543_s30 }
 0x3af   : > { %10547 = vst [vmem:[#allocation15_spill] sm:$0xff] %v8129_v9  ;;  %v1339_v63 = vadd.f32 %v10550_v25, %v10549_v40  ;;  %10551 = vst [vmem:[#allocation20_spill] sm:$0xff] %v8136_v14  ;;  %v8140_v51 = vmul.f32 %v4367_v22, %v7456_v23  ;;  %v10555_v9 = vld [vmem:[#allocation24_spill] sm:$0xff]  ;;  %v8152_v25 = vadd.f32 %v7518_v50, %v1336_v0  ;;  %v10559_v0 = vld [vmem:[#allocation33_spill] sm:$0xff] }
 0x3b0   : > { %10552 = vst [vmem:[#allocation21_spill] sm:$0xff] %v8142_v18  ;;  %10553 = vst [vmem:[#allocation19_spill] sm:$0xff] %v8144_v47  ;;  %v1340_v59 = vadd.f32 %v10555_v9, %v10554_v7  ;;  %v4368_v52 = vld [vmem:[%s4604_s27 + $0x2c1] sm:$0xff]  ;;  %v4369_v53 = vld [vmem:[%s4604_s27 + $0x2c9] sm:$0xff]  ;;  %v8176_v47 = vadd.f32 %v7534_v57, %v1337_v43  ;;  %v8196_v43 = vpop.permute.xlu1 %3143 }
 0x3b1   : > { %10556 = vst [vmem:[#allocation25_spill] sm:$0xff] %v8149_v26  ;;  %10557 = vst [vmem:[#allocation24_spill] sm:$0xff] %v8152_v25  ;;  %v8156_v45 = vmul.f32 %v4368_v52, %v7456_v23  ;;  %v8160_v40 = vmul.f32 %v4369_v53, %v7456_v23  ;;  %v4370_v9 = vld [vmem:[%s4604_s27 + $0x112] sm:$0xff]  ;;  %v8167_v48 = vld [vmem:[%s4604_s27 + $0x10a] sm:$0xff] }
 0x3b2   : > { %v3397_v42 = vmul.f32 %v4370_v9, %v7315_v61  ;;  %10558 = vst [vmem:[#allocation395_spill] sm:$0xff] %v8167_v48  ;;  %v3396_v50 = vmul.f32 %v8167_v48, %v7315_v61  ;;  %v10560_v22 = vld [vmem:[#allocation28_spill] sm:$0xff]  ;;  %v10561_v52 = vld [vmem:[#allocation22_spill] sm:$0xff]  ;;  %v10562_v18 = vld [vmem:[#allocation23_spill] sm:$0xff]  ;;  %v8183_v9 = vadd.f32 %v7560_v8, %v1339_v63  ;;  %v8186_v48 = vadd.f32 %v7538_v58, %v1338_v16 }
 0x3b3   : > { %v1342_v7 = vadd.f32 %v10560_v22, %v10559_v0  ;;  %v1341_v53 = vadd.f32 %v10562_v18, %v10561_v52  ;;  %10563 = vst [vmem:[#allocation33_spill] sm:$0xff] %v8176_v47  ;;  %v4372_v1 = vld [vmem:[%s4604_s27 + $0x2d1] sm:$0xff]  ;;  %v4373_v0 = vld [vmem:[%s4604_s27 + $0x2e1] sm:$0xff]  ;;  %v4374_v18 = vld [vmem:[%s4604_s27 + $0x2e9] sm:$0xff]  ;;  %v8198_v52 = vpop.permute.xlu0 %3141 }
 0x3b4   : > { %v8180_v15 = vmul.f32 %v4372_v1, %v7456_v23  ;;  %10564 = vst [vmem:[#allocation28_spill] sm:$0xff] %v8183_v9  ;;  %10565 = vst [vmem:[#allocation22_spill] sm:$0xff] %v8186_v48  ;;  %v8190_v22 = vmul.f32 %v4373_v0, %v7456_v23  ;;  %v8194_v57 = vmul.f32 %v4374_v18, %v7456_v23  ;;  %v10568_v1 = vld [vmem:[#allocation37_spill] sm:$0xff]  ;;  %v10569_v8 = vld [vmem:[#allocation32_spill] sm:$0xff]  ;;  %3585 = vrot.lane.b32.xlu1 %v3397_v42, %s4543_s30 }
 0x3b5   : > { %10566 = vst [vmem:[#allocation23_spill] sm:$0xff] %v8196_v43  ;;  %10567 = vst [vmem:[#allocation396_spill] sm:$0xff] %v8198_v52  ;;  %v1344_v63 = vadd.f32 %v10569_v8, %v10568_v1  ;;  %v10570_v9 = vld [vmem:[#allocation30_spill] sm:$0xff]  ;;  %v10571_v58 = vld [vmem:[#allocation27_spill] sm:$0xff]  ;;  %v8205_v48 = vadd.f32 %v7564_v4, %v1340_v59  ;;  %3583 = vrot.lane.b32.xlu0 %v3396_v50, %s4543_s30  ;;  %v8229_v42 = vadd.f32 %v7580_v3, %v1342_v7 }
 0x3b6   : > { %v1343_v16 = vadd.f32 %v10571_v58, %v10570_v9  ;;  %v4375_v0 = vld [vmem:[%s4604_s27 + $0x2f1] sm:$0xff]  ;;  %v4376_v18 = vld [vmem:[%s4604_s27 + $0x301] sm:$0xff]  ;;  %v4379_v26 = vld [vmem:[%s4604_s27 + $0x309] sm:$0xff] }
 0x3b7   : > { %10572 = vst [vmem:[#allocation37_spill] sm:$0xff] %v8205_v48  ;;  %v8209_v25 = vmul.f32 %v4375_v0, %v7456_v23  ;;  %v8213_v43 = vmul.f32 %v4376_v18, %v7456_v23  ;;  %v4377_v1 = vld [vmem:[%s4604_s27 + $0x12a] sm:$0xff]  ;;  %v4378_v8 = vld [vmem:[%s4604_s27 + $0x122] sm:$0xff]  ;;  %v10574_v0 = vld [vmem:[#allocation34_spill] sm:$0xff]  ;;  %v8226_v18 = vadd.f32 %v7576_v31, %v1341_v53  ;;  %v8243_v31 = vpop.permute.xlu1 %3147  ;;  %v8245_v3 = vpop.permute.xlu0 %3145 }
 0x3b8   : > { %v3399_v9 = vmul.f32 %v4377_v1, %v7315_v61  ;;  %v3398_v4 = vmul.f32 %v4378_v8, %v7315_v61  ;;  %v10573_v59 = vld [vmem:[#allocation36_spill] sm:$0xff]  ;;  %v10575_v52 = vld [vmem:[#allocation31_spill] sm:$0xff]  ;;  %10576 = vst [vmem:[#allocation32_spill] sm:$0xff] %v8229_v42  ;;  %v10578_v47 = vld [vmem:[#allocation38_spill] sm:$0xff] }
 0x3b9   : > { %v1346_v58 = vadd.f32 %v10573_v59, %v7449_v13  ;;  %v1345_v48 = vadd.f32 %v10575_v52, %v10574_v0  ;;  %v10577_v50 = vld [vmem:[#allocation40_spill] sm:$0xff]  ;;  %v10579_v14 = vld [vmem:[#allocation35_spill] sm:$0xff]  ;;  %v8237_v13 = vmul.f32 %v4379_v26, %v7456_v23  ;;  %v4380_v52 = vld [vmem:[%s4604_s27 + $0x311] sm:$0xff]  ;;  %10580 = vst [vmem:[#allocation30_spill] sm:$0xff] %v8243_v31 }
 0x3ba   : > { %v1348_v1 = vadd.f32 %v10577_v50, %v7468_v39  ;;  %v1347_v8 = vadd.f32 %v10579_v14, %v10578_v47  ;;  %v8241_v59 = vmul.f32 %v4380_v52, %v7456_v23  ;;  %10581 = vst [vmem:[#allocation27_spill] sm:$0xff] %v8245_v3  ;;  %v10582_v7 = vld [vmem:[#allocation39_spill] sm:$0xff]  ;;  %v8250_v47 = vadd.f32 %v7596_v17, %v1343_v16  ;;  %v4382_v0 = vld [vmem:[%s4604_s27 + $0x329] sm:$0xff]  ;;  %v4384_v16 = vld [vmem:[%s4604_s27 + $0x132] sm:$0xff] }
 0x3bb   : > { %v1349_v39 = vadd.f32 %v10582_v7, %v7464_v32  ;;  %v8253_v14 = vadd.f32 %v7600_v19, %v1344_v63  ;;  %v4381_v26 = vld [vmem:[%s4604_s27 + $0x321] sm:$0xff]  ;;  %v8261_v50 = vmul.f32 %v4382_v0, %v7456_v23  ;;  %3589 = vrot.lane.b32.xlu1 %v3399_v9, %s4543_s30  ;;  %3587 = vrot.lane.b32.xlu0 %v3398_v4, %s4543_s30  ;;  %v4385_v7 = vld [vmem:[%s4604_s27 + $0x331] sm:$0xff] }
 0x3bc   : > { %10583 = vst [vmem:[#allocation36_spill] sm:$0xff] %v8250_v47  ;;  %v8257_v53 = vmul.f32 %v4381_v26, %v7456_v23  ;;  %v4383_v32 = vld [vmem:[%s4604_s27 + $0x142] sm:$0xff]  ;;  %v3400_v19 = vmul.f32 %v4384_v16, %v7315_v61  ;;  %v8270_v63 = vadd.f32 %v7604_v21, %v1345_v48  ;;  %v8273_v52 = vadd.f32 %v7626_v12, %v1346_v58  ;;  %v8295_v58 = vpop.permute.xlu1 %3151  ;;  %v10593_v3 = vld [vmem:[#allocation45_spill] sm:$0xff] }
 0x3bd   : > { %10584 = vst [vmem:[#allocation34_spill] sm:$0xff] %v8253_v14  ;;  %v3401_v17 = vmul.f32 %v4383_v32, %v7315_v61  ;;  %v8277_v26 = vmul.f32 %v4385_v7, %v7456_v23  ;;  %v4386_v9 = vld [vmem:[%s4604_s27 + $0x341] sm:$0xff]  ;;  %v8286_v16 = vadd.f32 %v7622_v46, %v1347_v8  ;;  %v8289_v21 = vadd.f32 %v7642_v54, %v1348_v1  ;;  %v4387_v12 = vld [vmem:[%s4604_s27 + $0x349] sm:$0xff]  ;;  %v8297_v7 = vpop.permute.xlu0 %3149  ;;  %v4388_v8 = vld [vmem:[%s4604_s27 + $0x351] sm:$0xff] }
 0x3be   : > { %10585 = vst [vmem:[#allocation31_spill] sm:$0xff] %v8270_v63  ;;  %10586 = vst [vmem:[#allocation40_spill] sm:$0xff] %v8273_v52  ;;  %v8281_v4 = vmul.f32 %v4386_v9, %v7456_v23  ;;  %v10587_v0 = vld [vmem:[#allocation44_spill] sm:$0xff]  ;;  %v8293_v48 = vmul.f32 %v4387_v12, %v7456_v23  ;;  %v8304_v46 = vadd.f32 %v7638_v38, %v1349_v39  ;;  %v10596_v1 = vld [vmem:[#allocation46_spill] sm:$0xff] }
 0x3bf   : > { %v1350_v32 = vadd.f32 %v10587_v0, %v7494_v6  ;;  %10588 = vst [vmem:[#allocation38_spill] sm:$0xff] %v8286_v16  ;;  %10589 = vst [vmem:[#allocation35_spill] sm:$0xff] %v8289_v21  ;;  %v10592_v9 = vld [vmem:[#allocation48_spill] sm:$0xff]  ;;  %v10594_v6 = vld [vmem:[#allocation43_spill] sm:$0xff]  ;;  %v8308_v54 = vmul.f32 %v4388_v8, %v7456_v23  ;;  %3593 = vrot.lane.b32.xlu1 %v3401_v17, %s4543_s30  ;;  %3591 = vrot.lane.b32.xlu0 %v3400_v19, %s4543_s30 }
 0x3c0   : > { %10590 = vst [vmem:[#allocation39_spill] sm:$0xff] %v8295_v58  ;;  %10591 = vst [vmem:[#allocation44_spill] sm:$0xff] %v8297_v7  ;;  %v1352_v31 = vadd.f32 %v10592_v9, %v7506_v5  ;;  %v1351_v0 = vadd.f32 %v10594_v6, %v10593_v3  ;;  %v10597_v12 = vld [vmem:[#allocation107_spill] sm:$0xff]  ;;  %v4389_v58 = vld [vmem:[%s4604_s27 + $0x152] sm:$0xff] }
 0x3c1   : > { %10595 = vst [vmem:[#allocation48_spill] sm:$0xff] %v8304_v46  ;;  %v1353_v21 = vadd.f32 %v10597_v12, %v10596_v1  ;;  %v3403_v5 = vmul.f32 %v4389_v58, %v7315_v61  ;;  %v4390_v9 = vld [vmem:[%s4604_s27 + $0x14a] sm:$0xff]  ;;  %v10598_v38 = vld [vmem:[#allocation47_spill] sm:$0xff]  ;;  %v10604_v46 = vld [vmem:[#allocation110_spill] sm:$0xff]  ;;  %v8336_v47 = vpop.permute.xlu0 %3153 }
 0x3c2   : > { %v3402_v3 = vmul.f32 %v4390_v9, %v7315_v61  ;;  %v1354_v39 = vadd.f32 %v10598_v38, %v7526_v30  ;;  %v10599_v6 = vld [vmem:[#allocation108_spill] sm:$0xff]  ;;  %v10600_v8 = vld [vmem:[#allocation49_spill] sm:$0xff]  ;;  %v10602_v17 = vld [vmem:[#allocation111_spill] sm:$0xff]  ;;  %10612 = vst [vmem:[#allocation43_spill] sm:$0xff] %v8336_v47 }
 0x3c3   : > { %v1356_v23 = vadd.f32 %v10599_v6, %v7542_v55  ;;  %v10601_v7 = vld [vmem:[#allocation109_spill] sm:$0xff]  ;;  %v1357_v12 = vadd.f32 %v10602_v17, %v7530_v37  ;;  %v10605_v52 = vld [vmem:[#allocation55_spill] sm:$0xff]  ;;  %v10606_v16 = vld [vmem:[#allocation112_spill] sm:$0xff]  ;;  %v8334_v6 = vpop.permute.xlu1 %3155  ;;  %3597 = vrot.lane.b32.xlu1 %v3403_v5, %s4543_s30 }
 0x3c4   : > { %v1355_v1 = vadd.f32 %v10601_v7, %v10600_v8  ;;  %v10603_v19 = vld [vmem:[#allocation53_spill] sm:$0xff]  ;;  %v1360_v9 = vadd.f32 %v10606_v16, %v10605_v52  ;;  %v10607_v14 = vld [vmem:[#allocation52_spill] sm:$0xff]  ;;  %v10609_v38 = vld [vmem:[#allocation54_spill] sm:$0xff]  ;;  %10611 = vst [vmem:[#allocation45_spill] sm:$0xff] %v8334_v6  ;;  %v8341_v8 = vadd.f32 %v7658_v33, %v1351_v0  ;;  %v8347_v52 = vadd.f32 %v7666_v2, %v1352_v31 }
 0x3c5   : > { %v1358_v58 = vadd.f32 %v10604_v46, %v10603_v19  ;;  %v10608_v63 = vld [vmem:[#allocation113_spill] sm:$0xff]  ;;  %v10610_v42 = vld [vmem:[#allocation115_spill] sm:$0xff]  ;;  %v10613_v7 = vld [vmem:[#allocation114_spill] sm:$0xff]  ;;  %v8344_v46 = vadd.f32 %v7662_v29, %v1350_v32  ;;  %3595 = vrot.lane.b32.xlu0 %v3402_v3, %s4543_s30 }
 0x3c6   : > { %v1359_v30 = vadd.f32 %v10608_v63, %v10607_v14  ;;  %v1361_v55 = vadd.f32 %v10610_v42, %v10609_v38  ;;  %v1362_v37 = vadd.f32 %v10613_v7, %v7592_v20  ;;  %10614 = vst [vmem:[#allocation46_spill] sm:$0xff] %v8347_v52  ;;  %v10615_v14 = vld [vmem:[#allocation69_spill] sm:$0xff]  ;;  %v4392_v20 = vld [vmem:[%s4604_s27 + $0x162] sm:$0xff]  ;;  %v10618_v29 = vld [vmem:[#allocation70_spill] sm:$0xff] }
 0x3c7   : > { %v8350_v63 = vadd.f32 %v10615_v14, %v1353_v21  ;;  %v4391_v42 = vld [vmem:[%s4604_s27 + $0x16a] sm:$0xff]  ;;  %v3404_v33 = vmul.f32 %v4392_v20, %v7315_v61  ;;  %v8362_v32 = vadd.f32 %v10618_v29, %v1354_v39  ;;  %v10624_v3 = vld [vmem:[#allocation282_spill] sm:$0xff]  ;;  %v8382_v20 = vpop.permute.xlu1 %3159  ;;  %v10639_v6 = vld [vmem:[#allocation119_spill] sm:$0xff] }
 0x3c8   : > { %v3405_v16 = vmul.f32 %v4391_v42, %v7315_v61  ;;  %v10616_v0 = vld [vmem:[#allocation72_spill] sm:$0xff]  ;;  %v10620_v2 = vld [vmem:[#allocation357_spill] sm:$0xff]  ;;  %v8371_v19 = vadd.f32 %v10624_v3, %v1359_v30  ;;  %v10626_v38 = vld [vmem:[#allocation74_spill] sm:$0xff]  ;;  %10632 = vst [vmem:[#allocation55_spill] sm:$0xff] %v8382_v20 }
 0x3c9   : > { %v8359_v17 = vadd.f32 %v10616_v0, %v1355_v1  ;;  %10619 = vst [vmem:[#allocation47_spill] sm:$0xff] %v8362_v32  ;;  %v8365_v31 = vadd.f32 %v10620_v2, %v1357_v12  ;;  %v10622_v21 = vld [vmem:[#allocation388_spill] sm:$0xff]  ;;  %v8374_v7 = vadd.f32 %v10626_v38, %v1358_v58  ;;  %v10628_v14 = vld [vmem:[#allocation77_spill] sm:$0xff]  ;;  %v8384_v12 = vpop.permute.xlu0 %3157  ;;  %v10636_v2 = vld [vmem:[#allocation58_spill] sm:$0xff]  ;;  %3599 = vrot.lane.b32.xlu0 %v3404_v33, %s4543_s30 }
 0x3ca   : > { %v8368_v5 = vadd.f32 %v10622_v21, %v1356_v23  ;;  %10625 = vst [vmem:[#allocation109_spill] sm:$0xff] %v8371_v19  ;;  %v8377_v1 = vadd.f32 %v10628_v14, %v1361_v55  ;;  %v10630_v42 = vld [vmem:[#allocation361_spill] sm:$0xff]  ;;  %10633 = vst [vmem:[#allocation112_spill] sm:$0xff] %v8384_v12  ;;  %v10634_v0 = vld [vmem:[#allocation60_spill] sm:$0xff]  ;;  %3601 = vrot.lane.b32.xlu1 %v3405_v16, %s4543_s30 }
 0x3cb   : > { %10617 = vst [vmem:[#allocation107_spill] sm:$0xff] %v8359_v17  ;;  %10621 = vst [vmem:[#allocation108_spill] sm:$0xff] %v8365_v31  ;;  %v8380_v39 = vadd.f32 %v10630_v42, %v1360_v9  ;;  %v10635_v23 = vld [vmem:[#allocation116_spill] sm:$0xff]  ;;  %v10637_v21 = vld [vmem:[#allocation117_spill] sm:$0xff] }
 0x3cc   : > { %10623 = vst [vmem:[#allocation49_spill] sm:$0xff] %v8368_v5  ;;  %10627 = vst [vmem:[#allocation111_spill] sm:$0xff] %v8374_v7  ;;  %v1364_v29 = vadd.f32 %v10635_v23, %v10634_v0  ;;  %v1363_v30 = vadd.f32 %v10637_v21, %v10636_v2  ;;  %v10638_v3 = vld [vmem:[#allocation59_spill] sm:$0xff]  ;;  %v10642_v55 = vld [vmem:[#allocation62_spill] sm:$0xff] }
 0x3cd   : > { %10629 = vst [vmem:[#allocation53_spill] sm:$0xff] %v8377_v1  ;;  %10631 = vst [vmem:[#allocation110_spill] sm:$0xff] %v8380_v39  ;;  %v1365_v58 = vadd.f32 %v10639_v6, %v10638_v3  ;;  %v10640_v38 = vld [vmem:[#allocation363_spill] sm:$0xff]  ;;  %v10643_v14 = vld [vmem:[#allocation118_spill] sm:$0xff]  ;;  %v8421_v17 = vpop.permute.xlu0 %3161 }
 0x3ce   : > { %v8393_v47 = vadd.f32 %v10640_v38, %v1362_v37  ;;  %v1366_v9 = vadd.f32 %v10643_v14, %v10642_v55  ;;  %v4393_v42 = vld [vmem:[%s4604_s27 + $0x182] sm:$0xff]  ;;  %v4394_v0 = vld [vmem:[%s4604_s27 + $0x172] sm:$0xff]  ;;  %10661 = vst [vmem:[#allocation54_spill] sm:$0xff] %v8421_v17 }
 0x3cf   : > { %v3407_v20 = vmul.f32 %v4393_v42, %v7315_v61  ;;  %v3406_v23 = vmul.f32 %v4394_v0, %v7315_v61  ;;  %v10644_v2 = vld [vmem:[#allocation66_spill] sm:$0xff]  ;;  %v10645_v21 = vld [vmem:[#allocation120_spill] sm:$0xff]  ;;  %v10646_v6 = vld [vmem:[#allocation61_spill] sm:$0xff] }
 0x3d0   : > { %10641 = vst [vmem:[#allocation52_spill] sm:$0xff] %v8393_v47  ;;  %v1368_v12 = vadd.f32 %v10645_v21, %v10644_v2  ;;  %v10647_v3 = vld [vmem:[#allocation121_spill] sm:$0xff]  ;;  %v10648_v38 = vld [vmem:[#allocation68_spill] sm:$0xff]  ;;  %v10649_v47 = vld [vmem:[#allocation122_spill] sm:$0xff] }
 0x3d1   : > { %v1367_v37 = vadd.f32 %v10647_v3, %v10646_v6  ;;  %v1370_v55 = vadd.f32 %v10649_v47, %v10648_v38  ;;  %v10650_v14 = vld [vmem:[#allocation65_spill] sm:$0xff]  ;;  %v10651_v16 = vld [vmem:[#allocation123_spill] sm:$0xff]  ;;  %v10653_v1 = vld [vmem:[#allocation124_spill] sm:$0xff]  ;;  %v8419_v3 = vpop.permute.xlu1 %3163  ;;  %3605 = vrot.lane.b32.xlu1 %v3407_v20, %s4543_s30  ;;  %3603 = vrot.lane.b32.xlu0 %v3406_v23, %s4543_s30 }
 0x3d2   : > { %v1369_v39 = vadd.f32 %v10651_v16, %v10650_v14  ;;  %v10652_v33 = vld [vmem:[#allocation355_spill] sm:$0xff]  ;;  %v10655_v19 = vld [vmem:[#allocation125_spill] sm:$0xff]  ;;  %v10657_v31 = vld [vmem:[#allocation126_spill] sm:$0xff]  ;;  %10660 = vst [vmem:[#allocation113_spill] sm:$0xff] %v8419_v3 }
 0x3d3   : > { %v1372_v42 = vadd.f32 %v10653_v1, %v10652_v33  ;;  %v10654_v7 = vld [vmem:[#allocation67_spill] sm:$0xff]  ;;  %v10656_v5 = vld [vmem:[#allocation73_spill] sm:$0xff]  ;;  %v10662_v47 = vld [vmem:[#allocation356_spill] sm:$0xff] }
 0x3d4   : > { %v1371_v0 = vadd.f32 %v10655_v19, %v10654_v7  ;;  %v1374_v2 = vadd.f32 %v10657_v31, %v10656_v5  ;;  %v10658_v21 = vld [vmem:[#allocation71_spill] sm:$0xff]  ;;  %v10663_v38 = vld [vmem:[#allocation129_spill] sm:$0xff]  ;;  %v10664_v16 = vld [vmem:[#allocation80_spill] sm:$0xff] }
 0x3d5   : > { %v10659_v32 = vld [vmem:[#allocation127_spill] sm:$0xff]  ;;  %v1375_v14 = vadd.f32 %v10663_v38, %v10662_v47  ;;  %v8426_v52 = vadd.f32 %v10664_v16, %v1363_v30  ;;  %v10666_v1 = vld [vmem:[#allocation290_spill] sm:$0xff]  ;;  %v10670_v31 = vld [vmem:[#allocation285_spill] sm:$0xff] }
 0x3d6   : > { %v1373_v6 = vadd.f32 %v10659_v32, %v10658_v21  ;;  %v8429_v33 = vadd.f32 %v10666_v1, %v1365_v58  ;;  %v10668_v19 = vld [vmem:[#allocation366_spill] sm:$0xff]  ;;  %v8435_v5 = vadd.f32 %v10670_v31, %v1366_v9  ;;  %v4396_v47 = vld [vmem:[%s4604_s27 + $0x18a] sm:$0xff]  ;;  %v10680_v23 = vld [vmem:[#allocation375_spill] sm:$0xff] }
 0x3d7   : > { %10665 = vst [vmem:[#allocation115_spill] sm:$0xff] %v8426_v52  ;;  %v8432_v7 = vadd.f32 %v10668_v19, %v1364_v29  ;;  %v4395_v32 = vld [vmem:[%s4604_s27 + $0x192] sm:$0xff]  ;;  %v3408_v30 = vmul.f32 %v4396_v47, %v7315_v61  ;;  %v10674_v58 = vld [vmem:[#allocation372_spill] sm:$0xff]  ;;  %v10678_v19 = vld [vmem:[#allocation87_spill] sm:$0xff]  ;;  %v8456_v31 = vadd.f32 %v10680_v23, %v1371_v0 }
 0x3d8   : > { %10667 = vst [vmem:[#allocation114_spill] sm:$0xff] %v8429_v33  ;;  %10671 = vst [vmem:[#allocation72_spill] sm:$0xff] %v8435_v5  ;;  %v3409_v21 = vmul.f32 %v4395_v32, %v7315_v61  ;;  %v10672_v38 = vld [vmem:[#allocation369_spill] sm:$0xff]  ;;  %v8447_v1 = vadd.f32 %v10674_v58, %v1369_v39  ;;  %v10676_v29 = vld [vmem:[#allocation84_spill] sm:$0xff]  ;;  %v8453_v20 = vadd.f32 %v10678_v19, %v1370_v55  ;;  %v8467_v58 = vpop.permute.xlu1 %3167 }
 0x3d9   : > { %10669 = vst [vmem:[#allocation69_spill] sm:$0xff] %v8432_v7  ;;  %v8444_v16 = vadd.f32 %v10672_v38, %v1367_v37  ;;  %v8450_v9 = vadd.f32 %v10676_v29, %v1368_v12  ;;  %10681 = vst [vmem:[#allocation74_spill] sm:$0xff] %v8456_v31  ;;  %v10682_v32 = vld [vmem:[#allocation289_spill] sm:$0xff]  ;;  %v10684_v47 = vld [vmem:[#allocation376_spill] sm:$0xff]  ;;  %v8469_v12 = vpop.permute.xlu0 %3165  ;;  %3607 = vrot.lane.b32.xlu0 %v3408_v30, %s4543_s30 }
 0x3da   : > { %10675 = vst [vmem:[#allocation357_spill] sm:$0xff] %v8447_v1  ;;  %10679 = vst [vmem:[#allocation282_spill] sm:$0xff] %v8453_v20  ;;  %v8459_v3 = vadd.f32 %v10682_v32, %v1373_v6  ;;  %v8462_v37 = vadd.f32 %v10684_v47, %v1372_v42  ;;  %v10686_v38 = vld [vmem:[#allocation378_spill] sm:$0xff]  ;;  %v10690_v29 = vld [vmem:[#allocation75_spill] sm:$0xff]  ;;  %3609 = vrot.lane.b32.xlu1 %v3409_v21, %s4543_s30 }
 0x3db   : > { %10673 = vst [vmem:[#allocation70_spill] sm:$0xff] %v8444_v16  ;;  %10677 = vst [vmem:[#allocation388_spill] sm:$0xff] %v8450_v9  ;;  %v8465_v39 = vadd.f32 %v10686_v38, %v1374_v2  ;;  %v10691_v55 = vld [vmem:[#allocation128_spill] sm:$0xff]  ;;  %v10693_v20 = vld [vmem:[#allocation130_spill] sm:$0xff] }
 0x3dc   : > { %10683 = vst [vmem:[#allocation77_spill] sm:$0xff] %v8459_v3  ;;  %10685 = vst [vmem:[#allocation361_spill] sm:$0xff] %v8462_v37  ;;  %v1376_v19 = vadd.f32 %v10691_v55, %v10690_v29  ;;  %v10692_v17 = vld [vmem:[#allocation76_spill] sm:$0xff]  ;;  %v10695_v31 = vld [vmem:[#allocation131_spill] sm:$0xff] }
 0x3dd   : > { %10687 = vst [vmem:[#allocation60_spill] sm:$0xff] %v8465_v39  ;;  %10688 = vst [vmem:[#allocation116_spill] sm:$0xff] %v8467_v58  ;;  %v1378_v0 = vadd.f32 %v10693_v20, %v10692_v17  ;;  %v10694_v23 = vld [vmem:[#allocation360_spill] sm:$0xff]  ;;  %v10696_v32 = vld [vmem:[#allocation90_spill] sm:$0xff]  ;;  %v8506_v7 = vpop.permute.xlu0 %3169 }
 0x3de   : > { %10689 = vst [vmem:[#allocation58_spill] sm:$0xff] %v8469_v12  ;;  %v1377_v6 = vadd.f32 %v10695_v31, %v10694_v23  ;;  %v8478_v3 = vadd.f32 %v10696_v32, %v1375_v14  ;;  %v10698_v42 = vld [vmem:[#allocation286_spill] sm:$0xff]  ;;  %v10699_v47 = vld [vmem:[#allocation133_spill] sm:$0xff]  ;;  %v4398_v29 = vld [vmem:[%s4604_s27 + $0x1a2] sm:$0xff] }
 0x3df   : > { %v1379_v2 = vadd.f32 %v10699_v47, %v10698_v42  ;;  %v4397_v38 = vld [vmem:[%s4604_s27 + $0x1aa] sm:$0xff]  ;;  %v3410_v55 = vmul.f32 %v4398_v29, %v7315_v61  ;;  %v10700_v17 = vld [vmem:[#allocation79_spill] sm:$0xff]  ;;  %v10703_v23 = vld [vmem:[#allocation134_spill] sm:$0xff]  ;;  %10717 = vst [vmem:[#allocation119_spill] sm:$0xff] %v8506_v7 }
 0x3e0   : > { %10697 = vst [vmem:[#allocation117_spill] sm:$0xff] %v8478_v3  ;;  %v3411_v58 = vmul.f32 %v4397_v38, %v7315_v61  ;;  %v10701_v20 = vld [vmem:[#allocation132_spill] sm:$0xff]  ;;  %v10702_v31 = vld [vmem:[#allocation81_spill] sm:$0xff]  ;;  %v10704_v32 = vld [vmem:[#allocation362_spill] sm:$0xff] }
 0x3e1   : > { %v1380_v12 = vadd.f32 %v10701_v20, %v10700_v17  ;;  %v1382_v14 = vadd.f32 %v10703_v23, %v10702_v31  ;;  %v10705_v3 = vld [vmem:[#allocation135_spill] sm:$0xff]  ;;  %v10706_v47 = vld [vmem:[#allocation365_spill] sm:$0xff]  ;;  %v10708_v30 = vld [vmem:[#allocation82_spill] sm:$0xff]  ;;  %v8504_v23 = vpop.permute.xlu1 %3171  ;;  %3611 = vrot.lane.b32.xlu0 %v3410_v55, %s4543_s30 }
 0x3e2   : > { %v1381_v42 = vadd.f32 %v10705_v3, %v10704_v32  ;;  %v10707_v21 = vld [vmem:[#allocation137_spill] sm:$0xff]  ;;  %v10709_v37 = vld [vmem:[#allocation136_spill] sm:$0xff]  ;;  %v10710_v1 = vld [vmem:[#allocation83_spill] sm:$0xff]  ;;  %10716 = vst [vmem:[#allocation59_spill] sm:$0xff] %v8504_v23  ;;  %3613 = vrot.lane.b32.xlu1 %v3411_v58, %s4543_s30 }
 0x3e3   : > { %v1383_v39 = vadd.f32 %v10707_v21, %v10706_v47  ;;  %v1384_v38 = vadd.f32 %v10709_v37, %v10708_v30  ;;  %v10711_v9 = vld [vmem:[#allocation138_spill] sm:$0xff]  ;;  %v10712_v16 = vld [vmem:[#allocation367_spill] sm:$0xff]  ;;  %v10714_v20 = vld [vmem:[#allocation368_spill] sm:$0xff]  ;;  %v8538_v58 = vadd.f32 %v7952_v60, %v1382_v14 }
 0x3e4   : > { %v1386_v29 = vadd.f32 %v10711_v9, %v10710_v1  ;;  %v10713_v5 = vld [vmem:[#allocation139_spill] sm:$0xff]  ;;  %v10715_v33 = vld [vmem:[#allocation141_spill] sm:$0xff]  ;;  %v10718_v3 = vld [vmem:[#allocation86_spill] sm:$0xff] }
 0x3e5   : > { %v1385_v17 = vadd.f32 %v10713_v5, %v10712_v16  ;;  %v1387_v31 = vadd.f32 %v10715_v33, %v10714_v20  ;;  %v10719_v32 = vld [vmem:[#allocation140_spill] sm:$0xff]  ;;  %v10720_v21 = vld [vmem:[#allocation93_spill] sm:$0xff]  ;;  %v10722_v1 = vld [vmem:[#allocation94_spill] sm:$0xff]  ;;  %v8520_v5 = vadd.f32 %v7932_v11, %v1379_v2  ;;  %v8535_v11 = vadd.f32 %v7968_v10, %v1383_v39  ;;  %10727 = vst [vmem:[#allocation120_spill] sm:$0xff] %v8538_v58  ;;  %v8554_v10 = vpop.permute.xlu0 %3173 }
 0x3e6   : > { %v1388_v47 = vadd.f32 %v10719_v32, %v10718_v3  ;;  %v8511_v52 = vadd.f32 %v10720_v21, %v1377_v6  ;;  %v10721_v37 = vld [vmem:[#allocation381_spill] sm:$0xff]  ;;  %v8517_v9 = vadd.f32 %v10722_v1, %v1378_v0  ;;  %v4399_v33 = vld [vmem:[%s4604_s27 + $0x1c2] sm:$0xff]  ;;  %v8529_v3 = vadd.f32 %v7948_v24, %v1381_v42  ;;  %10733 = vst [vmem:[#allocation123_spill] sm:$0xff] %v8554_v10  ;;  %v10734_v39 = vld [vmem:[#allocation294_spill] sm:$0xff] }
 0x3e7   : > { %v8514_v30 = vadd.f32 %v10721_v37, %v1376_v19  ;;  %10723 = vst [vmem:[#allocation363_spill] sm:$0xff] %v8520_v5  ;;  %v3413_v16 = vmul.f32 %v4399_v33, %v7315_v61  ;;  %v4400_v20 = vld [vmem:[%s4604_s27 + $0x1b2] sm:$0xff]  ;;  %v8532_v19 = vadd.f32 %v7936_v56, %v1380_v12  ;;  %10726 = vst [vmem:[#allocation66_spill] sm:$0xff] %v8535_v11  ;;  %v8552_v12 = vpop.permute.xlu1 %3175  ;;  %v10736_v14 = vld [vmem:[#allocation371_spill] sm:$0xff] }
 0x3e8   : > { %v3412_v6 = vmul.f32 %v4400_v20, %v7315_v61  ;;  %10724 = vst [vmem:[#allocation62_spill] sm:$0xff] %v8529_v3  ;;  %v8541_v0 = vadd.f32 %v7997_v49, %v1385_v17  ;;  %v8544_v2 = vadd.f32 %v7972_v28, %v1384_v38  ;;  %v8547_v24 = vadd.f32 %v8013_v35, %v1387_v31  ;;  %v10735_v60 = vld [vmem:[#allocation142_spill] sm:$0xff]  ;;  %v10737_v42 = vld [vmem:[#allocation143_spill] sm:$0xff]  ;;  %v10738_v17 = vld [vmem:[#allocation88_spill] sm:$0xff] }
 0x3e9   : > { %10725 = vst [vmem:[#allocation118_spill] sm:$0xff] %v8532_v19  ;;  %v8550_v56 = vadd.f32 %v8001_v62, %v1386_v29  ;;  %10732 = vst [vmem:[#allocation65_spill] sm:$0xff] %v8552_v12  ;;  %v1390_v55 = vadd.f32 %v10735_v60, %v10734_v39  ;;  %v1389_v49 = vadd.f32 %v10737_v42, %v10736_v14  ;;  %v10739_v32 = vld [vmem:[#allocation145_spill] sm:$0xff]  ;;  %v10742_v31 = vld [vmem:[#allocation144_spill] sm:$0xff]  ;;  %3617 = vrot.lane.b32.xlu1 %v3413_v16, %s4543_s30 }
 0x3ea   : > { %10728 = vst [vmem:[#allocation61_spill] sm:$0xff] %v8541_v0  ;;  %10729 = vst [vmem:[#allocation121_spill] sm:$0xff] %v8544_v2  ;;  %v1391_v28 = vadd.f32 %v10739_v32, %v10738_v17  ;;  %v8563_v38 = vadd.f32 %v8017_v41, %v1388_v47  ;;  %v10741_v35 = vld [vmem:[#allocation377_spill] sm:$0xff]  ;;  %3615 = vrot.lane.b32.xlu0 %v3412_v6, %s4543_s30  ;;  %v10743_v33 = vld [vmem:[#allocation380_spill] sm:$0xff] }
 0x3eb   : > { %10730 = vst [vmem:[#allocation68_spill] sm:$0xff] %v8547_v24  ;;  %10731 = vst [vmem:[#allocation122_spill] sm:$0xff] %v8550_v56  ;;  %v1392_v62 = vadd.f32 %v10742_v31, %v10741_v35  ;;  %v4401_v29 = vld [vmem:[%s4604_s27 + $0x1d2] sm:$0xff]  ;;  %v4402_v37 = vld [vmem:[%s4604_s27 + $0x1ca] sm:$0xff] }
 0x3ec   : > { %10740 = vst [vmem:[#allocation355_spill] sm:$0xff] %v8563_v38  ;;  %v3415_v21 = vmul.f32 %v4401_v29, %v7315_v61  ;;  %v3414_v1 = vmul.f32 %v4402_v37, %v7315_v61  ;;  %v10744_v20 = vld [vmem:[#allocation146_spill] sm:$0xff]  ;;  %v10745_v60 = vld [vmem:[#allocation89_spill] sm:$0xff]  ;;  %v10746_v14 = vld [vmem:[#allocation147_spill] sm:$0xff]  ;;  %v8591_v38 = vpop.permute.xlu0 %3177 }
 0x3ed   : > { %v1394_v39 = vadd.f32 %v10744_v20, %v10743_v33  ;;  %v1393_v41 = vadd.f32 %v10746_v14, %v10745_v60  ;;  %v10747_v47 = vld [vmem:[#allocation293_spill] sm:$0xff]  ;;  %v10748_v42 = vld [vmem:[#allocation148_spill] sm:$0xff]  ;;  %v10751_v6 = vld [vmem:[#allocation95_spill] sm:$0xff]  ;;  %v8589_v14 = vpop.permute.xlu1 %3179  ;;  %10759 = vst [vmem:[#allocation67_spill] sm:$0xff] %v8591_v38 }
 0x3ee   : > { %v1396_v17 = vadd.f32 %v10748_v42, %v10747_v47  ;;  %v10749_v32 = vld [vmem:[#allocation92_spill] sm:$0xff]  ;;  %v10750_v16 = vld [vmem:[#allocation149_spill] sm:$0xff]  ;;  %v10752_v31 = vld [vmem:[#allocation150_spill] sm:$0xff]  ;;  %10758 = vst [vmem:[#allocation124_spill] sm:$0xff] %v8589_v14  ;;  %3621 = vrot.lane.b32.xlu1 %v3415_v21, %s4543_s30  ;;  %3619 = vrot.lane.b32.xlu0 %v3414_v1, %s4543_s30 }
 0x3ef   : > { %v1395_v35 = vadd.f32 %v10750_v16, %v10749_v32  ;;  %v1398_v29 = vadd.f32 %v10752_v31, %v10751_v6  ;;  %v10753_v12 = vld [vmem:[#allocation297_spill] sm:$0xff]  ;;  %v10754_v10 = vld [vmem:[#allocation151_spill] sm:$0xff]  ;;  %v10755_v23 = vld [vmem:[#allocation152_spill] sm:$0xff]  ;;  %v8596_v16 = vadd.f32 %v8033_v44, %v1389_v49  ;;  %v8599_v6 = vadd.f32 %v8065_v34, %v1391_v28 }
 0x3f0   : > { %v1397_v37 = vadd.f32 %v10754_v10, %v10753_v12  ;;  %v1400_v33 = vadd.f32 %v10755_v23, %v7964_v36  ;;  %v10756_v20 = vld [vmem:[#allocation382_spill] sm:$0xff]  ;;  %v10757_v7 = vld [vmem:[#allocation153_spill] sm:$0xff]  ;;  %v10760_v47 = vld [vmem:[#allocation384_spill] sm:$0xff]  ;;  %v8602_v12 = vadd.f32 %v8037_v27, %v1390_v55 }
 0x3f1   : > { %v1399_v60 = vadd.f32 %v10757_v7, %v10756_v20  ;;  %v10761_v42 = vld [vmem:[#allocation155_spill] sm:$0xff]  ;;  %10762 = vst [vmem:[#allocation125_spill] sm:$0xff] %v8596_v16  ;;  %10763 = vst [vmem:[#allocation73_spill] sm:$0xff] %v8599_v6  ;;  %v4403_v7 = vld [vmem:[%s4604_s27 + $0x1ea] sm:$0xff] }
 0x3f2   : > { %v1401_v32 = vadd.f32 %v10761_v42, %v10760_v47  ;;  %10764 = vst [vmem:[#allocation126_spill] sm:$0xff] %v8602_v12  ;;  %v10765_v36 = vld [vmem:[#allocation7_spill] sm:$0xff]  ;;  %v3417_v10 = vmul.f32 %v4403_v7, %v7315_v61  ;;  %v10767_v49 = vld [vmem:[#allocation14_spill] sm:$0xff]  ;;  %v10769_v34 = vld [vmem:[#allocation17_spill] sm:$0xff]  ;;  %v8637_v7 = vpop.permute.xlu1 %3183 }
 0x3f3   : > { %v8605_v23 = vadd.f32 %v10765_v36, %v1392_v62  ;;  %v4404_v31 = vld [vmem:[%s4604_s27 + $0x1e2] sm:$0xff]  ;;  %v8614_v20 = vadd.f32 %v10767_v49, %v1393_v41  ;;  %v8617_v28 = vadd.f32 %v10769_v34, %v1395_v35  ;;  %v10775_v1 = vld [vmem:[#allocation18_spill] sm:$0xff]  ;;  %v8629_v42 = vadd.f32 %v8140_v51, %v1399_v60  ;;  %10781 = vst [vmem:[#allocation372_spill] sm:$0xff] %v8637_v7  ;;  %v10797_v14 = vld [vmem:[#allocation161_spill] sm:$0xff] }
 0x3f4   : > { %v3416_v44 = vmul.f32 %v4404_v31, %v7315_v61  ;;  %v10771_v27 = vld [vmem:[#allocation391_spill] sm:$0xff]  ;;  %v10773_v62 = vld [vmem:[#allocation16_spill] sm:$0xff]  ;;  %v8626_v47 = vadd.f32 %v10775_v1, %v1397_v37  ;;  %v8635_v35 = vadd.f32 %v8156_v45, %v1400_v33  ;;  %v10783_v31 = vld [vmem:[#allocation98_spill] sm:$0xff]  ;;  %v8648_v60 = vadd.f32 %v8160_v40, %v1401_v32  ;;  %3625 = vrot.lane.b32.xlu1 %v3417_v10, %s4543_s30 }
 0x3f5   : > { %10766 = vst [vmem:[#allocation71_spill] sm:$0xff] %v8605_v23  ;;  %10768 = vst [vmem:[#allocation127_spill] sm:$0xff] %v8614_v20  ;;  %v8620_v55 = vadd.f32 %v10771_v27, %v1394_v39  ;;  %v8623_v21 = vadd.f32 %v10773_v62, %v1396_v17  ;;  %v10778_v36 = vld [vmem:[#allocation15_spill] sm:$0xff]  ;;  %v8639_v39 = vpop.permute.xlu0 %3181  ;;  %v10784_v17 = vld [vmem:[#allocation154_spill] sm:$0xff] }
 0x3f6   : > { %10770 = vst [vmem:[#allocation356_spill] sm:$0xff] %v8617_v28  ;;  %10776 = vst [vmem:[#allocation290_spill] sm:$0xff] %v8626_v47  ;;  %v8632_v41 = vadd.f32 %v10778_v36, %v1398_v29  ;;  %v1402_v49 = vadd.f32 %v10784_v17, %v10783_v31  ;;  %v10785_v34 = vld [vmem:[#allocation100_spill] sm:$0xff]  ;;  %v10787_v62 = vld [vmem:[#allocation97_spill] sm:$0xff]  ;;  %3623 = vrot.lane.b32.xlu0 %v3416_v44, %s4543_s30 }
 0x3f7   : > { %10772 = vst [vmem:[#allocation129_spill] sm:$0xff] %v8620_v55  ;;  %10774 = vst [vmem:[#allocation80_spill] sm:$0xff] %v8623_v21  ;;  %v10786_v27 = vld [vmem:[#allocation156_spill] sm:$0xff]  ;;  %v10788_v1 = vld [vmem:[#allocation157_spill] sm:$0xff] }
 0x3f8   : > { %10777 = vst [vmem:[#allocation366_spill] sm:$0xff] %v8629_v42  ;;  %10779 = vst [vmem:[#allocation285_spill] sm:$0xff] %v8632_v41  ;;  %v1404_v37 = vadd.f32 %v10786_v27, %v10785_v34  ;;  %v1403_v51 = vadd.f32 %v10788_v1, %v10787_v62  ;;  %v10790_v29 = vld [vmem:[#allocation99_spill] sm:$0xff]  ;;  %v4406_v31 = vld [vmem:[%s4604_s27 + $0x1f2] sm:$0xff] }
 0x3f9   : > { %10780 = vst [vmem:[#allocation369_spill] sm:$0xff] %v8635_v35  ;;  %10782 = vst [vmem:[#allocation84_spill] sm:$0xff] %v8639_v39  ;;  %v10791_v36 = vld [vmem:[#allocation159_spill] sm:$0xff]  ;;  %v3418_v17 = vmul.f32 %v4406_v31, %v7315_v61  ;;  %v10793_v27 = vld [vmem:[#allocation158_spill] sm:$0xff] }
 0x3fa   : > { %10789 = vst [vmem:[#allocation87_spill] sm:$0xff] %v8648_v60  ;;  %v1405_v45 = vadd.f32 %v10791_v36, %v10790_v29  ;;  %v4405_v33 = vld [vmem:[%s4604_s27 + $0x202] sm:$0xff]  ;;  %v10794_v62 = vld [vmem:[#allocation105_spill] sm:$0xff]  ;;  %v10800_v44 = vld [vmem:[#allocation10_spill] sm:$0xff] }
 0x3fb   : > { %v3419_v7 = vmul.f32 %v4405_v33, %v7315_v61  ;;  %v10792_v34 = vld [vmem:[#allocation103_spill] sm:$0xff]  ;;  %v10795_v1 = vld [vmem:[#allocation160_spill] sm:$0xff]  ;;  %v10796_v32 = vld [vmem:[#allocation101_spill] sm:$0xff]  ;;  %3627 = vrot.lane.b32.xlu0 %v3418_v17, %s4543_s30 }
 0x3fc   : > { %v1406_v39 = vadd.f32 %v10793_v27, %v10792_v34  ;;  %v1408_v40 = vadd.f32 %v10795_v1, %v10794_v62  ;;  %v1407_v38 = vadd.f32 %v10797_v14, %v10796_v32  ;;  %v10798_v29 = vld [vmem:[#allocation104_spill] sm:$0xff]  ;;  %v10801_v60 = vld [vmem:[#allocation163_spill] sm:$0xff]  ;;  %v10802_v33 = vld [vmem:[#allocation9_spill] sm:$0xff]  ;;  %v8676_v14 = vpop.permute.xlu1 %3187  ;;  %v8678_v1 = vpop.permute.xlu0 %3185 }
 0x3fd   : > { %v10799_v36 = vld [vmem:[#allocation164_spill] sm:$0xff]  ;;  %v1410_v35 = vadd.f32 %v10801_v60, %v10800_v44  ;;  %v10803_v42 = vld [vmem:[#allocation167_spill] sm:$0xff]  ;;  %v10804_v41 = vld [vmem:[#allocation6_spill] sm:$0xff]  ;;  %10808 = vst [vmem:[#allocation375_spill] sm:$0xff] %v8676_v14  ;;  %v8683_v60 = vadd.f32 %v8190_v22, %v1403_v51  ;;  %3629 = vrot.lane.b32.xlu1 %v3419_v7, %s4543_s30 }
 0x3fe   : > { %v1409_v10 = vadd.f32 %v10799_v36, %v10798_v29  ;;  %v1412_v31 = vadd.f32 %v10803_v42, %v10802_v33  ;;  %v10805_v47 = vld [vmem:[#allocation168_spill] sm:$0xff]  ;;  %10809 = vst [vmem:[#allocation289_spill] sm:$0xff] %v8678_v1  ;;  %v10810_v32 = vld [vmem:[#allocation11_spill] sm:$0xff]  ;;  %v8686_v42 = vadd.f32 %v8180_v15, %v1402_v49  ;;  %v8701_v51 = vadd.f32 %v8237_v13, %v1407_v38  ;;  %v10880_v28 = vld [vmem:[#allocation53_spill] sm:$0xff] }
 0x3ff   : > { %v1411_v34 = vadd.f32 %v10805_v47, %v10804_v41  ;;  %v10806_v27 = vld [vmem:[#allocation12_spill] sm:$0xff]  ;;  %v10811_v29 = vld [vmem:[#allocation171_spill] sm:$0xff]  ;;  %10812 = vst [vmem:[#allocation376_spill] sm:$0xff] %v8683_v60  ;;  %v8689_v47 = vadd.f32 %v8194_v57, %v1404_v37  ;;  %v4407_v41 = vld [vmem:[%s4604_s27 + $0x212] sm:$0xff]  ;;  %v8704_v15 = vadd.f32 %v8213_v43, %v1406_v39  ;;  %v8710_v57 = vadd.f32 %v8241_v59, %v1408_v40 }
 0x400   : > { %v10807_v21 = vld [vmem:[#allocation172_spill] sm:$0xff]  ;;  %v1414_v36 = vadd.f32 %v10811_v29, %v10810_v32  ;;  %10813 = vst [vmem:[#allocation378_spill] sm:$0xff] %v8686_v42  ;;  %v3421_v44 = vmul.f32 %v4407_v41, %v7315_v61  ;;  %10816 = vst [vmem:[#allocation76_spill] sm:$0xff] %v8701_v51  ;;  %v8716_v49 = vadd.f32 %v8261_v50, %v1410_v35  ;;  %v8724_v38 = vpop.permute.xlu1 %3191  ;;  %v10826_v39 = vld [vmem:[#allocation25_spill] sm:$0xff] }
 0x401   : > { %v1413_v62 = vadd.f32 %v10807_v21, %v10806_v27  ;;  %10814 = vst [vmem:[#allocation75_spill] sm:$0xff] %v8689_v47  ;;  %v8692_v21 = vadd.f32 %v8209_v25, %v1405_v45  ;;  %v4408_v33 = vld [vmem:[%s4604_s27 + $0x20a] sm:$0xff]  ;;  %10817 = vst [vmem:[#allocation130_spill] sm:$0xff] %v8704_v15  ;;  %v8707_v25 = vadd.f32 %v8257_v53, %v1409_v10  ;;  %v8726_v53 = vpop.permute.xlu0 %3189  ;;  %v10827_v59 = vld [vmem:[#allocation175_spill] sm:$0xff] }
 0x402   : > { %v3420_v22 = vmul.f32 %v4408_v33, %v7315_v61  ;;  %10819 = vst [vmem:[#allocation131_spill] sm:$0xff] %v8710_v57  ;;  %v8713_v7 = vadd.f32 %v8277_v26, %v1411_v34  ;;  %10821 = vst [vmem:[#allocation286_spill] sm:$0xff] %v8716_v49  ;;  %v8722_v43 = vadd.f32 %v8281_v4, %v1412_v31  ;;  %v10828_v45 = vld [vmem:[#allocation20_spill] sm:$0xff]  ;;  %v10830_v40 = vld [vmem:[#allocation33_spill] sm:$0xff]  ;;  %3633 = vrot.lane.b32.xlu1 %v3421_v44, %s4543_s30 }
 0x403   : > { %10815 = vst [vmem:[#allocation128_spill] sm:$0xff] %v8692_v21  ;;  %10818 = vst [vmem:[#allocation360_spill] sm:$0xff] %v8707_v25  ;;  %v8719_v13 = vadd.f32 %v8293_v48, %v1413_v62  ;;  %v8730_v37 = vadd.f32 %v10827_v59, %v10826_v39  ;;  %v10829_v26 = vld [vmem:[#allocation176_spill] sm:$0xff]  ;;  %v10831_v50 = vld [vmem:[#allocation179_spill] sm:$0xff]  ;;  %v8739_v48 = vadd.f32 %v8308_v54, %v1414_v36 }
 0x404   : > { %10820 = vst [vmem:[#allocation90_spill] sm:$0xff] %v8713_v7  ;;  %10823 = vst [vmem:[#allocation79_spill] sm:$0xff] %v8722_v43  ;;  %v2067_v17 = vadd.f32 %v10829_v26, %v10828_v45  ;;  %v8736_v35 = vadd.f32 %v10831_v50, %v10830_v40  ;;  %v10833_v4 = vld [vmem:[#allocation24_spill] sm:$0xff]  ;;  %3631 = vrot.lane.b32.xlu0 %v3420_v22, %s4543_s30  ;;  %v10836_v41 = vld [vmem:[#allocation183_spill] sm:$0xff] }
 0x405   : > { %10822 = vst [vmem:[#allocation133_spill] sm:$0xff] %v8719_v13  ;;  %10824 = vst [vmem:[#allocation132_spill] sm:$0xff] %v8724_v38  ;;  %v10834_v10 = vld [vmem:[#allocation180_spill] sm:$0xff]  ;;  %v10837_v54 = vld [vmem:[#allocation22_spill] sm:$0xff] }
 0x406   : > { %10825 = vst [vmem:[#allocation81_spill] sm:$0xff] %v8726_v53  ;;  %10832 = vst [vmem:[#allocation134_spill] sm:$0xff] %v8739_v48  ;;  %v8743_v31 = vadd.f32 %v10834_v10, %v10833_v4  ;;  %v4409_v34 = vld [vmem:[%s4604_s27 + $0x22a] sm:$0xff]  ;;  %v4410_v62 = vld [vmem:[%s4604_s27 + $0x222] sm:$0xff] }
 0x407   : > { %v3423_v27 = vmul.f32 %v4409_v34, %v7315_v61  ;;  %v3422_v32 = vmul.f32 %v4410_v62, %v7315_v61  ;;  %v10835_v29 = vld [vmem:[#allocation28_spill] sm:$0xff]  ;;  %v10839_v59 = vld [vmem:[#allocation187_spill] sm:$0xff]  ;;  %v10840_v22 = vld [vmem:[#allocation37_spill] sm:$0xff] }
 0x408   : > { %v8753_v33 = vadd.f32 %v10836_v41, %v10835_v29  ;;  %v10838_v36 = vld [vmem:[#allocation184_spill] sm:$0xff]  ;;  %v8761_v44 = vadd.f32 %v10839_v59, %v8226_v18  ;;  %v10843_v50 = vld [vmem:[#allocation191_spill] sm:$0xff]  ;;  %v8782_v18 = vpop.permute.xlu1 %3195  ;;  %v8784_v59 = vpop.permute.xlu0 %3193  ;;  %v10875_v15 = vld [vmem:[#allocation218_spill] sm:$0xff] }
 0x409   : > { %v8757_v39 = vadd.f32 %v10838_v36, %v10837_v54  ;;  %v10841_v45 = vld [vmem:[#allocation188_spill] sm:$0xff]  ;;  %v10846_v29 = vld [vmem:[#allocation31_spill] sm:$0xff]  ;;  %v8780_v36 = vstv %s8674_s10  ;;  %10848 = vst [vmem:[#allocation362_spill] sm:$0xff] %v8782_v18  ;;  %10849 = vst [vmem:[#allocation135_spill] sm:$0xff] %v8784_v59  ;;  %3637 = vrot.lane.b32.xlu1 %v3423_v27, %s4543_s30  ;;  %3635 = vrot.lane.b32.xlu0 %v3422_v32, %s4543_s30 }
 0x40a   : > { %v8765_v26 = vadd.f32 %v10841_v45, %v10840_v22  ;;  %v10842_v40 = vld [vmem:[#allocation36_spill] sm:$0xff]  ;;  %v10847_v41 = vld [vmem:[#allocation195_spill] sm:$0xff]  ;;  %v10850_v22 = vld [vmem:[#allocation34_spill] sm:$0xff] }
 0x40b   : > { %v8769_v4 = vadd.f32 %v10843_v50, %v10842_v40  ;;  %v10844_v10 = vld [vmem:[#allocation32_spill] sm:$0xff]  ;;  %v8777_v54 = vadd.f32 %v10847_v41, %v10846_v29  ;;  %v10852_v40 = vld [vmem:[#allocation38_spill] sm:$0xff]  ;;  %v10853_v50 = vld [vmem:[#allocation199_spill] sm:$0xff] }
 0x40c   : > { %v10845_v34 = vld [vmem:[#allocation192_spill] sm:$0xff]  ;;  %v8792_v13 = vadd.f32 %v10853_v50, %v10852_v40  ;;  %v10857_v41 = vld [vmem:[#allocation203_spill] sm:$0xff]  ;;  %v4412_v40 = vld [vmem:[%s4604_s27 + $0x232] sm:$0xff]  ;;  %v8840_v25 = vpop.permute.xlu0 %3197 }
 0x40d   : > { %v8773_v62 = vadd.f32 %v10845_v34, %v10844_v10  ;;  %v10851_v45 = vld [vmem:[#allocation196_spill] sm:$0xff]  ;;  %v10858_v18 = vld [vmem:[#allocation35_spill] sm:$0xff]  ;;  %v3424_v50 = vmul.f32 %v4412_v40, %v7315_v61  ;;  %10868 = vst [vmem:[#allocation137_spill] sm:$0xff] %v8840_v25  ;;  %v10873_v25 = vld [vmem:[#allocation217_spill] sm:$0xff] }
 0x40e   : > { %v8788_v48 = vadd.f32 %v10851_v45, %v10850_v22  ;;  %v10854_v10 = vld [vmem:[#allocation40_spill] sm:$0xff]  ;;  %v10865_v14 = vld [vmem:[#allocation107_spill] sm:$0xff]  ;;  %v10876_v21 = vld [vmem:[#allocation109_spill] sm:$0xff] }
 0x40f   : > { %v10855_v34 = vld [vmem:[#allocation200_spill] sm:$0xff]  ;;  %3639 = vrot.lane.b32.xlu0 %v3424_v50, %s4543_s30  ;;  %v10877_v47 = vld [vmem:[#allocation219_spill] sm:$0xff]  ;;  %v10891_v56 = vld [vmem:[#allocation182_spill] sm:$0xff] }
 0x410   : > { %v8796_v38 = vadd.f32 %v10855_v34, %v10854_v10  ;;  %v10856_v29 = vld [vmem:[#allocation48_spill] sm:$0xff]  ;;  %v10860_v10 = vld [vmem:[#allocation207_spill] sm:$0xff]  ;;  %v8873_v60 = vadd.f32 %v10877_v47, %v10876_v21  ;;  %v8901_v20 = vpop.permute.xlu0 %3201  ;;  %v4434_v3 = vld [vmem:[%s4604_s27 + $0x272] sm:$0xff] }
 0x411   : > { %v8800_v43 = vadd.f32 %v10857_v41, %v10856_v29  ;;  %v10859_v7 = vld [vmem:[#allocation204_spill] sm:$0xff]  ;;  %v8814_v34 = vadd.f32 %v10860_v10, %v8341_v8  ;;  %v10866_v8 = vld [vmem:[#allocation215_spill] sm:$0xff]  ;;  %10883 = vst [vmem:[#allocation136_spill] sm:$0xff] %v8901_v20 }
 0x412   : > { %v8804_v59 = vadd.f32 %v10859_v7, %v10858_v18  ;;  %v4411_v22 = vld [vmem:[%s4604_s27 + $0x242] sm:$0xff]  ;;  %v8832_v10 = vadd.f32 %v10866_v8, %v10865_v14  ;;  %v4414_v49 = vld [vmem:[%s4604_s27 + $0xa] sm:$0xff]  ;;  %v10871_v14 = vld [vmem:[#allocation174_spill] sm:$0xff] }
 0x413   : > { %v3425_v45 = vmul.f32 %v4411_v22, %v7315_v61  ;;  %v10861_v29 = vld [vmem:[#allocation208_spill] sm:$0xff]  ;;  %v10862_v18 = vld [vmem:[#allocation211_spill] sm:$0xff]  ;;  %v10863_v22 = vld [vmem:[#allocation46_spill] sm:$0xff]  ;;  %v2555_v8 = vadd.f32 %v10871_v14, %v2067_v17 }
 0x414   : > { %v8818_v7 = vadd.f32 %v10861_v29, %v8344_v46  ;;  %v8822_v27 = vadd.f32 %v10862_v18, %v8350_v63  ;;  %v4413_v32 = vld [vmem:[%s4604_s27 + $0x2] sm:$0xff]  ;;  %v2720_v46 = vmul.f32 %v4414_v49, %v8780_v36  ;;  %v4415_v29 = vld [vmem:[%s4604_s27 + $0x12] sm:$0xff]  ;;  %v8838_v18 = vpop.permute.xlu1 %3199  ;;  %v4417_v57 = vld [vmem:[%s4604_s27 + $0x2a] sm:$0xff] }
 0x415   : > { %v2719_v41 = vmul.f32 %v4413_v32, %v8780_v36  ;;  %v10864_v53 = vld [vmem:[#allocation212_spill] sm:$0xff]  ;;  %v2721_v63 = vmul.f32 %v4415_v29, %v8780_v36  ;;  %10867 = vst [vmem:[#allocation365_spill] sm:$0xff] %v8838_v18  ;;  %v8855_v29 = vmul.f32 %v4417_v57, %v8780_v36  ;;  %3641 = vrot.lane.b32.xlu1 %v3425_v45, %s4543_s30  ;;  %v4418_v17 = vld [vmem:[%s4604_s27 + $0x252] sm:$0xff]  ;;  %v10892_v19 = vld [vmem:[#allocation339_spill] sm:$0xff] }
 0x416   : > { %v8828_v40 = vadd.f32 %v10864_v53, %v10863_v22  ;;  %v10869_v53 = vld [vmem:[#allocation47_spill] sm:$0xff]  ;;  %v10870_v32 = vld [vmem:[#allocation216_spill] sm:$0xff]  ;;  %v10874_v14 = vld [vmem:[#allocation49_spill] sm:$0xff] }
 0x417   : > { %v8846_v22 = vadd.f32 %v10870_v32, %v10869_v53  ;;  %v4416_v1 = vld [vmem:[%s4604_s27 + $0x22] sm:$0xff]  ;;  %v3427_v53 = vmul.f32 %v4418_v17, %v7315_v61  ;;  %v4419_v32 = vld [vmem:[%s4604_s27 + $0x24a] sm:$0xff]  ;;  %v8869_v57 = vadd.f32 %v10875_v15, %v10874_v14  ;;  %v2800_v12 = vadd.f32 %v2719_v41, %v2555_v8  ;;  %v4427_v8 = vld [vmem:[%s4604_s27 + $0x72] sm:$0xff] }
 0x418   : > { %v8851_v49 = vmul.f32 %v4416_v1, %v8780_v36  ;;  %v10872_v18 = vld [vmem:[#allocation108_spill] sm:$0xff]  ;;  %v3426_v1 = vmul.f32 %v4419_v32, %v7315_v61  ;;  %v10878_v17 = vld [vmem:[#allocation111_spill] sm:$0xff]  ;;  %v10881_v15 = vld [vmem:[#allocation221_spill] sm:$0xff] }
 0x419   : > { %v8859_v51 = vadd.f32 %v10873_v25, %v10872_v18  ;;  %v4420_v25 = vld [vmem:[%s4604_s27 + $0x32] sm:$0xff]  ;;  %v4421_v50 = vld [vmem:[%s4604_s27 + $0x42] sm:$0xff]  ;;  %v8889_v14 = vadd.f32 %v10881_v15, %v10880_v28  ;;  %v4422_v47 = vld [vmem:[%s4604_s27 + $0x4a] sm:$0xff]  ;;  %3645 = vrot.lane.b32.xlu1 %v3427_v53, %s4543_s30 }
 0x41a   : > { %v8877_v45 = vmul.f32 %v4420_v25, %v8780_v36  ;;  %v8881_v18 = vmul.f32 %v4421_v50, %v8780_v36  ;;  %v10879_v42 = vld [vmem:[#allocation220_spill] sm:$0xff]  ;;  %v8893_v21 = vmul.f32 %v4422_v47, %v8780_v36  ;;  %v4423_v25 = vld [vmem:[%s4604_s27 + $0x52] sm:$0xff]  ;;  %v8899_v50 = vpop.permute.xlu1 %3203  ;;  %3643 = vrot.lane.b32.xlu0 %v3426_v1, %s4543_s30 }
 0x41b   : > { %v8885_v32 = vadd.f32 %v10879_v42, %v10878_v17  ;;  %v8897_v55 = vmul.f32 %v4423_v25, %v8780_v36  ;;  %10882 = vst [vmem:[#allocation82_spill] sm:$0xff] %v8899_v50  ;;  %v10884_v42 = vld [vmem:[#allocation110_spill] sm:$0xff]  ;;  %v10887_v47 = vld [vmem:[#allocation173_spill] sm:$0xff]  ;;  %v4424_v25 = vld [vmem:[%s4604_s27 + $0x62] sm:$0xff] }
 0x41c   : > { %v10885_v17 = vld [vmem:[#allocation222_spill] sm:$0xff]  ;;  %v2556_v6 = vadd.f32 %v10887_v47, %v8730_v37  ;;  %v8913_v16 = vmul.f32 %v4424_v25, %v8780_v36  ;;  %v10888_v37 = vld [vmem:[#allocation340_spill] sm:$0xff]  ;;  %v8924_v47 = vmul.f32 %v4427_v8, %v8780_v36  ;;  %v8946_v8 = vstv %s8842_s11 }
 0x41d   : > { %v8905_v23 = vadd.f32 %v10885_v17, %v10884_v42  ;;  %v10886_v28 = vld [vmem:[#allocation178_spill] sm:$0xff]  ;;  %v4425_v42 = vld [vmem:[%s4604_s27 + $0x26a] sm:$0xff]  ;;  %v3288_v41 = vadd.f32 %v10888_v37, %v2800_v12  ;;  %v4429_v1 = vld [vmem:[%s4604_s27 + $0x82] sm:$0xff] }
 0x41e   : > { %v2557_v15 = vadd.f32 %v10886_v28, %v8743_v31  ;;  %v3429_v17 = vmul.f32 %v4425_v42, %v7315_v61  ;;  %v4426_v31 = vld [vmem:[%s4604_s27 + $0x262] sm:$0xff]  ;;  %v4428_v25 = vld [vmem:[%s4604_s27 + $0x6a] sm:$0xff]  ;;  %v8932_v50 = vmul.f32 %v4429_v1, %v8780_v36  ;;  %v8948_v1 = vpop.permute.xlu0 %3205 }
 0x41f   : > { %v3428_v28 = vmul.f32 %v4426_v31, %v7315_v61  ;;  %v8928_v53 = vmul.f32 %v4428_v25, %v8780_v36  ;;  %v10889_v42 = vld [vmem:[#allocation177_spill] sm:$0xff]  ;;  %v3534_v25 = vpop.permute.xlu1 %3533  ;;  %10890 = vst [vmem:[#allocation83_spill] sm:$0xff] %v8948_v1  ;;  %v3430_v1 = vmul.f32 %v4434_v3, %v7315_v61 }
 0x420   : > { %v2558_v20 = vadd.f32 %v10889_v42, %v8736_v35  ;;  %v4430_v24 = vld [vmem:[%s4604_s27 + $0x8a] sm:$0xff]  ;;  %v4431_v31 = vld [vmem:[%s4604_s27 + $0x92] sm:$0xff]  ;;  %v2559_v35 = vadd.f32 %v10891_v56, %v8757_v39  ;;  %v2801_v42 = vadd.f32 %v2720_v46, %v2556_v6  ;;  %v2802_v0 = vadd.f32 %v2721_v63, %v2557_v15  ;;  %3649 = vrot.lane.b32.xlu1 %v3429_v17, %s4543_s30 }
 0x421   : > { %v8938_v12 = vmul.f32 %v4430_v24, %v8780_v36  ;;  %v8942_v37 = vmul.f32 %v4431_v31, %v8780_v36  ;;  %v3776_v2 = vadd.f32 %v3534_v25, %v3288_v41  ;;  %v4432_v24 = vld [vmem:[%s4604_s27 + $0xa2] sm:$0xff]  ;;  %3647 = vrot.lane.b32.xlu0 %v3428_v28, %s4543_s30  ;;  %v10893_v56 = vld [vmem:[#allocation342_spill] sm:$0xff]  ;;  %v4435_v39 = vld [vmem:[%s4604_s27 + $0xaa] sm:$0xff] }
 0x422   : > { %v8954_v11 = vmul.f32 %v4432_v24, %v8780_v36  ;;  %v4433_v31 = vld [vmem:[%s4604_s27 + $0x282] sm:$0xff]  ;;  %v3289_v5 = vadd.f32 %v10892_v19, %v2801_v42  ;;  %v3290_v6 = vadd.f32 %v10893_v56, %v2802_v0  ;;  %v8966_v46 = vmul.f32 %v4435_v39, %v8780_v36  ;;  %v10894_v15 = vld [vmem:[#allocation186_spill] sm:$0xff]  ;;  %v10895_v28 = vld [vmem:[#allocation181_spill] sm:$0xff]  ;;  %v3536_v0 = vpop.permute.xlu0 %3535 }
 0x423   : > { %v3431_v58 = vmul.f32 %v4433_v31, %v7315_v61  ;;  %v3859_v63 = vadd.f32 %v8946_v8, %v3776_v2  ;;  %v2561_v17 = vadd.f32 %v10894_v15, %v8765_v26  ;;  %v2560_v41 = vadd.f32 %v10895_v28, %v8753_v33  ;;  %v3538_v19 = vpop.permute.xlu1 %3537  ;;  %v4436_v24 = vld [vmem:[%s4604_s27 + $0xb2] sm:$0xff]  ;;  %v4438_v31 = vld [vmem:[%s4604_s27 + $0x28a] sm:$0xff] }
 0x424   : > { %v2803_v3 = vadd.f32 %v8851_v49, %v2558_v20  ;;  %v2804_v2 = vadd.f32 %v8855_v29, %v2559_v35  ;;  %v3778_v42 = vadd.f32 %v3538_v19, %v3290_v6  ;;  %v3777_v26 = vadd.f32 %v3536_v0, %v3289_v5  ;;  %v4437_v20 = vld [vmem:[%s4604_s27 + $0x292] sm:$0xff]  ;;  %v10897_v35 = vld [vmem:[#allocation344_spill] sm:$0xff] }
 0x425   : > { %v3940_v25 = vmax.f32 %v3859_v63, 0.0  ;;  %v8982_v33 = vmul.f32 %v4436_v24, %v8780_v36  ;;  %3653 = vrot.lane.b32.xlu1 %v3431_v58, %s4543_s30  ;;  %3651 = vrot.lane.b32.xlu0 %v3430_v1, %s4543_s30  ;;  %v3433_v49 = vmul.f32 %v4437_v20, %v7315_v61  ;;  %v3432_v56 = vmul.f32 %v4438_v31, %v7315_v61  ;;  %v10896_v39 = vld [vmem:[#allocation341_spill] sm:$0xff]  ;;  %v10898_v1 = vld [vmem:[#allocation190_spill] sm:$0xff] }
 0x426   : > { %v3291_v29 = vadd.f32 %v10896_v39, %v2803_v3  ;;  %v3292_v6 = vadd.f32 %v10897_v35, %v2804_v2  ;;  %v3861_v5 = vadd.f32 %v8946_v8, %v3778_v42  ;;  %v3860_v58 = vadd.f32 %v8946_v8, %v3777_v26  ;;  %v10899_v15 = vld [vmem:[#allocation185_spill] sm:$0xff]  ;;  %v3540_v2 = vpop.permute.xlu0 %3539  ;;  %v4439_v26 = vld [vmem:[%s4604_s27 + $0xc2] sm:$0xff]  ;;  %v10901_v39 = vld [vmem:[#allocation346_spill] sm:$0xff] }
 0x427   : > { %4022 = vst.msk [vmem:[%s8977_s16] sm:$0xff] %vm4021_vm0, %v3940_v25  ;;  %v2563_v63 = vadd.f32 %v10898_v1, %v8773_v62  ;;  %v2562_v28 = vadd.f32 %v10899_v15, %v8761_v44  ;;  %v2805_v19 = vadd.f32 %v8877_v45, %v2560_v41  ;;  %v2806_v3 = vadd.f32 %v8881_v18, %v2561_v17  ;;  %v3542_v0 = vpop.permute.xlu1 %3541  ;;  %v4440_v44 = vld [vmem:[%s4604_s27 + $0x2aa] sm:$0xff]  ;;  %v4441_v45 = vld [vmem:[%s4604_s27 + $0x2a2] sm:$0xff] }
 0x428   : > { %v3942_v25 = vmax.f32 %v3861_v5, 0.0  ;;  %v3941_v42 = vmax.f32 %v3860_v58, 0.0  ;;  %v3780_v24 = vadd.f32 %v3542_v0, %v3292_v6  ;;  %v3779_v20 = vadd.f32 %v3540_v2, %v3291_v29  ;;  %v10900_v17 = vld [vmem:[#allocation343_spill] sm:$0xff]  ;;  %v10903_v5 = vld [vmem:[#allocation189_spill] sm:$0xff] }
 0x429   : > { %v9004_v31 = vmul.f32 %v4439_v26, %v8780_v36  ;;  %3657 = vrot.lane.b32.xlu1 %v3433_v49, %s4543_s30  ;;  %3655 = vrot.lane.b32.xlu0 %v3432_v56, %s4543_s30  ;;  %v3435_v62 = vmul.f32 %v4440_v44, %v7315_v61  ;;  %v3434_v18 = vmul.f32 %v4441_v45, %v7315_v61  ;;  %v10902_v56 = vld [vmem:[#allocation194_spill] sm:$0xff]  ;;  %v10906_v26 = vld [vmem:[#allocation348_spill] sm:$0xff] }
 0x42a   : > { %v3293_v41 = vadd.f32 %v10900_v17, %v2805_v19  ;;  %v3294_v35 = vadd.f32 %v10901_v39, %v2806_v3  ;;  %4024 = vst.msk [vmem:[%s8977_s16 + $0x10] sm:$0xff] %vm4021_vm0, %v3942_v25  ;;  %4023 = vst.msk [vmem:[%s8977_s16 + $0x8] sm:$0xff] %vm4021_vm0, %v3941_v42  ;;  %v3863_v29 = vadd.f32 %v8946_v8, %v3780_v24  ;;  %v3544_v3 = vpop.permute.xlu0 %3543  ;;  %v10904_v24 = vld [vmem:[#allocation385_spill] sm:$0xff] }
 0x42b   : > { %v3862_v49 = vadd.f32 %v8946_v8, %v3779_v20  ;;  %v2565_v6 = vadd.f32 %v10902_v56, %v8788_v48  ;;  %v2564_v58 = vadd.f32 %v10903_v5, %v8769_v4  ;;  %v2807_v1 = vadd.f32 %v8893_v21, %v2562_v28  ;;  %v3546_v19 = vpop.permute.xlu1 %3545  ;;  %v4442_v48 = vld [vmem:[%s4604_s27 + $0x2c2] sm:$0xff] }
 0x42c   : > { %v2808_v15 = vadd.f32 %v8897_v55, %v2563_v63  ;;  %v3944_v0 = vmax.f32 %v3863_v29, 0.0  ;;  %v3782_v25 = vadd.f32 %v3546_v19, %v3294_v35  ;;  %v3781_v42 = vadd.f32 %v3544_v3, %v3293_v41  ;;  %v4443_v55 = vld [vmem:[%s4604_s27 + $0x2b2] sm:$0xff] }
 0x42d   : > { %v3943_v2 = vmax.f32 %v3862_v49, 0.0  ;;  %v9028_v20 = vmul.f32 %v10904_v24, %v8780_v36  ;;  %3661 = vrot.lane.b32.xlu1 %v3435_v62, %s4543_s30  ;;  %3659 = vrot.lane.b32.xlu0 %v3434_v18, %s4543_s30  ;;  %v3437_v4 = vmul.f32 %v4442_v48, %v7315_v61  ;;  %v3436_v21 = vmul.f32 %v4443_v55, %v7315_v61  ;;  %v10905_v63 = vld [vmem:[#allocation345_spill] sm:$0xff]  ;;  %v10907_v18 = vld [vmem:[#allocation198_spill] sm:$0xff] }
 0x42e   : > { %v3295_v28 = vadd.f32 %v10905_v63, %v2807_v1  ;;  %v3296_v44 = vadd.f32 %v10906_v26, %v2808_v15  ;;  %4026 = vst.msk [vmem:[%s8977_s16 + $0x20] sm:$0xff] %vm4021_vm0, %v3944_v0  ;;  %v3865_v45 = vadd.f32 %v8946_v8, %v3782_v25  ;;  %v3864_v62 = vadd.f32 %v8946_v8, %v3781_v42  ;;  %v10908_v41 = vld [vmem:[#allocation193_spill] sm:$0xff]  ;;  %v3548_v56 = vpop.permute.xlu0 %3547  ;;  %v10911_v48 = vld [vmem:[#allocation202_spill] sm:$0xff] }
 0x42f   : > { %4025 = vst.msk [vmem:[%s8977_s16 + $0x18] sm:$0xff] %vm4021_vm0, %v3943_v2  ;;  %v2567_v17 = vadd.f32 %v10907_v18, %v8796_v38  ;;  %v2566_v39 = vadd.f32 %v10908_v41, %v8777_v54  ;;  %v2809_v35 = vadd.f32 %v8913_v16, %v2564_v58  ;;  %v2810_v29 = vadd.f32 %v8928_v53, %v2565_v6  ;;  %v3550_v49 = vpop.permute.xlu1 %3549  ;;  %v4444_v3 = vld [vmem:[%s4604_s27 + $0xd2] sm:$0xff]  ;;  %v4446_v54 = vld [vmem:[%s4604_s27 + $0x2ca] sm:$0xff]  ;;  %v10909_v6 = vld [vmem:[#allocation347_spill] sm:$0xff] }
 0x430   : > { %v3946_v5 = vmax.f32 %v3865_v45, 0.0  ;;  %v3945_v1 = vmax.f32 %v3864_v62, 0.0  ;;  %v3784_v15 = vadd.f32 %v3550_v49, %v3296_v44  ;;  %v3783_v19 = vadd.f32 %v3548_v56, %v3295_v28  ;;  %v4445_v38 = vld [vmem:[%s4604_s27 + $0x2d2] sm:$0xff]  ;;  %v10915_v49 = vld [vmem:[#allocation352_spill] sm:$0xff] }
 0x431   : > { %v9052_v0 = vmul.f32 %v4444_v3, %v8780_v36  ;;  %3665 = vrot.lane.b32.xlu1 %v3437_v4, %s4543_s30  ;;  %3663 = vrot.lane.b32.xlu0 %v3436_v21, %s4543_s30  ;;  %v3439_v16 = vmul.f32 %v4445_v38, %v7315_v61  ;;  %v3438_v53 = vmul.f32 %v4446_v54, %v7315_v61  ;;  %v10910_v2 = vld [vmem:[#allocation350_spill] sm:$0xff]  ;;  %v10912_v55 = vld [vmem:[#allocation197_spill] sm:$0xff] }
 0x432   : > { %v3297_v58 = vadd.f32 %v10909_v6, %v2809_v35  ;;  %v3298_v25 = vadd.f32 %v10910_v2, %v2810_v29  ;;  %4028 = vst.msk [vmem:[%s8977_s16 + $0x30] sm:$0xff] %vm4021_vm0, %v3946_v5  ;;  %4027 = vst.msk [vmem:[%s8977_s16 + $0x28] sm:$0xff] %vm4021_vm0, %v3945_v1  ;;  %v3867_v42 = vadd.f32 %v8946_v8, %v3784_v15  ;;  %v3552_v44 = vpop.permute.xlu0 %3551  ;;  %v10913_v35 = vld [vmem:[#allocation8_spill] sm:$0xff]  ;;  %v10916_v15 = vld [vmem:[#allocation206_spill] sm:$0xff] }
 0x433   : > { %v3866_v24 = vadd.f32 %v8946_v8, %v3783_v19  ;;  %v2569_v4 = vadd.f32 %v10911_v48, %v8804_v59  ;;  %v2568_v21 = vadd.f32 %v10912_v55, %v8792_v13  ;;  %v2811_v63 = vadd.f32 %v8924_v47, %v2566_v39  ;;  %v3554_v26 = vpop.permute.xlu1 %3553  ;;  %v4447_v13 = vld [vmem:[%s4604_s27 + $0x2ea] sm:$0xff] }
 0x434   : > { %v2812_v28 = vadd.f32 %v8932_v50, %v2567_v17  ;;  %v3948_v45 = vmax.f32 %v3867_v42, 0.0  ;;  %v3786_v18 = vadd.f32 %v3554_v26, %v3298_v25  ;;  %v3785_v41 = vadd.f32 %v3552_v44, %v3297_v58  ;;  %v4448_v50 = vld [vmem:[%s4604_s27 + $0x2e2] sm:$0xff]  ;;  %v10914_v17 = vld [vmem:[#allocation349_spill] sm:$0xff]  ;;  %v10921_v44 = vld [vmem:[#allocation210_spill] sm:$0xff] }
 0x435   : > { %v3947_v62 = vmax.f32 %v3866_v24, 0.0  ;;  %v9076_v29 = vmul.f32 %v10913_v35, %v8780_v36  ;;  %3669 = vrot.lane.b32.xlu1 %v3439_v16, %s4543_s30  ;;  %3667 = vrot.lane.b32.xlu0 %v3438_v53, %s4543_s30  ;;  %v3441_v59 = vmul.f32 %v4447_v13, %v7315_v61  ;;  %v3440_v47 = vmul.f32 %v4448_v50, %v7315_v61  ;;  %v10917_v3 = vld [vmem:[#allocation201_spill] sm:$0xff]  ;;  %v10918_v24 = vld [vmem:[#allocation106_spill] sm:$0xff] }
 0x436   : > { %v3299_v39 = vadd.f32 %v10914_v17, %v2811_v63  ;;  %v3300_v56 = vadd.f32 %v10915_v49, %v2812_v28  ;;  %4030 = vst.msk [vmem:[%s8977_s16 + $0x40] sm:$0xff] %vm4021_vm0, %v3948_v45  ;;  %v3869_v5 = vadd.f32 %v8946_v8, %v3786_v18  ;;  %v3868_v1 = vadd.f32 %v8946_v8, %v3785_v41  ;;  %v3556_v6 = vpop.permute.xlu0 %3555  ;;  %v10923_v49 = vld [vmem:[#allocation394_spill] sm:$0xff] }
 0x437   : > { %4029 = vst.msk [vmem:[%s8977_s16 + $0x38] sm:$0xff] %vm4021_vm0, %v3947_v62  ;;  %v2571_v19 = vadd.f32 %v10916_v15, %v8818_v7  ;;  %v2570_v38 = vadd.f32 %v10917_v3, %v8800_v43  ;;  %v2813_v16 = vadd.f32 %v8938_v12, %v2568_v21  ;;  %v2814_v54 = vadd.f32 %v8942_v37, %v2569_v4  ;;  %v3558_v53 = vpop.permute.xlu1 %3557  ;;  %v4449_v43 = vld [vmem:[%s4604_s27 + $0x302] sm:$0xff]  ;;  %v4450_v12 = vld [vmem:[%s4604_s27 + $0x2f2] sm:$0xff] }
 0x438   : > { %v3950_v58 = vmax.f32 %v3869_v5, 0.0  ;;  %v3949_v2 = vmax.f32 %v3868_v1, 0.0  ;;  %v3788_v25 = vadd.f32 %v3558_v53, %v3300_v56  ;;  %v3787_v42 = vadd.f32 %v3556_v6, %v3299_v39  ;;  %v10919_v4 = vld [vmem:[#allocation351_spill] sm:$0xff]  ;;  %v10920_v21 = vld [vmem:[#allocation354_spill] sm:$0xff]  ;;  %v10922_v62 = vld [vmem:[#allocation205_spill] sm:$0xff] }
 0x439   : > { %v9100_v48 = vmul.f32 %v10918_v24, %v8780_v36  ;;  %3673 = vrot.lane.b32.xlu1 %v3441_v59, %s4543_s30  ;;  %3671 = vrot.lane.b32.xlu0 %v3440_v47, %s4543_s30  ;;  %v3443_v7 = vmul.f32 %v4449_v43, %v7315_v61  ;;  %v3442_v37 = vmul.f32 %v4450_v12, %v7315_v61  ;;  %v10924_v5 = vld [vmem:[#allocation353_spill] sm:$0xff]  ;;  %v10925_v15 = vld [vmem:[#allocation359_spill] sm:$0xff] }
 0x43a   : > { %v3301_v55 = vadd.f32 %v10919_v4, %v2813_v16  ;;  %v3302_v63 = vadd.f32 %v10920_v21, %v2814_v54  ;;  %4032 = vst.msk [vmem:[%s8977_s16 + $0x50] sm:$0xff] %vm4021_vm0, %v3950_v58  ;;  %4031 = vst.msk [vmem:[%s8977_s16 + $0x48] sm:$0xff] %vm4021_vm0, %v3949_v2  ;;  %v3871_v28 = vadd.f32 %v8946_v8, %v3788_v25  ;;  %v3560_v59 = vpop.permute.xlu0 %3559  ;;  %v10926_v16 = vld [vmem:[#allocation214_spill] sm:$0xff]  ;;  %v10927_v53 = vld [vmem:[#allocation209_spill] sm:$0xff] }
 0x43b   : > { %v3870_v26 = vadd.f32 %v8946_v8, %v3787_v42  ;;  %v2573_v45 = vadd.f32 %v10921_v44, %v8828_v40  ;;  %v2572_v18 = vadd.f32 %v10922_v62, %v8814_v34  ;;  %v2815_v41 = vadd.f32 %v8954_v11, %v2570_v38  ;;  %v3562_v13 = vpop.permute.xlu1 %3561  ;;  %v4451_v34 = vld [vmem:[%s4604_s27 + $0x312] sm:$0xff]  ;;  %v4452_v40 = vld [vmem:[%s4604_s27 + $0x30a] sm:$0xff] }
 0x43c   : > { %v2816_v35 = vadd.f32 %v8966_v46, %v2571_v19  ;;  %v3952_v50 = vmax.f32 %v3871_v28, 0.0  ;;  %v3790_v17 = vadd.f32 %v3562_v13, %v3302_v63  ;;  %v3789_v39 = vadd.f32 %v3560_v59, %v3301_v55  ;;  %v10929_v55 = vld [vmem:[#allocation358_spill] sm:$0xff] }
 0x43d   : > { %v3951_v47 = vmax.f32 %v3870_v26, 0.0  ;;  %v9124_v56 = vmul.f32 %v10923_v49, %v8780_v36  ;;  %3677 = vrot.lane.b32.xlu1 %v3443_v7, %s4543_s30  ;;  %3675 = vrot.lane.b32.xlu0 %v3442_v37, %s4543_s30  ;;  %v3445_v11 = vmul.f32 %v4451_v34, %v7315_v61  ;;  %v3444_v46 = vmul.f32 %v4452_v40, %v7315_v61  ;;  %v10928_v37 = vld [vmem:[#allocation13_spill] sm:$0xff]  ;;  %v10930_v63 = vld [vmem:[#allocation374_spill] sm:$0xff]  ;;  %v10933_v34 = vld [vmem:[#allocation395_spill] sm:$0xff] }
 0x43e   : > { %v3303_v1 = vadd.f32 %v10924_v5, %v2815_v41  ;;  %v3304_v19 = vadd.f32 %v10925_v15, %v2816_v35  ;;  %4034 = vst.msk [vmem:[%s8977_s16 + $0x60] sm:$0xff] %vm4021_vm0, %v3952_v50  ;;  %v3873_v3 = vadd.f32 %v8946_v8, %v3790_v17  ;;  %v3872_v38 = vadd.f32 %v8946_v8, %v3789_v39  ;;  %v3564_v42 = vpop.permute.xlu0 %3563  ;;  %v10934_v40 = vld [vmem:[#allocation373_spill] sm:$0xff]  ;;  %v10935_v5 = vld [vmem:[#allocation387_spill] sm:$0xff] }
 0x43f   : > { %4033 = vst.msk [vmem:[%s8977_s16 + $0x58] sm:$0xff] %vm4021_vm0, %v3951_v47  ;;  %v2575_v54 = vadd.f32 %v10926_v16, %v8846_v22  ;;  %v2574_v6 = vadd.f32 %v10927_v53, %v8822_v27  ;;  %v2817_v58 = vadd.f32 %v8982_v33, %v2572_v18  ;;  %v2818_v2 = vadd.f32 %v9004_v31, %v2573_v45  ;;  %v3566_v25 = vpop.permute.xlu1 %3565  ;;  %v4453_v27 = vld [vmem:[%s4604_s27 + $0x32a] sm:$0xff]  ;;  %v4454_v33 = vld [vmem:[%s4604_s27 + $0x322] sm:$0xff] }
 0x440   : > { %v3954_v24 = vmax.f32 %v3873_v3, 0.0  ;;  %v3953_v43 = vmax.f32 %v3872_v38, 0.0  ;;  %v3792_v7 = vadd.f32 %v3566_v25, %v3304_v19  ;;  %v3791_v12 = vadd.f32 %v3564_v42, %v3303_v1  ;;  %v10931_v45 = vld [vmem:[#allocation213_spill] sm:$0xff]  ;;  %v10932_v18 = vld [vmem:[#allocation271_spill] sm:$0xff]  ;;  %v10936_v3 = vld [vmem:[#allocation272_spill] sm:$0xff] }
 0x441   : > { %v9148_v4 = vmul.f32 %v10928_v37, %v8780_v36  ;;  %3681 = vrot.lane.b32.xlu1 %v3445_v11, %s4543_s30  ;;  %3679 = vrot.lane.b32.xlu0 %v3444_v46, %s4543_s30  ;;  %v3447_v22 = vmul.f32 %v4453_v27, %v7315_v61  ;;  %v3446_v31 = vmul.f32 %v4454_v33, %v7315_v61  ;;  %v10937_v16 = vld [vmem:[#allocation273_spill] sm:$0xff]  ;;  %v10938_v37 = vld [vmem:[#allocation386_spill] sm:$0xff] }
 0x442   : > { %v3305_v21 = vadd.f32 %v10929_v55, %v2817_v58  ;;  %v3306_v28 = vadd.f32 %v10930_v63, %v2818_v2  ;;  %4036 = vst.msk [vmem:[%s8977_s16 + $0x70] sm:$0xff] %vm4021_vm0, %v3954_v24  ;;  %4035 = vst.msk [vmem:[%s8977_s16 + $0x68] sm:$0xff] %vm4021_vm0, %v3953_v43  ;;  %v3875_v26 = vadd.f32 %v8946_v8, %v3792_v7  ;;  %v3568_v50 = vpop.permute.xlu0 %3567  ;;  %v4457_v7 = vld [vmem:[%s4604_s27 + $0x112] sm:$0xff] }
 0x443   : > { %v3874_v44 = vadd.f32 %v8946_v8, %v3791_v12  ;;  %v2577_v62 = vadd.f32 %v10931_v45, %v8869_v57  ;;  %v2576_v41 = vadd.f32 %v10932_v18, %v8832_v10  ;;  %v2819_v35 = vadd.f32 %v9028_v20, %v2574_v6  ;;  %v3570_v59 = vpop.permute.xlu1 %3569  ;;  %v4455_v10 = vld [vmem:[%s4604_s27 + $0x342] sm:$0xff]  ;;  %v4456_v20 = vld [vmem:[%s4604_s27 + $0x332] sm:$0xff] }
 0x444   : > { %v2820_v13 = vadd.f32 %v9052_v0, %v2575_v54  ;;  %v3956_v47 = vmax.f32 %v3875_v26, 0.0  ;;  %v3794_v39 = vadd.f32 %v3570_v59, %v3306_v28  ;;  %v3793_v49 = vadd.f32 %v3568_v50, %v3305_v21  ;;  %v10940_v21 = vld [vmem:[#allocation274_spill] sm:$0xff]  ;;  %v10941_v28 = vld [vmem:[#allocation275_spill] sm:$0xff]  ;;  %v10942_v59 = vld [vmem:[#allocation52_spill] sm:$0xff] }
 0x445   : > { %v3955_v17 = vmax.f32 %v3874_v44, 0.0  ;;  %v2744_v11 = vmul.f32 %v10933_v34, %v8780_v36  ;;  %3685 = vrot.lane.b32.xlu1 %v3447_v22, %s4543_s30  ;;  %3683 = vrot.lane.b32.xlu0 %v3446_v31, %s4543_s30  ;;  %v3449_v57 = vmul.f32 %v4455_v10, %v7315_v61  ;;  %v3448_v0 = vmul.f32 %v4456_v20, %v7315_v61  ;;  %v10939_v22 = vld [vmem:[#allocation29_spill] sm:$0xff]  ;;  %v10943_v50 = vld [vmem:[#allocation224_spill] sm:$0xff] }
 0x446   : > { %v3307_v46 = vadd.f32 %v10934_v40, %v2819_v35  ;;  %v3308_v1 = vadd.f32 %v10935_v5, %v2820_v13  ;;  %4038 = vst.msk [vmem:[%s8977_s16 + $0x80] sm:$0xff] %vm4021_vm0, %v3956_v47  ;;  %v3877_v15 = vadd.f32 %v8946_v8, %v3794_v39  ;;  %v3876_v19 = vadd.f32 %v8946_v8, %v3793_v49  ;;  %v3572_v2 = vpop.permute.xlu0 %3571  ;;  %v4461_v39 = vld [vmem:[%s4604_s27 + $0x12a] sm:$0xff]  ;;  %v10945_v49 = vld [vmem:[#allocation42_spill] sm:$0xff] }
 0x447   : > { %4037 = vst.msk [vmem:[%s8977_s16 + $0x78] sm:$0xff] %vm4021_vm0, %v3955_v17  ;;  %v2579_v38 = vadd.f32 %v10936_v3, %v8885_v32  ;;  %v2578_v54 = vadd.f32 %v10937_v16, %v8859_v51  ;;  %v2821_v53 = vadd.f32 %v9076_v29, %v2576_v41  ;;  %v2822_v6 = vadd.f32 %v9100_v48, %v2577_v62  ;;  %v3574_v58 = vpop.permute.xlu1 %3573  ;;  %v4458_v51 = vld [vmem:[%s4604_s27 + $0x352] sm:$0xff]  ;;  %v4459_v29 = vld [vmem:[%s4604_s27 + $0x34a] sm:$0xff]  ;;  %v4460_v17 = vld [vmem:[%s4604_s27 + $0x122] sm:$0xff] }
 0x448   : > { %v3958_v25 = vmax.f32 %v3877_v15, 0.0  ;;  %v3957_v42 = vmax.f32 %v3876_v19, 0.0  ;;  %v3796_v24 = vadd.f32 %v3574_v58, %v3308_v1  ;;  %v3795_v43 = vadd.f32 %v3572_v2, %v3307_v46  ;;  %v10946_v20 = vld [vmem:[#allocation276_spill] sm:$0xff]  ;;  %v10947_v40 = vld [vmem:[#allocation277_spill] sm:$0xff] }
 0x449   : > { %v2745_v12 = vmul.f32 %v4457_v7, %v8780_v36  ;;  %3689 = vrot.lane.b32.xlu1 %v3449_v57, %s4543_s30  ;;  %3687 = vrot.lane.b32.xlu0 %v3448_v0, %s4543_s30  ;;  %v3451_v32 = vmul.f32 %v4458_v51, %v7315_v61  ;;  %v3450_v48 = vmul.f32 %v4459_v29, %v7315_v61  ;;  %v10950_v2 = vld [vmem:[#allocation69_spill] sm:$0xff]  ;;  %v10953_v51 = vld [vmem:[#allocation51_spill] sm:$0xff] }
 0x44a   : > { %v3309_v27 = vadd.f32 %v10938_v37, %v2821_v53  ;;  %v3310_v33 = vadd.f32 %v10939_v22, %v2822_v6  ;;  %4040 = vst.msk [vmem:[%s8977_s16 + $0x90] sm:$0xff] %vm4021_vm0, %v3958_v25  ;;  %4039 = vst.msk [vmem:[%s8977_s16 + $0x88] sm:$0xff] %vm4021_vm0, %v3957_v42  ;;  %v3879_v31 = vadd.f32 %v8946_v8, %v3796_v24  ;;  %v3576_v62 = vpop.permute.xlu0 %3575  ;;  %v10948_v53 = vld [vmem:[#allocation115_spill] sm:$0xff]  ;;  %v10951_v25 = vld [vmem:[#allocation226_spill] sm:$0xff] }
 0x44b   : > { %v3878_v55 = vadd.f32 %v8946_v8, %v3795_v43  ;;  %v2581_v63 = vadd.f32 %v10940_v21, %v8905_v23  ;;  %v2580_v61 = vadd.f32 %v10941_v28, %v8873_v60  ;;  %v2823_v26 = vadd.f32 %v9124_v56, %v2578_v54  ;;  %v3578_v45 = vpop.permute.xlu1 %3577  ;;  %v10944_v56 = vld [vmem:[#allocation26_spill] sm:$0xff]  ;;  %v10949_v6 = vld [vmem:[#allocation223_spill] sm:$0xff]  ;;  %v10952_v7 = vld [vmem:[#allocation41_spill] sm:$0xff] }
 0x44c   : > { %v2824_v44 = vadd.f32 %v9148_v4, %v2579_v38  ;;  %v3960_v18 = vmax.f32 %v3879_v31, 0.0  ;;  %v3798_v35 = vadd.f32 %v3578_v45, %v3310_v33  ;;  %v3797_v13 = vadd.f32 %v3576_v62, %v3309_v27  ;;  %v4462_v24 = vld [vmem:[%s4604_s27 + $0x132] sm:$0xff]  ;;  %v10955_v22 = vld [vmem:[#allocation279_spill] sm:$0xff] }
 0x44d   : > { %v3959_v41 = vmax.f32 %v3878_v55, 0.0  ;;  %v2095_v47 = vadd.f32 %v10943_v50, %v10942_v59  ;;  %v2746_v23 = vmul.f32 %v4460_v17, %v8780_v36  ;;  %v2747_v60 = vmul.f32 %v4461_v39, %v8780_v36  ;;  %3693 = vrot.lane.b32.xlu1 %v3451_v32, %s4543_s30  ;;  %3691 = vrot.lane.b32.xlu0 %v3450_v48, %s4543_s30  ;;  %v10954_v37 = vld [vmem:[#allocation278_spill] sm:$0xff]  ;;  %v10957_v62 = vld [vmem:[#allocation225_spill] sm:$0xff] }
 0x44e   : > { %v3311_v4 = vadd.f32 %v10944_v56, %v2823_v26  ;;  %v3312_v34 = vadd.f32 %v10945_v49, %v2824_v44  ;;  %4042 = vst.msk [vmem:[%s8977_s16 + $0xa0] sm:$0xff] %vm4021_vm0, %v3960_v18  ;;  %v3881_v10 = vadd.f32 %v8946_v8, %v3798_v35  ;;  %v3880_v57 = vadd.f32 %v8946_v8, %v3797_v13  ;;  %v3580_v19 = vpop.permute.xlu0 %3579  ;;  %v10956_v45 = vld [vmem:[#allocation114_spill] sm:$0xff]  ;;  %v10959_v35 = vld [vmem:[#allocation228_spill] sm:$0xff] }
 0x44f   : > { %4041 = vst.msk [vmem:[%s8977_s16 + $0x98] sm:$0xff] %vm4021_vm0, %v3959_v41  ;;  %v2583_v0 = vadd.f32 %v10946_v20, %v2095_v47  ;;  %v2582_v46 = vadd.f32 %v10947_v40, %v8889_v14  ;;  %v2825_v5 = vadd.f32 %v2744_v11, %v2580_v61  ;;  %v2826_v1 = vadd.f32 %v2745_v12, %v2581_v63  ;;  %v3582_v15 = vpop.permute.xlu1 %3581  ;;  %v4463_v14 = vld [vmem:[%s4604_s27 + $0x142] sm:$0xff]  ;;  %v4464_v59 = vld [vmem:[%s4604_s27 + $0x14a] sm:$0xff]  ;;  %v4465_v47 = vld [vmem:[%s4604_s27 + $0x152] sm:$0xff] }
 0x450   : > { %v3962_v3 = vmax.f32 %v3881_v10, 0.0  ;;  %v3961_v38 = vmax.f32 %v3880_v57, 0.0  ;;  %v3800_v16 = vadd.f32 %v3582_v15, %v3312_v34  ;;  %v3799_v54 = vadd.f32 %v3580_v19, %v3311_v4  ;;  %v10958_v41 = vld [vmem:[#allocation72_spill] sm:$0xff]  ;;  %v10963_v57 = vld [vmem:[#allocation281_spill] sm:$0xff] }
 0x451   : > { %v2096_v58 = vadd.f32 %v10949_v6, %v10948_v53  ;;  %v2097_v42 = vadd.f32 %v10951_v25, %v10950_v2  ;;  %v2748_v43 = vmul.f32 %v4462_v24, %v8780_v36  ;;  %v2749_v11 = vmul.f32 %v4463_v14, %v8780_v36  ;;  %v10962_v34 = vld [vmem:[#allocation280_spill] sm:$0xff]  ;;  %v10967_v6 = vld [vmem:[#allocation230_spill] sm:$0xff] }
 0x452   : > { %v3313_v12 = vadd.f32 %v10952_v7, %v2825_v5  ;;  %v3314_v32 = vadd.f32 %v10953_v51, %v2826_v1  ;;  %4044 = vst.msk [vmem:[%s8977_s16 + $0xb0] sm:$0xff] %vm4021_vm0, %v3962_v3  ;;  %4043 = vst.msk [vmem:[%s8977_s16 + $0xa8] sm:$0xff] %vm4021_vm0, %v3961_v38  ;;  %v3883_v29 = vadd.f32 %v8946_v8, %v3800_v16  ;;  %v3584_v63 = vpop.permute.xlu0 %3583  ;;  %v10964_v38 = vld [vmem:[#allocation70_spill] sm:$0xff]  ;;  %v10965_v16 = vld [vmem:[#allocation227_spill] sm:$0xff] }
 0x453   : > { %v3882_v48 = vadd.f32 %v8946_v8, %v3799_v54  ;;  %v2585_v27 = vadd.f32 %v10954_v37, %v2097_v42  ;;  %v2584_v33 = vadd.f32 %v10955_v22, %v2096_v58  ;;  %v2827_v31 = vadd.f32 %v2746_v23, %v2582_v46  ;;  %v3586_v21 = vpop.permute.xlu1 %3585  ;;  %v10960_v23 = vld [vmem:[#allocation50_spill] sm:$0xff]  ;;  %v10966_v53 = vld [vmem:[#allocation388_spill] sm:$0xff] }
 0x454   : > { %v2828_v55 = vadd.f32 %v2747_v60, %v2583_v0  ;;  %v3964_v28 = vmax.f32 %v3883_v29, 0.0  ;;  %v3802_v26 = vadd.f32 %v3586_v21, %v3314_v32  ;;  %v3801_v44 = vadd.f32 %v3584_v63, %v3313_v12  ;;  %v10961_v60 = vld [vmem:[#allocation57_spill] sm:$0xff]  ;;  %v4466_v2 = vld [vmem:[%s4604_s27 + $0x162] sm:$0xff] }
 0x455   : > { %v3963_v61 = vmax.f32 %v3882_v48, 0.0  ;;  %v2098_v18 = vadd.f32 %v10957_v62, %v10956_v45  ;;  %v2099_v13 = vadd.f32 %v10959_v35, %v10958_v41  ;;  %v2750_v50 = vmul.f32 %v4464_v59, %v8780_v36  ;;  %v4467_v42 = vld [vmem:[%s4604_s27 + $0x16a] sm:$0xff]  ;;  %v10970_v32 = vld [vmem:[#allocation283_spill] sm:$0xff]  ;;  %v10974_v45 = vld [vmem:[#allocation282_spill] sm:$0xff] }
 0x456   : > { %v2751_v17 = vmul.f32 %v4465_v47, %v8780_v36  ;;  %v3315_v39 = vadd.f32 %v10960_v23, %v2827_v31  ;;  %v3316_v56 = vadd.f32 %v10961_v60, %v2828_v55  ;;  %4046 = vst.msk [vmem:[%s8977_s16 + $0xc0] sm:$0xff] %vm4021_vm0, %v3964_v28  ;;  %v3885_v4 = vadd.f32 %v8946_v8, %v3802_v26  ;;  %v3588_v5 = vpop.permute.xlu0 %3587  ;;  %v10971_v48 = vld [vmem:[#allocation284_spill] sm:$0xff]  ;;  %v10973_v26 = vld [vmem:[#allocation229_spill] sm:$0xff] }
 0x457   : > { %4045 = vst.msk [vmem:[%s8977_s16 + $0xb8] sm:$0xff] %vm4021_vm0, %v3963_v61  ;;  %v3884_v49 = vadd.f32 %v8946_v8, %v3801_v44  ;;  %v2587_v10 = vadd.f32 %v10962_v34, %v2099_v13  ;;  %v2586_v20 = vadd.f32 %v10963_v57, %v2098_v18  ;;  %v2829_v0 = vadd.f32 %v2748_v43, %v2584_v33  ;;  %v3590_v46 = vpop.permute.xlu1 %3589  ;;  %v10968_v43 = vld [vmem:[#allocation56_spill] sm:$0xff]  ;;  %v10972_v61 = vld [vmem:[#allocation357_spill] sm:$0xff] }
 0x458   : > { %v2830_v40 = vadd.f32 %v2749_v11, %v2585_v27  ;;  %v3966_v1 = vmax.f32 %v3885_v4, 0.0  ;;  %v3804_v19 = vadd.f32 %v3590_v46, %v3316_v56  ;;  %v3803_v3 = vadd.f32 %v3588_v5, %v3315_v39  ;;  %v10969_v11 = vld [vmem:[#allocation64_spill] sm:$0xff]  ;;  %v4468_v41 = vld [vmem:[%s4604_s27 + $0x172] sm:$0xff]  ;;  %v10978_v56 = vld [vmem:[#allocation287_spill] sm:$0xff] }
 0x459   : > { %v3965_v15 = vmax.f32 %v3884_v49, 0.0  ;;  %v2100_v54 = vadd.f32 %v10965_v16, %v10964_v38  ;;  %v2101_v58 = vadd.f32 %v10967_v6, %v10966_v53  ;;  %v2752_v25 = vmul.f32 %v4466_v2, %v8780_v36  ;;  %v10975_v62 = vld [vmem:[#allocation232_spill] sm:$0xff]  ;;  %v10982_v38 = vld [vmem:[#allocation361_spill] sm:$0xff]  ;;  %v10983_v16 = vld [vmem:[#allocation234_spill] sm:$0xff] }
 0x45a   : > { %v2753_v24 = vmul.f32 %v4467_v42, %v8780_v36  ;;  %v3317_v14 = vadd.f32 %v10968_v43, %v2829_v0  ;;  %v3318_v7 = vadd.f32 %v10969_v11, %v2830_v40  ;;  %4048 = vst.msk [vmem:[%s8977_s16 + $0xd0] sm:$0xff] %vm4021_vm0, %v3966_v1  ;;  %v3887_v12 = vadd.f32 %v8946_v8, %v3804_v19  ;;  %v3592_v31 = vpop.permute.xlu0 %3591  ;;  %v4469_v13 = vld [vmem:[%s4604_s27 + $0x182] sm:$0xff]  ;;  %v4470_v53 = vld [vmem:[%s4604_s27 + $0x18a] sm:$0xff] }
 0x45b   : > { %4047 = vst.msk [vmem:[%s8977_s16 + $0xc8] sm:$0xff] %vm4021_vm0, %v3965_v15  ;;  %v3886_v51 = vadd.f32 %v8946_v8, %v3803_v3  ;;  %v2589_v29 = vadd.f32 %v10970_v32, %v2101_v58  ;;  %v2588_v37 = vadd.f32 %v10971_v48, %v2100_v54  ;;  %v2831_v27 = vadd.f32 %v2750_v50, %v2586_v20  ;;  %v3594_v33 = vpop.permute.xlu1 %3593  ;;  %v10976_v50 = vld [vmem:[#allocation63_spill] sm:$0xff]  ;;  %v10979_v49 = vld [vmem:[#allocation288_spill] sm:$0xff]  ;;  %v10980_v15 = vld [vmem:[#allocation74_spill] sm:$0xff] }
 0x45c   : > { %v2832_v22 = vadd.f32 %v2751_v17, %v2587_v10  ;;  %v3968_v55 = vmax.f32 %v3887_v12, 0.0  ;;  %v3806_v63 = vadd.f32 %v3594_v33, %v3318_v7  ;;  %v3805_v28 = vadd.f32 %v3592_v31, %v3317_v14  ;;  %v10977_v17 = vld [vmem:[#allocation390_spill] sm:$0xff]  ;;  %v10981_v19 = vld [vmem:[#allocation231_spill] sm:$0xff] }
 0x45d   : > { %v3967_v21 = vmax.f32 %v3886_v51, 0.0  ;;  %v2102_v44 = vadd.f32 %v10973_v26, %v10972_v61  ;;  %v2103_v18 = vadd.f32 %v10975_v62, %v10974_v45  ;;  %v2754_v35 = vmul.f32 %v4468_v41, %v8780_v36  ;;  %v4471_v58 = vld [vmem:[%s4604_s27 + $0x192] sm:$0xff]  ;;  %v10986_v7 = vld [vmem:[#allocation291_spill] sm:$0xff]  ;;  %v10987_v51 = vld [vmem:[#allocation292_spill] sm:$0xff] }
 0x45e   : > { %v2755_v59 = vmul.f32 %v4469_v13, %v8780_v36  ;;  %v3319_v47 = vadd.f32 %v10976_v50, %v2831_v27  ;;  %v3320_v23 = vadd.f32 %v10977_v17, %v2832_v22  ;;  %4050 = vst.msk [vmem:[%s8977_s16 + $0xe0] sm:$0xff] %vm4021_vm0, %v3968_v55  ;;  %v3889_v39 = vadd.f32 %v8946_v8, %v3806_v63  ;;  %v3596_v0 = vpop.permute.xlu0 %3595  ;;  %v10989_v63 = vld [vmem:[#allocation233_spill] sm:$0xff]  ;;  %v10990_v61 = vld [vmem:[#allocation60_spill] sm:$0xff] }
 0x45f   : > { %4049 = vst.msk [vmem:[%s8977_s16 + $0xd8] sm:$0xff] %vm4021_vm0, %v3967_v21  ;;  %v3888_v60 = vadd.f32 %v8946_v8, %v3805_v28  ;;  %v2591_v4 = vadd.f32 %v10978_v56, %v2103_v18  ;;  %v2590_v34 = vadd.f32 %v10979_v49, %v2102_v44  ;;  %v2833_v10 = vadd.f32 %v2752_v25, %v2588_v37  ;;  %v3598_v20 = vpop.permute.xlu1 %3597  ;;  %v10984_v25 = vld [vmem:[#allocation389_spill] sm:$0xff]  ;;  %v10991_v26 = vld [vmem:[#allocation236_spill] sm:$0xff] }
 0x460   : > { %v2834_v57 = vadd.f32 %v2753_v24, %v2589_v29  ;;  %v3970_v40 = vmax.f32 %v3889_v39, 0.0  ;;  %v3808_v5 = vadd.f32 %v3598_v20, %v3320_v23  ;;  %v3807_v1 = vadd.f32 %v3596_v0, %v3319_v47  ;;  %v10985_v24 = vld [vmem:[#allocation364_spill] sm:$0xff]  ;;  %v10988_v21 = vld [vmem:[#allocation77_spill] sm:$0xff]  ;;  %v10994_v23 = vld [vmem:[#allocation295_spill] sm:$0xff] }
 0x461   : > { %v3969_v46 = vmax.f32 %v3888_v60, 0.0  ;;  %v2104_v3 = vadd.f32 %v10981_v19, %v10980_v15  ;;  %v2105_v54 = vadd.f32 %v10983_v16, %v10982_v38  ;;  %v2756_v6 = vmul.f32 %v4470_v53, %v8780_v36  ;;  %v4472_v45 = vld [vmem:[%s4604_s27 + $0x1a2] sm:$0xff]  ;;  %v4473_v18 = vld [vmem:[%s4604_s27 + $0x1aa] sm:$0xff]  ;;  %v10998_v15 = vld [vmem:[#allocation238_spill] sm:$0xff] }
 0x462   : > { %v2757_v2 = vmul.f32 %v4471_v58, %v8780_v36  ;;  %v3321_v42 = vadd.f32 %v10984_v25, %v2833_v10  ;;  %v3322_v43 = vadd.f32 %v10985_v24, %v2834_v57  ;;  %4052 = vst.msk [vmem:[%s8977_s16 + $0xf0] sm:$0xff] %vm4021_vm0, %v3970_v40  ;;  %v3891_v14 = vadd.f32 %v8946_v8, %v3808_v5  ;;  %v3600_v27 = vpop.permute.xlu0 %3599  ;;  %v10995_v60 = vld [vmem:[#allocation296_spill] sm:$0xff]  ;;  %v10997_v5 = vld [vmem:[#allocation235_spill] sm:$0xff]  ;;  %v10999_v53 = vld [vmem:[#allocation370_spill] sm:$0xff] }
 0x463   : > { %4051 = vst.msk [vmem:[%s8977_s16 + $0xe8] sm:$0xff] %vm4021_vm0, %v3969_v46  ;;  %v3890_v11 = vadd.f32 %v8946_v8, %v3807_v1  ;;  %v2593_v12 = vadd.f32 %v10986_v7, %v2105_v54  ;;  %v2592_v32 = vadd.f32 %v10987_v51, %v2104_v3  ;;  %v2835_v29 = vadd.f32 %v2754_v35, %v2590_v34  ;;  %v3602_v37 = vpop.permute.xlu1 %3601  ;;  %v10992_v35 = vld [vmem:[#allocation78_spill] sm:$0xff]  ;;  %v10996_v46 = vld [vmem:[#allocation117_spill] sm:$0xff]  ;;  %v4475_v16 = vld [vmem:[%s4604_s27 + $0x1c2] sm:$0xff] }
 0x464   : > { %v2836_v48 = vadd.f32 %v2755_v59, %v2591_v4  ;;  %v3972_v22 = vmax.f32 %v3891_v14, 0.0  ;;  %v3810_v31 = vadd.f32 %v3602_v37, %v3322_v43  ;;  %v3809_v55 = vadd.f32 %v3600_v27, %v3321_v42  ;;  %v10993_v59 = vld [vmem:[#allocation85_spill] sm:$0xff]  ;;  %v11000_v58 = vld [vmem:[#allocation379_spill] sm:$0xff]  ;;  %v11001_v42 = vld [vmem:[#allocation298_spill] sm:$0xff] }
 0x465   : > { %v3971_v33 = vmax.f32 %v3890_v11, 0.0  ;;  %v2106_v28 = vadd.f32 %v10989_v63, %v10988_v21  ;;  %v2107_v44 = vadd.f32 %v10991_v26, %v10990_v61  ;;  %v2758_v62 = vmul.f32 %v4472_v45, %v8780_v36  ;;  %v4474_v3 = vld [vmem:[%s4604_s27 + $0x1b2] sm:$0xff]  ;;  %v11002_v43 = vld [vmem:[#allocation299_spill] sm:$0xff] }
 0x466   : > { %v2759_v41 = vmul.f32 %v4473_v18, %v8780_v36  ;;  %v3323_v13 = vadd.f32 %v10992_v35, %v2835_v29  ;;  %v3324_v50 = vadd.f32 %v10993_v59, %v2836_v48  ;;  %4054 = vst.msk [vmem:[%s8977_s16 + $0x100] sm:$0xff] %vm4021_vm0, %v3972_v22  ;;  %v3893_v47 = vadd.f32 %v8946_v8, %v3810_v31  ;;  %v3604_v10 = vpop.permute.xlu0 %3603  ;;  %v11003_v27 = vld [vmem:[#allocation237_spill] sm:$0xff]  ;;  %v11005_v61 = vld [vmem:[#allocation91_spill] sm:$0xff] }
 0x467   : > { %4053 = vst.msk [vmem:[%s8977_s16 + $0xf8] sm:$0xff] %vm4021_vm0, %v3971_v33  ;;  %v3892_v17 = vadd.f32 %v8946_v8, %v3809_v55  ;;  %v2595_v39 = vadd.f32 %v10994_v23, %v2107_v44  ;;  %v2594_v56 = vadd.f32 %v10995_v60, %v2106_v28  ;;  %v2837_v4 = vadd.f32 %v2756_v6, %v2592_v32  ;;  %v3606_v34 = vpop.permute.xlu1 %3605  ;;  %v11004_v33 = vld [vmem:[#allocation240_spill] sm:$0xff]  ;;  %v4477_v63 = vld [vmem:[%s4604_s27 + $0x1d2] sm:$0xff] }
 0x468   : > { %v2838_v49 = vadd.f32 %v2757_v2, %v2593_v12  ;;  %v3974_v57 = vmax.f32 %v3893_v47, 0.0  ;;  %v3812_v0 = vadd.f32 %v3606_v34, %v3324_v50  ;;  %v3811_v40 = vadd.f32 %v3604_v10, %v3323_v13  ;;  %v4476_v55 = vld [vmem:[%s4604_s27 + $0x1ca] sm:$0xff]  ;;  %v11011_v34 = vld [vmem:[#allocation118_spill] sm:$0xff] }
 0x469   : > { %v3973_v20 = vmax.f32 %v3892_v17, 0.0  ;;  %v2108_v1 = vadd.f32 %v10997_v5, %v10996_v46  ;;  %v2109_v19 = vadd.f32 %v10998_v15, %v8514_v30  ;;  %v2760_v38 = vmul.f32 %v4474_v3, %v8780_v36  ;;  %v11006_v44 = vld [vmem:[#allocation96_spill] sm:$0xff]  ;;  %v11012_v10 = vld [vmem:[#allocation242_spill] sm:$0xff]  ;;  %v11013_v5 = vld [vmem:[#allocation383_spill] sm:$0xff] }
 0x46a   : > { %v2761_v54 = vmul.f32 %v4475_v16, %v8780_v36  ;;  %v3325_v6 = vadd.f32 %v10999_v53, %v2837_v4  ;;  %v3326_v2 = vadd.f32 %v11000_v58, %v2838_v49  ;;  %4056 = vst.msk [vmem:[%s8977_s16 + $0x110] sm:$0xff] %vm4021_vm0, %v3974_v57  ;;  %v3895_v25 = vadd.f32 %v8946_v8, %v3812_v0  ;;  %v3608_v51 = vpop.permute.xlu0 %3607  ;;  %v11010_v4 = vld [vmem:[#allocation239_spill] sm:$0xff]  ;;  %v11014_v15 = vld [vmem:[#allocation102_spill] sm:$0xff]  ;;  %v11016_v53 = vld [vmem:[#allocation304_spill] sm:$0xff] }
 0x46b   : > { %4055 = vst.msk [vmem:[%s8977_s16 + $0x108] sm:$0xff] %vm4021_vm0, %v3973_v20  ;;  %v3894_v30 = vadd.f32 %v8946_v8, %v3811_v40  ;;  %v2597_v24 = vadd.f32 %v11001_v42, %v2109_v19  ;;  %v2596_v14 = vadd.f32 %v11002_v43, %v2108_v1  ;;  %v2839_v11 = vadd.f32 %v2758_v62, %v2594_v56  ;;  %v3610_v12 = vpop.permute.xlu1 %3609  ;;  %v11007_v62 = vld [vmem:[#allocation301_spill] sm:$0xff]  ;;  %v11009_v56 = vld [vmem:[#allocation363_spill] sm:$0xff] }
 0x46c   : > { %v2840_v7 = vadd.f32 %v2759_v41, %v2595_v39  ;;  %v3976_v32 = vmax.f32 %v3895_v25, 0.0  ;;  %v3814_v48 = vadd.f32 %v3610_v12, %v3326_v2  ;;  %v3813_v37 = vadd.f32 %v3608_v51, %v3325_v6  ;;  %v11008_v41 = vld [vmem:[#allocation302_spill] sm:$0xff]  ;;  %v4478_v20 = vld [vmem:[%s4604_s27 + $0x1e2] sm:$0xff]  ;;  %v4479_v40 = vld [vmem:[%s4604_s27 + $0x1ea] sm:$0xff] }
 0x46d   : > { %v3975_v29 = vmax.f32 %v3894_v30, 0.0  ;;  %v2110_v22 = vadd.f32 %v11003_v27, %v8511_v52  ;;  %v2111_v31 = vadd.f32 %v11004_v33, %v8517_v9  ;;  %v2762_v21 = vmul.f32 %v4476_v55, %v8780_v36  ;;  %v11015_v16 = vld [vmem:[#allocation303_spill] sm:$0xff]  ;;  %v11019_v51 = vld [vmem:[#allocation120_spill] sm:$0xff]  ;;  %v11022_v55 = vld [vmem:[#allocation393_spill] sm:$0xff] }
 0x46e   : > { %v2763_v28 = vmul.f32 %v4477_v63, %v8780_v36  ;;  %v3327_v26 = vadd.f32 %v11005_v61, %v2839_v11  ;;  %v3328_v45 = vadd.f32 %v11006_v44, %v2840_v7  ;;  %4058 = vst.msk [vmem:[%s8977_s16 + $0x120] sm:$0xff] %vm4021_vm0, %v3976_v32  ;;  %v3897_v52 = vadd.f32 %v8946_v8, %v3814_v48  ;;  %v3612_v47 = vpop.permute.xlu0 %3611  ;;  %v11017_v11 = vld [vmem:[#allocation62_spill] sm:$0xff]  ;;  %v11018_v7 = vld [vmem:[#allocation241_spill] sm:$0xff]  ;;  %v11020_v32 = vld [vmem:[#allocation244_spill] sm:$0xff] }
 0x46f   : > { %4057 = vst.msk [vmem:[%s8977_s16 + $0x118] sm:$0xff] %vm4021_vm0, %v3975_v29  ;;  %v3896_v9 = vadd.f32 %v8946_v8, %v3813_v37  ;;  %v2599_v18 = vadd.f32 %v11007_v62, %v2111_v31  ;;  %v2598_v35 = vadd.f32 %v11008_v41, %v2110_v22  ;;  %v2841_v13 = vadd.f32 %v2760_v38, %v2596_v14  ;;  %v3614_v50 = vpop.permute.xlu1 %3613  ;;  %v4480_v48 = vld [vmem:[%s4604_s27 + $0x1f2] sm:$0xff]  ;;  %v4481_v27 = vld [vmem:[%s4604_s27 + $0x202] sm:$0xff] }
 0x470   : > { %v2842_v59 = vadd.f32 %v2761_v54, %v2597_v24  ;;  %v3978_v17 = vmax.f32 %v3897_v52, 0.0  ;;  %v3816_v39 = vadd.f32 %v3614_v50, %v3328_v45  ;;  %v3815_v60 = vadd.f32 %v3612_v47, %v3327_v26  ;;  %v11021_v33 = vld [vmem:[#allocation300_spill] sm:$0xff]  ;;  %v11023_v61 = vld [vmem:[#allocation305_spill] sm:$0xff]  ;;  %v11024_v44 = vld [vmem:[#allocation306_spill] sm:$0xff] }
 0x471   : > { %v3977_v23 = vmax.f32 %v3896_v9, 0.0  ;;  %v2112_v49 = vadd.f32 %v11010_v4, %v11009_v56  ;;  %v2113_v57 = vadd.f32 %v11012_v10, %v11011_v34  ;;  %v2764_v0 = vmul.f32 %v4478_v20, %v8780_v36  ;;  %v11025_v50 = vld [vmem:[#allocation66_spill] sm:$0xff]  ;;  %v11026_v47 = vld [vmem:[#allocation243_spill] sm:$0xff]  ;;  %v4482_v56 = vld [vmem:[%s4604_s27 + $0x20a] sm:$0xff] }
 0x472   : > { %v2765_v46 = vmul.f32 %v4479_v40, %v8780_v36  ;;  %v3329_v1 = vadd.f32 %v11013_v5, %v2841_v13  ;;  %v3330_v19 = vadd.f32 %v11014_v15, %v2842_v59  ;;  %4060 = vst.msk [vmem:[%s8977_s16 + $0x130] sm:$0xff] %vm4021_vm0, %v3978_v17  ;;  %v3899_v3 = vadd.f32 %v8946_v8, %v3816_v39  ;;  %v3616_v30 = vpop.permute.xlu0 %3615  ;;  %v11028_v39 = vld [vmem:[#allocation246_spill] sm:$0xff]  ;;  %v11029_v10 = vld [vmem:[#allocation392_spill] sm:$0xff]  ;;  %v11030_v20 = vld [vmem:[#allocation19_spill] sm:$0xff] }
 0x473   : > { %4059 = vst.msk [vmem:[%s8977_s16 + $0x128] sm:$0xff] %vm4021_vm0, %v3977_v23  ;;  %v3898_v38 = vadd.f32 %v8946_v8, %v3815_v60  ;;  %v2601_v54 = vadd.f32 %v11015_v16, %v2113_v57  ;;  %v2600_v6 = vadd.f32 %v11016_v53, %v2112_v49  ;;  %v2843_v58 = vadd.f32 %v2762_v21, %v2598_v35  ;;  %v3618_v25 = vpop.permute.xlu1 %3617  ;;  %v11027_v23 = vld [vmem:[#allocation121_spill] sm:$0xff]  ;;  %v11031_v5 = vld [vmem:[#allocation307_spill] sm:$0xff]  ;;  %v11032_v15 = vld [vmem:[#allocation308_spill] sm:$0xff] }
 0x474   : > { %v2844_v2 = vadd.f32 %v2763_v28, %v2599_v18  ;;  %v3980_v42 = vmax.f32 %v3899_v3, 0.0  ;;  %v3818_v43 = vadd.f32 %v3618_v25, %v3330_v19  ;;  %v3817_v14 = vadd.f32 %v3616_v30, %v3329_v1  ;;  %v4483_v49 = vld [vmem:[%s4604_s27 + $0x212] sm:$0xff] }
 0x475   : > { %v3979_v24 = vmax.f32 %v3898_v38, 0.0  ;;  %v2114_v12 = vadd.f32 %v11018_v7, %v11017_v11  ;;  %v2115_v29 = vadd.f32 %v11020_v32, %v11019_v51  ;;  %v2766_v37 = vmul.f32 %v4480_v48, %v8780_v36  ;;  %v11033_v25 = vld [vmem:[#allocation61_spill] sm:$0xff]  ;;  %v4484_v11 = vld [vmem:[%s4604_s27 + $0x222] sm:$0xff] }
 0x476   : > { %v2767_v22 = vmul.f32 %v4481_v27, %v8780_v36  ;;  %v3331_v31 = vadd.f32 %v11021_v33, %v2843_v58  ;;  %v3332_v21 = vadd.f32 %v11022_v55, %v2844_v2  ;;  %4062 = vst.msk [vmem:[%s8977_s16 + $0x140] sm:$0xff] %vm4021_vm0, %v3980_v42  ;;  %v3901_v63 = vadd.f32 %v8946_v8, %v3818_v43  ;;  %v3620_v18 = vpop.permute.xlu0 %3619  ;;  %v11034_v30 = vld [vmem:[#allocation245_spill] sm:$0xff]  ;;  %v11036_v43 = vld [vmem:[#allocation248_spill] sm:$0xff]  ;;  %v11040_v55 = vld [vmem:[#allocation310_spill] sm:$0xff] }
 0x477   : > { %4061 = vst.msk [vmem:[%s8977_s16 + $0x138] sm:$0xff] %vm4021_vm0, %v3979_v24  ;;  %v3900_v28 = vadd.f32 %v8946_v8, %v3817_v14  ;;  %v2603_v26 = vadd.f32 %v11023_v61, %v2115_v29  ;;  %v2602_v45 = vadd.f32 %v11024_v44, %v2114_v12  ;;  %v2845_v52 = vadd.f32 %v2764_v0, %v2600_v6  ;;  %v3622_v62 = vpop.permute.xlu1 %3621  ;;  %v11035_v24 = vld [vmem:[#allocation122_spill] sm:$0xff]  ;;  %v4485_v12 = vld [vmem:[%s4604_s27 + $0x22a] sm:$0xff] }
 0x478   : > { %v2846_v9 = vadd.f32 %v2765_v46, %v2601_v54  ;;  %v3982_v41 = vmax.f32 %v3901_v63, 0.0  ;;  %v3820_v13 = vadd.f32 %v3622_v62, %v3332_v21  ;;  %v3819_v59 = vadd.f32 %v3620_v18, %v3331_v31  ;;  %v11037_v32 = vld [vmem:[#allocation21_spill] sm:$0xff]  ;;  %v11038_v48 = vld [vmem:[#allocation396_spill] sm:$0xff]  ;;  %v11042_v18 = vld [vmem:[#allocation247_spill] sm:$0xff] }
 0x479   : > { %v3981_v35 = vmax.f32 %v3900_v28, 0.0  ;;  %v2116_v17 = vadd.f32 %v11026_v47, %v11025_v50  ;;  %v2117_v60 = vadd.f32 %v11028_v39, %v11027_v23  ;;  %v2768_v4 = vmul.f32 %v4482_v56, %v8780_v36  ;;  %v11039_v33 = vld [vmem:[#allocation309_spill] sm:$0xff]  ;;  %v11041_v62 = vld [vmem:[#allocation68_spill] sm:$0xff]  ;;  %v11045_v39 = vld [vmem:[#allocation23_spill] sm:$0xff] }
 0x47a   : > { %v2769_v34 = vmul.f32 %v4483_v49, %v8780_v36  ;;  %v3333_v57 = vadd.f32 %v11029_v10, %v2845_v52  ;;  %v3334_v0 = vadd.f32 %v11030_v20, %v2846_v9  ;;  %4064 = vst.msk [vmem:[%s8977_s16 + $0x150] sm:$0xff] %vm4021_vm0, %v3982_v41  ;;  %v3903_v40 = vadd.f32 %v8946_v8, %v3820_v13  ;;  %v3624_v54 = vpop.permute.xlu0 %3623  ;;  %v11044_v13 = vld [vmem:[#allocation250_spill] sm:$0xff]  ;;  %v11046_v56 = vld [vmem:[#allocation27_spill] sm:$0xff]  ;;  %v11048_v20 = vld [vmem:[#allocation312_spill] sm:$0xff] }
 0x47b   : > { %4063 = vst.msk [vmem:[%s8977_s16 + $0x148] sm:$0xff] %vm4021_vm0, %v3981_v35  ;;  %v3902_v46 = vadd.f32 %v8946_v8, %v3819_v59  ;;  %v2605_v1 = vadd.f32 %v11031_v5, %v2117_v60  ;;  %v2604_v19 = vadd.f32 %v11032_v15, %v2116_v17  ;;  %v2847_v3 = vadd.f32 %v2766_v37, %v2602_v45  ;;  %v3626_v16 = vpop.permute.xlu1 %3625  ;;  %v11043_v35 = vld [vmem:[#allocation355_spill] sm:$0xff]  ;;  %v4486_v50 = vld [vmem:[%s4604_s27 + $0x232] sm:$0xff] }
 0x47c   : > { %v2848_v38 = vadd.f32 %v2767_v22, %v2603_v26  ;;  %v3984_v53 = vmax.f32 %v3903_v40, 0.0  ;;  %v3822_v58 = vadd.f32 %v3626_v16, %v3334_v0  ;;  %v3821_v2 = vadd.f32 %v3624_v54, %v3333_v57  ;;  %v4487_v17 = vld [vmem:[%s4604_s27 + $0x242] sm:$0xff]  ;;  %v11049_v16 = vld [vmem:[#allocation125_spill] sm:$0xff] }
 0x47d   : > { %v3983_v6 = vmax.f32 %v3902_v46, 0.0  ;;  %v2118_v42 = vadd.f32 %v11034_v30, %v11033_v25  ;;  %v2119_v14 = vadd.f32 %v11036_v43, %v11035_v24  ;;  %v2770_v7 = vmul.f32 %v4484_v11, %v8780_v36  ;;  %v11047_v10 = vld [vmem:[#allocation311_spill] sm:$0xff]  ;;  %v11050_v54 = vld [vmem:[#allocation249_spill] sm:$0xff]  ;;  %v11053_v43 = vld [vmem:[#allocation30_spill] sm:$0xff] }
 0x47e   : > { %v2771_v51 = vmul.f32 %v4485_v12, %v8780_v36  ;;  %v3335_v29 = vadd.f32 %v11037_v32, %v2847_v3  ;;  %v3336_v37 = vadd.f32 %v11038_v48, %v2848_v38  ;;  %4066 = vst.msk [vmem:[%s8977_s16 + $0x160] sm:$0xff] %vm4021_vm0, %v3984_v53  ;;  %v3905_v27 = vadd.f32 %v8946_v8, %v3822_v58  ;;  %v3628_v26 = vpop.permute.xlu0 %3627  ;;  %v11052_v58 = vld [vmem:[#allocation252_spill] sm:$0xff]  ;;  %v11055_v32 = vld [vmem:[#allocation313_spill] sm:$0xff]  ;;  %v11056_v48 = vld [vmem:[#allocation314_spill] sm:$0xff] }
 0x47f   : > { %4065 = vst.msk [vmem:[%s8977_s16 + $0x158] sm:$0xff] %vm4021_vm0, %v3983_v6  ;;  %v3904_v22 = vadd.f32 %v8946_v8, %v3821_v2  ;;  %v2607_v31 = vadd.f32 %v11039_v33, %v2119_v14  ;;  %v2606_v21 = vadd.f32 %v11040_v55, %v2118_v42  ;;  %v2849_v63 = vadd.f32 %v2768_v4, %v2604_v19  ;;  %v3630_v61 = vpop.permute.xlu1 %3629  ;;  %v11051_v6 = vld [vmem:[#allocation126_spill] sm:$0xff]  ;;  %v4488_v25 = vld [vmem:[%s4604_s27 + $0x24a] sm:$0xff] }
 0x480   : > { %v2850_v28 = vadd.f32 %v2769_v34, %v2605_v1  ;;  %v3986_v44 = vmax.f32 %v3905_v27, 0.0  ;;  %v3824_v52 = vadd.f32 %v3630_v61, %v3336_v37  ;;  %v3823_v9 = vadd.f32 %v3628_v26, %v3335_v29  ;;  %v4489_v42 = vld [vmem:[%s4604_s27 + $0x252] sm:$0xff]  ;;  %v11054_v11 = vld [vmem:[#allocation44_spill] sm:$0xff]  ;;  %v11058_v26 = vld [vmem:[#allocation251_spill] sm:$0xff] }
 0x481   : > { %v3985_v45 = vmax.f32 %v3904_v22, 0.0  ;;  %v2120_v41 = vadd.f32 %v11042_v18, %v11041_v62  ;;  %v2121_v59 = vadd.f32 %v11044_v13, %v11043_v35  ;;  %v2772_v47 = vmul.f32 %v4486_v50, %v8780_v36  ;;  %v11057_v61 = vld [vmem:[#allocation73_spill] sm:$0xff]  ;;  %v4490_v62 = vld [vmem:[%s4604_s27 + $0x262] sm:$0xff] }
 0x482   : > { %v2773_v23 = vmul.f32 %v4487_v17, %v8780_v36  ;;  %v3337_v60 = vadd.f32 %v11045_v39, %v2849_v63  ;;  %v3338_v4 = vadd.f32 %v11046_v56, %v2850_v28  ;;  %4068 = vst.msk [vmem:[%s8977_s16 + $0x170] sm:$0xff] %vm4021_vm0, %v3986_v44  ;;  %v3907_v49 = vadd.f32 %v8946_v8, %v3824_v52  ;;  %v3632_v1 = vpop.permute.xlu0 %3631  ;;  %v11060_v52 = vld [vmem:[#allocation254_spill] sm:$0xff]  ;;  %v11061_v13 = vld [vmem:[#allocation39_spill] sm:$0xff]  ;;  %v11064_v56 = vld [vmem:[#allocation316_spill] sm:$0xff] }
 0x483   : > { %4067 = vst.msk [vmem:[%s8977_s16 + $0x168] sm:$0xff] %vm4021_vm0, %v3985_v45  ;;  %v3906_v34 = vadd.f32 %v8946_v8, %v3823_v9  ;;  %v2609_v57 = vadd.f32 %v11047_v10, %v2121_v59  ;;  %v2608_v0 = vadd.f32 %v11048_v20, %v2120_v41  ;;  %v2851_v40 = vadd.f32 %v2770_v7, %v2606_v21  ;;  %v3634_v5 = vpop.permute.xlu1 %3633  ;;  %v11059_v45 = vld [vmem:[#allocation71_spill] sm:$0xff]  ;;  %v4491_v41 = vld [vmem:[%s4604_s27 + $0x26a] sm:$0xff] }
 0x484   : > { %v2852_v46 = vadd.f32 %v2771_v51, %v2607_v31  ;;  %v3988_v15 = vmax.f32 %v3907_v49, 0.0  ;;  %v3826_v3 = vadd.f32 %v3634_v5, %v3338_v4  ;;  %v3825_v38 = vadd.f32 %v3632_v1, %v3337_v60  ;;  %v11062_v50 = vld [vmem:[#allocation43_spill] sm:$0xff]  ;;  %v11066_v1 = vld [vmem:[#allocation253_spill] sm:$0xff] }
 0x485   : > { %v3987_v19 = vmax.f32 %v3906_v34, 0.0  ;;  %v2122_v53 = vadd.f32 %v11050_v54, %v11049_v16  ;;  %v2123_v2 = vadd.f32 %v11052_v58, %v11051_v6  ;;  %v2774_v30 = vmul.f32 %v4488_v25, %v8780_v36  ;;  %v11063_v39 = vld [vmem:[#allocation315_spill] sm:$0xff]  ;;  %v4492_v16 = vld [vmem:[%s4604_s27 + $0x272] sm:$0xff]  ;;  %v11070_v25 = vld [vmem:[#allocation112_spill] sm:$0xff] }
 0x486   : > { %v2775_v24 = vmul.f32 %v4489_v42, %v8780_v36  ;;  %v3339_v14 = vadd.f32 %v11053_v43, %v2851_v40  ;;  %v3340_v7 = vadd.f32 %v11054_v11, %v2852_v46  ;;  %4070 = vst.msk [vmem:[%s8977_s16 + $0x180] sm:$0xff] %vm4021_vm0, %v3988_v15  ;;  %v3909_v12 = vadd.f32 %v8946_v8, %v3826_v3  ;;  %v3636_v31 = vpop.permute.xlu0 %3635  ;;  %v11065_v5 = vld [vmem:[#allocation127_spill] sm:$0xff]  ;;  %v11068_v3 = vld [vmem:[#allocation256_spill] sm:$0xff]  ;;  %v11069_v58 = vld [vmem:[#allocation45_spill] sm:$0xff] }
 0x487   : > { %4069 = vst.msk [vmem:[%s8977_s16 + $0x178] sm:$0xff] %vm4021_vm0, %v3987_v19  ;;  %v3908_v51 = vadd.f32 %v8946_v8, %v3825_v38  ;;  %v2611_v29 = vadd.f32 %v11055_v32, %v2123_v2  ;;  %v2610_v37 = vadd.f32 %v11056_v48, %v2122_v53  ;;  %v2853_v27 = vadd.f32 %v2772_v47, %v2608_v0  ;;  %v3638_v33 = vpop.permute.xlu1 %3637  ;;  %v11067_v19 = vld [vmem:[#allocation129_spill] sm:$0xff]  ;;  %v4493_v53 = vld [vmem:[%s4604_s27 + $0x282] sm:$0xff]  ;;  %v11072_v11 = vld [vmem:[#allocation318_spill] sm:$0xff] }
 0x488   : > { %v2854_v22 = vadd.f32 %v2773_v23, %v2609_v57  ;;  %v3990_v55 = vmax.f32 %v3909_v12, 0.0  ;;  %v3828_v63 = vadd.f32 %v3638_v33, %v3340_v7  ;;  %v3827_v28 = vadd.f32 %v3636_v31, %v3339_v14  ;;  %v11071_v43 = vld [vmem:[#allocation317_spill] sm:$0xff]  ;;  %v11073_v33 = vld [vmem:[#allocation356_spill] sm:$0xff]  ;;  %v11074_v31 = vld [vmem:[#allocation255_spill] sm:$0xff] }
 0x489   : > { %v3989_v21 = vmax.f32 %v3908_v51, 0.0  ;;  %v2124_v44 = vadd.f32 %v11058_v26, %v11057_v61  ;;  %v2125_v9 = vadd.f32 %v11060_v52, %v11059_v45  ;;  %v2776_v18 = vmul.f32 %v4490_v62, %v8780_v36  ;;  %v4494_v61 = vld [vmem:[%s4604_s27 + $0x28a] sm:$0xff]  ;;  %v11077_v52 = vld [vmem:[#allocation55_spill] sm:$0xff]  ;;  %v11078_v62 = vld [vmem:[#allocation54_spill] sm:$0xff] }
 0x48a   : > { %v2777_v35 = vmul.f32 %v4491_v41, %v8780_v36  ;;  %v3341_v59 = vadd.f32 %v11061_v13, %v2853_v27  ;;  %v3342_v47 = vadd.f32 %v11062_v50, %v2854_v22  ;;  %4072 = vst.msk [vmem:[%s8977_s16 + $0x190] sm:$0xff] %vm4021_vm0, %v3990_v55  ;;  %v3911_v17 = vadd.f32 %v8946_v8, %v3828_v63  ;;  %v3640_v57 = vpop.permute.xlu0 %3639  ;;  %v11076_v63 = vld [vmem:[#allocation258_spill] sm:$0xff]  ;;  %v11079_v13 = vld [vmem:[#allocation319_spill] sm:$0xff]  ;;  %v11080_v50 = vld [vmem:[#allocation320_spill] sm:$0xff] }
 0x48b   : > { %4071 = vst.msk [vmem:[%s8977_s16 + $0x188] sm:$0xff] %vm4021_vm0, %v3989_v21  ;;  %v3910_v23 = vadd.f32 %v8946_v8, %v3827_v28  ;;  %v2613_v60 = vadd.f32 %v11063_v39, %v2125_v9  ;;  %v2612_v4 = vadd.f32 %v11064_v56, %v2124_v44  ;;  %v2855_v49 = vadd.f32 %v2774_v30, %v2610_v37  ;;  %v3642_v10 = vpop.permute.xlu1 %3641  ;;  %v11075_v21 = vld [vmem:[#allocation80_spill] sm:$0xff]  ;;  %v4495_v44 = vld [vmem:[%s4604_s27 + $0x292] sm:$0xff] }
 0x48c   : > { %v2856_v34 = vadd.f32 %v2775_v24, %v2611_v29  ;;  %v3992_v20 = vmax.f32 %v3911_v17, 0.0  ;;  %v3830_v40 = vadd.f32 %v3642_v10, %v3342_v47  ;;  %v3829_v46 = vadd.f32 %v3640_v57, %v3341_v59  ;;  %v11081_v10 = vld [vmem:[#allocation290_spill] sm:$0xff]  ;;  %v11082_v57 = vld [vmem:[#allocation257_spill] sm:$0xff] }
 0x48d   : > { %v3991_v0 = vmax.f32 %v3910_v23, 0.0  ;;  %v2126_v15 = vadd.f32 %v11066_v1, %v11065_v5  ;;  %v2127_v38 = vadd.f32 %v11068_v3, %v11067_v19  ;;  %v2778_v54 = vmul.f32 %v4492_v16, %v8780_v36  ;;  %v4496_v5 = vld [vmem:[%s4604_s27 + $0x2a2] sm:$0xff]  ;;  %v11085_v3 = vld [vmem:[#allocation113_spill] sm:$0xff]  ;;  %v11086_v16 = vld [vmem:[#allocation58_spill] sm:$0xff] }
 0x48e   : > { %v2779_v6 = vmul.f32 %v4493_v53, %v8780_v36  ;;  %v3343_v2 = vadd.f32 %v11069_v58, %v2855_v49  ;;  %v3344_v30 = vadd.f32 %v11070_v25, %v2856_v34  ;;  %4074 = vst.msk [vmem:[%s8977_s16 + $0x1a0] sm:$0xff] %vm4021_vm0, %v3992_v20  ;;  %v3913_v42 = vadd.f32 %v8946_v8, %v3830_v40  ;;  %v3644_v29 = vpop.permute.xlu0 %3643  ;;  %v11084_v40 = vld [vmem:[#allocation260_spill] sm:$0xff]  ;;  %v11087_v58 = vld [vmem:[#allocation321_spill] sm:$0xff]  ;;  %v11088_v25 = vld [vmem:[#allocation322_spill] sm:$0xff] }
 0x48f   : > { %4073 = vst.msk [vmem:[%s8977_s16 + $0x198] sm:$0xff] %vm4021_vm0, %v3991_v0  ;;  %v3912_v24 = vadd.f32 %v8946_v8, %v3829_v46  ;;  %v2615_v14 = vadd.f32 %v11071_v43, %v2127_v38  ;;  %v2614_v7 = vadd.f32 %v11072_v11, %v2126_v15  ;;  %v2857_v12 = vadd.f32 %v2776_v18, %v2612_v4  ;;  %v3646_v32 = vpop.permute.xlu1 %3645  ;;  %v11083_v0 = vld [vmem:[#allocation285_spill] sm:$0xff] }
 0x490   : > { %v2858_v51 = vadd.f32 %v2777_v35, %v2613_v60  ;;  %v3994_v48 = vmax.f32 %v3913_v42, 0.0  ;;  %v3832_v27 = vadd.f32 %v3646_v32, %v3344_v30  ;;  %v3831_v22 = vadd.f32 %v3644_v29, %v3343_v2  ;;  %v4497_v15 = vld [vmem:[%s4604_s27 + $0x2aa] sm:$0xff]  ;;  %v11089_v32 = vld [vmem:[#allocation366_spill] sm:$0xff]  ;;  %v11090_v29 = vld [vmem:[#allocation259_spill] sm:$0xff] }
 0x491   : > { %v3993_v37 = vmax.f32 %v3912_v24, 0.0  ;;  %v2128_v55 = vadd.f32 %v11074_v31, %v11073_v33  ;;  %v2129_v28 = vadd.f32 %v11076_v63, %v11075_v21  ;;  %v2780_v26 = vmul.f32 %v4494_v61, %v8780_v36  ;;  %v4498_v33 = vld [vmem:[%s4604_s27 + $0x2b2] sm:$0xff]  ;;  %v11093_v63 = vld [vmem:[#allocation116_spill] sm:$0xff]  ;;  %v11094_v61 = vld [vmem:[#allocation119_spill] sm:$0xff] }
 0x492   : > { %v2781_v45 = vmul.f32 %v4495_v44, %v8780_v36  ;;  %v3345_v9 = vadd.f32 %v11077_v52, %v2857_v12  ;;  %v3346_v18 = vadd.f32 %v11078_v62, %v2858_v51  ;;  %4076 = vst.msk [vmem:[%s8977_s16 + $0x1b0] sm:$0xff] %vm4021_vm0, %v3994_v48  ;;  %v3915_v41 = vadd.f32 %v8946_v8, %v3832_v27  ;;  %v11092_v27 = vld [vmem:[#allocation262_spill] sm:$0xff]  ;;  %v11095_v52 = vld [vmem:[#allocation323_spill] sm:$0xff]  ;;  %v11096_v62 = vld [vmem:[#allocation324_spill] sm:$0xff] }
 0x493   : > { %4075 = vst.msk [vmem:[%s8977_s16 + $0x1a8] sm:$0xff] %vm4021_vm0, %v3993_v37  ;;  %v3914_v35 = vadd.f32 %v8946_v8, %v3831_v22  ;;  %v2617_v59 = vadd.f32 %v11079_v13, %v2129_v28  ;;  %v2616_v47 = vadd.f32 %v11080_v50, %v2128_v55  ;;  %v2859_v17 = vadd.f32 %v2778_v54, %v2614_v7  ;;  %v3650_v39 = vpop.permute.xlu1 %3649  ;;  %v3648_v60 = vpop.permute.xlu0 %3647  ;;  %v11091_v37 = vld [vmem:[#allocation369_spill] sm:$0xff]  ;;  %v4499_v55 = vld [vmem:[%s4604_s27 + $0x2c2] sm:$0xff] }
 0x494   : > { %v2860_v23 = vadd.f32 %v2779_v6, %v2615_v14  ;;  %v3996_v56 = vmax.f32 %v3915_v41, 0.0  ;;  %v3834_v49 = vadd.f32 %v3650_v39, %v3346_v18  ;;  %v3833_v34 = vadd.f32 %v3648_v60, %v3345_v9  ;;  %v11097_v39 = vld [vmem:[#allocation87_spill] sm:$0xff]  ;;  %v11098_v60 = vld [vmem:[#allocation261_spill] sm:$0xff] }
 0x495   : > { %v3995_v4 = vmax.f32 %v3914_v35, 0.0  ;;  %v2130_v20 = vadd.f32 %v11082_v57, %v11081_v10  ;;  %v2131_v46 = vadd.f32 %v11084_v40, %v11083_v0  ;;  %v2782_v1 = vmul.f32 %v4496_v5, %v8780_v36  ;;  %v4500_v10 = vld [vmem:[%s4604_s27 + $0x2ca] sm:$0xff]  ;;  %v11101_v40 = vld [vmem:[#allocation59_spill] sm:$0xff] }
 0x496   : > { %v2783_v19 = vmul.f32 %v4497_v15, %v8780_v36  ;;  %v3347_v38 = vadd.f32 %v11085_v3, %v2859_v17  ;;  %v3348_v54 = vadd.f32 %v11086_v16, %v2860_v23  ;;  %4078 = vst.msk [vmem:[%s8977_s16 + $0x1c0] sm:$0xff] %vm4021_vm0, %v3996_v56  ;;  %v3917_v53 = vadd.f32 %v8946_v8, %v3834_v49  ;;  %v11100_v49 = vld [vmem:[#allocation264_spill] sm:$0xff]  ;;  %v11102_v5 = vld [vmem:[#allocation123_spill] sm:$0xff]  ;;  %v11103_v3 = vld [vmem:[#allocation325_spill] sm:$0xff] }
 0x497   : > { %4077 = vst.msk [vmem:[%s8977_s16 + $0x1b8] sm:$0xff] %vm4021_vm0, %v3995_v4  ;;  %v3916_v6 = vadd.f32 %v8946_v8, %v3833_v34  ;;  %v2619_v2 = vadd.f32 %v11087_v58, %v2131_v46  ;;  %v2618_v30 = vadd.f32 %v11088_v25, %v2130_v20  ;;  %v2861_v42 = vadd.f32 %v2780_v26, %v2616_v47  ;;  %v3654_v43 = vpop.permute.xlu1 %3653  ;;  %v3652_v14 = vpop.permute.xlu0 %3651  ;;  %v11099_v4 = vld [vmem:[#allocation378_spill] sm:$0xff] }
 0x498   : > { %v2862_v24 = vadd.f32 %v2781_v45, %v2617_v59  ;;  %v3998_v11 = vmax.f32 %v3917_v53, 0.0  ;;  %v3836_v12 = vadd.f32 %v3654_v43, %v3348_v54  ;;  %v3835_v51 = vadd.f32 %v3652_v14, %v3347_v38  ;;  %v4501_v20 = vld [vmem:[%s4604_s27 + $0x2d2] sm:$0xff]  ;;  %v11105_v43 = vld [vmem:[#allocation376_spill] sm:$0xff]  ;;  %v11106_v14 = vld [vmem:[#allocation263_spill] sm:$0xff] }
 0x499   : > { %v3997_v7 = vmax.f32 %v3916_v6, 0.0  ;;  %v2132_v48 = vadd.f32 %v11090_v29, %v11089_v32  ;;  %v2133_v22 = vadd.f32 %v11092_v27, %v11091_v37  ;;  %v2784_v31 = vmul.f32 %v4498_v33, %v8780_v36  ;;  %v11104_v16 = vld [vmem:[#allocation326_spill] sm:$0xff]  ;;  %v4502_v32 = vld [vmem:[%s4604_s27 + $0x2e2] sm:$0xff]  ;;  %v11109_v27 = vld [vmem:[#allocation65_spill] sm:$0xff] }
 0x49a   : > { %v2785_v21 = vmul.f32 %v4499_v55, %v8780_v36  ;;  %v3349_v28 = vadd.f32 %v11093_v63, %v2861_v42  ;;  %v3350_v26 = vadd.f32 %v11094_v61, %v2862_v24  ;;  %4080 = vst.msk [vmem:[%s8977_s16 + $0x1d0] sm:$0xff] %vm4021_vm0, %v3998_v11  ;;  %v3919_v44 = vadd.f32 %v8946_v8, %v3836_v12  ;;  %v11108_v12 = vld [vmem:[#allocation266_spill] sm:$0xff]  ;;  %v11110_v33 = vld [vmem:[#allocation67_spill] sm:$0xff]  ;;  %v11112_v61 = vld [vmem:[#allocation328_spill] sm:$0xff] }
 0x49b   : > { %4079 = vst.msk [vmem:[%s8977_s16 + $0x1c8] sm:$0xff] %vm4021_vm0, %v3997_v7  ;;  %v3918_v45 = vadd.f32 %v8946_v8, %v3835_v51  ;;  %v2621_v9 = vadd.f32 %v11095_v52, %v2133_v22  ;;  %v2620_v18 = vadd.f32 %v11096_v62, %v2132_v48  ;;  %v2863_v41 = vadd.f32 %v2782_v1, %v2618_v30  ;;  %v3658_v13 = vpop.permute.xlu1 %3657  ;;  %v3656_v59 = vpop.permute.xlu0 %3655  ;;  %v11107_v7 = vld [vmem:[#allocation75_spill] sm:$0xff]  ;;  %v4503_v48 = vld [vmem:[%s4604_s27 + $0x2ea] sm:$0xff] }
 0x49c   : > { %v2864_v35 = vadd.f32 %v2783_v19, %v2619_v2  ;;  %v4000_v50 = vmax.f32 %v3919_v44, 0.0  ;;  %v3838_v17 = vadd.f32 %v3658_v13, %v3350_v26  ;;  %v3837_v23 = vadd.f32 %v3656_v59, %v3349_v28  ;;  %v11111_v63 = vld [vmem:[#allocation327_spill] sm:$0xff]  ;;  %v11113_v13 = vld [vmem:[#allocation128_spill] sm:$0xff]  ;;  %v11114_v59 = vld [vmem:[#allocation265_spill] sm:$0xff] }
 0x49d   : > { %v3999_v47 = vmax.f32 %v3918_v45, 0.0  ;;  %v2134_v56 = vadd.f32 %v11098_v60, %v11097_v39  ;;  %v2135_v34 = vadd.f32 %v11100_v49, %v11099_v4  ;;  %v2786_v57 = vmul.f32 %v4500_v10, %v8780_v36  ;;  %v4504_v39 = vld [vmem:[%s4604_s27 + $0x2f2] sm:$0xff]  ;;  %v11117_v49 = vld [vmem:[#allocation124_spill] sm:$0xff] }
 0x49e   : > { %v2787_v0 = vmul.f32 %v4501_v20, %v8780_v36  ;;  %v3351_v46 = vadd.f32 %v11101_v40, %v2863_v41  ;;  %v3352_v1 = vadd.f32 %v11102_v5, %v2864_v35  ;;  %4082 = vst.msk [vmem:[%s8977_s16 + $0x1e0] sm:$0xff] %vm4021_vm0, %v4000_v50  ;;  %v3921_v15 = vadd.f32 %v8946_v8, %v3838_v17  ;;  %v11116_v17 = vld [vmem:[#allocation268_spill] sm:$0xff]  ;;  %v11119_v40 = vld [vmem:[#allocation329_spill] sm:$0xff]  ;;  %v11120_v5 = vld [vmem:[#allocation330_spill] sm:$0xff] }
 0x49f   : > { %4081 = vst.msk [vmem:[%s8977_s16 + $0x1d8] sm:$0xff] %vm4021_vm0, %v3999_v47  ;;  %v3920_v19 = vadd.f32 %v8946_v8, %v3837_v23  ;;  %v2623_v38 = vadd.f32 %v11103_v3, %v2135_v34  ;;  %v2622_v54 = vadd.f32 %v11104_v16, %v2134_v56  ;;  %v2865_v53 = vadd.f32 %v2784_v31, %v2620_v18  ;;  %v3662_v58 = vpop.permute.xlu1 %3661  ;;  %v3660_v2 = vpop.permute.xlu0 %3659  ;;  %v11115_v47 = vld [vmem:[#allocation130_spill] sm:$0xff]  ;;  %v4505_v56 = vld [vmem:[%s4604_s27 + $0x302] sm:$0xff] }
 0x4a0   : > { %v2866_v6 = vadd.f32 %v2785_v21, %v2621_v9  ;;  %v4002_v25 = vmax.f32 %v3921_v15, 0.0  ;;  %v3840_v42 = vadd.f32 %v3662_v58, %v3352_v1  ;;  %v3839_v24 = vadd.f32 %v3660_v2, %v3351_v46  ;;  %v11118_v10 = vld [vmem:[#allocation84_spill] sm:$0xff]  ;;  %v11122_v2 = vld [vmem:[#allocation267_spill] sm:$0xff] }
 0x4a1   : > { %v4001_v30 = vmax.f32 %v3920_v19, 0.0  ;;  %v2136_v11 = vadd.f32 %v11106_v14, %v11105_v43  ;;  %v2137_v51 = vadd.f32 %v11108_v12, %v11107_v7  ;;  %v2788_v29 = vmul.f32 %v4502_v32, %v8780_v36  ;;  %v11121_v58 = vld [vmem:[#allocation76_spill] sm:$0xff]  ;;  %v11126_v32 = vld [vmem:[#allocation289_spill] sm:$0xff] }
 0x4a2   : > { %v2789_v37 = vmul.f32 %v4503_v48, %v8780_v36  ;;  %v3353_v22 = vadd.f32 %v11109_v27, %v2865_v53  ;;  %v3354_v31 = vadd.f32 %v11110_v33, %v2866_v6  ;;  %4084 = vst.msk [vmem:[%s8977_s16 + $0x1f0] sm:$0xff] %vm4021_vm0, %v4002_v25  ;;  %v3923_v55 = vadd.f32 %v8946_v8, %v3840_v42  ;;  %v11124_v42 = vld [vmem:[#allocation270_spill] sm:$0xff]  ;;  %v4506_v43 = vld [vmem:[%s4604_s27 + $0x30a] sm:$0xff]  ;;  %v11127_v27 = vld [vmem:[#allocation331_spill] sm:$0xff] }
 0x4a3   : > { %4083 = vst.msk [vmem:[%s8977_s16 + $0x1e8] sm:$0xff] %vm4021_vm0, %v4001_v30  ;;  %v3922_v21 = vadd.f32 %v8946_v8, %v3839_v24  ;;  %v2625_v28 = vadd.f32 %v11111_v63, %v2137_v51  ;;  %v2624_v26 = vadd.f32 %v11112_v61, %v2136_v11  ;;  %v2867_v44 = vadd.f32 %v2786_v57, %v2622_v54  ;;  %v3666_v52 = vpop.permute.xlu1 %3665  ;;  %v3664_v9 = vpop.permute.xlu0 %3663  ;;  %v11123_v30 = vld [vmem:[#allocation131_spill] sm:$0xff]  ;;  %v4507_v11 = vld [vmem:[%s4604_s27 + $0x312] sm:$0xff]  ;;  %v11125_v12 = vld [vmem:[#allocation372_spill] sm:$0xff] }
 0x4a4   : > { %v2868_v45 = vadd.f32 %v2787_v0, %v2623_v38  ;;  %v4004_v62 = vmax.f32 %v3923_v55, 0.0  ;;  %v3842_v41 = vadd.f32 %v3666_v52, %v3354_v31  ;;  %v3841_v35 = vadd.f32 %v3664_v9, %v3353_v22  ;;  %v11128_v33 = vld [vmem:[#allocation332_spill] sm:$0xff]  ;;  %v11130_v9 = vld [vmem:[#allocation269_spill] sm:$0xff] }
 0x4a5   : > { %v4003_v18 = vmax.f32 %v3922_v21, 0.0  ;;  %v2138_v50 = vadd.f32 %v11114_v59, %v11113_v13  ;;  %v2139_v23 = vadd.f32 %v11116_v17, %v11115_v47  ;;  %v2790_v60 = vmul.f32 %v4504_v39, %v8780_v36  ;;  %v11129_v52 = vld [vmem:[#allocation360_spill] sm:$0xff]  ;;  %v11133_v17 = vld [vmem:[#allocation375_spill] sm:$0xff]  ;;  %v11134_v39 = vld [vmem:[#allocation81_spill] sm:$0xff] }
 0x4a6   : > { %v2791_v4 = vmul.f32 %v4505_v56, %v8780_v36  ;;  %v3355_v34 = vadd.f32 %v11117_v49, %v2867_v44  ;;  %v3356_v57 = vadd.f32 %v11118_v10, %v2868_v45  ;;  %4086 = vst.msk [vmem:[%s8977_s16 + $0x200] sm:$0xff] %vm4021_vm0, %v4004_v62  ;;  %v3925_v20 = vadd.f32 %v8946_v8, %v3842_v41  ;;  %v11132_v41 = vld [vmem:[#allocation162_spill] sm:$0xff]  ;;  %v4508_v13 = vld [vmem:[%s4604_s27 + $0x322] sm:$0xff]  ;;  %v11135_v49 = vld [vmem:[#allocation333_spill] sm:$0xff] }
 0x4a7   : > { %4085 = vst.msk [vmem:[%s8977_s16 + $0x1f8] sm:$0xff] %vm4021_vm0, %v4003_v18  ;;  %v3924_v0 = vadd.f32 %v8946_v8, %v3841_v35  ;;  %v2627_v46 = vadd.f32 %v11119_v40, %v2139_v23  ;;  %v2626_v1 = vadd.f32 %v11120_v5, %v2138_v50  ;;  %v2869_v15 = vadd.f32 %v2788_v29, %v2624_v26  ;;  %v3670_v3 = vpop.permute.xlu1 %3669  ;;  %v3668_v38 = vpop.permute.xlu0 %3667  ;;  %v11131_v18 = vld [vmem:[#allocation286_spill] sm:$0xff]  ;;  %v4509_v50 = vld [vmem:[%s4604_s27 + $0x32a] sm:$0xff] }
 0x4a8   : > { %v2870_v19 = vadd.f32 %v2789_v37, %v2625_v28  ;;  %v4006_v16 = vmax.f32 %v3925_v20, 0.0  ;;  %v3844_v53 = vadd.f32 %v3670_v3, %v3356_v57  ;;  %v3843_v6 = vadd.f32 %v3668_v38, %v3355_v34  ;;  %v11136_v10 = vld [vmem:[#allocation334_spill] sm:$0xff] }
 0x4a9   : > { %v4005_v54 = vmax.f32 %v3924_v0, 0.0  ;;  %v2140_v25 = vadd.f32 %v11122_v2, %v11121_v58  ;;  %v2141_v24 = vadd.f32 %v11124_v42, %v11123_v30  ;;  %v2792_v14 = vmul.f32 %v4506_v43, %v8780_v36  ;;  %v11137_v3 = vld [vmem:[#allocation90_spill] sm:$0xff]  ;;  %v11141_v42 = vld [vmem:[#allocation132_spill] sm:$0xff]  ;;  %v11142_v43 = vld [vmem:[#allocation135_spill] sm:$0xff] }
 0x4aa   : > { %v2793_v7 = vmul.f32 %v4507_v11, %v8780_v36  ;;  %v3357_v51 = vadd.f32 %v11125_v12, %v2869_v15  ;;  %v3358_v29 = vadd.f32 %v11126_v32, %v2870_v19  ;;  %4088 = vst.msk [vmem:[%s8977_s16 + $0x210] sm:$0xff] %vm4021_vm0, %v4006_v16  ;;  %v3927_v48 = vadd.f32 %v8946_v8, %v3844_v53  ;;  %v11138_v38 = vld [vmem:[#allocation166_spill] sm:$0xff]  ;;  %v11140_v53 = vld [vmem:[#allocation165_spill] sm:$0xff]  ;;  %v11143_v12 = vld [vmem:[#allocation335_spill] sm:$0xff] }
 0x4ab   : > { %4087 = vst.msk [vmem:[%s8977_s16 + $0x208] sm:$0xff] %vm4021_vm0, %v4005_v54  ;;  %v3926_v37 = vadd.f32 %v8946_v8, %v3843_v6  ;;  %v2629_v22 = vadd.f32 %v11127_v27, %v2141_v24  ;;  %v2628_v31 = vadd.f32 %v11128_v33, %v2140_v25  ;;  %v2871_v55 = vadd.f32 %v2790_v60, %v2626_v1  ;;  %v3674_v63 = vpop.permute.xlu1 %3673  ;;  %v3672_v28 = vpop.permute.xlu0 %3671  ;;  %v11139_v54 = vld [vmem:[#allocation79_spill] sm:$0xff]  ;;  %v4510_v58 = vld [vmem:[%s4604_s27 + $0x332] sm:$0xff]  ;;  %v11144_v32 = vld [vmem:[#allocation336_spill] sm:$0xff] }
 0x4ac   : > { %v2872_v21 = vadd.f32 %v2791_v4, %v2627_v46  ;;  %v4008_v61 = vmax.f32 %v3927_v48, 0.0  ;;  %v3846_v44 = vadd.f32 %v3674_v63, %v3358_v29  ;;  %v3845_v45 = vadd.f32 %v3672_v28, %v3357_v51  ;;  %v4511_v25 = vld [vmem:[%s4604_s27 + $0x342] sm:$0xff]  ;;  %v11145_v63 = vld [vmem:[#allocation133_spill] sm:$0xff]  ;;  %v11146_v28 = vld [vmem:[#allocation170_spill] sm:$0xff] }
 0x4ad   : > { %v4007_v26 = vmax.f32 %v3926_v37, 0.0  ;;  %v2142_v62 = vadd.f32 %v11130_v9, %v11129_v52  ;;  %v2143_v35 = vadd.f32 %v11132_v41, %v11131_v18  ;;  %v2794_v59 = vmul.f32 %v4508_v13, %v8780_v36  ;;  %v4512_v52 = vld [vmem:[%s4604_s27 + $0x34a] sm:$0xff]  ;;  %v11149_v41 = vld [vmem:[#allocation362_spill] sm:$0xff] }
 0x4ae   : > { %v2795_v47 = vmul.f32 %v4509_v50, %v8780_v36  ;;  %v3359_v23 = vadd.f32 %v11133_v17, %v2871_v55  ;;  %v3360_v60 = vadd.f32 %v11134_v39, %v2872_v21  ;;  %4090 = vst.msk [vmem:[%s8977_s16 + $0x220] sm:$0xff] %vm4021_vm0, %v4008_v61  ;;  %v3929_v56 = vadd.f32 %v8946_v8, %v3846_v44  ;;  %v11148_v44 = vld [vmem:[#allocation169_spill] sm:$0xff]  ;;  %v11152_v39 = vld [vmem:[#allocation338_spill] sm:$0xff] }
 0x4af   : > { %4089 = vst.msk [vmem:[%s8977_s16 + $0x218] sm:$0xff] %vm4021_vm0, %v4007_v26  ;;  %v3928_v4 = vadd.f32 %v8946_v8, %v3845_v45  ;;  %v2631_v34 = vadd.f32 %v11135_v49, %v2143_v35  ;;  %v2630_v57 = vadd.f32 %v11136_v10, %v2142_v62  ;;  %v2873_v20 = vadd.f32 %v2792_v14, %v2628_v31  ;;  %v3678_v40 = vpop.permute.xlu1 %3677  ;;  %v3676_v46 = vpop.permute.xlu0 %3675  ;;  %v11147_v26 = vld [vmem:[#allocation134_spill] sm:$0xff]  ;;  %v11150_v13 = vld [vmem:[#allocation137_spill] sm:$0xff] }
 0x4b0   : > { %v2874_v0 = vadd.f32 %v2793_v7, %v2629_v22  ;;  %v4010_v5 = vmax.f32 %v3929_v56, 0.0  ;;  %v3848_v15 = vadd.f32 %v3678_v40, %v3360_v60  ;;  %v3847_v19 = vadd.f32 %v3676_v46, %v3359_v23  ;;  %v4513_v62 = vld [vmem:[%s4604_s27 + $0x352] sm:$0xff]  ;;  %v11154_v46 = vld [vmem:[#allocation136_spill] sm:$0xff] }
 0x4b1   : > { %v4009_v1 = vmax.f32 %v3928_v4, 0.0  ;;  %v2144_v16 = vadd.f32 %v11138_v38, %v11137_v3  ;;  %v2145_v6 = vadd.f32 %v11140_v53, %v11139_v54  ;;  %v2796_v2 = vmul.f32 %v4510_v58, %v8780_v36  ;;  %v11151_v17 = vld [vmem:[#allocation337_spill] sm:$0xff] }
 0x4b2   : > { %v2797_v30 = vmul.f32 %v4511_v25, %v8780_v36  ;;  %v3361_v24 = vadd.f32 %v11141_v42, %v2873_v20  ;;  %v3362_v14 = vadd.f32 %v11142_v43, %v2874_v0  ;;  %4092 = vst.msk [vmem:[%s8977_s16 + $0x230] sm:$0xff] %vm4021_vm0, %v4010_v5  ;;  %v3931_v11 = vadd.f32 %v8946_v8, %v3848_v15  ;;  %v11153_v0 = vld [vmem:[#allocation365_spill] sm:$0xff] }
 0x4b3   : > { %4091 = vst.msk [vmem:[%s8977_s16 + $0x228] sm:$0xff] %vm4021_vm0, %v4009_v1  ;;  %v3930_v7 = vadd.f32 %v8946_v8, %v3847_v19  ;;  %v2633_v51 = vadd.f32 %v11143_v12, %v2145_v6  ;;  %v2632_v29 = vadd.f32 %v11144_v32, %v2144_v16  ;;  %v2875_v48 = vadd.f32 %v2794_v59, %v2630_v57  ;;  %v3682_v27 = vpop.permute.xlu1 %3681  ;;  %v3680_v22 = vpop.permute.xlu0 %3679 }
 0x4b4   : > { %v2876_v37 = vadd.f32 %v2795_v47, %v2631_v34  ;;  %v4012_v33 = vmax.f32 %v3931_v11, 0.0  ;;  %v3850_v55 = vadd.f32 %v3682_v27, %v3362_v14  ;;  %v3849_v21 = vadd.f32 %v3680_v22, %v3361_v24 }
 0x4b5   : > { %v4011_v31 = vmax.f32 %v3930_v7, 0.0  ;;  %v2146_v61 = vadd.f32 %v11146_v28, %v11145_v63  ;;  %v2147_v45 = vadd.f32 %v11148_v44, %v11147_v26  ;;  %v2798_v9 = vmul.f32 %v4512_v52, %v8780_v36 }
 0x4b6   : > { %v2799_v18 = vmul.f32 %v4513_v62, %v8780_v36  ;;  %v3363_v35 = vadd.f32 %v11149_v41, %v2875_v48  ;;  %v3364_v59 = vadd.f32 %v11150_v13, %v2876_v37  ;;  %4094 = vst.msk [vmem:[%s8977_s16 + $0x240] sm:$0xff] %vm4021_vm0, %v4012_v33  ;;  %v3933_v50 = vadd.f32 %v8946_v8, %v3850_v55 }
 0x4b7   : > { %4093 = vst.msk [vmem:[%s8977_s16 + $0x238] sm:$0xff] %vm4021_vm0, %v4011_v31  ;;  %v3932_v47 = vadd.f32 %v8946_v8, %v3849_v21  ;;  %v2635_v23 = vadd.f32 %v11151_v17, %v2147_v45  ;;  %v2634_v60 = vadd.f32 %v11152_v39, %v2146_v61  ;;  %v2877_v56 = vadd.f32 %v2796_v2, %v2632_v29  ;;  %v3686_v4 = vpop.permute.xlu1 %3685  ;;  %v3684_v49 = vpop.permute.xlu0 %3683  ;;  %v11155_v2 = vld [vmem:[#allocation82_spill] sm:$0xff] }
 0x4b8   : > { %v2878_v36 = vadd.f32 %v2797_v30, %v2633_v51  ;;  %v4014_v34 = vmax.f32 %v3933_v50, 0.0  ;;  %v3852_v57 = vadd.f32 %v3686_v4, %v3364_v59  ;;  %v3851_v20 = vadd.f32 %v3684_v49, %v3363_v35  ;;  %v11156_v30 = vld [vmem:[#allocation83_spill] sm:$0xff] }
 0x4b9   : > { %v4013_v10 = vmax.f32 %v3932_v47, 0.0  ;;  %v3365_v40 = vadd.f32 %v11153_v0, %v2877_v56  ;;  %v2879_v19 = vadd.f32 %v2798_v9, %v2634_v60  ;;  %v2880_v3 = vadd.f32 %v2799_v18, %v2635_v23 }
 0x4ba   : > { %v3366_v5 = vadd.f32 %v11154_v46, %v2878_v36  ;;  %4096 = vst.msk [vmem:[%s8977_s16 + $0x250] sm:$0xff] %vm4021_vm0, %v4014_v34  ;;  %v3935_v1 = vadd.f32 %v8946_v8, %v3852_v57  ;;  %v3934_v15 = vadd.f32 %v8946_v8, %v3851_v20 }
 0x4bb   : > { %4095 = vst.msk [vmem:[%s8977_s16 + $0x248] sm:$0xff] %vm4021_vm0, %v4013_v10  ;;  %v3690_v38 = vpop.permute.xlu1 %3689  ;;  %v3688_v16 = vpop.permute.xlu0 %3687  ;;  %v3367_v25 = vadd.f32 %v11155_v2, %v2879_v19  ;;  %v3368_v42 = vadd.f32 %v11156_v30, %v2880_v3 }
 0x4bc   : > { %v4016_v54 = vmax.f32 %v3935_v1, 0.0  ;;  %v4015_v53 = vmax.f32 %v3934_v15, 0.0  ;;  %v3854_v6 = vadd.f32 %v3690_v38, %v3366_v5  ;;  %v3853_v58 = vadd.f32 %v3688_v16, %v3365_v40 }
 0x4be   : > { %4098 = vst.msk [vmem:[%s8977_s16 + $0x260] sm:$0xff] %vm4021_vm0, %v4016_v54  ;;  %4097 = vst.msk [vmem:[%s8977_s16 + $0x258] sm:$0xff] %vm4021_vm0, %v4015_v53  ;;  %v3937_v24 = vadd.f32 %v8946_v8, %v3854_v6  ;;  %v3936_v43 = vadd.f32 %v8946_v8, %v3853_v58 }
 0x4bf   : > { %v3694_v14 = vpop.permute.xlu1 %3693  ;;  %v3692_v11 = vpop.permute.xlu0 %3691 }
 0x4c0   : > { %v4018_v7 = vmax.f32 %v3937_v24, 0.0  ;;  %v4017_v12 = vmax.f32 %v3936_v43, 0.0  ;;  %v3856_v51 = vadd.f32 %v3694_v14, %v3368_v42  ;;  %v3855_v32 = vadd.f32 %v3692_v11, %v3367_v25 }
 0x4c2   : > { %4100 = vst.msk [vmem:[%s8977_s16 + $0x270] sm:$0xff] %vm4021_vm0, %v4018_v7  ;;  %4099 = vst.msk [vmem:[%s8977_s16 + $0x268] sm:$0xff] %vm4021_vm0, %v4017_v12  ;;  %v3939_v29 = vadd.f32 %v8946_v8, %v3856_v51  ;;  %v3938_v48 = vadd.f32 %v8946_v8, %v3855_v32 }
 0x4c4   : > { %v4020_v37 = vmax.f32 %v3939_v29, 0.0  ;;  %v4019_v27 = vmax.f32 %v3938_v48, 0.0 }
 0x4c6   : > { %4102 = vst.msk [vmem:[%s8977_s16 + $0x280] sm:$0xff] %vm4021_vm0, %v4020_v37  ;;  %4101 = vst.msk [vmem:[%s8977_s16 + $0x278] sm:$0xff] %vm4021_vm0, %v4019_v27 }
 0x4c7 PF: > { %s15_s14 = sadd.s32 1, %s4539_s14  }
 0x4c8   : > { %p12_p1 = scmp.ge.s32.totalorder %s15_s14, 4  }
 0x4ca   :  { %14 = sbr.rel (!%p12_p1) target bundleno = 3 (0x3), region = 67 }
 0x4d1   :  { %4127 = vsyncpa [#allocation4], 1 }
 0x4d2   :  { %4129 = vsyncpa [#allocation4 + $0x1], 1 }

// kernel: decnn_forward.5
= control target key start
LH: loop header
LB: loop body
LE: loop exit
PB: predicated region body
PF: predicated region fallthrough
CT: control target
= control target key end

     0   :  { %s2114_s12 = smov 0   ;;  %s2569_s0 = inlined_call_operand.vmem [shape: f32[16,27], index: 0, kind: input, shape index: {}]   ;;  %s2570_s1 = inlined_call_operand.vmem [shape: f32[16,1], index: 1, kind: input, shape index: {}]   ;;  %s2571_s2 = inlined_call_operand.vmem [shape: f32[2,27,3888], index: 2, kind: input, shape index: {}]   ;;  %s2572_s3 = inlined_call_operand.vmem [shape: f32[2,16,3888], index: 3, kind: output, shape index: {}]  }
   0x1 LB: > { %s1820_s13 = sadd.s32 4294967295, %s2089_s12   ;;  %p1824_p0 = scmp.ge.s32.totalorder %s2089_s12, 1  ;;  %s2089_s12 = sphi %s2114_s12, %s13_s12  }
   0x2   : > { %p137_p1 = scmp.lt.s32.totalorder %s2089_s12, 3 }
   0x4   : > { %p138_p2 = pnand %p1824_p0, %p137_p1 }
   0x5   : > { %p161_p3 = scmp.lt.s32.totalorder (!%p138_p2), %s1820_s13, 1  ;;  %v2091_v0 = vmov (!%p138_p2), 0.0   ;;  %v297_v1 = vld [vmem:[%s2570_s1] sm:$0xff] (!%p138_p2)  ;;  %v2092_v2 = vmov (!%p138_p2), 0   ;;  %vm316_vm0 = vcmask (!%p138_p2), 1042432   ;;  %v298_v3 = vld [vmem:[%s2570_s1 + $0x8] sm:$0xff] (!%p138_p2) }
   0x6   : > { %141 = sbr.rel (%p138_p2) target bundleno = 306 (0x132), region = 32  ;;  %474 = vmatprep.mubr.f32.mxu0 (!%p138_p2), %v2091_v0  ;;  %551 = vmatprep.mubr.f32.mxu1 (!%p138_p2), %v2091_v0  ;;  %vm2093_vm1 = vmmov (!%p138_p2), 1   ;;  %v2165_v31 = vld [vmem:[%s2569_s0] sm:$0xff] (!%p138_p2)  ;;  %vm309_vm3 = vcmask (!%p138_p2), 220160   ;;  %v2196_v54 = vld [vmem:[%s2569_s0 + $0x8] sm:$0xff] (!%p138_p2)  ;;  %vm1732_vm4 = vcmask (!%p138_p2), 392192  }
   0x7   : > { %2082 = vset.pattern.permute.xlu0 (!%p138_p2), %v2092_v2  ;;  %vm2138_vm2 = vmpackc.low (!%p138_p2), %vm316_vm0, %vm2093_vm1 }
   0x8   : > { %301 = vperm.xlu0 (!%p138_p2), %2082, %v297_v1  }
   0xc   : > { %306 = vperm.xlu0 (!%p138_p2), %2082, %v298_v3  }
   0xd   : > { %s2576_s13 = smov (!%p161_p3, %s1820_s13), 1 }
   0xe   : > { %s2069_s16 = smul.u32 992, %s2576_s13 }
   0xf   : > { %s2070_s26 = smul.u32 496, %s2576_s13 }
  0x10   : > { %s2136_s21 = scalar_lea.vmem %s2571_s2, %s2069_s16 }
  0x11   : > { %v174_v5 = vld [vmem:[%s2136_s21 + $0x8] sm:$0xff]  ;;  %v205_v6 = vld [vmem:[%s2136_s21 + $0x100] sm:$0xff]  ;;  %v204_v9 = vld [vmem:[%s2136_s21 + $0xf8] sm:$0xff]  ;;  %s2439_s29 = scalar_lea.vmem %s2572_s3, %s2070_s26 }
  0x12   : > { %v173_v7 = vld [vmem:[%s2136_s21] sm:$0xff]  ;;  %v1909_v8 = vpack.c.bf16 %v205_v6, %v174_v5  ;;  %v176_v10 = vld [vmem:[%s2136_s21 + $0x18] sm:$0xff]  ;;  %v207_v11 = vld [vmem:[%s2136_s21 + $0x110] sm:$0xff] }
  0x13   : > { %v1911_v12 = vpack.c.bf16 %v204_v9, %v173_v7  ;;  %v1919_v13 = vpack.c.bf16 %v207_v11, %v176_v10  ;;  %v175_v14 = vld [vmem:[%s2136_s21 + $0x10] sm:$0xff]  ;;  %v206_v15 = vld [vmem:[%s2136_s21 + $0x108] sm:$0xff]  ;;  %v236_v16 = vld [vmem:[%s2136_s21 + $0x1f8] sm:$0xff] }
  0x14   : > { %1910 = vmatprep.subr.bf16.mxu0 %v1909_v8  ;;  %v1921_v17 = vpack.c.bf16 %v206_v15, %v175_v14  ;;  %v267_v18 = vld [vmem:[%s2136_s21 + $0x2f0] sm:$0x7]  ;;  %v266_v20 = vld [vmem:[%s2136_s21 + $0x2e8] sm:$0x7]  ;;  %v269_v24 = vld [vmem:[%s2136_s21 + $0x300] sm:$0x7] }
  0x15   : > { %v235_v19 = vld [vmem:[%s2136_s21 + $0x1f0] sm:$0xff]  ;;  %1912 = vmatpush1.bf16.msra.mxu0 %v1911_v12  ;;  %1920 = vmatprep.subr.bf16.mxu1 %v1919_v13  ;;  %v1913_v21 = vpack.c.bf16 %v267_v18, %v236_v16  ;;  %v238_v23 = vld [vmem:[%s2136_s21 + $0x208] sm:$0xff]  ;;  %v237_v25 = vld [vmem:[%s2136_s21 + $0x200] sm:$0xff] }
  0x16   : > { %v1916_v22 = vpack.c.bf16 %v266_v20, %v235_v19  ;;  %1922 = vmatpush1.bf16.msra.mxu1 %v1921_v17  ;;  %v1923_v26 = vpack.c.bf16 %v269_v24, %v238_v23  ;;  %v268_v27 = vld [vmem:[%s2136_s21 + $0x2f8] sm:$0x7]  ;;  %v178_v28 = vld [vmem:[%s2136_s21 + $0x28] sm:$0xff]  ;;  %v209_v29 = vld [vmem:[%s2136_s21 + $0x120] sm:$0xff] }
  0x17   : > { %1915 = vmatprep.subr.msk.bf16.mxu0 %vm2138_vm2, %v1913_v21  ;;  %v1926_v30 = vpack.c.bf16 %v268_v27, %v237_v25  ;;  %v1929_v32 = vpack.c.bf16 %v209_v29, %v178_v28  ;;  %v177_v33 = vld [vmem:[%s2136_s21 + $0x20] sm:$0xff]  ;;  %v208_v34 = vld [vmem:[%s2136_s21 + $0x118] sm:$0xff]  ;;  %v211_v36 = vld [vmem:[%s2136_s21 + $0x130] sm:$0xff] }
  0x18   : > { %v180_v35 = vld [vmem:[%s2136_s21 + $0x38] sm:$0xff]  ;;  %1925 = vmatprep.subr.msk.bf16.mxu1 %vm2138_vm2, %v1923_v26  ;;  %v179_v37 = vld [vmem:[%s2136_s21 + $0x30] sm:$0xff]  ;;  %v210_v38 = vld [vmem:[%s2136_s21 + $0x128] sm:$0xff]  ;;  %v1931_v39 = vpack.c.bf16 %v208_v34, %v177_v33 }
  0x19   : > { %1918 = vmatpush1.bf16.msk.msra.mxu0 %vm2138_vm2, %v1916_v22  ;;  %v1939_v40 = vpack.c.bf16 %v211_v36, %v180_v35  ;;  %v240_v41 = vld [vmem:[%s2136_s21 + $0x218] sm:$0xff]  ;;  %v271_v42 = vld [vmem:[%s2136_s21 + $0x310] sm:$0x7]  ;;  %v1941_v44 = vpack.c.bf16 %v210_v38, %v179_v37  ;;  %v270_v45 = vld [vmem:[%s2136_s21 + $0x308] sm:$0x7] }
  0x1a   : > { %v239_v43 = vld [vmem:[%s2136_s21 + $0x210] sm:$0xff]  ;;  %1928 = vmatpush1.bf16.msk.msra.mxu1 %vm2138_vm2, %v1926_v30  ;;  %1930 = vmatprep.subr.bf16.mxu0 %v1929_v32  ;;  %v242_v46 = vld [vmem:[%s2136_s21 + $0x228] sm:$0xff]  ;;  %v273_v47 = vld [vmem:[%s2136_s21 + $0x320] sm:$0x7]  ;;  %v1933_v48 = vpack.c.bf16 %v271_v42, %v240_v41 }
  0x1b   : > { %1940 = vmatprep.subr.bf16.mxu1 %v1939_v40  ;;  %v241_v49 = vld [vmem:[%s2136_s21 + $0x220] sm:$0xff]  ;;  %v272_v50 = vld [vmem:[%s2136_s21 + $0x318] sm:$0x7]  ;;  %v1943_v51 = vpack.c.bf16 %v273_v47, %v242_v46  ;;  %v182_v52 = vld [vmem:[%s2136_s21 + $0x48] sm:$0xff]  ;;  %v1936_v55 = vpack.c.bf16 %v270_v45, %v239_v43 }
  0x1c   : > { %1829 = vmatmul.mubr.msk.f32.vlgmr.msra.gmra.mrb[0].mxu0 %vm309_vm3, %v2165_v31  ;;  %v213_v53 = vld [vmem:[%s2136_s21 + $0x140] sm:$0xff]  ;;  %v184_v56 = vld [vmem:[%s2136_s21 + $0x58] sm:$0xff]  ;;  %v215_v57 = vld [vmem:[%s2136_s21 + $0x150] sm:$0xff]  ;;  %v1946_v58 = vpack.c.bf16 %v272_v50, %v241_v49 }
  0x1d   : > { %1833 = vmatmul.mubr.msk.f32.vlgmr.msra.gmra.mrb[0].mxu1 %vm309_vm3, %v2165_v31  ;;  %1932 = vmatpush1.bf16.msra.mxu0 %v1931_v39  ;;  %v181_v59 = vld [vmem:[%s2136_s21 + $0x40] sm:$0xff]  ;;  %v212_v60 = vld [vmem:[%s2136_s21 + $0x138] sm:$0xff]  ;;  %v1949_v61 = vpack.c.bf16 %v213_v53, %v182_v52  ;;  %v183_v62 = vld [vmem:[%s2136_s21 + $0x50] sm:$0xff]  ;;  %v1959_v1 = vpack.c.bf16 %v215_v57, %v184_v56 }
  0x1e   : > { %1942 = vmatpush1.bf16.msra.mxu1 %v1941_v44  ;;  %480 = vmatprep.mubr.f32.mxu0 %v2091_v0  ;;  %v214_v63 = vld [vmem:[%s2136_s21 + $0x148] sm:$0xff]  ;;  %v244_v2 = vld [vmem:[%s2136_s21 + $0x238] sm:$0xff]  ;;  %v275_v3 = vld [vmem:[%s2136_s21 + $0x330] sm:$0x7]  ;;  %v1951_v5 = vpack.c.bf16 %v212_v60, %v181_v59 }
  0x1f   : > { %557 = vmatprep.mubr.f32.mxu1 %v2091_v0  ;;  %1935 = vmatprep.subr.msk.bf16.mxu0 %vm2138_vm2, %v1933_v48  ;;  %v246_v6 = vld [vmem:[%s2136_s21 + $0x248] sm:$0xff]  ;;  %v277_v7 = vld [vmem:[%s2136_s21 + $0x340] sm:$0x7]  ;;  %v1961_v8 = vpack.c.bf16 %v214_v63, %v183_v62  ;;  %v243_v9 = vld [vmem:[%s2136_s21 + $0x230] sm:$0xff]  ;;  %v1953_v11 = vpack.c.bf16 %v275_v3, %v244_v2 }
  0x20   : > { %1830 = vmatmul.mubr.msk.f32.gmra.mrb[2].mxu0 %vm309_vm3, %v2196_v54  ;;  %1945 = vmatprep.subr.msk.bf16.mxu1 %vm2138_vm2, %v1943_v51  ;;  %v274_v10 = vld [vmem:[%s2136_s21 + $0x328] sm:$0x7]  ;;  %v245_v12 = vld [vmem:[%s2136_s21 + $0x240] sm:$0xff]  ;;  %v276_v13 = vld [vmem:[%s2136_s21 + $0x338] sm:$0x7]  ;;  %v1963_v14 = vpack.c.bf16 %v277_v7, %v246_v6 }
  0x21   : > { %1834 = vmatmul.mubr.msk.f32.gmra.mrb[2].mxu1 %vm309_vm3, %v2196_v54  ;;  %1938 = vmatpush1.bf16.msk.msra.mxu0 %vm2138_vm2, %v1936_v55  ;;  %v186_v15 = vld [vmem:[%s2136_s21 + $0x68] sm:$0xff]  ;;  %v217_v16 = vld [vmem:[%s2136_s21 + $0x160] sm:$0xff]  ;;  %v1956_v17 = vpack.c.bf16 %v274_v10, %v243_v9  ;;  %v188_v18 = vld [vmem:[%s2136_s21 + $0x78] sm:$0xff]  ;;  %v1966_v20 = vpack.c.bf16 %v276_v13, %v245_v12 }
  0x22   : > { %1948 = vmatpush1.bf16.msk.msra.mxu1 %vm2138_vm2, %v1946_v58  ;;  %628 = vmatprep.mubr.f32.mxu0 %v2091_v0  ;;  %v219_v19 = vld [vmem:[%s2136_s21 + $0x170] sm:$0xff]  ;;  %v185_v21 = vld [vmem:[%s2136_s21 + $0x60] sm:$0xff]  ;;  %v216_v22 = vld [vmem:[%s2136_s21 + $0x158] sm:$0xff]  ;;  %v1969_v23 = vpack.c.bf16 %v217_v16, %v186_v15 }
  0x23   : > { %705 = vmatprep.mubr.f32.mxu1 %v2091_v0  ;;  %1950 = vmatprep.subr.bf16.mxu0 %v1949_v61  ;;  %v187_v24 = vld [vmem:[%s2136_s21 + $0x70] sm:$0xff]  ;;  %v218_v25 = vld [vmem:[%s2136_s21 + $0x168] sm:$0xff]  ;;  %v1979_v26 = vpack.c.bf16 %v219_v19, %v188_v18  ;;  %v248_v27 = vld [vmem:[%s2136_s21 + $0x258] sm:$0xff]  ;;  %v1971_v29 = vpack.c.bf16 %v216_v22, %v185_v21 }
  0x24   : > { %1837 = vmatmul.mubr.msk.f32.vlgmr.msra.gmra.mrb[4].mxu0 %vm309_vm3, %v2165_v31  ;;  %1960 = vmatprep.subr.bf16.mxu1 %v1959_v1  ;;  %v279_v28 = vld [vmem:[%s2136_s21 + $0x350] sm:$0x7]  ;;  %v250_v30 = vld [vmem:[%s2136_s21 + $0x268] sm:$0xff]  ;;  %v281_v32 = vld [vmem:[%s2136_s21 + $0x360] sm:$0x7]  ;;  %v1981_v33 = vpack.c.bf16 %v218_v25, %v187_v24 }
  0x25   : > { %1841 = vmatmul.mubr.msk.f32.vlgmr.msra.gmra.mrb[4].mxu1 %vm309_vm3, %v2165_v31  ;;  %1952 = vmatpush1.bf16.msra.mxu0 %v1951_v5  ;;  %v247_v34 = vld [vmem:[%s2136_s21 + $0x250] sm:$0xff]  ;;  %v278_v35 = vld [vmem:[%s2136_s21 + $0x348] sm:$0x7]  ;;  %v1973_v36 = vpack.c.bf16 %v279_v28, %v248_v27  ;;  %v249_v37 = vld [vmem:[%s2136_s21 + $0x260] sm:$0xff]  ;;  %v1983_v39 = vpack.c.bf16 %v281_v32, %v250_v30 }
  0x26   : > { %1962 = vmatpush1.bf16.msra.mxu1 %v1961_v8  ;;  %634 = vmatprep.mubr.f32.mxu0 %v2091_v0  ;;  %v280_v38 = vld [vmem:[%s2136_s21 + $0x358] sm:$0x7]  ;;  %v190_v40 = vld [vmem:[%s2136_s21 + $0x88] sm:$0xff]  ;;  %v221_v41 = vld [vmem:[%s2136_s21 + $0x180] sm:$0xff]  ;;  %v1976_v42 = vpack.c.bf16 %v278_v35, %v247_v34 }
  0x27   : > { %711 = vmatprep.mubr.f32.mxu1 %v2091_v0  ;;  %1955 = vmatprep.subr.msk.bf16.mxu0 %vm2138_vm2, %v1953_v11  ;;  %v192_v43 = vld [vmem:[%s2136_s21 + $0x98] sm:$0xff]  ;;  %v223_v44 = vld [vmem:[%s2136_s21 + $0x190] sm:$0xff]  ;;  %v1986_v45 = vpack.c.bf16 %v280_v38, %v249_v37  ;;  %v189_v46 = vld [vmem:[%s2136_s21 + $0x80] sm:$0xff]  ;;  %v1989_v48 = vpack.c.bf16 %v221_v41, %v190_v40 }
  0x28   : > { %1838 = vmatmul.mubr.msk.f32.gmra.mrb[6].mxu0 %vm309_vm3, %v2196_v54  ;;  %1965 = vmatprep.subr.msk.bf16.mxu1 %vm2138_vm2, %v1963_v14  ;;  %v220_v47 = vld [vmem:[%s2136_s21 + $0x178] sm:$0xff]  ;;  %v191_v49 = vld [vmem:[%s2136_s21 + $0x90] sm:$0xff]  ;;  %v222_v50 = vld [vmem:[%s2136_s21 + $0x188] sm:$0xff]  ;;  %v1999_v51 = vpack.c.bf16 %v223_v44, %v192_v43 }
  0x29   : > { %1842 = vmatmul.mubr.msk.f32.gmra.mrb[6].mxu1 %vm309_vm3, %v2196_v54  ;;  %1958 = vmatpush1.bf16.msk.msra.mxu0 %vm2138_vm2, %v1956_v17  ;;  %v252_v52 = vld [vmem:[%s2136_s21 + $0x278] sm:$0xff]  ;;  %v283_v53 = vld [vmem:[%s2136_s21 + $0x370] sm:$0x7]  ;;  %v1991_v55 = vpack.c.bf16 %v220_v47, %v189_v46  ;;  %v254_v56 = vld [vmem:[%s2136_s21 + $0x288] sm:$0xff]  ;;  %v2001_v58 = vpack.c.bf16 %v222_v50, %v191_v49 }
  0x2a   : > { %1968 = vmatpush1.bf16.msk.msra.mxu1 %vm2138_vm2, %v1966_v20  ;;  %782 = vmatprep.mubr.f32.mxu0 %v2091_v0  ;;  %v285_v57 = vld [vmem:[%s2136_s21 + $0x380] sm:$0x7]  ;;  %v251_v59 = vld [vmem:[%s2136_s21 + $0x270] sm:$0xff]  ;;  %v282_v60 = vld [vmem:[%s2136_s21 + $0x368] sm:$0x7]  ;;  %v1993_v61 = vpack.c.bf16 %v283_v53, %v252_v52 }
  0x2b   : > { %859 = vmatprep.mubr.f32.mxu1 %v2091_v0  ;;  %1970 = vmatprep.subr.bf16.mxu0 %v1969_v23  ;;  %v253_v62 = vld [vmem:[%s2136_s21 + $0x280] sm:$0xff]  ;;  %v284_v63 = vld [vmem:[%s2136_s21 + $0x378] sm:$0x7]  ;;  %v2003_v1 = vpack.c.bf16 %v285_v57, %v254_v56  ;;  %v194_v2 = vld [vmem:[%s2136_s21 + $0xa8] sm:$0xff]  ;;  %v1996_v5 = vpack.c.bf16 %v282_v60, %v251_v59 }
  0x2c   : > { %1845 = vmatmul.mubr.msk.f32.vlgmr.msra.gmra.mrb[8].mxu0 %vm309_vm3, %v2165_v31  ;;  %1980 = vmatprep.subr.bf16.mxu1 %v1979_v26  ;;  %v225_v3 = vld [vmem:[%s2136_s21 + $0x1a0] sm:$0xff]  ;;  %v196_v6 = vld [vmem:[%s2136_s21 + $0xb8] sm:$0xff]  ;;  %v227_v7 = vld [vmem:[%s2136_s21 + $0x1b0] sm:$0xff]  ;;  %v2006_v8 = vpack.c.bf16 %v284_v63, %v253_v62 }
  0x2d   : > { %1849 = vmatmul.mubr.msk.f32.vlgmr.msra.gmra.mrb[8].mxu1 %vm309_vm3, %v2165_v31  ;;  %1972 = vmatpush1.bf16.msra.mxu0 %v1971_v29  ;;  %v193_v9 = vld [vmem:[%s2136_s21 + $0xa0] sm:$0xff]  ;;  %v224_v10 = vld [vmem:[%s2136_s21 + $0x198] sm:$0xff]  ;;  %v2009_v11 = vpack.c.bf16 %v225_v3, %v194_v2  ;;  %v195_v12 = vld [vmem:[%s2136_s21 + $0xb0] sm:$0xff]  ;;  %v2019_v14 = vpack.c.bf16 %v227_v7, %v196_v6 }
  0x2e   : > { %1982 = vmatpush1.bf16.msra.mxu1 %v1981_v33  ;;  %788 = vmatprep.mubr.f32.mxu0 %v2091_v0  ;;  %v226_v13 = vld [vmem:[%s2136_s21 + $0x1a8] sm:$0xff]  ;;  %v256_v15 = vld [vmem:[%s2136_s21 + $0x298] sm:$0xff]  ;;  %v287_v16 = vld [vmem:[%s2136_s21 + $0x390] sm:$0x7]  ;;  %v2011_v17 = vpack.c.bf16 %v224_v10, %v193_v9 }
  0x2f   : > { %865 = vmatprep.mubr.f32.mxu1 %v2091_v0  ;;  %1975 = vmatprep.subr.msk.bf16.mxu0 %vm2138_vm2, %v1973_v36  ;;  %v258_v18 = vld [vmem:[%s2136_s21 + $0x2a8] sm:$0xff]  ;;  %v289_v19 = vld [vmem:[%s2136_s21 + $0x3a0] sm:$0x7]  ;;  %v2021_v20 = vpack.c.bf16 %v226_v13, %v195_v12  ;;  %v255_v21 = vld [vmem:[%s2136_s21 + $0x290] sm:$0xff]  ;;  %v2013_v23 = vpack.c.bf16 %v287_v16, %v256_v15 }
  0x30   : > { %1846 = vmatmul.mubr.msk.f32.gmra.mrb[10].mxu0 %vm309_vm3, %v2196_v54  ;;  %1985 = vmatprep.subr.msk.bf16.mxu1 %vm2138_vm2, %v1983_v39  ;;  %v286_v22 = vld [vmem:[%s2136_s21 + $0x388] sm:$0x7]  ;;  %v257_v24 = vld [vmem:[%s2136_s21 + $0x2a0] sm:$0xff]  ;;  %v288_v25 = vld [vmem:[%s2136_s21 + $0x398] sm:$0x7]  ;;  %v2023_v26 = vpack.c.bf16 %v289_v19, %v258_v18 }
  0x31   : > { %1850 = vmatmul.mubr.msk.f32.gmra.mrb[10].mxu1 %vm309_vm3, %v2196_v54  ;;  %1978 = vmatpush1.bf16.msk.msra.mxu0 %vm2138_vm2, %v1976_v42  ;;  %v198_v27 = vld [vmem:[%s2136_s21 + $0xc8] sm:$0xff]  ;;  %v229_v28 = vld [vmem:[%s2136_s21 + $0x1c0] sm:$0xff]  ;;  %v2016_v29 = vpack.c.bf16 %v286_v22, %v255_v21  ;;  %v200_v30 = vld [vmem:[%s2136_s21 + $0xd8] sm:$0xff]  ;;  %v2026_v33 = vpack.c.bf16 %v288_v25, %v257_v24 }
  0x32   : > { %1988 = vmatpush1.bf16.msk.msra.mxu1 %vm2138_vm2, %v1986_v45  ;;  %936 = vmatprep.mubr.f32.mxu0 %v2091_v0  ;;  %v231_v32 = vld [vmem:[%s2136_s21 + $0x1d0] sm:$0xff]  ;;  %v197_v34 = vld [vmem:[%s2136_s21 + $0xc0] sm:$0xff]  ;;  %v228_v35 = vld [vmem:[%s2136_s21 + $0x1b8] sm:$0xff]  ;;  %v2029_v36 = vpack.c.bf16 %v229_v28, %v198_v27 }
  0x33   : > { %1013 = vmatprep.mubr.f32.mxu1 %v2091_v0  ;;  %1990 = vmatprep.subr.bf16.mxu0 %v1989_v48  ;;  %v199_v37 = vld [vmem:[%s2136_s21 + $0xd0] sm:$0xff]  ;;  %v230_v38 = vld [vmem:[%s2136_s21 + $0x1c8] sm:$0xff]  ;;  %v2039_v39 = vpack.c.bf16 %v231_v32, %v200_v30  ;;  %v260_v40 = vld [vmem:[%s2136_s21 + $0x2b8] sm:$0xff]  ;;  %v2031_v42 = vpack.c.bf16 %v228_v35, %v197_v34 }
  0x34   : > { %1853 = vmatmul.mubr.msk.f32.vlgmr.msra.gmra.mrb[12].mxu0 %vm309_vm3, %v2165_v31  ;;  %2000 = vmatprep.subr.bf16.mxu1 %v1999_v51  ;;  %v291_v41 = vld [vmem:[%s2136_s21 + $0x3b0] sm:$0x7]  ;;  %v262_v43 = vld [vmem:[%s2136_s21 + $0x2c8] sm:$0xff]  ;;  %v293_v44 = vld [vmem:[%s2136_s21 + $0x3c0] sm:$0x7]  ;;  %v2041_v45 = vpack.c.bf16 %v230_v38, %v199_v37 }
  0x35   : > { %1857 = vmatmul.mubr.msk.f32.vlgmr.msra.gmra.mrb[12].mxu1 %vm309_vm3, %v2165_v31  ;;  %1992 = vmatpush1.bf16.msra.mxu0 %v1991_v55  ;;  %v259_v46 = vld [vmem:[%s2136_s21 + $0x2b0] sm:$0xff]  ;;  %v290_v47 = vld [vmem:[%s2136_s21 + $0x3a8] sm:$0x7]  ;;  %v2033_v48 = vpack.c.bf16 %v291_v41, %v260_v40  ;;  %v261_v49 = vld [vmem:[%s2136_s21 + $0x2c0] sm:$0xff]  ;;  %v2043_v51 = vpack.c.bf16 %v293_v44, %v262_v43 }
  0x36   : > { %2002 = vmatpush1.bf16.msra.mxu1 %v2001_v58  ;;  %942 = vmatprep.mubr.f32.mxu0 %v2091_v0  ;;  %v292_v50 = vld [vmem:[%s2136_s21 + $0x3b8] sm:$0x7]  ;;  %v202_v52 = vld [vmem:[%s2136_s21 + $0xe8] sm:$0xff]  ;;  %v233_v53 = vld [vmem:[%s2136_s21 + $0x1e0] sm:$0xff]  ;;  %v2036_v55 = vpack.c.bf16 %v290_v47, %v259_v46 }
  0x37   : > { %1019 = vmatprep.mubr.f32.mxu1 %v2091_v0  ;;  %1995 = vmatprep.subr.msk.bf16.mxu0 %vm2138_vm2, %v1993_v61  ;;  %v203_v56 = vld [vmem:[%s2136_s21 + $0xf0] sm:$0xff]  ;;  %v234_v57 = vld [vmem:[%s2136_s21 + $0x1e8] sm:$0xff]  ;;  %v2046_v58 = vpack.c.bf16 %v292_v50, %v261_v49  ;;  %v201_v59 = vld [vmem:[%s2136_s21 + $0xe0] sm:$0xff]  ;;  %v2049_v61 = vpack.c.bf16 %v233_v53, %v202_v52 }
  0x38   : > { %1854 = vmatmul.mubr.msk.f32.gmra.mrb[14].mxu0 %vm309_vm3, %v2196_v54  ;;  %2005 = vmatprep.subr.msk.bf16.mxu1 %vm2138_vm2, %v2003_v1  ;;  %v232_v60 = vld [vmem:[%s2136_s21 + $0x1d8] sm:$0xff]  ;;  %v2059_v62 = vpack.c.bf16 %v234_v57, %v203_v56  ;;  %v295_v1 = vld [vmem:[%s2136_s21 + $0x3d0] sm:$0x7]  ;;  %v265_v3 = vld [vmem:[%s2136_s21 + $0x2e0] sm:$0xff] }
  0x39   : > { %1858 = vmatmul.mubr.msk.f32.gmra.mrb[14].mxu1 %vm309_vm3, %v2196_v54  ;;  %1998 = vmatpush1.bf16.msk.msra.mxu0 %vm2138_vm2, %v1996_v5  ;;  %v264_v63 = vld [vmem:[%s2136_s21 + $0x2d8] sm:$0xff]  ;;  %v2051_v2 = vpack.c.bf16 %v232_v60, %v201_v59  ;;  %v263_v6 = vld [vmem:[%s2136_s21 + $0x2d0] sm:$0xff]  ;;  %v294_v7 = vld [vmem:[%s2136_s21 + $0x3c8] sm:$0x7] }
  0x3a   : > { %2008 = vmatpush1.bf16.msk.msra.mxu1 %vm2138_vm2, %v2006_v8  ;;  %1090 = vmatprep.mubr.f32.mxu0 %v2091_v0  ;;  %v296_v5 = vld [vmem:[%s2136_s21 + $0x3d8] sm:$0x7]  ;;  %v2053_v8 = vpack.c.bf16 %v295_v1, %v264_v63  ;;  %v2056_v10 = vpack.c.bf16 %v294_v7, %v263_v6 }
  0x3b   : > { %1167 = vmatprep.mubr.f32.mxu1 %v2091_v0  ;;  %2010 = vmatprep.subr.bf16.mxu0 %v2009_v11  ;;  %v2063_v9 = vpack.c.bf16 %v296_v5, %v265_v3 }
  0x3c   : > { %1861 = vmatmul.mubr.msk.f32.vlgmr.msra.gmra.mrb[16].mxu0 %vm309_vm3, %v2165_v31  ;;  %2020 = vmatprep.subr.bf16.mxu1 %v2019_v14 }
  0x3d   : > { %1865 = vmatmul.mubr.msk.f32.vlgmr.msra.gmra.mrb[16].mxu1 %vm309_vm3, %v2165_v31  ;;  %2012 = vmatpush1.bf16.msra.mxu0 %v2011_v17 }
  0x3e   : > { %2022 = vmatpush1.bf16.msra.mxu1 %v2021_v20  ;;  %1096 = vmatprep.mubr.f32.mxu0 %v2091_v0 }
  0x3f   : > { %1173 = vmatprep.mubr.f32.mxu1 %v2091_v0  ;;  %2015 = vmatprep.subr.msk.bf16.mxu0 %vm2138_vm2, %v2013_v23 }
  0x40   : > { %1862 = vmatmul.mubr.msk.f32.gmra.mrb[18].mxu0 %vm309_vm3, %v2196_v54  ;;  %2025 = vmatprep.subr.msk.bf16.mxu1 %vm2138_vm2, %v2023_v26 }
  0x41   : > { %1866 = vmatmul.mubr.msk.f32.gmra.mrb[18].mxu1 %vm309_vm3, %v2196_v54  ;;  %2018 = vmatpush1.bf16.msk.msra.mxu0 %vm2138_vm2, %v2016_v29 }
  0x42   : > { %2028 = vmatpush1.bf16.msk.msra.mxu1 %vm2138_vm2, %v2026_v33  ;;  %1244 = vmatprep.mubr.f32.mxu0 %v2091_v0 }
  0x43   : > { %1321 = vmatprep.mubr.f32.mxu1 %v2091_v0  ;;  %2030 = vmatprep.subr.bf16.mxu0 %v2029_v36 }
  0x44   : > { %1869 = vmatmul.mubr.msk.f32.vlgmr.msra.gmra.mrb[20].mxu0 %vm309_vm3, %v2165_v31  ;;  %2040 = vmatprep.subr.bf16.mxu1 %v2039_v39 }
  0x45   : > { %1873 = vmatmul.mubr.msk.f32.vlgmr.msra.gmra.mrb[20].mxu1 %vm309_vm3, %v2165_v31  ;;  %2032 = vmatpush1.bf16.msra.mxu0 %v2031_v42 }
  0x46   : > { %2042 = vmatpush1.bf16.msra.mxu1 %v2041_v45  ;;  %1250 = vmatprep.mubr.f32.mxu0 %v2091_v0 }
  0x47   : > { %1327 = vmatprep.mubr.f32.mxu1 %v2091_v0  ;;  %2035 = vmatprep.subr.msk.bf16.mxu0 %vm2138_vm2, %v2033_v48 }
  0x48   : > { %1870 = vmatmul.mubr.msk.f32.gmra.mrb[22].mxu0 %vm309_vm3, %v2196_v54  ;;  %2045 = vmatprep.subr.msk.bf16.mxu1 %vm2138_vm2, %v2043_v51 }
  0x49   : > { %1874 = vmatmul.mubr.msk.f32.gmra.mrb[22].mxu1 %vm309_vm3, %v2196_v54  ;;  %2038 = vmatpush1.bf16.msk.msra.mxu0 %vm2138_vm2, %v2036_v55 }
  0x4a   : > { %2048 = vmatpush1.bf16.msk.msra.mxu1 %vm2138_vm2, %v2046_v58  ;;  %1398 = vmatprep.mubr.f32.mxu0 %v2091_v0 }
  0x4b   : > { %1475 = vmatprep.mubr.f32.mxu1 %v2091_v0  ;;  %2050 = vmatprep.subr.bf16.mxu0 %v2049_v61 }
  0x4c   : > { %1877 = vmatmul.mubr.msk.f32.vlgmr.msra.gmra.mrb[24].mxu0 %vm309_vm3, %v2165_v31  ;;  %2060 = vmatprep.subr.bf16.mxu1 %v2059_v62 }
  0x4d   : > { %1881 = vmatmul.mubr.msk.f32.vlgmr.msra.gmra.mrb[24].mxu1 %vm309_vm3, %v2165_v31  ;;  %2052 = vmatpush1.bf16.msra.mxu0 %v2051_v2 }
  0x4e   : > { %2062 = vmatpush3.bf16.msra.mxu1 %v2059_v62  ;;  %1404 = vmatprep.mubr.f32.mxu0 %v2091_v0 }
  0x4f   : > { %1481 = vmatprep.mubr.f32.mxu1 %v2091_v0  ;;  %2055 = vmatprep.subr.msk.bf16.mxu0 %vm2138_vm2, %v2053_v8 }
  0x50   : > { %1878 = vmatmul.mubr.msk.f32.gmra.mrb[26].mxu0 %vm309_vm3, %v2196_v54  ;;  %2065 = vmatprep.subr.msk.bf16.mxu1 %vm2138_vm2, %v2063_v9 }
  0x51   : > { %1882 = vmatmul.mubr.msk.f32.gmra.mrb[26].mxu1 %vm309_vm3, %v2196_v54  ;;  %2058 = vmatpush1.bf16.msk.msra.mxu0 %vm2138_vm2, %v2056_v10 }
  0x52   : > { %2068 = vmatpush3.bf16.msk.msra.mxu1 %vm2138_vm2, %v2063_v9  ;;  %1552 = vmatprep.mubr.f32.mxu0 %v2091_v0 }
  0x53   : > { %1906 = vmatprep.mubr.msk.f32.mxu1 %vm309_vm3, %v2165_v31 }
  0x54   : > { %1885 = vmatmul.mubr.msk.f32.vlgmr.msra.gmra.mrb[28].mxu0 %vm309_vm3, %v2165_v31 }
  0x55   : > { %1907 = vmatmul.mubr.msk.f32.vlgmr.msra.gmra.mrb[28].mxu1 %vm309_vm3, %v2196_v54  ;;  %1558 = vmatprep.mubr.f32.mxu0 %v2091_v0 }
  0x58   : > { %1886 = vmatmul.mubr.msk.f32.gmra.mrb[30].mxu0 %vm309_vm3, %v2196_v54 }
  0x87   : > { %v2432_v11 = vpop.permute.xlu0 %301 }
  0x8b   : > { %v2443_v54 = vpop.permute.xlu0 %306 }
  0xef   : > { %v476_v4 = vpop.f32.mrb[0].mxu0 }
  0xf0   : > { %v477_v12 = vadd.f32 %v476_v4, %v2432_v11  ;;  %v478_v13 = vpop.f32.mrb[1].mxu0  ;;  %v553_v14 = vpop.f32.mrb[0].mxu1 }
  0xf1   : > { %v479_v0 = vadd.f32 %v478_v13, %v2432_v11  ;;  %v554_v31 = vadd.f32 %v553_v14, %v2432_v11  ;;  %v555_v15 = vpop.f32.mrb[1].mxu1 }
  0xf2   : > { %v1640_v16 = vmax.f32 %v477_v12, 0.0  ;;  %v556_v17 = vadd.f32 %v555_v15, %v2432_v11 }
  0xf3   : > { %v1641_v18 = vmax.f32 %v479_v0, 0.0  ;;  %v482_v19 = vpop.f32.mrb[2].mxu0  ;;  %v1642_v20 = vmax.f32 %v554_v31, 0.0 }
  0xf4   : > { %1702 = vst [vmem:[%s2439_s29] sm:$0xff] %v1640_v16  ;;  %v483_v21 = vadd.f32 %v482_v19, %v2443_v54  ;;  %v484_v22 = vpop.f32.mrb[3].mxu0  ;;  %v1643_v23 = vmax.f32 %v556_v17, 0.0  ;;  %v559_v24 = vpop.f32.mrb[2].mxu1 }
  0xf5   : > { %1703 = vst [vmem:[%s2439_s29 + $0x8] sm:$0xff] %v1641_v18  ;;  %1704 = vst [vmem:[%s2439_s29 + $0x10] sm:$0xff] %v1642_v20  ;;  %v485_v25 = vadd.f32 %v484_v22, %v2443_v54  ;;  %v560_v26 = vadd.f32 %v559_v24, %v2443_v54  ;;  %v561_v27 = vpop.f32.mrb[3].mxu1 }
  0xf6   : > { %v1671_v28 = vmax.f32 %v483_v21, 0.0  ;;  %1705 = vst [vmem:[%s2439_s29 + $0x18] sm:$0xff] %v1643_v23  ;;  %v562_v29 = vadd.f32 %v561_v27, %v2443_v54 }
  0xf7   : > { %v1672_v30 = vmax.f32 %v485_v25, 0.0  ;;  %v1673_v32 = vmax.f32 %v560_v26, 0.0  ;;  %v630_v33 = vpop.f32.mrb[4].mxu0 }
  0xf8   : > { %1734 = vst [vmem:[%s2439_s29 + $0xf8] sm:$0xff] %v1671_v28  ;;  %v631_v34 = vadd.f32 %v630_v33, %v2432_v11  ;;  %v1674_v35 = vmax.f32 %v562_v29, 0.0  ;;  %v632_v36 = vpop.f32.mrb[5].mxu0  ;;  %v707_v37 = vpop.f32.mrb[4].mxu1 }
  0xf9   : > { %1735 = vst [vmem:[%s2439_s29 + $0x100] sm:$0xff] %v1672_v30  ;;  %1736 = vst [vmem:[%s2439_s29 + $0x108] sm:$0xff] %v1673_v32  ;;  %v633_v38 = vadd.f32 %v632_v36, %v2432_v11  ;;  %v708_v39 = vadd.f32 %v707_v37, %v2432_v11  ;;  %v709_v40 = vpop.f32.mrb[5].mxu1 }
  0xfa   : > { %v1644_v41 = vmax.f32 %v631_v34, 0.0  ;;  %1737 = vst [vmem:[%s2439_s29 + $0x110] sm:$0xff] %v1674_v35  ;;  %v710_v42 = vadd.f32 %v709_v40, %v2432_v11 }
  0xfb   : > { %v1645_v43 = vmax.f32 %v633_v38, 0.0  ;;  %v636_v44 = vpop.f32.mrb[6].mxu0  ;;  %v1646_v45 = vmax.f32 %v708_v39, 0.0 }
  0xfc   : > { %1706 = vst [vmem:[%s2439_s29 + $0x20] sm:$0xff] %v1644_v41  ;;  %v637_v46 = vadd.f32 %v636_v44, %v2443_v54  ;;  %v638_v47 = vpop.f32.mrb[7].mxu0  ;;  %v1647_v48 = vmax.f32 %v710_v42, 0.0  ;;  %v713_v49 = vpop.f32.mrb[6].mxu1 }
  0xfd   : > { %1707 = vst [vmem:[%s2439_s29 + $0x28] sm:$0xff] %v1645_v43  ;;  %1708 = vst [vmem:[%s2439_s29 + $0x30] sm:$0xff] %v1646_v45  ;;  %v639_v50 = vadd.f32 %v638_v47, %v2443_v54  ;;  %v714_v51 = vadd.f32 %v713_v49, %v2443_v54  ;;  %v715_v52 = vpop.f32.mrb[7].mxu1 }
  0xfe   : > { %v1675_v53 = vmax.f32 %v637_v46, 0.0  ;;  %1709 = vst [vmem:[%s2439_s29 + $0x38] sm:$0xff] %v1647_v48  ;;  %v716_v55 = vadd.f32 %v715_v52, %v2443_v54 }
  0xff   : > { %v1676_v56 = vmax.f32 %v639_v50, 0.0  ;;  %v1677_v57 = vmax.f32 %v714_v51, 0.0  ;;  %v784_v58 = vpop.f32.mrb[8].mxu0 }
 0x100   : > { %1738 = vst [vmem:[%s2439_s29 + $0x118] sm:$0xff] %v1675_v53  ;;  %v785_v59 = vadd.f32 %v784_v58, %v2432_v11  ;;  %v1678_v60 = vmax.f32 %v716_v55, 0.0  ;;  %v786_v61 = vpop.f32.mrb[9].mxu0  ;;  %v861_v62 = vpop.f32.mrb[8].mxu1 }
 0x101   : > { %1739 = vst [vmem:[%s2439_s29 + $0x120] sm:$0xff] %v1676_v56  ;;  %1740 = vst [vmem:[%s2439_s29 + $0x128] sm:$0xff] %v1677_v57  ;;  %v787_v63 = vadd.f32 %v786_v61, %v2432_v11  ;;  %v862_v1 = vadd.f32 %v861_v62, %v2432_v11  ;;  %v863_v2 = vpop.f32.mrb[9].mxu1 }
 0x102   : > { %v1648_v3 = vmax.f32 %v785_v59, 0.0  ;;  %1741 = vst [vmem:[%s2439_s29 + $0x130] sm:$0xff] %v1678_v60  ;;  %v864_v5 = vadd.f32 %v863_v2, %v2432_v11 }
 0x103   : > { %v1649_v6 = vmax.f32 %v787_v63, 0.0  ;;  %v790_v7 = vpop.f32.mrb[10].mxu0  ;;  %v1650_v8 = vmax.f32 %v862_v1, 0.0 }
 0x104   : > { %1710 = vst [vmem:[%s2439_s29 + $0x40] sm:$0xff] %v1648_v3  ;;  %v791_v9 = vadd.f32 %v790_v7, %v2443_v54  ;;  %v792_v10 = vpop.f32.mrb[11].mxu0  ;;  %v1651_v4 = vmax.f32 %v864_v5, 0.0  ;;  %v867_v12 = vpop.f32.mrb[10].mxu1 }
 0x105   : > { %1711 = vst [vmem:[%s2439_s29 + $0x48] sm:$0xff] %v1649_v6  ;;  %1712 = vst [vmem:[%s2439_s29 + $0x50] sm:$0xff] %v1650_v8  ;;  %v793_v13 = vadd.f32 %v792_v10, %v2443_v54  ;;  %v868_v14 = vadd.f32 %v867_v12, %v2443_v54  ;;  %v869_v0 = vpop.f32.mrb[11].mxu1 }
 0x106   : > { %v1679_v31 = vmax.f32 %v791_v9, 0.0  ;;  %1713 = vst [vmem:[%s2439_s29 + $0x58] sm:$0xff] %v1651_v4  ;;  %v870_v15 = vadd.f32 %v869_v0, %v2443_v54 }
 0x107   : > { %v1680_v16 = vmax.f32 %v793_v13, 0.0  ;;  %v1681_v17 = vmax.f32 %v868_v14, 0.0  ;;  %v938_v18 = vpop.f32.mrb[12].mxu0 }
 0x108   : > { %1742 = vst [vmem:[%s2439_s29 + $0x138] sm:$0xff] %v1679_v31  ;;  %v939_v19 = vadd.f32 %v938_v18, %v2432_v11  ;;  %v1682_v20 = vmax.f32 %v870_v15, 0.0  ;;  %v940_v21 = vpop.f32.mrb[13].mxu0  ;;  %v1015_v22 = vpop.f32.mrb[12].mxu1 }
 0x109   : > { %1743 = vst [vmem:[%s2439_s29 + $0x140] sm:$0xff] %v1680_v16  ;;  %1744 = vst [vmem:[%s2439_s29 + $0x148] sm:$0xff] %v1681_v17  ;;  %v941_v23 = vadd.f32 %v940_v21, %v2432_v11  ;;  %v1016_v24 = vadd.f32 %v1015_v22, %v2432_v11  ;;  %v1017_v25 = vpop.f32.mrb[13].mxu1 }
 0x10a   : > { %v1652_v26 = vmax.f32 %v939_v19, 0.0  ;;  %1745 = vst [vmem:[%s2439_s29 + $0x150] sm:$0xff] %v1682_v20  ;;  %v1018_v27 = vadd.f32 %v1017_v25, %v2432_v11 }
 0x10b   : > { %v1653_v28 = vmax.f32 %v941_v23, 0.0  ;;  %v944_v29 = vpop.f32.mrb[14].mxu0  ;;  %v1654_v30 = vmax.f32 %v1016_v24, 0.0 }
 0x10c   : > { %1714 = vst [vmem:[%s2439_s29 + $0x60] sm:$0xff] %v1652_v26  ;;  %v945_v32 = vadd.f32 %v944_v29, %v2443_v54  ;;  %v946_v33 = vpop.f32.mrb[15].mxu0  ;;  %v1655_v34 = vmax.f32 %v1018_v27, 0.0  ;;  %v1021_v35 = vpop.f32.mrb[14].mxu1 }
 0x10d   : > { %1715 = vst [vmem:[%s2439_s29 + $0x68] sm:$0xff] %v1653_v28  ;;  %1716 = vst [vmem:[%s2439_s29 + $0x70] sm:$0xff] %v1654_v30  ;;  %v947_v36 = vadd.f32 %v946_v33, %v2443_v54  ;;  %v1022_v37 = vadd.f32 %v1021_v35, %v2443_v54  ;;  %v1023_v38 = vpop.f32.mrb[15].mxu1 }
 0x10e   : > { %v1683_v39 = vmax.f32 %v945_v32, 0.0  ;;  %1717 = vst [vmem:[%s2439_s29 + $0x78] sm:$0xff] %v1655_v34  ;;  %v1024_v40 = vadd.f32 %v1023_v38, %v2443_v54 }
 0x10f   : > { %v1684_v41 = vmax.f32 %v947_v36, 0.0  ;;  %v1685_v42 = vmax.f32 %v1022_v37, 0.0  ;;  %v1092_v43 = vpop.f32.mrb[16].mxu0 }
 0x110   : > { %1746 = vst [vmem:[%s2439_s29 + $0x158] sm:$0xff] %v1683_v39  ;;  %v1093_v44 = vadd.f32 %v1092_v43, %v2432_v11  ;;  %v1686_v45 = vmax.f32 %v1024_v40, 0.0  ;;  %v1094_v46 = vpop.f32.mrb[17].mxu0  ;;  %v1169_v47 = vpop.f32.mrb[16].mxu1 }
 0x111   : > { %1747 = vst [vmem:[%s2439_s29 + $0x160] sm:$0xff] %v1684_v41  ;;  %1748 = vst [vmem:[%s2439_s29 + $0x168] sm:$0xff] %v1685_v42  ;;  %v1095_v48 = vadd.f32 %v1094_v46, %v2432_v11  ;;  %v1170_v49 = vadd.f32 %v1169_v47, %v2432_v11  ;;  %v1171_v50 = vpop.f32.mrb[17].mxu1 }
 0x112   : > { %v1656_v51 = vmax.f32 %v1093_v44, 0.0  ;;  %1749 = vst [vmem:[%s2439_s29 + $0x170] sm:$0xff] %v1686_v45  ;;  %v1172_v52 = vadd.f32 %v1171_v50, %v2432_v11 }
 0x113   : > { %v1657_v53 = vmax.f32 %v1095_v48, 0.0  ;;  %v1098_v55 = vpop.f32.mrb[18].mxu0  ;;  %v1658_v56 = vmax.f32 %v1170_v49, 0.0 }
 0x114   : > { %1718 = vst [vmem:[%s2439_s29 + $0x80] sm:$0xff] %v1656_v51  ;;  %v1099_v57 = vadd.f32 %v1098_v55, %v2443_v54  ;;  %v1100_v58 = vpop.f32.mrb[19].mxu0  ;;  %v1659_v59 = vmax.f32 %v1172_v52, 0.0  ;;  %v1175_v60 = vpop.f32.mrb[18].mxu1 }
 0x115   : > { %1719 = vst [vmem:[%s2439_s29 + $0x88] sm:$0xff] %v1657_v53  ;;  %1720 = vst [vmem:[%s2439_s29 + $0x90] sm:$0xff] %v1658_v56  ;;  %v1101_v61 = vadd.f32 %v1100_v58, %v2443_v54  ;;  %v1176_v62 = vadd.f32 %v1175_v60, %v2443_v54  ;;  %v1177_v63 = vpop.f32.mrb[19].mxu1 }
 0x116   : > { %v1687_v1 = vmax.f32 %v1099_v57, 0.0  ;;  %1721 = vst [vmem:[%s2439_s29 + $0x98] sm:$0xff] %v1659_v59  ;;  %v1178_v2 = vadd.f32 %v1177_v63, %v2443_v54 }
 0x117   : > { %v1688_v3 = vmax.f32 %v1101_v61, 0.0  ;;  %v1689_v5 = vmax.f32 %v1176_v62, 0.0  ;;  %v1246_v6 = vpop.f32.mrb[20].mxu0 }
 0x118   : > { %1750 = vst [vmem:[%s2439_s29 + $0x178] sm:$0xff] %v1687_v1  ;;  %v1247_v7 = vadd.f32 %v1246_v6, %v2432_v11  ;;  %v1690_v8 = vmax.f32 %v1178_v2, 0.0  ;;  %v1248_v9 = vpop.f32.mrb[21].mxu0  ;;  %v1323_v10 = vpop.f32.mrb[20].mxu1 }
 0x119   : > { %1751 = vst [vmem:[%s2439_s29 + $0x180] sm:$0xff] %v1688_v3  ;;  %1752 = vst [vmem:[%s2439_s29 + $0x188] sm:$0xff] %v1689_v5  ;;  %v1249_v4 = vadd.f32 %v1248_v9, %v2432_v11  ;;  %v1324_v12 = vadd.f32 %v1323_v10, %v2432_v11  ;;  %v1325_v13 = vpop.f32.mrb[21].mxu1 }
 0x11a   : > { %v1660_v14 = vmax.f32 %v1247_v7, 0.0  ;;  %1753 = vst [vmem:[%s2439_s29 + $0x190] sm:$0xff] %v1690_v8  ;;  %v1326_v0 = vadd.f32 %v1325_v13, %v2432_v11 }
 0x11b   : > { %v1661_v31 = vmax.f32 %v1249_v4, 0.0  ;;  %v1252_v15 = vpop.f32.mrb[22].mxu0  ;;  %v1662_v16 = vmax.f32 %v1324_v12, 0.0 }
 0x11c   : > { %1722 = vst [vmem:[%s2439_s29 + $0xa0] sm:$0xff] %v1660_v14  ;;  %v1253_v17 = vadd.f32 %v1252_v15, %v2443_v54  ;;  %v1254_v18 = vpop.f32.mrb[23].mxu0  ;;  %v1663_v19 = vmax.f32 %v1326_v0, 0.0  ;;  %v1329_v20 = vpop.f32.mrb[22].mxu1 }
 0x11d   : > { %1723 = vst [vmem:[%s2439_s29 + $0xa8] sm:$0xff] %v1661_v31  ;;  %1724 = vst [vmem:[%s2439_s29 + $0xb0] sm:$0xff] %v1662_v16  ;;  %v1255_v21 = vadd.f32 %v1254_v18, %v2443_v54  ;;  %v1330_v22 = vadd.f32 %v1329_v20, %v2443_v54  ;;  %v1331_v23 = vpop.f32.mrb[23].mxu1 }
 0x11e   : > { %v1691_v24 = vmax.f32 %v1253_v17, 0.0  ;;  %1725 = vst [vmem:[%s2439_s29 + $0xb8] sm:$0xff] %v1663_v19  ;;  %v1332_v25 = vadd.f32 %v1331_v23, %v2443_v54 }
 0x11f   : > { %v1692_v26 = vmax.f32 %v1255_v21, 0.0  ;;  %v1693_v27 = vmax.f32 %v1330_v22, 0.0  ;;  %v1400_v28 = vpop.f32.mrb[24].mxu0 }
 0x120   : > { %1754 = vst [vmem:[%s2439_s29 + $0x198] sm:$0xff] %v1691_v24  ;;  %v1401_v29 = vadd.f32 %v1400_v28, %v2432_v11  ;;  %v1694_v30 = vmax.f32 %v1332_v25, 0.0  ;;  %v1402_v32 = vpop.f32.mrb[25].mxu0  ;;  %v1477_v33 = vpop.f32.mrb[24].mxu1 }
 0x121   : > { %1755 = vst [vmem:[%s2439_s29 + $0x1a0] sm:$0xff] %v1692_v26  ;;  %1756 = vst [vmem:[%s2439_s29 + $0x1a8] sm:$0xff] %v1693_v27  ;;  %v1403_v34 = vadd.f32 %v1402_v32, %v2432_v11  ;;  %v1478_v35 = vadd.f32 %v1477_v33, %v2432_v11  ;;  %v1479_v36 = vpop.f32.mrb[25].mxu1 }
 0x122   : > { %v1664_v37 = vmax.f32 %v1401_v29, 0.0  ;;  %1757 = vst [vmem:[%s2439_s29 + $0x1b0] sm:$0xff] %v1694_v30  ;;  %v1480_v38 = vadd.f32 %v1479_v36, %v2432_v11 }
 0x123   : > { %v1665_v39 = vmax.f32 %v1403_v34, 0.0  ;;  %v1406_v40 = vpop.f32.mrb[26].mxu0  ;;  %v1666_v41 = vmax.f32 %v1478_v35, 0.0 }
 0x124   : > { %1726 = vst [vmem:[%s2439_s29 + $0xc0] sm:$0xff] %v1664_v37  ;;  %v1407_v42 = vadd.f32 %v1406_v40, %v2443_v54  ;;  %v1408_v43 = vpop.f32.mrb[27].mxu0  ;;  %v1667_v44 = vmax.f32 %v1480_v38, 0.0  ;;  %v1483_v45 = vpop.f32.mrb[26].mxu1 }
 0x125   : > { %1727 = vst [vmem:[%s2439_s29 + $0xc8] sm:$0xff] %v1665_v39  ;;  %1728 = vst [vmem:[%s2439_s29 + $0xd0] sm:$0xff] %v1666_v41  ;;  %v1409_v46 = vadd.f32 %v1408_v43, %v2443_v54  ;;  %v1484_v47 = vadd.f32 %v1483_v45, %v2443_v54  ;;  %v1485_v48 = vpop.f32.mrb[27].mxu1 }
 0x126   : > { %v1695_v49 = vmax.f32 %v1407_v42, 0.0  ;;  %1729 = vst [vmem:[%s2439_s29 + $0xd8] sm:$0xff] %v1667_v44  ;;  %v1486_v50 = vadd.f32 %v1485_v48, %v2443_v54 }
 0x127   : > { %v1696_v51 = vmax.f32 %v1409_v46, 0.0  ;;  %v1697_v52 = vmax.f32 %v1484_v47, 0.0  ;;  %v1554_v53 = vpop.f32.mrb[28].mxu0 }
 0x128   : > { %1758 = vst [vmem:[%s2439_s29 + $0x1b8] sm:$0xff] %v1695_v49  ;;  %v1698_v55 = vmax.f32 %v1486_v50, 0.0  ;;  %v1555_v56 = vadd.f32 %v1554_v53, %v2432_v11  ;;  %v1556_v57 = vpop.f32.mrb[29].mxu0  ;;  %v1908_v58 = vpop.f32.mrb[28].mxu1 }
 0x129   : > { %1759 = vst [vmem:[%s2439_s29 + $0x1c0] sm:$0xff] %v1696_v51  ;;  %1760 = vst [vmem:[%s2439_s29 + $0x1c8] sm:$0xff] %v1697_v52  ;;  %v1557_v59 = vadd.f32 %v1556_v57, %v2432_v11  ;;  %v1637_v60 = vadd.f32 %v1908_v58, %v2443_v54  ;;  %v1631_v61 = vpop.f32.mrb[29].mxu1 }
 0x12a   : > { %1761 = vst [vmem:[%s2439_s29 + $0x1d0] sm:$0xff] %v1698_v55  ;;  %v1668_v62 = vmax.f32 %v1555_v56, 0.0  ;;  %v1632_v63 = vadd.f32 %v1631_v61, %v2432_v11 }
 0x12b   : > { %v1669_v1 = vmax.f32 %v1557_v59, 0.0  ;;  %v1701_v2 = vmax.f32 %v1637_v60, 0.0  ;;  %v1560_v3 = vpop.f32.mrb[30].mxu0 }
 0x12c   : > { %1730 = vst [vmem:[%s2439_s29 + $0xe0] sm:$0xff] %v1668_v62  ;;  %v1670_v5 = vmax.f32 %v1632_v63, 0.0  ;;  %v1561_v6 = vadd.f32 %v1560_v3, %v2443_v54  ;;  %v1562_v7 = vpop.f32.mrb[31].mxu0 }
 0x12d   : > { %1731 = vst [vmem:[%s2439_s29 + $0xe8] sm:$0xff] %v1669_v1  ;;  %1764 = vst.msk [vmem:[%s2439_s29 + $0x1e8] sm:$0xff] %vm1732_vm4, %v1701_v2  ;;  %v1563_v8 = vadd.f32 %v1562_v7, %v2443_v54 }
 0x12e   : > { %1733 = vst.msk [vmem:[%s2439_s29 + $0xf0] sm:$0xff] %vm1732_vm4, %v1670_v5  ;;  %v1699_v9 = vmax.f32 %v1561_v6, 0.0 }
 0x12f   : > { %v1700_v10 = vmax.f32 %v1563_v8, 0.0 }
 0x130   : > { %1762 = vst [vmem:[%s2439_s29 + $0x1d8] sm:$0xff] %v1699_v9 }
 0x131   : > { %1763 = vst [vmem:[%s2439_s29 + $0x1e0] sm:$0xff] %v1700_v10 }
 0x132 PF: > { %s13_s12 = sadd.s32 1, %s2089_s12  }
 0x133   : > { %p10_p4 = scmp.ge.s32.totalorder %s13_s12, 4  }
 0x135   :  { %12 = sbr.rel (!%p10_p4) target bundleno = 1 (0x1), region = 62 }

// kernel: decnn_forward.6
= control target key start
LH: loop header
LB: loop body
LE: loop exit
PB: predicated region body
PF: predicated region fallthrough
CT: control target
= control target key end

     0   :  { %s1026_s12 = smov 0   ;;  %s1282_s0 = inlined_call_operand.vmem [shape: f32[8,432], index: 0, kind: input, shape index: {}]   ;;  %s1283_s1 = inlined_call_operand.vmem [shape: f32[8,1], index: 1, kind: input, shape index: {}]   ;;  %s1284_s2 = inlined_call_operand.vmem [shape: f32[2,432,468], index: 2, kind: input, shape index: {}]   ;;  %s1285_s3 = inlined_call_operand.vmem [shape: f32[2,8,468], index: 3, kind: output, shape index: {}]  }
   0x1 LB: > { %s749_s13 = sadd.s32 4294967295, %s1003_s12   ;;  %p753_p0 = scmp.ge.s32.totalorder %s1003_s12, 1  ;;  %s1003_s12 = sphi %s1026_s12, %s13_s12  }
   0x2   : > { %p137_p1 = scmp.lt.s32.totalorder %s1003_s12, 3 }
   0x4   : > { %p138_p2 = pnand %p753_p0, %p137_p1 }
   0x5   : > { %p161_p3 = scmp.lt.s32.totalorder (!%p138_p2), %s749_s13, 1  ;;  %v172_v0 = vld [vmem:[%s1282_s0 + $0x8] sm:$0xff] (!%p138_p2)  ;;  %v391_v1 = vld [vmem:[%s1283_s1] sm:$0xff] (!%p138_p2)  ;;  %v1005_v2 = vmov (!%p138_p2), 0   ;;  %vm397_vm0 = vcmask (!%p138_p2), 392192   ;;  %vm692_vm1 = vcmask (!%p138_p2), 687104  }
   0x6   : > { %141 = sbr.rel (%p138_p2) target bundleno = 348 (0x15c), region = 32  ;;  %465 = vmatprep.mubr.f32.mxu0 (!%p138_p2), %v172_v0  ;;  %607 = vmatprep.mubr.f32.mxu1 (!%p138_p2), %v172_v0 }
   0x7   : > { %996 = vset.pattern.permute.xlu0 (!%p138_p2), %v1005_v2 }
   0x8   : > { %394 = vperm.xlu0 (!%p138_p2), %996, %v391_v1  }
   0xd   : > { %s1287_s13 = smov (!%p161_p3, %s749_s13), 1 }
   0xe   : > { %s986_s18 = smul.u32 1728, %s1287_s13  ;;  %s761_s28 = sshll.u32 %s1287_s13, 5 }
   0xf   : > { %s170_s4 = scalar_lea.vmem %s1285_s3, %s761_s28 }
  0x10   : > { %s1046_s21 = scalar_lea.vmem %s1284_s2, %s986_s18 }
  0x11   : > { %v176_v3 = vld [vmem:[%s1046_s21 + $0x8] sm:$0xff]  ;;  %v178_v5 = vld [vmem:[%s1046_s21 + $0x18] sm:$0xff]  ;;  %v175_v8 = vld [vmem:[%s1046_s21] sm:$0xff] }
  0x12   : > { %v180_v4 = vld [vmem:[%s1046_s21 + $0x28] sm:$0xff]  ;;  %v182_v7 = vld [vmem:[%s1046_s21 + $0x38] sm:$0xff]  ;;  %v179_v9 = vld [vmem:[%s1046_s21 + $0x20] sm:$0xff] }
  0x13   : > { %v762_v6 = vpack.c.bf16 %v180_v4, %v176_v3  ;;  %v870_v10 = vpack.c.bf16 %v182_v7, %v178_v5  ;;  %v764_v11 = vpack.c.bf16 %v179_v9, %v175_v8  ;;  %v177_v12 = vld [vmem:[%s1046_s21 + $0x10] sm:$0xff]  ;;  %v184_v14 = vld [vmem:[%s1046_s21 + $0x48] sm:$0xff]  ;;  %v186_v17 = vld [vmem:[%s1046_s21 + $0x58] sm:$0xff] }
  0x14   : > { %v181_v13 = vld [vmem:[%s1046_s21 + $0x30] sm:$0xff]  ;;  %v188_v16 = vld [vmem:[%s1046_s21 + $0x68] sm:$0xff]  ;;  %v190_v18 = vld [vmem:[%s1046_s21 + $0x78] sm:$0xff] }
  0x15   : > { %763 = vmatprep.subr.bf16.mxu0 %v762_v6  ;;  %v872_v15 = vpack.c.bf16 %v181_v13, %v177_v12  ;;  %871 = vmatprep.subr.bf16.mxu1 %v870_v10  ;;  %v766_v19 = vpack.c.bf16 %v188_v16, %v184_v14  ;;  %v874_v20 = vpack.c.bf16 %v190_v18, %v186_v17  ;;  %v183_v21 = vld [vmem:[%s1046_s21 + $0x40] sm:$0xff]  ;;  %v185_v23 = vld [vmem:[%s1046_s21 + $0x50] sm:$0xff]  ;;  %v192_v26 = vld [vmem:[%s1046_s21 + $0x88] sm:$0xff] }
  0x16   : > { %765 = vmatpush1.bf16.msra.mxu0 %v764_v11  ;;  %v187_v22 = vld [vmem:[%s1046_s21 + $0x60] sm:$0xff]  ;;  %v189_v25 = vld [vmem:[%s1046_s21 + $0x70] sm:$0xff]  ;;  %v196_v27 = vld [vmem:[%s1046_s21 + $0xa8] sm:$0xff] }
  0x17   : > { %873 = vmatpush1.bf16.msra.mxu1 %v872_v15  ;;  %v768_v24 = vpack.c.bf16 %v187_v22, %v183_v21  ;;  %767 = vmatprep.subr.bf16.mxu0 %v766_v19  ;;  %v876_v28 = vpack.c.bf16 %v189_v25, %v185_v23  ;;  %v770_v29 = vpack.c.bf16 %v196_v27, %v192_v26  ;;  %v194_v30 = vld [vmem:[%s1046_s21 + $0x98] sm:$0xff]  ;;  %v191_v32 = vld [vmem:[%s1046_s21 + $0x80] sm:$0xff]  ;;  %v193_v35 = vld [vmem:[%s1046_s21 + $0x90] sm:$0xff] }
  0x18   : > { %875 = vmatprep.subr.bf16.mxu1 %v874_v20  ;;  %v198_v31 = vld [vmem:[%s1046_s21 + $0xb8] sm:$0xff]  ;;  %v195_v34 = vld [vmem:[%s1046_s21 + $0xa0] sm:$0xff]  ;;  %v197_v36 = vld [vmem:[%s1046_s21 + $0xb0] sm:$0xff] }
  0x19   : > { %v878_v33 = vpack.c.bf16 %v198_v31, %v194_v30  ;;  %v772_v37 = vpack.c.bf16 %v195_v34, %v191_v32  ;;  %v200_v38 = vld [vmem:[%s1046_s21 + $0xc8] sm:$0xff]  ;;  %v202_v40 = vld [vmem:[%s1046_s21 + $0xd8] sm:$0xff]  ;;  %v880_v41 = vpack.c.bf16 %v197_v36, %v193_v35  ;;  %v199_v44 = vld [vmem:[%s1046_s21 + $0xc0] sm:$0xff] }
  0x1a   : > { %769 = vmatpush1.bf16.msra.mxu0 %v768_v24  ;;  %v204_v39 = vld [vmem:[%s1046_s21 + $0xe8] sm:$0xff]  ;;  %v206_v43 = vld [vmem:[%s1046_s21 + $0xf8] sm:$0xff]  ;;  %v203_v45 = vld [vmem:[%s1046_s21 + $0xe0] sm:$0xff] }
  0x1b   : > { %877 = vmatpush1.bf16.msra.mxu1 %v876_v28  ;;  %771 = vmatprep.subr.bf16.mxu0 %v770_v29  ;;  %v774_v42 = vpack.c.bf16 %v204_v39, %v200_v38  ;;  %v882_v46 = vpack.c.bf16 %v206_v43, %v202_v40  ;;  %v201_v47 = vld [vmem:[%s1046_s21 + $0xd0] sm:$0xff]  ;;  %v208_v49 = vld [vmem:[%s1046_s21 + $0x108] sm:$0xff]  ;;  %v210_v51 = vld [vmem:[%s1046_s21 + $0x118] sm:$0xff]  ;;  %v776_v53 = vpack.c.bf16 %v203_v45, %v199_v44 }
  0x1c   : > { %879 = vmatprep.subr.bf16.mxu1 %v878_v33  ;;  %v205_v48 = vld [vmem:[%s1046_s21 + $0xf0] sm:$0xff]  ;;  %v212_v50 = vld [vmem:[%s1046_s21 + $0x128] sm:$0xff]  ;;  %v214_v52 = vld [vmem:[%s1046_s21 + $0x138] sm:$0xff] }
  0x1d   : > { %v884_v54 = vpack.c.bf16 %v205_v48, %v201_v47  ;;  %v778_v55 = vpack.c.bf16 %v212_v50, %v208_v49  ;;  %v207_v56 = vld [vmem:[%s1046_s21 + $0x100] sm:$0xff]  ;;  %v209_v58 = vld [vmem:[%s1046_s21 + $0x110] sm:$0xff]  ;;  %v886_v59 = vpack.c.bf16 %v214_v52, %v210_v51  ;;  %v216_v61 = vld [vmem:[%s1046_s21 + $0x148] sm:$0xff] }
  0x1e   : > { %773 = vmatpush1.bf16.msra.mxu0 %v772_v37  ;;  %v211_v57 = vld [vmem:[%s1046_s21 + $0x120] sm:$0xff]  ;;  %v213_v60 = vld [vmem:[%s1046_s21 + $0x130] sm:$0xff]  ;;  %v220_v62 = vld [vmem:[%s1046_s21 + $0x168] sm:$0xff] }
  0x1f   : > { %881 = vmatpush1.bf16.msra.mxu1 %v880_v41  ;;  %775 = vmatprep.subr.bf16.mxu0 %v774_v42  ;;  %v218_v63 = vld [vmem:[%s1046_s21 + $0x158] sm:$0xff]  ;;  %v780_v1 = vpack.c.bf16 %v211_v57, %v207_v56  ;;  %v888_v2 = vpack.c.bf16 %v213_v60, %v209_v58  ;;  %v782_v3 = vpack.c.bf16 %v220_v62, %v216_v61  ;;  %v215_v4 = vld [vmem:[%s1046_s21 + $0x140] sm:$0xff]  ;;  %v217_v6 = vld [vmem:[%s1046_s21 + $0x150] sm:$0xff] }
  0x20   : > { %883 = vmatprep.subr.bf16.mxu1 %v882_v46  ;;  %v222_v0 = vld [vmem:[%s1046_s21 + $0x178] sm:$0xff]  ;;  %v219_v5 = vld [vmem:[%s1046_s21 + $0x160] sm:$0xff]  ;;  %v221_v8 = vld [vmem:[%s1046_s21 + $0x170] sm:$0xff] }
  0x21   : > { %v890_v7 = vpack.c.bf16 %v222_v0, %v218_v63  ;;  %v224_v9 = vld [vmem:[%s1046_s21 + $0x188] sm:$0xff]  ;;  %v226_v11 = vld [vmem:[%s1046_s21 + $0x198] sm:$0xff]  ;;  %v784_v13 = vpack.c.bf16 %v219_v5, %v215_v4  ;;  %v892_v14 = vpack.c.bf16 %v221_v8, %v217_v6  ;;  %v223_v16 = vld [vmem:[%s1046_s21 + $0x180] sm:$0xff] }
  0x22   : > { %777 = vmatpush1.bf16.msra.mxu0 %v776_v53  ;;  %v228_v10 = vld [vmem:[%s1046_s21 + $0x1a8] sm:$0xff]  ;;  %v230_v12 = vld [vmem:[%s1046_s21 + $0x1b8] sm:$0xff]  ;;  %v227_v17 = vld [vmem:[%s1046_s21 + $0x1a0] sm:$0xff] }
  0x23   : > { %885 = vmatpush1.bf16.msra.mxu1 %v884_v54  ;;  %779 = vmatprep.subr.bf16.mxu0 %v778_v55  ;;  %v786_v15 = vpack.c.bf16 %v228_v10, %v224_v9  ;;  %v225_v18 = vld [vmem:[%s1046_s21 + $0x190] sm:$0xff]  ;;  %v894_v19 = vpack.c.bf16 %v230_v12, %v226_v11  ;;  %v232_v21 = vld [vmem:[%s1046_s21 + $0x1c8] sm:$0xff]  ;;  %v234_v23 = vld [vmem:[%s1046_s21 + $0x1d8] sm:$0xff]  ;;  %v788_v25 = vpack.c.bf16 %v227_v17, %v223_v16 }
  0x24   : > { %887 = vmatprep.subr.bf16.mxu1 %v886_v59  ;;  %v229_v20 = vld [vmem:[%s1046_s21 + $0x1b0] sm:$0xff]  ;;  %v236_v22 = vld [vmem:[%s1046_s21 + $0x1e8] sm:$0xff]  ;;  %v238_v24 = vld [vmem:[%s1046_s21 + $0x1f8] sm:$0xff] }
  0x25   : > { %v896_v26 = vpack.c.bf16 %v229_v20, %v225_v18  ;;  %v790_v27 = vpack.c.bf16 %v236_v22, %v232_v21  ;;  %v231_v28 = vld [vmem:[%s1046_s21 + $0x1c0] sm:$0xff]  ;;  %v233_v30 = vld [vmem:[%s1046_s21 + $0x1d0] sm:$0xff]  ;;  %v898_v31 = vpack.c.bf16 %v238_v24, %v234_v23  ;;  %v240_v33 = vld [vmem:[%s1046_s21 + $0x208] sm:$0xff] }
  0x26   : > { %781 = vmatpush1.bf16.msra.mxu0 %v780_v1  ;;  %v235_v29 = vld [vmem:[%s1046_s21 + $0x1e0] sm:$0xff]  ;;  %v237_v32 = vld [vmem:[%s1046_s21 + $0x1f0] sm:$0xff]  ;;  %v244_v34 = vld [vmem:[%s1046_s21 + $0x228] sm:$0xff] }
  0x27   : > { %889 = vmatpush1.bf16.msra.mxu1 %v888_v2  ;;  %783 = vmatprep.subr.bf16.mxu0 %v782_v3  ;;  %v242_v35 = vld [vmem:[%s1046_s21 + $0x218] sm:$0xff]  ;;  %v792_v37 = vpack.c.bf16 %v235_v29, %v231_v28  ;;  %v900_v38 = vpack.c.bf16 %v237_v32, %v233_v30  ;;  %v794_v39 = vpack.c.bf16 %v244_v34, %v240_v33  ;;  %v239_v40 = vld [vmem:[%s1046_s21 + $0x200] sm:$0xff]  ;;  %v241_v42 = vld [vmem:[%s1046_s21 + $0x210] sm:$0xff] }
  0x28   : > { %891 = vmatprep.subr.bf16.mxu1 %v890_v7  ;;  %v246_v36 = vld [vmem:[%s1046_s21 + $0x238] sm:$0xff]  ;;  %v243_v41 = vld [vmem:[%s1046_s21 + $0x220] sm:$0xff]  ;;  %v245_v44 = vld [vmem:[%s1046_s21 + $0x230] sm:$0xff] }
  0x29   : > { %v902_v43 = vpack.c.bf16 %v246_v36, %v242_v35  ;;  %v248_v45 = vld [vmem:[%s1046_s21 + $0x248] sm:$0xff]  ;;  %v250_v47 = vld [vmem:[%s1046_s21 + $0x258] sm:$0xff]  ;;  %v796_v49 = vpack.c.bf16 %v243_v41, %v239_v40  ;;  %v904_v50 = vpack.c.bf16 %v245_v44, %v241_v42  ;;  %v247_v52 = vld [vmem:[%s1046_s21 + $0x240] sm:$0xff] }
  0x2a   : > { %785 = vmatpush1.bf16.msra.mxu0 %v784_v13  ;;  %v252_v46 = vld [vmem:[%s1046_s21 + $0x268] sm:$0xff]  ;;  %v254_v48 = vld [vmem:[%s1046_s21 + $0x278] sm:$0xff]  ;;  %v251_v53 = vld [vmem:[%s1046_s21 + $0x260] sm:$0xff] }
  0x2b   : > { %893 = vmatpush1.bf16.msra.mxu1 %v892_v14  ;;  %787 = vmatprep.subr.bf16.mxu0 %v786_v15  ;;  %v798_v51 = vpack.c.bf16 %v252_v46, %v248_v45  ;;  %v249_v54 = vld [vmem:[%s1046_s21 + $0x250] sm:$0xff]  ;;  %v906_v55 = vpack.c.bf16 %v254_v48, %v250_v47  ;;  %v256_v57 = vld [vmem:[%s1046_s21 + $0x288] sm:$0xff]  ;;  %v258_v59 = vld [vmem:[%s1046_s21 + $0x298] sm:$0xff]  ;;  %v800_v61 = vpack.c.bf16 %v251_v53, %v247_v52 }
  0x2c   : > { %895 = vmatprep.subr.bf16.mxu1 %v894_v19  ;;  %v253_v56 = vld [vmem:[%s1046_s21 + $0x270] sm:$0xff]  ;;  %v260_v58 = vld [vmem:[%s1046_s21 + $0x2a8] sm:$0xff]  ;;  %v262_v60 = vld [vmem:[%s1046_s21 + $0x2b8] sm:$0xff] }
  0x2d   : > { %v908_v62 = vpack.c.bf16 %v253_v56, %v249_v54  ;;  %v802_v63 = vpack.c.bf16 %v260_v58, %v256_v57  ;;  %v255_v0 = vld [vmem:[%s1046_s21 + $0x280] sm:$0xff]  ;;  %v257_v2 = vld [vmem:[%s1046_s21 + $0x290] sm:$0xff]  ;;  %v910_v3 = vpack.c.bf16 %v262_v60, %v258_v59  ;;  %v264_v5 = vld [vmem:[%s1046_s21 + $0x2c8] sm:$0xff] }
  0x2e   : > { %789 = vmatpush1.bf16.msra.mxu0 %v788_v25  ;;  %v259_v1 = vld [vmem:[%s1046_s21 + $0x2a0] sm:$0xff]  ;;  %v261_v4 = vld [vmem:[%s1046_s21 + $0x2b0] sm:$0xff]  ;;  %v268_v6 = vld [vmem:[%s1046_s21 + $0x2e8] sm:$0xff] }
  0x2f   : > { %897 = vmatpush1.bf16.msra.mxu1 %v896_v26  ;;  %791 = vmatprep.subr.bf16.mxu0 %v790_v27  ;;  %v266_v7 = vld [vmem:[%s1046_s21 + $0x2d8] sm:$0xff]  ;;  %v804_v9 = vpack.c.bf16 %v259_v1, %v255_v0  ;;  %v912_v10 = vpack.c.bf16 %v261_v4, %v257_v2  ;;  %v806_v11 = vpack.c.bf16 %v268_v6, %v264_v5  ;;  %v263_v12 = vld [vmem:[%s1046_s21 + $0x2c0] sm:$0xff]  ;;  %v265_v14 = vld [vmem:[%s1046_s21 + $0x2d0] sm:$0xff] }
  0x30   : > { %899 = vmatprep.subr.bf16.mxu1 %v898_v31  ;;  %v270_v8 = vld [vmem:[%s1046_s21 + $0x2f8] sm:$0xff]  ;;  %v267_v13 = vld [vmem:[%s1046_s21 + $0x2e0] sm:$0xff]  ;;  %v269_v16 = vld [vmem:[%s1046_s21 + $0x2f0] sm:$0xff] }
  0x31   : > { %v914_v15 = vpack.c.bf16 %v270_v8, %v266_v7  ;;  %v272_v17 = vld [vmem:[%s1046_s21 + $0x308] sm:$0xff]  ;;  %v274_v19 = vld [vmem:[%s1046_s21 + $0x318] sm:$0xff]  ;;  %v808_v21 = vpack.c.bf16 %v267_v13, %v263_v12  ;;  %v916_v22 = vpack.c.bf16 %v269_v16, %v265_v14  ;;  %v271_v24 = vld [vmem:[%s1046_s21 + $0x300] sm:$0xff] }
  0x32   : > { %793 = vmatpush1.bf16.msra.mxu0 %v792_v37  ;;  %v276_v18 = vld [vmem:[%s1046_s21 + $0x328] sm:$0xff]  ;;  %v278_v20 = vld [vmem:[%s1046_s21 + $0x338] sm:$0xff]  ;;  %v275_v25 = vld [vmem:[%s1046_s21 + $0x320] sm:$0xff] }
  0x33   : > { %901 = vmatpush1.bf16.msra.mxu1 %v900_v38  ;;  %795 = vmatprep.subr.bf16.mxu0 %v794_v39  ;;  %v810_v23 = vpack.c.bf16 %v276_v18, %v272_v17  ;;  %v273_v26 = vld [vmem:[%s1046_s21 + $0x310] sm:$0xff]  ;;  %v918_v27 = vpack.c.bf16 %v278_v20, %v274_v19  ;;  %v280_v29 = vld [vmem:[%s1046_s21 + $0x348] sm:$0xff]  ;;  %v282_v31 = vld [vmem:[%s1046_s21 + $0x358] sm:$0xff]  ;;  %v812_v33 = vpack.c.bf16 %v275_v25, %v271_v24 }
  0x34   : > { %903 = vmatprep.subr.bf16.mxu1 %v902_v43  ;;  %v277_v28 = vld [vmem:[%s1046_s21 + $0x330] sm:$0xff]  ;;  %v284_v30 = vld [vmem:[%s1046_s21 + $0x368] sm:$0xff]  ;;  %v286_v32 = vld [vmem:[%s1046_s21 + $0x378] sm:$0xff] }
  0x35   : > { %v920_v34 = vpack.c.bf16 %v277_v28, %v273_v26  ;;  %v814_v35 = vpack.c.bf16 %v284_v30, %v280_v29  ;;  %v279_v36 = vld [vmem:[%s1046_s21 + $0x340] sm:$0xff]  ;;  %v281_v38 = vld [vmem:[%s1046_s21 + $0x350] sm:$0xff]  ;;  %v922_v39 = vpack.c.bf16 %v286_v32, %v282_v31  ;;  %v288_v41 = vld [vmem:[%s1046_s21 + $0x388] sm:$0xff] }
  0x36   : > { %797 = vmatpush1.bf16.msra.mxu0 %v796_v49  ;;  %v283_v37 = vld [vmem:[%s1046_s21 + $0x360] sm:$0xff]  ;;  %v285_v40 = vld [vmem:[%s1046_s21 + $0x370] sm:$0xff]  ;;  %v292_v42 = vld [vmem:[%s1046_s21 + $0x3a8] sm:$0xff] }
  0x37   : > { %905 = vmatpush1.bf16.msra.mxu1 %v904_v50  ;;  %799 = vmatprep.subr.bf16.mxu0 %v798_v51  ;;  %v290_v43 = vld [vmem:[%s1046_s21 + $0x398] sm:$0xff]  ;;  %v816_v45 = vpack.c.bf16 %v283_v37, %v279_v36  ;;  %v924_v46 = vpack.c.bf16 %v285_v40, %v281_v38  ;;  %v818_v47 = vpack.c.bf16 %v292_v42, %v288_v41  ;;  %v287_v48 = vld [vmem:[%s1046_s21 + $0x380] sm:$0xff]  ;;  %v289_v50 = vld [vmem:[%s1046_s21 + $0x390] sm:$0xff] }
  0x38   : > { %907 = vmatprep.subr.bf16.mxu1 %v906_v55  ;;  %v294_v44 = vld [vmem:[%s1046_s21 + $0x3b8] sm:$0xff]  ;;  %v291_v49 = vld [vmem:[%s1046_s21 + $0x3a0] sm:$0xff]  ;;  %v293_v52 = vld [vmem:[%s1046_s21 + $0x3b0] sm:$0xff] }
  0x39   : > { %v926_v51 = vpack.c.bf16 %v294_v44, %v290_v43  ;;  %v296_v53 = vld [vmem:[%s1046_s21 + $0x3c8] sm:$0xff]  ;;  %v298_v55 = vld [vmem:[%s1046_s21 + $0x3d8] sm:$0xff]  ;;  %v820_v57 = vpack.c.bf16 %v291_v49, %v287_v48  ;;  %v928_v58 = vpack.c.bf16 %v293_v52, %v289_v50  ;;  %v295_v60 = vld [vmem:[%s1046_s21 + $0x3c0] sm:$0xff] }
  0x3a   : > { %801 = vmatpush1.bf16.msra.mxu0 %v800_v61  ;;  %v300_v54 = vld [vmem:[%s1046_s21 + $0x3e8] sm:$0xff]  ;;  %v302_v56 = vld [vmem:[%s1046_s21 + $0x3f8] sm:$0xff]  ;;  %v299_v61 = vld [vmem:[%s1046_s21 + $0x3e0] sm:$0xff] }
  0x3b   : > { %909 = vmatpush1.bf16.msra.mxu1 %v908_v62  ;;  %803 = vmatprep.subr.bf16.mxu0 %v802_v63  ;;  %v822_v59 = vpack.c.bf16 %v300_v54, %v296_v53  ;;  %v297_v62 = vld [vmem:[%s1046_s21 + $0x3d0] sm:$0xff]  ;;  %v930_v63 = vpack.c.bf16 %v302_v56, %v298_v55  ;;  %v304_v1 = vld [vmem:[%s1046_s21 + $0x408] sm:$0xff]  ;;  %v310_v4 = vld [vmem:[%s1046_s21 + $0x438] sm:$0xff]  ;;  %v824_v5 = vpack.c.bf16 %v299_v61, %v295_v60 }
  0x3c   : > { %911 = vmatprep.subr.bf16.mxu1 %v910_v3  ;;  %v301_v0 = vld [vmem:[%s1046_s21 + $0x3f0] sm:$0xff]  ;;  %v308_v2 = vld [vmem:[%s1046_s21 + $0x428] sm:$0xff]  ;;  %v306_v3 = vld [vmem:[%s1046_s21 + $0x418] sm:$0xff] }
  0x3d   : > { %v932_v6 = vpack.c.bf16 %v301_v0, %v297_v62  ;;  %v826_v7 = vpack.c.bf16 %v308_v2, %v304_v1  ;;  %v303_v8 = vld [vmem:[%s1046_s21 + $0x400] sm:$0xff]  ;;  %v309_v12 = vld [vmem:[%s1046_s21 + $0x430] sm:$0xff]  ;;  %v312_v13 = vld [vmem:[%s1046_s21 + $0x448] sm:$0xff] }
  0x3e   : > { %805 = vmatpush1.bf16.msra.mxu0 %v804_v9  ;;  %v307_v9 = vld [vmem:[%s1046_s21 + $0x420] sm:$0xff]  ;;  %v316_v14 = vld [vmem:[%s1046_s21 + $0x468] sm:$0xff]  ;;  %v318_v16 = vld [vmem:[%s1046_s21 + $0x478] sm:$0xff] }
  0x3f   : > { %913 = vmatpush1.bf16.msra.mxu1 %v912_v10  ;;  %807 = vmatprep.subr.bf16.mxu0 %v806_v11  ;;  %v305_v10 = vld [vmem:[%s1046_s21 + $0x410] sm:$0xff]  ;;  %v934_v11 = vpack.c.bf16 %v310_v4, %v306_v3  ;;  %v171_v17 = vld [vmem:[%s1282_s0] sm:$0xff]  ;;  %v828_v18 = vpack.c.bf16 %v307_v9, %v303_v8  ;;  %v830_v20 = vpack.c.bf16 %v316_v14, %v312_v13  ;;  %v320_v26 = vld [vmem:[%s1046_s21 + $0x488] sm:$0xff] }
  0x40   : > { %915 = vmatprep.subr.bf16.mxu1 %v914_v15  ;;  %v314_v15 = vld [vmem:[%s1046_s21 + $0x458] sm:$0xff]  ;;  %v936_v19 = vpack.c.bf16 %v309_v12, %v305_v10  ;;  %v317_v25 = vld [vmem:[%s1046_s21 + $0x470] sm:$0xff]  ;;  %v332_v40 = vld [vmem:[%s1046_s21 + $0x4e8] sm:$0xff] }
  0x41   : > { %v938_v24 = vpack.c.bf16 %v318_v16, %v314_v15  ;;  %v322_v28 = vld [vmem:[%s1046_s21 + $0x498] sm:$0xff]  ;;  %v321_v36 = vld [vmem:[%s1046_s21 + $0x490] sm:$0xff]  ;;  %v340_v52 = vld [vmem:[%s1046_s21 + $0x528] sm:$0xff] }
  0x42   : > { %809 = vmatpush1.bf16.msra.mxu0 %v808_v21  ;;  %v311_v21 = vld [vmem:[%s1046_s21 + $0x440] sm:$0xff]  ;;  %v326_v29 = vld [vmem:[%s1046_s21 + $0x4b8] sm:$0xff]  ;;  %v325_v38 = vld [vmem:[%s1046_s21 + $0x4b0] sm:$0xff] }
  0x43   : > { %917 = vmatpush1.bf16.msra.mxu1 %v916_v22  ;;  %811 = vmatprep.subr.bf16.mxu0 %v810_v23  ;;  %v315_v22 = vld [vmem:[%s1046_s21 + $0x460] sm:$0xff]  ;;  %v313_v23 = vld [vmem:[%s1046_s21 + $0x450] sm:$0xff]  ;;  %v174_v30 = vld [vmem:[%s1282_s0 + $0x18] sm:$0xff]  ;;  %v942_v37 = vpack.c.bf16 %v326_v29, %v322_v28  ;;  %v944_v44 = vpack.c.bf16 %v325_v38, %v321_v36 }
  0x44   : > { %919 = vmatprep.subr.bf16.mxu1 %v918_v27  ;;  %v324_v27 = vld [vmem:[%s1046_s21 + $0x4a8] sm:$0xff]  ;;  %v832_v31 = vpack.c.bf16 %v315_v22, %v311_v21  ;;  %v940_v32 = vpack.c.bf16 %v317_v25, %v313_v23  ;;  %v330_v41 = vld [vmem:[%s1046_s21 + $0x4d8] sm:$0xff]  ;;  %v329_v48 = vld [vmem:[%s1046_s21 + $0x4d0] sm:$0xff] }
  0x45   : > { %v334_v42 = vld [vmem:[%s1046_s21 + $0x4f8] sm:$0xff]  ;;  %v333_v50 = vld [vmem:[%s1046_s21 + $0x4f0] sm:$0xff]  ;;  %v348_v0 = vld [vmem:[%s1046_s21 + $0x568] sm:$0xff] }
  0x46   : > { %813 = vmatpush1.bf16.msra.mxu0 %v812_v33  ;;  %v834_v33 = vpack.c.bf16 %v324_v27, %v320_v26  ;;  %v946_v49 = vpack.c.bf16 %v334_v42, %v330_v41  ;;  %v338_v53 = vld [vmem:[%s1046_s21 + $0x518] sm:$0xff]  ;;  %v948_v56 = vpack.c.bf16 %v333_v50, %v329_v48  ;;  %v337_v60 = vld [vmem:[%s1046_s21 + $0x510] sm:$0xff]  ;;  %v356_v12 = vld [vmem:[%s1046_s21 + $0x5a8] sm:$0xff] }
  0x47   : > { %921 = vmatpush1.bf16.msra.mxu1 %v920_v34  ;;  %815 = vmatprep.subr.bf16.mxu0 %v814_v35  ;;  %v319_v34 = vld [vmem:[%s1046_s21 + $0x480] sm:$0xff]  ;;  %v342_v54 = vld [vmem:[%s1046_s21 + $0x538] sm:$0xff]  ;;  %v341_v62 = vld [vmem:[%s1046_s21 + $0x530] sm:$0xff] }
  0x48   : > { %923 = vmatprep.subr.bf16.mxu1 %v922_v39  ;;  %v323_v35 = vld [vmem:[%s1046_s21 + $0x4a0] sm:$0xff]  ;;  %v328_v39 = vld [vmem:[%s1046_s21 + $0x4c8] sm:$0xff]  ;;  %v950_v61 = vpack.c.bf16 %v342_v54, %v338_v53  ;;  %v346_v1 = vld [vmem:[%s1046_s21 + $0x558] sm:$0xff]  ;;  %v952_v4 = vpack.c.bf16 %v341_v62, %v337_v60 }
  0x49   : > { %v836_v43 = vpack.c.bf16 %v323_v35, %v319_v34  ;;  %v350_v2 = vld [vmem:[%s1046_s21 + $0x578] sm:$0xff]  ;;  %v345_v8 = vld [vmem:[%s1046_s21 + $0x550] sm:$0xff]  ;;  %v360_v23 = vld [vmem:[%s1046_s21 + $0x5c8] sm:$0xff] }
  0x4a   : > { %817 = vmatpush1.bf16.msra.mxu0 %v816_v45  ;;  %v838_v45 = vpack.c.bf16 %v332_v40, %v328_v39  ;;  %v954_v9 = vpack.c.bf16 %v350_v2, %v346_v1  ;;  %v349_v10 = vld [vmem:[%s1046_s21 + $0x570] sm:$0xff]  ;;  %v354_v13 = vld [vmem:[%s1046_s21 + $0x598] sm:$0xff]  ;;  %v368_v35 = vld [vmem:[%s1046_s21 + $0x608] sm:$0xff] }
  0x4b   : > { %925 = vmatpush1.bf16.msra.mxu1 %v924_v46  ;;  %819 = vmatprep.subr.bf16.mxu0 %v818_v47  ;;  %v327_v46 = vld [vmem:[%s1046_s21 + $0x4c0] sm:$0xff]  ;;  %v358_v14 = vld [vmem:[%s1046_s21 + $0x5b8] sm:$0xff]  ;;  %v956_v16 = vpack.c.bf16 %v349_v10, %v345_v8  ;;  %v357_v22 = vld [vmem:[%s1046_s21 + $0x5b0] sm:$0xff] }
  0x4c   : > { %927 = vmatprep.subr.bf16.mxu1 %v926_v51  ;;  %v331_v47 = vld [vmem:[%s1046_s21 + $0x4e0] sm:$0xff]  ;;  %v336_v51 = vld [vmem:[%s1046_s21 + $0x508] sm:$0xff]  ;;  %v958_v21 = vpack.c.bf16 %v358_v14, %v354_v13  ;;  %v362_v25 = vld [vmem:[%s1046_s21 + $0x5d8] sm:$0xff] }
  0x4d   : > { %v840_v55 = vpack.c.bf16 %v331_v47, %v327_v46  ;;  %v366_v26 = vld [vmem:[%s1046_s21 + $0x5f8] sm:$0xff]  ;;  %v365_v34 = vld [vmem:[%s1046_s21 + $0x5f0] sm:$0xff]  ;;  %v372_v36 = vld [vmem:[%s1046_s21 + $0x628] sm:$0xff] }
  0x4e   : > { %821 = vmatpush1.bf16.msra.mxu0 %v820_v57  ;;  %v842_v57 = vpack.c.bf16 %v340_v52, %v336_v51  ;;  %v374_v38 = vld [vmem:[%s1046_s21 + $0x638] sm:$0xff]  ;;  %v858_v41 = vpack.c.bf16 %v372_v36, %v368_v35  ;;  %v367_v42 = vld [vmem:[%s1046_s21 + $0x600] sm:$0xff]  ;;  %v373_v46 = vld [vmem:[%s1046_s21 + $0x630] sm:$0xff] }
  0x4f   : > { %929 = vmatpush1.bf16.msra.mxu1 %v928_v58  ;;  %823 = vmatprep.subr.bf16.mxu0 %v822_v59  ;;  %v335_v58 = vld [vmem:[%s1046_s21 + $0x500] sm:$0xff]  ;;  %v376_v47 = vld [vmem:[%s1046_s21 + $0x648] sm:$0xff]  ;;  %v382_v50 = vld [vmem:[%s1046_s21 + $0x678] sm:$0xff] }
  0x50   : > { %931 = vmatprep.subr.bf16.mxu1 %v930_v63  ;;  %v339_v59 = vld [vmem:[%s1046_s21 + $0x520] sm:$0xff]  ;;  %v344_v63 = vld [vmem:[%s1046_s21 + $0x548] sm:$0xff]  ;;  %v390_v62 = vld [vmem:[%s1046_s21 + $0x6b8] sm:$0xff] }
  0x51   : > { %v844_v3 = vpack.c.bf16 %v339_v59, %v335_v58  ;;  %v380_v48 = vld [vmem:[%s1046_s21 + $0x668] sm:$0xff]  ;;  %v375_v54 = vld [vmem:[%s1046_s21 + $0x640] sm:$0xff]  ;;  %v381_v58 = vld [vmem:[%s1046_s21 + $0x670] sm:$0xff] }
  0x52   : > { %825 = vmatpush1.bf16.msra.mxu0 %v824_v5  ;;  %v846_v5 = vpack.c.bf16 %v348_v0, %v344_v63  ;;  %v862_v53 = vpack.c.bf16 %v380_v48, %v376_v47  ;;  %v384_v59 = vld [vmem:[%s1046_s21 + $0x688] sm:$0xff]  ;;  %v383_v2 = vld [vmem:[%s1046_s21 + $0x680] sm:$0xff] }
  0x53   : > { %933 = vmatpush1.bf16.msra.mxu1 %v932_v6  ;;  %827 = vmatprep.subr.bf16.mxu0 %v826_v7  ;;  %v343_v6 = vld [vmem:[%s1046_s21 + $0x540] sm:$0xff]  ;;  %v388_v60 = vld [vmem:[%s1046_s21 + $0x6a8] sm:$0xff] }
  0x54   : > { %935 = vmatprep.subr.bf16.mxu1 %v934_v11  ;;  %v347_v7 = vld [vmem:[%s1046_s21 + $0x560] sm:$0xff]  ;;  %v352_v11 = vld [vmem:[%s1046_s21 + $0x588] sm:$0xff]  ;;  %v866_v1 = vpack.c.bf16 %v388_v60, %v384_v59 }
  0x55   : > { %466 = vmatmul.mubr.f32.vlgmr.msra.gmra.mrb[0].mxu0 %v171_v17  ;;  %v848_v15 = vpack.c.bf16 %v347_v7, %v343_v6  ;;  %v389_v6 = vld [vmem:[%s1046_s21 + $0x6b0] sm:$0xff] }
  0x56   : > { %829 = vmatpush1.bf16.msra.mxu0 %v828_v18  ;;  %608 = vmatmul.mubr.f32.vlgmr.msra.gmra.mrb[0].mxu1 %v171_v17  ;;  %v850_v17 = vpack.c.bf16 %v356_v12, %v352_v11  ;;  %v351_v18 = vld [vmem:[%s1046_s21 + $0x580] sm:$0xff] }
  0x57   : > { %937 = vmatpush1.bf16.msra.mxu1 %v936_v19  ;;  %831 = vmatprep.subr.bf16.mxu0 %v830_v20  ;;  %v355_v19 = vld [vmem:[%s1046_s21 + $0x5a0] sm:$0xff]  ;;  %v353_v20 = vld [vmem:[%s1046_s21 + $0x590] sm:$0xff] }
  0x58   : > { %939 = vmatprep.subr.bf16.mxu1 %v938_v24  ;;  %757 = vmatprep.mubr.msk.f32.mxu0 %vm397_vm0, %v174_v30  ;;  %v364_v24 = vld [vmem:[%s1046_s21 + $0x5e8] sm:$0xff]  ;;  %v852_v27 = vpack.c.bf16 %v355_v19, %v351_v18  ;;  %v960_v28 = vpack.c.bf16 %v357_v22, %v353_v20 }
  0x59   : > { %758 = vmatprep.mubr.msk.f32.mxu1 %vm397_vm0, %v174_v30  ;;  %v854_v29 = vpack.c.bf16 %v364_v24, %v360_v23  ;;  %v359_v30 = vld [vmem:[%s1046_s21 + $0x5c0] sm:$0xff] }
  0x5a   : > { %833 = vmatpush1.bf16.msra.mxu0 %v832_v31  ;;  %v363_v31 = vld [vmem:[%s1046_s21 + $0x5e0] sm:$0xff] }
  0x5b   : > { %941 = vmatpush1.bf16.msra.mxu1 %v940_v32  ;;  %835 = vmatprep.subr.bf16.mxu0 %v834_v33  ;;  %v361_v32 = vld [vmem:[%s1046_s21 + $0x5d0] sm:$0xff]  ;;  %v962_v33 = vpack.c.bf16 %v366_v26, %v362_v25  ;;  %v856_v39 = vpack.c.bf16 %v363_v31, %v359_v30 }
  0x5c   : > { %943 = vmatprep.subr.bf16.mxu1 %v942_v37  ;;  %v370_v37 = vld [vmem:[%s1046_s21 + $0x618] sm:$0xff]  ;;  %v964_v40 = vpack.c.bf16 %v365_v34, %v361_v32 }
  0x5e   : > { %837 = vmatpush1.bf16.msra.mxu0 %v836_v43  ;;  %v371_v43 = vld [vmem:[%s1046_s21 + $0x620] sm:$0xff] }
  0x5f   : > { %945 = vmatpush1.bf16.msra.mxu1 %v944_v44  ;;  %839 = vmatprep.subr.bf16.mxu0 %v838_v45  ;;  %v369_v44 = vld [vmem:[%s1046_s21 + $0x610] sm:$0xff]  ;;  %v966_v45 = vpack.c.bf16 %v374_v38, %v370_v37  ;;  %v860_v51 = vpack.c.bf16 %v371_v43, %v367_v42 }
  0x60   : > { %947 = vmatprep.subr.bf16.mxu1 %v946_v49  ;;  %v378_v49 = vld [vmem:[%s1046_s21 + $0x658] sm:$0xff]  ;;  %v968_v52 = vpack.c.bf16 %v373_v46, %v369_v44 }
  0x62   : > { %841 = vmatpush1.bf16.msra.mxu0 %v840_v55  ;;  %v379_v55 = vld [vmem:[%s1046_s21 + $0x660] sm:$0xff] }
  0x63   : > { %949 = vmatpush1.bf16.msra.mxu1 %v948_v56  ;;  %843 = vmatprep.subr.bf16.mxu0 %v842_v57  ;;  %v377_v56 = vld [vmem:[%s1046_s21 + $0x650] sm:$0xff]  ;;  %v970_v57 = vpack.c.bf16 %v382_v50, %v378_v49  ;;  %v864_v63 = vpack.c.bf16 %v379_v55, %v375_v54 }
  0x64   : > { %951 = vmatprep.subr.bf16.mxu1 %v950_v61  ;;  %v386_v61 = vld [vmem:[%s1046_s21 + $0x698] sm:$0xff]  ;;  %v972_v0 = vpack.c.bf16 %v381_v58, %v377_v56 }
  0x66   : > { %845 = vmatpush1.bf16.msra.mxu0 %v844_v3  ;;  %v387_v3 = vld [vmem:[%s1046_s21 + $0x6a0] sm:$0xff] }
  0x67   : > { %953 = vmatpush1.bf16.msra.mxu1 %v952_v4  ;;  %847 = vmatprep.subr.bf16.mxu0 %v846_v5  ;;  %v974_v4 = vpack.c.bf16 %v390_v62, %v386_v61  ;;  %v385_v5 = vld [vmem:[%s1046_s21 + $0x690] sm:$0xff]  ;;  %v868_v7 = vpack.c.bf16 %v387_v3, %v383_v2 }
  0x68   : > { %955 = vmatprep.subr.bf16.mxu1 %v954_v9  ;;  %v976_v8 = vpack.c.bf16 %v389_v6, %v385_v5  ;;  %v173_v9 = vld [vmem:[%s1282_s0 + $0x10] sm:$0xff] }
  0x6a   : > { %849 = vmatpush1.bf16.msra.mxu0 %v848_v15 }
  0x6b   : > { %957 = vmatpush1.bf16.msra.mxu1 %v956_v16  ;;  %851 = vmatprep.subr.bf16.mxu0 %v850_v17 }
  0x6c   : > { %959 = vmatprep.subr.bf16.mxu1 %v958_v21 }
  0x6e   : > { %853 = vmatpush1.bf16.msra.mxu0 %v852_v27 }
  0x6f   : > { %961 = vmatpush1.bf16.msra.mxu1 %v960_v28  ;;  %855 = vmatprep.subr.bf16.mxu0 %v854_v29 }
  0x70   : > { %963 = vmatprep.subr.bf16.mxu1 %v962_v33 }
  0x72   : > { %857 = vmatpush1.bf16.msra.mxu0 %v856_v39 }
  0x73   : > { %965 = vmatpush1.bf16.msra.mxu1 %v964_v40  ;;  %859 = vmatprep.subr.bf16.mxu0 %v858_v41 }
  0x74   : > { %967 = vmatprep.subr.bf16.mxu1 %v966_v45 }
  0x76   : > { %861 = vmatpush1.bf16.msra.mxu0 %v860_v51 }
  0x77   : > { %969 = vmatpush1.bf16.msra.mxu1 %v968_v52  ;;  %863 = vmatprep.subr.bf16.mxu0 %v862_v53 }
  0x78   : > { %971 = vmatprep.subr.bf16.mxu1 %v970_v57 }
  0x7a   : > { %865 = vmatpush1.bf16.msra.mxu0 %v864_v63 }
  0x7b   : > { %973 = vmatpush1.bf16.msra.mxu1 %v972_v0  ;;  %867 = vmatprep.subr.bf16.mxu0 %v866_v1 }
  0x7c   : > { %975 = vmatprep.subr.bf16.mxu1 %v974_v4 }
  0x7e   : > { %869 = vmatpush1.bf16.msra.mxu0 %v868_v7 }
  0x7f   : > { %977 = vmatpush1.bf16.msra.mxu1 %v976_v8 }
  0x81   : > { %537 = vmatmul.mubr.f32.vlgmr.msra.gmra.mrb[0].mxu0 %v173_v9 }
  0x82   : > { %679 = vmatmul.mubr.f32.vlgmr.msra.gmra.mrb[0].mxu1 %v173_v9 }
  0x87   : > { %v395_v10 = vpop.permute.xlu0 %394 }
 0x154   : > { %v538_v11 = vpop.f32.mrb[0].mxu0 }
 0x155   : > { %v978_v12 = vadd.f32 %v538_v11, %v395_v10  ;;  %v680_v13 = vpop.f32.mrb[0].mxu1  ;;  %v540_v14 = vpop.f32.mrb[1].mxu0 }
 0x156   : > { %v980_v15 = vadd.f32 %v680_v13, %v395_v10  ;;  %v979_v16 = vadd.f32 %v540_v14, %v395_v10  ;;  %v682_v17 = vpop.f32.mrb[1].mxu1 }
 0x157   : > { %v685_v18 = vmax.f32 %v978_v12, 0.0  ;;  %v981_v19 = vadd.f32 %v682_v17, %v395_v10 }
 0x158   : > { %v687_v20 = vmax.f32 %v980_v15, 0.0  ;;  %v686_v21 = vmax.f32 %v979_v16, 0.0 }
 0x159   : > { %689 = vst [vmem:[%s170_s4] sm:$0xff] %v685_v18  ;;  %v688_v22 = vmax.f32 %v981_v19, 0.0 }
 0x15a   : > { %691 = vst [vmem:[%s170_s4 + $0x10] sm:$0xff] %v687_v20  ;;  %690 = vst [vmem:[%s170_s4 + $0x8] sm:$0xff] %v686_v21 }
 0x15b   : > { %693 = vst.msk [vmem:[%s170_s4 + $0x18] sm:$0xff] %vm692_vm1, %v688_v22 }
 0x15c PF: > { %s13_s12 = sadd.s32 1, %s1003_s12  }
 0x15d   : > { %p10_p4 = scmp.ge.s32.totalorder %s13_s12, 4  }
 0x15f   :  { %12 = sbr.rel (!%p10_p4) target bundleno = 1 (0x1), region = 62 }

// kernel: decnn_forward.7
= control target key start
LH: loop header
LB: loop body
LE: loop exit
PB: predicated region body
PF: predicated region fallthrough
CT: control target
= control target key end

     0   :  { %8 = vsyncpa [#allocation4], 0  ;;  %s795_s0 = inlined_call_operand.vmem [shape: f32[16,63], index: 0, kind: input, shape index: {}]   ;;  %s796_s1 = inlined_call_operand.vmem [shape: f32[63,512], index: 1, kind: input, shape index: {}]   ;;  %s797_s2 = inlined_call_operand.vmem [shape: f32[1,512], index: 2, kind: input, shape index: {}]   ;;  %s798_s3 = inlined_call_operand.hbm [shape: f32[16,512], index: 3, kind: output, shape index: {}]  }
   0x1   :  { %10 = vsyncpa [#allocation4 + $0x1], 0  ;;  %s637_s12 = smov 0   ;;  %s639_s13 = smov 0  }
   0x2   :  { %s641_s14 = smov 0   ;;  %s643_s15 = smov 0  }
   0x3 LB: > { %s658_s16 = sadd.s32 4294967295, %s609_s15   ;;  %s456_s17 = sadd.s32 4294967294, %s609_s15   ;;  %s609_s15 = sphi %s643_s15, %s804_s15   ;;  %s605_s14 = sphi %s641_s14, %s803_s14   ;;  %s601_s13 = sphi %s639_s13, %s802_s13   ;;  %s597_s12 = sphi %s637_s12, %s801_s12  }
   0x4   : > { %s662_s18 = sadd.s32 1, %s609_s15   ;;  %s44_s19 = sadd.s32 1, %s605_s14 }
   0x5   : > { %s41_s20 = ssub.s32 %s609_s15, %s662_s18  ;;  %p51_p0 = scmp.ne.s32.totalorder %s605_s14, %s601_s13 }
   0x6   : > { %p42_p1 = scmp.eq.s32.totalorder %s41_s20, 0  ;;  %p52_p2 = scmp.eq.s32.totalorder %s609_s15, 0 }
   0x7   : > { %p107_p3 = scmp.eq.s32.totalorder %s658_s16, 1  ;;  %p112_p4 = scmp.ne.s32.totalorder %s601_s13, %s597_s12 }
   0x8   : > { %s674_s21 = scalar_select %p42_p1, %s605_s14, %s44_s19  }
   0x9   : > { %p53_p5 = por %p52_p2, %p51_p0  ;;  %p676_p6 = por %p107_p3, %p51_p0 }
   0xa   : > { %p113_p7 = scmp.eq.s32.totalorder %s456_s17, 1  ;;  %p458_p9 = scmp.ge.s32.totalorder %s609_s15, 2 }
   0xc   : > { %p680_p8 = por %p113_p7, %p112_p4  ;;  %132 = sbr.rel (%p458_p9) target bundleno = 31 (0x1f), region = 20 }
  0x13   : > { %135 = sbr.rel (!%p53_p5) target bundleno = 31 (0x1f), region = 24  ;;  %s137_s24 = sand.u32 (%p53_p5), 1, %s605_s14  }
  0x14   : > { %s475_s25 = sshll.u32 (%p53_p5), %s609_s15, 4  ;;  %s459_s26 = sshll.u32 (%p53_p5), %s137_s24, 7 }
  0x15   : > { %s692_s29 = scalar_lea.vmem (%p53_p5), %s796_s1, %s475_s25  ;;  %s139_s30 = scalar_lea.vmem (%p53_p5), [#allocation2], %s459_s26 }
  0x16   : > { %v155_v0 = vld [vmem:[%s692_s29] sm:$0xff] (%p53_p5)  ;;  %v157_v1 = vld [vmem:[%s692_s29 + $0x8] sm:$0xff] (%p53_p5) }
  0x17   : > { %v159_v2 = vld [vmem:[%s692_s29 + $0x20] sm:$0xff] (%p53_p5)  ;;  %156 = vst [vmem:[%s139_s30] sm:$0xff] (%p53_p5), %v155_v0  ;;  %158 = vst [vmem:[%s139_s30 + $0x8] sm:$0xff] (%p53_p5), %v157_v1  ;;  %v161_v3 = vld [vmem:[%s692_s29 + $0x28] sm:$0xff] (%p53_p5) }
  0x18   : > { %160 = vst [vmem:[%s139_s30 + $0x10] sm:$0xff] (%p53_p5), %v159_v2  ;;  %v163_v4 = vld [vmem:[%s692_s29 + $0x40] sm:$0xff] (%p53_p5)  ;;  %v165_v5 = vld [vmem:[%s692_s29 + $0x48] sm:$0xff] (%p53_p5)  ;;  %162 = vst [vmem:[%s139_s30 + $0x18] sm:$0xff] (%p53_p5), %v161_v3 }
  0x19   : > { %164 = vst [vmem:[%s139_s30 + $0x20] sm:$0xff] (%p53_p5), %v163_v4  ;;  %166 = vst [vmem:[%s139_s30 + $0x28] sm:$0xff] (%p53_p5), %v165_v5  ;;  %v167_v6 = vld [vmem:[%s692_s29 + $0x60] sm:$0xff] (%p53_p5)  ;;  %v169_v7 = vld [vmem:[%s692_s29 + $0x68] sm:$0xff] (%p53_p5) }
  0x1a   : > { %v171_v8 = vld [vmem:[%s692_s29 + $0x80] sm:$0xff]  ;;  %168 = vst [vmem:[%s139_s30 + $0x30] sm:$0xff] %v167_v6  ;;  %170 = vst [vmem:[%s139_s30 + $0x38] sm:$0xff] %v169_v7  ;;  %v173_v9 = vld [vmem:[%s692_s29 + $0x88] sm:$0xff] }
  0x1b   : > { %172 = vst [vmem:[%s139_s30 + $0x40] sm:$0xff] %v171_v8  ;;  %v175_v10 = vld [vmem:[%s692_s29 + $0xa0] sm:$0xff]  ;;  %v177_v11 = vld [vmem:[%s692_s29 + $0xa8] sm:$0xff]  ;;  %174 = vst [vmem:[%s139_s30 + $0x48] sm:$0xff] %v173_v9 }
  0x1c   : > { %176 = vst [vmem:[%s139_s30 + $0x50] sm:$0xff] %v175_v10  ;;  %178 = vst [vmem:[%s139_s30 + $0x58] sm:$0xff] %v177_v11  ;;  %v179_v12 = vld [vmem:[%s692_s29 + $0xc0] sm:$0xff]  ;;  %v181_v13 = vld [vmem:[%s692_s29 + $0xc8] sm:$0xff] }
  0x1d   : > { %v183_v14 = vld [vmem:[%s692_s29 + $0xe0] sm:$0xff]  ;;  %180 = vst [vmem:[%s139_s30 + $0x60] sm:$0xff] %v179_v12  ;;  %182 = vst [vmem:[%s139_s30 + $0x68] sm:$0xff] %v181_v13  ;;  %v185_v15 = vld [vmem:[%s692_s29 + $0xe8] sm:$0xff] }
  0x1e   : > { %184 = vst [vmem:[%s139_s30 + $0x70] sm:$0xff] %v183_v14  ;;  %186 = vst [vmem:[%s139_s30 + $0x78] sm:$0xff] %v185_v15 }
  0x1f PF: > { %p462_p10 = scmp.ge.s32.totalorder %s609_s15, 1  ;;  %p199_p11 = scmp.lt.s32.totalorder %s609_s15, 3 }
  0x21   : > { %p200_p12 = pnand %p462_p10, %p199_p11 }
  0x22   : > { %s713_s4 = sand.u32 (!%p200_p12), 1, %s601_s13   ;;  %v611_v16 = vmov (!%p200_p12), 0.0   ;;  %vm277_vm0 = vcmask (!%p200_p12), 1046528   ;;  %vm612_vm1 = vmmov (!%p200_p12), 1   ;;  %v240_v41 = vld [vmem:[%s795_s0] sm:$0xff] (!%p200_p12)  ;;  %vm270_vm3 = vcmask (!%p200_p12), 515072  }
  0x23   : > { %203 = sbr.rel (%p200_p12) target bundleno = 287 (0x11f), region = 51  ;;  %s463_s5 = sshll.u32 (!%p200_p12), %s713_s4, 7  ;;  %348 = vmatprep.mubr.f32.mxu0 (!%p200_p12), %v611_v16  ;;  %354 = vmatprep.mubr.f32.mxu1 (!%p200_p12), %v611_v16  ;;  %vm490_vm2 = vmpackc.low (!%p200_p12), %vm277_vm0, %vm612_vm1  ;;  %v241_v42 = vld [vmem:[%s795_s0 + $0x8] sm:$0xff] (!%p200_p12)  ;;  %v260_v43 = vlaneseq (!%p200_p12) }
  0x24   : > { %s716_s6 = scalar_lea.vmem (!%p200_p12), [#allocation2], %s463_s5  ;;  %s465_s11 = sshll.u32 (!%p200_p12), %s658_s16, 1 }
  0x25   : > { %v243_v17 = vld [vmem:[%s716_s6 + $0x8] sm:$0xff] (!%p200_p12)  ;;  %v245_v18 = vld [vmem:[%s716_s6 + $0x18] sm:$0xff] (!%p200_p12)  ;;  %v242_v19 = vld [vmem:[%s716_s6] sm:$0xff] (!%p200_p12)  ;;  %p235_p13 = scmp.lt.s32.totalorder (!%p200_p12), %s465_s11, 3  ;;  %v261_v44 = vshrl.u32 (!%p200_p12), %v260_v43, 7  ;;  %s464_s17 = sshll.u32 (!%p200_p12), %s713_s4, 5 }
  0x26   : > { %v477_v20 = vpack.c.bf16 (!%p200_p12), %v245_v18, %v243_v17  ;;  %v244_v21 = vld [vmem:[%s716_s6 + $0x10] sm:$0xff] (!%p200_p12)  ;;  %v247_v22 = vld [vmem:[%s716_s6 + $0x28] sm:$0xff] (!%p200_p12)  ;;  %v249_v23 = vld [vmem:[%s716_s6 + $0x38] sm:$0xff] (!%p200_p12)  ;;  %s232_s25 = scalar_lea.vmem (!%p200_p12), [#allocation3], %s464_s17  ;;  %s476_s27 = sshll.u32 (!%p200_p12), %s658_s16, 8 }
  0x27   : > { %v479_v24 = vpack.c.bf16 (!%p200_p12), %v244_v21, %v242_v19  ;;  %v481_v25 = vpack.c.bf16 (!%p200_p12), %v249_v23, %v247_v22  ;;  %v246_v26 = vld [vmem:[%s716_s6 + $0x20] sm:$0xff] (!%p200_p12)  ;;  %v248_v27 = vld [vmem:[%s716_s6 + $0x30] sm:$0xff] (!%p200_p12)  ;;  %v251_v28 = vld [vmem:[%s716_s6 + $0x48] sm:$0xff] (!%p200_p12)  ;;  %v262_v45 = vsub.s32 (!%p200_p12), 0, %v261_v44  ;;  %v266_v47 = vsub.s32 (!%p200_p12), 1, %v261_v44  ;;  %s379_s26 = sshll.u32 (!%p200_p12), %s232_s25, 4  ;;  %s751_s30 = scalar_lea.hbm (!%p200_p12), %s798_s3, %s476_s27  ;;  %s746_s26 = int_to_ptr.vmem [resolvable:$true] %s379_s26 }
  0x28   : > { %478 = vmatprep.subr.bf16.mxu0 (!%p200_p12), %v477_v20  ;;  %495 = vmatprep.subr.bf16.mxu1 (!%p200_p12), %v477_v20  ;;  %v253_v29 = vld [vmem:[%s716_s6 + $0x58] sm:$0xff] (!%p200_p12)  ;;  %v483_v30 = vpack.c.bf16 (!%p200_p12), %v248_v27, %v246_v26  ;;  %v250_v32 = vld [vmem:[%s716_s6 + $0x40] sm:$0xff] (!%p200_p12)  ;;  %v252_v33 = vld [vmem:[%s716_s6 + $0x50] sm:$0xff] (!%p200_p12)  ;;  %s366_s16 = scalar_lea.sflag (!%p200_p12), [#allocation4], %s713_s4  ;;  %s547_s5 = scalar_lea.vmem (!%p200_p12), %s746_s26, 512 }
  0x29   : > { %480 = vmatpush1.bf16.msra.mxu0 (!%p200_p12), %v479_v24  ;;  %499 = vmatpush1.bf16.msra.mxu1 (!%p200_p12), %v479_v24  ;;  %v485_v31 = vpack.c.bf16 (!%p200_p12), %v253_v29, %v251_v28  ;;  %v255_v34 = vld [vmem:[%s716_s6 + $0x68] sm:$0xff] (!%p200_p12)  ;;  %v257_v35 = vld [vmem:[%s716_s6 + $0x78] sm:$0x7f] (!%p200_p12)  ;;  %v487_v36 = vpack.c.bf16 (!%p200_p12), %v252_v33, %v250_v32  ;;  %v254_v38 = vld [vmem:[%s716_s6 + $0x60] sm:$0xff] (!%p200_p12)  ;;  %p548_p0 = scmp.ne.s32.totalorder (!%p200_p12), %s746_s26, %s547_s5 }
  0x2a   : > { %482 = vmatprep.subr.bf16.mxu0 %v481_v25  ;;  %496 = vmatprep.subr.bf16.mxu1 %v481_v25  ;;  %v489_v37 = vpack.c.bf16 %v257_v35, %v255_v34  ;;  %v256_v39 = vld [vmem:[%s716_s6 + $0x70] sm:$0x7f]  ;;  %s806_s11 = smov (!%p235_p13, %s465_s11), 3  ;;  %s613_s6 = smov [#allocation3]  }
  0x2b   : > { %v492_v40 = vpack.c.bf16 %v256_v39, %v254_v38  ;;  %s237_s24 = scalar_lea.vmem %s797_s2, %s806_s11  ;;  %p549_p1 = pnand %p548_p0, %p676_p6 }
  0x2c   : > { %v258_v46 = vld [vmem:[%s237_s24] sm:$0x3]  ;;  %s551_s7 = sshll.u32 %s613_s6, 4  ;;  %s552_s7 = int_to_ptr.vmem [resolvable:$false] %s551_s7 }
  0x2d   : > { %484 = vmatpush1.bf16.msra.mxu0 %v483_v30  ;;  %500 = vmatpush1.bf16.msra.mxu1 %v483_v30  ;;  %v263_v48 = vrot.slane %v258_v46, %v262_v45  ;;  %v267_v49 = vrot.slane %v258_v46, %v266_v47  ;;  %p550_p2 = pneg %p549_p1  ;;  %s553_s8 = scalar_lea.vmem %s552_s7, 1024 }
  0x2e   : > { %486 = vmatprep.subr.bf16.mxu0 %v485_v31  ;;  %497 = vmatprep.subr.bf16.mxu1 %v485_v31  ;;  %p554_p3 = scmp.lt.s32.totalorder %s746_s26, %s552_s7  ;;  %p555_p4 = scmp.lt.s32.totalorder %s553_s8, %s547_s5 }
  0x30   : > { %p556_p5 = por %p555_p4, %p554_p3 }
  0x31   : > { %488 = vmatpush1.bf16.msra.mxu0 %v487_v36  ;;  %501 = vmatpush1.bf16.msra.mxu1 %v487_v36 }
  0x32   : > { %491 = vmatprep.subr.msk.bf16.mxu0 %vm490_vm2, %v489_v37  ;;  %498 = vmatprep.subr.msk.bf16.mxu1 %vm490_vm2, %v489_v37  ;;  %p557_p7 = pnand %p556_p5, %p550_p2 }
  0x35   : > { %494 = vmatpush1.bf16.msk.msra.mxu0 %vm490_vm2, %v492_v40  ;;  %502 = vmatpush1.bf16.msk.msra.mxu1 %vm490_vm2, %v492_v40 }
  0x38   : > { %468 = vmatmul.mubr.msk.f32.vlgmr.msra.gmra.mrb[0].mxu0 %vm270_vm3, %v240_v41  ;;  %469 = vmatmul.mubr.msk.f32.vlgmr.msra.gmra.mrb[0].mxu1 %vm270_vm3, %v241_v42 }
 0x10b   : > { %v350_v50 = vpop.f32.mrb[0].mxu0  ;;  %v356_v51 = vpop.f32.mrb[0].mxu1 }
 0x10c   : > { %v351_v52 = vadd.f32 %v350_v50, %v263_v48  ;;  %v357_v53 = vadd.f32 %v356_v51, %v263_v48  ;;  %v352_v54 = vpop.f32.mrb[1].mxu0  ;;  %v358_v55 = vpop.f32.mrb[1].mxu1 }
 0x10d   : > { %v353_v56 = vadd.f32 %v352_v54, %v267_v49  ;;  %v359_v57 = vadd.f32 %v358_v55, %v267_v49 }
 0x10e   : > { %361 = vst [vmem:[%s232_s25] sm:$0xff] %v351_v52  ;;  %363 = vst [vmem:[%s232_s25 + $0x10] sm:$0xff] %v357_v53 }
 0x10f   : > { %362 = vst [vmem:[%s232_s25 + $0x8] sm:$0xff] %v353_v56  ;;  %364 = vst [vmem:[%s232_s25 + $0x18] sm:$0xff] %v359_v57 }
 0x110   : > { %560 = shalt.err (!%p557_p7)
}
 0x111   : > { %s561_s9 = scalar_lea.hbm %s751_s30, 512  ;;  %s565_s17 = scalar_lea.hbm %s798_s3, 1024 }
 0x112   : > { %p562_p10 = scmp.ne.s32.totalorder %s751_s30, %s561_s9  ;;  %p566_p13 = scmp.lt.u32.totalorder %s751_s30, %s798_s3 }
 0x113   : > { %p567_p0 = scmp.lt.u32.totalorder %s565_s17, %s561_s9  ;;  %p569_p2 = scmp.lt.u32.totalorder %s561_s9, %s751_s30 }
 0x114   : > { %p563_p11 = pnand %p562_p10, %p676_p6 }
 0x115   : > { %p568_p1 = por %p567_p0, %p566_p13 }
 0x116   : > { %p564_p12 = pneg %p563_p11 }
 0x117   : > { %p570_p3 = por %p569_p2, %p568_p1 }
 0x119   : > { %p571_p4 = pnand %p570_p3, %p564_p12 }
 0x11b   : > { %574 = shalt.err (!%p571_p4)
}
 0x11c   : > { %s614_s24 = smov 256   ;;  %s615_s25 = smov 512  }
 0x11d   : > { %s616_s27 = smov 16  }
 0x11e   : > { %503 = dma.vmem_to_hbm [thread:$0]  (%p676_p6), %s746_s26, 512, %s751_s30, %s366_s16, %s614_s24, %s615_s25, %s616_s27  }
 0x11f PF: > { %s394_s28 = sand.u32 1, %s597_s12   ;;  %p506_p5 = pnand %p458_p9, %p680_p8 }
 0x120   : > { %s395_s29 = scalar_lea.sflag [#allocation4], %s394_s28 }
 0x121   : > { %592 = dma.done.wait (!%p506_p5), %s395_s29, 512  }
 0x122   : > { %594 = vsyncadd (!%p506_p5), %s395_s29, 4294966784  ;;  %p13_p7 = scmp.ge.s32.totalorder %s662_s18, 4   ;;  %s801_s12 = smov %s601_s13 }
 0x123   : > { %s802_s13 = smov %s605_s14  ;;  %s803_s14 = smov %s674_s21 }
 0x124   : > { %s804_s15 = smov %s662_s18  ;;  %15 = sbr.rel (!%p13_p7) target bundleno = 3 (0x3), region = 98 }
 0x12b   :  { %400 = vsyncpa [#allocation4], 1 }
 0x12c   :  { %402 = vsyncpa [#allocation4 + $0x1], 1 }

</bundles_post_ra>
